<compile_context>
chip_gen: v7x
topology: tpu7x:2x2x1
jax: 0.10.0
libtpu: 0.0.40
codegen_flags: <defaults>
</compile_context>

<pallas_src>
import jax
import jax.numpy as jnp
import numpy as np
from jax.experimental import pallas as pl
from jax.experimental.pallas import tpu as pltpu


def _round_up(x, m):
    return ((x + m - 1) // m) * m


def _pad_to(x, shape):
    return jnp.pad(x, [(0, s - d) for d, s in zip(x.shape, shape)])


def _pad_gate_cols(w, d, dp):
    """Pad the 4*d LSTM gate axis (PyTorch order i, f, g, o) to 4*dp, per gate block."""
    lead = w.shape[:-1]
    w4 = w.reshape(lead + (4, d))
    w4 = jnp.pad(w4, [(0, 0)] * len(lead) + [(0, 0), (0, dp - d)])
    return w4.reshape(lead + (4 * dp,))


def _const_spec(shape):
    """Time-invariant input: constant index map; single-buffered where supported."""
    index_map = lambda *_: (0,) * len(shape)
    try:
        # Block index never changes -> no pipelining needed; halve VMEM footprint.
        return pl.BlockSpec(shape, index_map, pipeline_mode=pl.Buffered(1))
    except Exception:  # older jax without pipeline_mode/Buffered -> default 2 buffers
        return pl.BlockSpec(shape, index_map)


def _decoder_step_kernel(
    # inputs
    enc_ref, att1_ref, emb_ref, mask_ref, ebias_ref, h0_ref, c0_ref,
    w_da_ref, b_da_ref, w_fa_ref, w_fb_ref, b_fb_ref,
    w_ih_e_ref, w_ih_a_ref, w_hh_ref, b_lstm_ref,
    # outputs (one lane-dense block per time step)
    hout_ref, alpha_ref,
    # scratch carried across the sequential time grid
    h_ref, c_ref,
):
    t = pl.program_id(0)
    Bp, Pp, Ep = enc_ref.shape
    Dp = h_ref.shape[1]
    Ap = att1_ref.shape[2]
    Lc = w_fa_ref.shape[1]

    @pl.when(t == 0)
    def _init():
        # init_hidden_state / att1 are computed in the wrapper (plain XLA); just load.
        h_ref[...] = h0_ref[...]
        c_ref[...] = c0_ref[...]

    h_prev = h_ref[...]                                       # (Bp, Dp) f32
    c_prev = c_ref[...]
    hb = h_prev.astype(jnp.bfloat16)

    # ---- Attention ----
    att2 = jnp.dot(hb, w_da_ref[...],
                   preferred_element_type=jnp.float32) + b_da_ref[...]      # (Bp, Ap)
    att = jnp.maximum(att1_ref[...].astype(jnp.float32) + att2[:, None, :], 0.0)
    # full_att score on the MXU: w_fa is laid out as an (Ap, 128) column with the real
    # weight in lane 0 (other lanes zero), so the lane-sum just extracts that column.
    att_b = att.astype(jnp.bfloat16).reshape(Bp * Pp, Ap)
    e_col = jnp.dot(att_b, w_fa_ref[...],
                    preferred_element_type=jnp.float32)                      # (Bp*Pp, Lc)
    e = jnp.sum(e_col.reshape(Bp, Pp, Lc), axis=2) + ebias_ref[...]          # (Bp, Pp)
    e_max = jnp.max(e, axis=1, keepdims=True)
    p = jnp.exp(e - e_max)
    alpha = p * pl.reciprocal(jnp.sum(p, axis=1, keepdims=True), approx=True)

    # attention-weighted encoding: batched (1, Pp) @ (Pp, Ep) mat-vec on the MXU.
    enc = enc_ref[...]                                        # (Bp, Pp, Ep) bf16
    awe = jnp.einsum('bqp,bpe->bqe',
                     alpha[:, None, :].astype(jnp.bfloat16), enc,
                     preferred_element_type=jnp.float32).reshape(Bp, Ep)

    # ---- gating scalar (f_beta + sigmoid) ----
    gate = jax.nn.sigmoid(jnp.dot(hb, w_fb_ref[...],
                                  preferred_element_type=jnp.float32) + b_fb_ref[...])
    awe = (gate * awe).astype(jnp.bfloat16)

    # ---- LSTMCell (PyTorch gate order i, f, g, o).  Input weight is split so the
    #      [embedding, awe] lane-axis concatenate is never materialized. ----
    emb_t = emb_ref[0]                                        # (Bp, EMp) bf16
    gates = (jnp.dot(emb_t, w_ih_e_ref[...], preferred_element_type=jnp.float32)
             + jnp.dot(awe, w_ih_a_ref[...], preferred_element_type=jnp.float32)
             + jnp.dot(hb, w_hh_ref[...], preferred_element_type=jnp.float32)
             + b_lstm_ref[...])                               # (Bp, 4*Dp)
    i_g = jax.nn.sigmoid(gates[:, 0 * Dp:1 * Dp])
    f_g = jax.nn.sigmoid(gates[:, 1 * Dp:2 * Dp])
    g_g = jnp.tanh(gates[:, 2 * Dp:3 * Dp])
    o_g = jax.nn.sigmoid(gates[:, 3 * Dp:4 * Dp])
    c_new = f_g * c_prev + i_g * g_g
    h_new = o_g * jnp.tanh(c_new)

    # Sample b is active at step t iff decode_length[b] > t (lengths sorted descending)
    # -- equivalent to PyTorch's h[:batch_size_t] prefix slicing.
    active = mask_ref[0] > 0.5                                # (Bp, 1) bool
    h_ref[...] = jnp.where(active, h_new, h_prev)
    c_ref[...] = jnp.where(active, c_new, c_prev)

    # Vocab projection hoisted out of the recurrence: emit h_t (bf16), project later.
    # TODO(synk): nn.Dropout(p=0.5) is identity in eval mode; training dropout not implemented.
    hout_ref[0] = h_new.astype(hout_ref.dtype)
    alpha_ref[0] = jnp.where(active, alpha, 0.0).astype(alpha_ref.dtype)


def _vocab_proj_kernel(h_ref, m_ref, w_ref, b_ref, o_ref):
    acc = jnp.dot(h_ref[...], w_ref[...], preferred_element_type=jnp.float32)
    o_ref[...] = (acc + b_ref[...]) * m_ref[...]


def init_params(key, vocab_size, embed_dim, decoder_dim, attention_dim, encoder_dim):
    """Deterministic parameter init (all linear weights stored as (in_dim, out_dim))."""
    ks = jax.random.split(key, 17)
    u = lambda k, shape, s=0.1: jax.random.uniform(k, shape, jnp.float32, -s, s)
    params = dict(
        embedding=u(ks[0], (vocab_size, embed_dim)),
        w_ea=u(ks[1], (encoder_dim, attention_dim)),
        b_ea=u(ks[2], (1, attention_dim)),
        w_da=u(ks[3], (decoder_dim, attention_dim)),
        b_da=u(ks[4], (1, attention_dim)),
        w_fa=u(ks[5], (1, attention_dim)),          # full_att.weight (1, A)
        b_fa=u(ks[6], (1, 1)),
        w_ih0=u(ks[7], (encoder_dim, decoder_dim)),  # init_h
        b_ih0=u(ks[8], (1, decoder_dim)),
        w_ic0=u(ks[9], (encoder_dim, decoder_dim)),  # init_c
        b_ic0=u(ks[10], (1, decoder_dim)),
        w_fb=u(ks[11], (decoder_dim, encoder_dim)),  # f_beta
        b_fb=u(ks[12], (1, encoder_dim)),
        w_ih=u(ks[13], (embed_dim + encoder_dim, 4 * decoder_dim)),
        w_hh=u(ks[14], (decoder_dim, 4 * decoder_dim)),
        # NOTE: when importing PyTorch LSTMCell weights, b_lstm must be b_ih + b_hh.
        b_lstm=u(ks[15], (1, 4 * decoder_dim)),
        w_fc=u(ks[16], (decoder_dim, vocab_size)),
        b_fc=jnp.zeros((1, vocab_size), jnp.float32),
    )
    return params


def decoder_with_attention_forward(params, encoder_out, encoded_captions, caption_lengths):
    B = encoder_out.shape[0]
    E = encoder_out.shape[-1]
    enc = encoder_out.reshape(B, -1, E)
    P = enc.shape[1]
    V = params['w_fc'].shape[1]
    EM = params['embedding'].shape[1]
    D = params['w_da'].shape[0]
    A = params['w_da'].shape[1]

    # Lane/sublane-friendly padded dims: batch -> multiple of 8 (sublanes); every
    # lane-axis dim -> multiple of 128 (lane-dense stores, aligned gate slices).
    Bp, Pp, Ep = _round_up(B, 8), _round_up(P, 128), _round_up(E, 128)
    EMp, Dp = _round_up(EM, 128), _round_up(D, 128)
    Ap, Vp = _round_up(A, 128), _round_up(V, 128)

    # ---- glue (XLA): sort by caption length (descending), embed captions ----
    cap_len = caption_lengths[:, 0]
    sort_ind = jnp.argsort(-cap_len)
    cap_len_sorted = cap_len[sort_ind]
    enc = enc[sort_ind]
    caps = encoded_captions[sort_ind]
    decode_lengths = (cap_len_sorted - 1).astype(jnp.int32)
    # TODO(synk): data-dependent trip count (= max(decode_lengths), same as PyTorch)
    #             forces a host sync and per-length recompile.
    T = int(jnp.max(decode_lengths))

    bf16 = jnp.bfloat16

    # ---- t==0 init hoisted out of the kernel: init_h/init_c + encoder-att projection
    #      in f32 XLA; att1 passed in already bf16. ----
    mean_enc = jnp.mean(enc, axis=1)                                   # (B, E)
    h0 = mean_enc @ params['w_ih0'] + params['b_ih0']                  # (B, D)
    c0 = mean_enc @ params['w_ic0'] + params['b_ic0']
    att1 = jnp.einsum('bpe,ea->bpa', enc, params['w_ea']) + params['b_ea']

    emb = params['embedding'][caps][:, :T, :]                          # (B, T, EM)
    emb_tm = jnp.transpose(emb, (1, 0, 2)).astype(bf16)                # (T, B, EM)
    emb_p = jnp.zeros((T, Bp, EMp), bf16).at[:, :B, :EM].set(emb_tm)
    enc_p = jnp.zeros((Bp, Pp, Ep), bf16).at[:B, :P, :E].set(enc.astype(bf16))
    att1_p = jnp.zeros((Bp, Pp, Ap), bf16).at[:B, :P, :A].set(att1.astype(bf16))
    h0_p = _pad_to(h0, (Bp, Dp))
    c0_p = _pad_to(c0, (Bp, Dp))

    dl_p = jnp.zeros((Bp,), jnp.int32).at[:B].set(decode_lengths)
    step_mask = (dl_p[None, :] > jnp.arange(T)[:, None]
                 ).astype(jnp.float32)[:, :, None]                     # (T, Bp, 1)

    # full_att bias folded into a per-pixel additive bias; padded pixels get -inf so
    # they get exactly zero softmax weight.
    e_bias = jnp.where(jnp.arange(Pp) < P, params['b_fa'][0, 0],
                       -1e30).astype(jnp.float32)[None, :]             # (1, Pp)
    # full_att weight as an (Ap, 128) column for the MXU score matmul (lane 0 only).
    w_fa_m = jnp.zeros((Ap, 128), bf16).at[:A, 0].set(params['w_fa'][0].astype(bf16))

    # ---- pad weights with zeros (numerically inert) and cast MXU operands to bf16 ----
    w_da = _pad_to(params['w_da'], (Dp, Ap)).astype(bf16)
    b_da = _pad_to(params['b_da'], (1, Ap))
    w_fb = _pad_to(params['w_fb'], (Dp, Ep)).astype(bf16)
    b_fb = _pad_to(params['b_fb'], (1, Ep))
    # Split the LSTM input weight: rows [0:EM) act on the embedding, rows [EM:) on the
    # attention-weighted encoding; pad each of the 4 gate blocks separately.
    w_ih_e = _pad_to(_pad_gate_cols(params['w_ih'][:EM], D, Dp), (EMp, 4 * Dp)).astype(bf16)
    w_ih_a = _pad_to(_pad_gate_cols(params['w_ih'][EM:], D, Dp), (Ep, 4 * Dp)).astype(bf16)
    w_hh = _pad_to(_pad_gate_cols(params['w_hh'], D, Dp), (Dp, 4 * Dp)).astype(bf16)
    b_lstm = _pad_gate_cols(params['b_lstm'], D, Dp)

    const_inputs = [enc_p, att1_p, e_bias, h0_p, c0_p,
                    w_da, b_da, w_fa_m, w_fb, b_fb, w_ih_e, w_ih_a, w_hh, b_lstm]

    in_specs = [
        _const_spec((Bp, Pp, Ep)),                          # encoder features
        _const_spec((Bp, Pp, Ap)),                          # att1 (bf16, precomputed)
        pl.BlockSpec((1, Bp, EMp), lambda t: (t, 0, 0)),    # embedding at step t
        pl.BlockSpec((1, Bp, 1), lambda t: (t, 0, 0)),      # active-sample mask at step t
        _const_spec((1, Pp)),                               # full_att bias + pixel padding
        _const_spec((Bp, Dp)),                              # h0
        _const_spec((Bp, Dp)),                              # c0
        _const_spec((Dp, Ap)), _const_spec((1, Ap)),        # decoder_att
        _const_spec((Ap, 128)),                             # full_att weight column
        _const_spec((Dp, Ep)), _const_spec((1, Ep)),        # f_beta
        _const_spec((EMp, 4 * Dp)), _const_spec((Ep, 4 * Dp)),
        _const_spec((Dp, 4 * Dp)), _const_spec((1, 4 * Dp)),
    ]
    out_specs = [pl.BlockSpec((1, Bp, Dp), lambda t: (t, 0, 0)),   # h_t
                 pl.BlockSpec((1, Bp, Pp), lambda t: (t, 0, 0))]   # alpha_t

    grid_spec = pltpu.PrefetchScalarGridSpec(
        num_scalar_prefetch=0,
        grid=(T,),
        in_specs=in_specs,
        out_specs=out_specs,
        scratch_shapes=[
            pltpu.VMEM((Bp, Dp), jnp.float32),        # h carry
            pltpu.VMEM((Bp, Dp), jnp.float32),        # c carry
        ],
    )

    # vmem limit derived from the actual resident set + device capacity.
    def _nbytes(x):
        return int(x.size) * x.dtype.itemsize
    resident = sum(_nbytes(x) for x in const_inputs)
    per_step = 2 * (Bp * EMp * 2 + Bp * 4 + Bp * Dp * 2 + Bp * Pp * 2)
    scratch_b = 2 * Bp * Dp * 4
    try:
        vmem_cap = int(pltpu.get_tpu_info().vmem_capacity_bytes)
    except Exception:
        vmem_cap = 64 * 1024 * 1024
    vmem_limit = int(min(max(2 * (resident + per_step + scratch_b) + (8 << 20), 32 << 20),
                         int(0.85 * vmem_cap)))

    flops = int(T * (2 * Bp * Dp * Ap                      # decoder_att
                     + 2 * Bp * Pp * Ap                    # relu add/max
                     + 2 * Bp * Pp * Ap * 128              # score matmul (padded N)
                     + 2 * Bp * Pp * Ep                    # weighted encoding
                     + 2 * Bp * Dp * Ep                    # f_beta
                     + 2 * Bp * (EMp + Ep + Dp) * 4 * Dp)) # LSTM matmuls
    transcendentals = int(T * Bp * (Pp + Ep + 6 * Dp))
    bytes_accessed = int(resident + T * (Bp * EMp * 2 + Bp * 4 + Bp * (Dp + Pp) * 2))

    h_tm, alphas_tm = pl.pallas_call(
        _decoder_step_kernel,
        out_shape=[jax.ShapeDtypeStruct((T, Bp, Dp), bf16),
                   jax.ShapeDtypeStruct((T, Bp, Pp), bf16)],
        grid_spec=grid_spec,
        compiler_params=pltpu.CompilerParams(
            # time axis is a true recurrence (h/c carried in scratch) -> arbitrary
            dimension_semantics=("arbitrary",),
            vmem_limit_bytes=vmem_limit,
        ),
        cost_estimate=pl.CostEstimate(flops=flops, transcendentals=transcendentals,
                                      bytes_accessed=bytes_accessed),
    )(enc_p, att1_p, emb_p, step_mask, e_bias, h0_p, c0_p,
      w_da, b_da, w_fa_m, w_fb, b_fb, w_ih_e, w_ih_a, w_hh, b_lstm)

    # ---- vocab projection hoisted out of the recurrence: one (T*Bp, Dp)@(Dp, Vp)
    #      matmul with near-full MXU occupancy; step mask applied in-kernel so rows
    #      past a sample's decode length are exactly zero (as in PyTorch). ----
    M = T * Bp
    Mp = _round_up(M, 256)
    tm = 256
    tn = max(d for d in (1024, 512, 256, 128) if Vp % d == 0)
    h_flat = _pad_to(h_tm.reshape(M, Dp), (Mp, Dp))
    m_flat = _pad_to(step_mask.reshape(M, 1), (Mp, 1))
    w_fc = _pad_to(params['w_fc'], (Dp, Vp)).astype(bf16)
    b_fc = _pad_to(params['b_fc'], (1, Vp))

    proj = pl.pallas_call(
        _vocab_proj_kernel,
        out_shape=jax.ShapeDtypeStruct((Mp, Vp), jnp.float32),
        grid=(Vp // tn, Mp // tm),
        in_specs=[pl.BlockSpec((tm, Dp), lambda j, i: (i, 0)),
                  pl.BlockSpec((tm, 1), lambda j, i: (i, 0)),
                  pl.BlockSpec((Dp, tn), lambda j, i: (0, j)),
                  pl.BlockSpec((1, tn), lambda j, i: (0, j))],
        out_specs=pl.BlockSpec((tm, tn), lambda j, i: (i, j)),
        compiler_params=pltpu.CompilerParams(
            dimension_semantics=("parallel", "parallel")),
        cost_estimate=pl.CostEstimate(
            flops=int(2 * Mp * Dp * Vp), transcendentals=0,
            bytes_accessed=int(Mp * Dp * 2 + Dp * Vp * 2 + Mp * Vp * 4)),
    )(h_flat, m_flat, w_fc, b_fc)

    predictions = jnp.transpose(proj[:M].reshape(T, Bp, Vp)[:, :B, :V], (1, 0, 2))
    alphas = jnp.transpose(alphas_tm[:, :B, :P].astype(jnp.float32), (1, 0, 2))
    return predictions, caps, [int(x) for x in np.asarray(decode_lengths)], alphas, sort_ind


def reference_forward(params, encoder_out, encoded_captions, caption_lengths):
    """Plain-JAX mirror of the PyTorch forward (eval mode) for correctness checking."""
    B = encoder_out.shape[0]
    E = encoder_out.shape[-1]
    enc = encoder_out.reshape(B, -1, E)
    P = enc.shape[1]
    V = params['w_fc'].shape[1]
    cap_len = caption_lengths[:, 0]
    sort_ind = jnp.argsort(-cap_len)
    cap_len_sorted = cap_len[sort_ind]
    enc = enc[sort_ind]
    caps = encoded_captions[sort_ind]
    emb = params['embedding'][caps]
    decode_lengths = np.asarray(cap_len_sorted - 1)
    T = int(decode_lengths.max())
    mean_enc = enc.mean(axis=1)
    h = mean_enc @ params['w_ih0'] + params['b_ih0']
    c = mean_enc @ params['w_ic0'] + params['b_ic0']
    D = h.shape[1]
    predictions = np.zeros((B, T, V), np.float32)
    alphas = np.zeros((B, T, P), np.float32)
    att1 = jnp.einsum('bpe,ea->bpa', enc, params['w_ea']) + params['b_ea']
    for t in range(T):
        bt = int(sum(int(l) > t for l in decode_lengths))
        att2 = h[:bt] @ params['w_da'] + params['b_da']
        att = jax.nn.relu(att1[:bt] + att2[:, None, :])
        e = jnp.einsum('bpa,a->bp', att, params['w_fa'][0]) + params['b_fa'][0, 0]
        alpha = jax.nn.softmax(e, axis=1)
        awe = (enc[:bt] * alpha[:, :, None]).sum(axis=1)
        gate = jax.nn.sigmoid(h[:bt] @ params['w_fb'] + params['b_fb'])
        awe = gate * awe
        x = jnp.concatenate([emb[:bt, t, :], awe], axis=1)
        gates = x @ params['w_ih'] + h[:bt] @ params['w_hh'] + params['b_lstm']
        i_g = jax.nn.sigmoid(gates[:, :D])
        f_g = jax.nn.sigmoid(gates[:, D:2 * D])
        g_g = jnp.tanh(gates[:, 2 * D:3 * D])
        o_g = jax.nn.sigmoid(gates[:, 3 * D:4 * D])
        c = f_g * c[:bt] + i_g * g_g
        h = o_g * jnp.tanh(c)
        preds = h @ params['w_fc'] + params['b_fc']
        predictions[:bt, t, :] = np.asarray(preds)
        alphas[:bt, t, :] = np.asarray(alpha)
    return predictions, alphas


if __name__ == "__main__":
    # Small shapes consistent with the module's forward.
    B, enc_size, E = 2, 4, 32          # encoder_out: (B, 4, 4, 32) -> num_pixels = 16
    D, A, embed_dim, V, L = 32, 32, 16, 40, 8

    key = jax.random.PRNGKey(0)
    kp, k1, k2 = jax.random.split(key, 3)
    params = init_params(kp, V, embed_dim, D, A, E)

    encoder_out = jax.random.normal(k1, (B, enc_size, enc_size, E), jnp.float32)
    encoded_captions = jax.random.randint(k2, (B, L), 0, V, jnp.int32)
    caption_lengths = jnp.array([[8], [5]], jnp.int32)

    preds, caps_sorted, dec_lens, alphas, sort_ind = decoder_with_attention_forward(
        params, encoder_out, encoded_captions, caption_lengths)
    jax.block_until_ready((preds, alphas))

    ref_preds, ref_alphas = reference_forward(params, encoder_out, encoded_captions,
                                              caption_lengths)
    # bf16 MXU operands / bf16 att1 & h_t -> slightly looser tolerance than pure-f32.
    np.testing.assert_allclose(np.asarray(preds), ref_preds, rtol=2e-2, atol=2e-2)
    np.testing.assert_allclose(np.asarray(alphas), ref_alphas, rtol=2e-2, atol=2e-2)
    print("KERNEL_OK")
</pallas_src>

<mosaic_0001>
module attributes {stable_mosaic.version = 11 : i64} {
  func.func @_decoder_step_kernel(%arg0: i32, %arg1: memref<8x128x128xbf16, #tpu.memory_space<vmem>>, %arg2: memref<8x128x128xbf16, #tpu.memory_space<vmem>>, %arg3: memref<1x8x128xbf16, #tpu.memory_space<vmem>>, %arg4: memref<1x8x1xf32, #tpu.memory_space<vmem>>, %arg5: memref<1x128xf32, #tpu.memory_space<vmem>>, %arg6: memref<8x128xf32, #tpu.memory_space<vmem>>, %arg7: memref<8x128xf32, #tpu.memory_space<vmem>>, %arg8: memref<128x128xbf16, #tpu.memory_space<vmem>>, %arg9: memref<1x128xf32, #tpu.memory_space<vmem>>, %arg10: memref<128x128xbf16, #tpu.memory_space<vmem>>, %arg11: memref<128x128xbf16, #tpu.memory_space<vmem>>, %arg12: memref<1x128xf32, #tpu.memory_space<vmem>>, %arg13: memref<128x512xbf16, #tpu.memory_space<vmem>>, %arg14: memref<128x512xbf16, #tpu.memory_space<vmem>>, %arg15: memref<128x512xbf16, #tpu.memory_space<vmem>>, %arg16: memref<1x512xf32, #tpu.memory_space<vmem>>, %arg17: memref<1x8x128xbf16, #tpu.memory_space<vmem>>, %arg18: memref<1x8x128xbf16, #tpu.memory_space<vmem>>, %arg19: memref<8x128xf32, #tpu.memory_space<vmem>>, %arg20: memref<8x128xf32, #tpu.memory_space<vmem>>) attributes {dimension_semantics = [#tpu.dimension_semantics<arbitrary>], iteration_bounds = array<i64: 7>, scalar_prefetch = 0 : i64, scratch_operands = 2 : i64, tpu.core_type = #tpu.core_type<tc>, window_params = [{pipeline_mode = #tpu.pipeline_mode<synchronous>, transform_indices = @transform_0, window_bounds = array<i64: 8, 128, 128>}, {pipeline_mode = #tpu.pipeline_mode<synchronous>, transform_indices = @transform_1, window_bounds = array<i64: 8, 128, 128>}, {transform_indices = @transform_2, window_bounds = array<i64: 1, 8, 128>}, {transform_indices = @transform_3, window_bounds = array<i64: 1, 8, 1>}, {pipeline_mode = #tpu.pipeline_mode<synchronous>, transform_indices = @transform_4, window_bounds = array<i64: 1, 128>}, {pipeline_mode = #tpu.pipeline_mode<synchronous>, transform_indices = @transform_5, window_bounds = array<i64: 8, 128>}, {pipeline_mode = #tpu.pipeline_mode<synchronous>, transform_indices = @transform_6, window_bounds = array<i64: 8, 128>}, {pipeline_mode = #tpu.pipeline_mode<synchronous>, transform_indices = @transform_7, window_bounds = array<i64: 128, 128>}, {pipeline_mode = #tpu.pipeline_mode<synchronous>, transform_indices = @transform_8, window_bounds = array<i64: 1, 128>}, {pipeline_mode = #tpu.pipeline_mode<synchronous>, transform_indices = @transform_9, window_bounds = array<i64: 128, 128>}, {pipeline_mode = #tpu.pipeline_mode<synchronous>, transform_indices = @transform_10, window_bounds = array<i64: 128, 128>}, {pipeline_mode = #tpu.pipeline_mode<synchronous>, transform_indices = @transform_11, window_bounds = array<i64: 1, 128>}, {pipeline_mode = #tpu.pipeline_mode<synchronous>, transform_indices = @transform_12, window_bounds = array<i64: 128, 512>}, {pipeline_mode = #tpu.pipeline_mode<synchronous>, transform_indices = @transform_13, window_bounds = array<i64: 128, 512>}, {pipeline_mode = #tpu.pipeline_mode<synchronous>, transform_indices = @transform_14, window_bounds = array<i64: 128, 512>}, {pipeline_mode = #tpu.pipeline_mode<synchronous>, transform_indices = @transform_15, window_bounds = array<i64: 1, 512>}, {transform_indices = @transform_16, window_bounds = array<i64: 1, 8, 128>}, {transform_indices = @transform_17, window_bounds = array<i64: 1, 8, 128>}]} {
    %c0_i32 = arith.constant 0 : i32
    %0 = arith.cmpi eq, %arg0, %c0_i32 : i32
    %1 = arith.extui %0 : i1 to i32
    %c0_i32_0 = arith.constant 0 : i32
    %2 = arith.cmpi ne, %1, %c0_i32_0 : i32
    scf.if %2 {
      %c0_62 = arith.constant 0 : index
      %c0_63 = arith.constant 0 : index
      %116 = vector.load %arg6[%c0_62, %c0_63] : memref<8x128xf32, #tpu.memory_space<vmem>>, vector<8x128xf32>
      %c0_64 = arith.constant 0 : index
      %c0_65 = arith.constant 0 : index
      %117 = vector.load %arg19[%c0_64, %c0_65] : memref<8x128xf32, #tpu.memory_space<vmem>>, vector<8x128xf32>
      tpu.vector_store %arg19[%c0_64, %c0_65], %116 {strides = array<i32>} : memref<8x128xf32, #tpu.memory_space<vmem>>, vector<8x128xf32>,
      %c0_66 = arith.constant 0 : index
      %c0_67 = arith.constant 0 : index
      %118 = vector.load %arg7[%c0_66, %c0_67] : memref<8x128xf32, #tpu.memory_space<vmem>>, vector<8x128xf32>
      %c0_68 = arith.constant 0 : index
      %c0_69 = arith.constant 0 : index
      %119 = vector.load %arg20[%c0_68, %c0_69] : memref<8x128xf32, #tpu.memory_space<vmem>>, vector<8x128xf32>
      tpu.vector_store %arg20[%c0_68, %c0_69], %118 {strides = array<i32>} : memref<8x128xf32, #tpu.memory_space<vmem>>, vector<8x128xf32>,
    } else {
    }
    %c0 = arith.constant 0 : index
    %c0_1 = arith.constant 0 : index
    %3 = vector.load %arg19[%c0, %c0_1] : memref<8x128xf32, #tpu.memory_space<vmem>>, vector<8x128xf32>
    %c0_2 = arith.constant 0 : index
    %c0_3 = arith.constant 0 : index
    %4 = vector.load %arg20[%c0_2, %c0_3] : memref<8x128xf32, #tpu.memory_space<vmem>>, vector<8x128xf32>
    %5 = arith.truncf %3 : vector<8x128xf32> to vector<8x128xbf16>
    %c0_4 = arith.constant 0 : index
    %c0_5 = arith.constant 0 : index
    %6 = vector.load %arg8[%c0_4, %c0_5] : memref<128x128xbf16, #tpu.memory_space<vmem>>, vector<128x128xbf16>
    %cst = arith.constant dense<0.000000e+00> : vector<8x128xf32>
    %7 = tpu.matmul %5, %6, %cst {dimension_numbers = #tpu.dot_dimension_numbers<[1], [0], [0], [1], [0, 0, 1, 1], [], []>} : vector<8x128xbf16>, vector<128x128xbf16>, vector<8x128xf32> -> vector<8x128xf32>
    %c0_6 = arith.constant 0 : index
    %c0_7 = arith.constant 0 : index
    %8 = vector.load %arg9[%c0_6, %c0_7] : memref<1x128xf32, #tpu.memory_space<vmem>>, vector<1x128xf32>
    %9 = vector.broadcast %8 : vector<1x128xf32> to vector<8x128xf32>
    %10 = arith.addf %7, %9 : vector<8x128xf32>
    %c0_8 = arith.constant 0 : index
    %c0_9 = arith.constant 0 : index
    %c0_10 = arith.constant 0 : index
    %11 = vector.load %arg2[%c0_8, %c0_9, %c0_10] : memref<8x128x128xbf16, #tpu.memory_space<vmem>>, vector<8x128x128xbf16>
    %12 = arith.extf %11 : vector<8x128x128xbf16> to vector<8x128x128xf32>
    %13 = vector.shape_cast %10 : vector<8x128xf32> to vector<8x1x128xf32>
    %14 = vector.broadcast %13 : vector<8x1x128xf32> to vector<8x128x128xf32>
    %15 = arith.addf %12, %14 : vector<8x128x128xf32>
    %cst_11 = arith.constant 0.000000e+00 : f32
    %16 = vector.broadcast %cst_11 : f32 to vector<8x128x128xf32>
    %17 = arith.maximumf %15, %16 : vector<8x128x128xf32>
    %18 = arith.truncf %17 : vector<8x128x128xf32> to vector<8x128x128xbf16>
    %19 = vector.shape_cast %18 : vector<8x128x128xbf16> to vector<1024x128xbf16>
    %c0_12 = arith.constant 0 : index
    %c0_13 = arith.constant 0 : index
    %20 = vector.load %arg10[%c0_12, %c0_13] : memref<128x128xbf16, #tpu.memory_space<vmem>>, vector<128x128xbf16>
    %cst_14 = arith.constant dense<0.000000e+00> : vector<1024x128xf32>
    %21 = tpu.matmul %19, %20, %cst_14 {dimension_numbers = #tpu.dot_dimension_numbers<[1], [0], [0], [1], [0, 0, 1, 1], [], []>} : vector<1024x128xbf16>, vector<128x128xbf16>, vector<1024x128xf32> -> vector<1024x128xf32>
    %22 = vector.shape_cast %21 : vector<1024x128xf32> to vector<8x128x128xf32>
    %cst_15 = arith.constant dense<0.000000e+00> : vector<8x128xf32>
    %23 = vector.multi_reduction <add>, %22, %cst_15 [2] : vector<8x128x128xf32> to vector<8x128xf32>
    %c0_16 = arith.constant 0 : index
    %c0_17 = arith.constant 0 : index
    %24 = vector.load %arg5[%c0_16, %c0_17] : memref<1x128xf32, #tpu.memory_space<vmem>>, vector<1x128xf32>
    %25 = vector.broadcast %24 : vector<1x128xf32> to vector<8x128xf32>
    %26 = arith.addf %23, %25 : vector<8x128xf32>
    %cst_18 = arith.constant dense<0xFF800000> : vector<8xf32>
    %27 = vector.multi_reduction <maximumf>, %26, %cst_18 [1] : vector<8x128xf32> to vector<8xf32>
    %28 = vector.shape_cast %27 : vector<8xf32> to vector<8x1xf32>
    %29 = vector.broadcast %28 : vector<8x1xf32> to vector<8x128xf32>
    %30 = arith.subf %26, %29 : vector<8x128xf32>
    %31 = math.exp %30 : vector<8x128xf32>
    %cst_19 = arith.constant dense<0.000000e+00> : vector<8xf32>
    %32 = vector.multi_reduction <add>, %31, %cst_19 [1] : vector<8x128xf32> to vector<8xf32>
    %33 = vector.shape_cast %32 : vector<8xf32> to vector<8x1xf32>
    %34 = tpu.reciprocal %33 {approx = true} : vector<8x1xf32> -> vector<8x1xf32>
    %35 = vector.broadcast %34 : vector<8x1xf32> to vector<8x128xf32>
    %36 = arith.mulf %31, %35 : vector<8x128xf32>
    %c0_20 = arith.constant 0 : index
    %c0_21 = arith.constant 0 : index
    %c0_22 = arith.constant 0 : index
    %37 = vector.load %arg1[%c0_20, %c0_21, %c0_22] : memref<8x128x128xbf16, #tpu.memory_space<vmem>>, vector<8x128x128xbf16>
    %38 = vector.shape_cast %36 : vector<8x128xf32> to vector<8x1x128xf32>
    %39 = arith.truncf %38 : vector<8x1x128xf32> to vector<8x1x128xbf16>
    "tpu.trace_start"() <{level = 10 : i32, message = "bqp,bpe->bqe"}> : () -> ()
    %cst_23 = arith.constant dense<0.000000e+00> : vector<8x1x128xf32>
    %40 = tpu.matmul %39, %37, %cst_23 {dimension_numbers = #tpu.dot_dimension_numbers<[2], [1], [1], [2], [0, 0, 0, 1, 1, 2], [0], [0]>} : vector<8x1x128xbf16>, vector<8x128x128xbf16>, vector<8x1x128xf32> -> vector<8x1x128xf32>
    "tpu.trace_stop"() : () -> ()
    %41 = vector.shape_cast %40 : vector<8x1x128xf32> to vector<8x128xf32>
    %c0_24 = arith.constant 0 : index
    %c0_25 = arith.constant 0 : index
    %42 = vector.load %arg11[%c0_24, %c0_25] : memref<128x128xbf16, #tpu.memory_space<vmem>>, vector<128x128xbf16>
    %cst_26 = arith.constant dense<0.000000e+00> : vector<8x128xf32>
    %43 = tpu.matmul %5, %42, %cst_26 {dimension_numbers = #tpu.dot_dimension_numbers<[1], [0], [0], [1], [0, 0, 1, 1], [], []>} : vector<8x128xbf16>, vector<128x128xbf16>, vector<8x128xf32> -> vector<8x128xf32>
    %c0_27 = arith.constant 0 : index
    %c0_28 = arith.constant 0 : index
    %44 = vector.load %arg12[%c0_27, %c0_28] : memref<1x128xf32, #tpu.memory_space<vmem>>, vector<1x128xf32>
    %45 = vector.broadcast %44 : vector<1x128xf32> to vector<8x128xf32>
    %46 = arith.addf %43, %45 : vector<8x128xf32>
    %47 = arith.negf %46 : vector<8x128xf32>
    %48 = math.exp %47 : vector<8x128xf32>
    %cst_29 = arith.constant 1.000000e+00 : f32
    %49 = vector.broadcast %cst_29 : f32 to vector<8x128xf32>
    %50 = arith.addf %49, %48 : vector<8x128xf32>
    %51 = arith.divf %49, %50 : vector<8x128xf32>
    %52 = arith.mulf %51, %41 : vector<8x128xf32>
    %53 = arith.truncf %52 : vector<8x128xf32> to vector<8x128xbf16>
    %c0_30 = arith.constant 0 : index
    %c0_31 = arith.constant 0 : index
    %c0_32 = arith.constant 0 : index
    %54 = vector.load %arg3[%c0_30, %c0_31, %c0_32] : memref<1x8x128xbf16, #tpu.memory_space<vmem>>, vector<1x8x128xbf16>
    %55 = vector.shape_cast %54 : vector<1x8x128xbf16> to vector<8x128xbf16>
    %c0_33 = arith.constant 0 : index
    %c0_34 = arith.constant 0 : index
    %56 = vector.load %arg13[%c0_33, %c0_34] : memref<128x512xbf16, #tpu.memory_space<vmem>>, vector<128x512xbf16>
    %cst_35 = arith.constant dense<0.000000e+00> : vector<8x512xf32>
    %57 = tpu.matmul %55, %56, %cst_35 {dimension_numbers = #tpu.dot_dimension_numbers<[1], [0], [0], [1], [0, 0, 1, 1], [], []>} : vector<8x128xbf16>, vector<128x512xbf16>, vector<8x512xf32> -> vector<8x512xf32>
    %c0_36 = arith.constant 0 : index
    %c0_37 = arith.constant 0 : index
    %58 = vector.load %arg14[%c0_36, %c0_37] : memref<128x512xbf16, #tpu.memory_space<vmem>>, vector<128x512xbf16>
    %cst_38 = arith.constant dense<0.000000e+00> : vector<8x512xf32>
    %59 = tpu.matmul %53, %58, %cst_38 {dimension_numbers = #tpu.dot_dimension_numbers<[1], [0], [0], [1], [0, 0, 1, 1], [], []>} : vector<8x128xbf16>, vector<128x512xbf16>, vector<8x512xf32> -> vector<8x512xf32>
    %60 = arith.addf %57, %59 : vector<8x512xf32>
    %c0_39 = arith.constant 0 : index
    %c0_40 = arith.constant 0 : index
    %61 = vector.load %arg15[%c0_39, %c0_40] : memref<128x512xbf16, #tpu.memory_space<vmem>>, vector<128x512xbf16>
    %cst_41 = arith.constant dense<0.000000e+00> : vector<8x512xf32>
    %62 = tpu.matmul %5, %61, %cst_41 {dimension_numbers = #tpu.dot_dimension_numbers<[1], [0], [0], [1], [0, 0, 1, 1], [], []>} : vector<8x128xbf16>, vector<128x512xbf16>, vector<8x512xf32> -> vector<8x512xf32>
    %63 = arith.addf %60, %62 : vector<8x512xf32>
    %c0_42 = arith.constant 0 : index
    %c0_43 = arith.constant 0 : index
    %64 = vector.load %arg16[%c0_42, %c0_43] : memref<1x512xf32, #tpu.memory_space<vmem>>, vector<1x512xf32>
    %65 = vector.broadcast %64 : vector<1x512xf32> to vector<8x512xf32>
    %66 = arith.addf %63, %65 : vector<8x512xf32>
    %67 = vector.extract_strided_slice %66 {offsets = [0, 0], sizes = [8, 128], strides = [1, 1]} : vector<8x512xf32> to vector<8x128xf32>
    %68 = arith.negf %67 : vector<8x128xf32>
    %69 = math.exp %68 : vector<8x128xf32>
    %cst_44 = arith.constant 1.000000e+00 : f32
    %70 = vector.broadcast %cst_44 : f32 to vector<8x128xf32>
    %71 = arith.addf %70, %69 : vector<8x128xf32>
    %72 = arith.divf %70, %71 : vector<8x128xf32>
    %73 = vector.extract_strided_slice %66 {offsets = [0, 128], sizes = [8, 128], strides = [1, 1]} : vector<8x512xf32> to vector<8x128xf32>
    %74 = arith.negf %73 : vector<8x128xf32>
    %75 = math.exp %74 : vector<8x128xf32>
    %cst_45 = arith.constant 1.000000e+00 : f32
    %76 = vector.broadcast %cst_45 : f32 to vector<8x128xf32>
    %77 = arith.addf %76, %75 : vector<8x128xf32>
    %78 = arith.divf %76, %77 : vector<8x128xf32>
    %79 = vector.extract_strided_slice %66 {offsets = [0, 256], sizes = [8, 128], strides = [1, 1]} : vector<8x512xf32> to vector<8x128xf32>
    %80 = math.tanh %79 : vector<8x128xf32>
    %81 = vector.extract_strided_slice %66 {offsets = [0, 384], sizes = [8, 128], strides = [1, 1]} : vector<8x512xf32> to vector<8x128xf32>
    %82 = arith.negf %81 : vector<8x128xf32>
    %83 = math.exp %82 : vector<8x128xf32>
    %cst_46 = arith.constant 1.000000e+00 : f32
    %84 = vector.broadcast %cst_46 : f32 to vector<8x128xf32>
    %85 = arith.addf %84, %83 : vector<8x128xf32>
    %86 = arith.divf %84, %85 : vector<8x128xf32>
    %87 = arith.mulf %78, %4 : vector<8x128xf32>
    %88 = arith.mulf %72, %80 : vector<8x128xf32>
    %89 = arith.addf %87, %88 : vector<8x128xf32>
    %90 = math.tanh %89 : vector<8x128xf32>
    %91 = arith.mulf %86, %90 : vector<8x128xf32>
    %c0_47 = arith.constant 0 : index
    %c0_48 = arith.constant 0 : index
    %c0_49 = arith.constant 0 : index
    %92 = vector.load %arg4[%c0_47, %c0_48, %c0_49] : memref<1x8x1xf32, #tpu.memory_space<vmem>>, vector<1x8x1xf32>
    %93 = vector.shape_cast %92 : vector<1x8x1xf32> to vector<8x1xf32>
    %cst_50 = arith.constant 5.000000e-01 : f32
    %94 = vector.broadcast %cst_50 : f32 to vector<8x1xf32>
    %95 = arith.cmpf ogt, %93, %94 : vector<8x1xf32>
    %96 = vector.shape_cast %95 : vector<8x1xi1> to vector<8x1xi1>
    %97 = vector.broadcast %96 : vector<8x1xi1> to vector<8x128xi1>
    %98 = arith.select %97, %91, %3 : vector<8x128xi1>, vector<8x128xf32>
    %c0_51 = arith.constant 0 : index
    %c0_52 = arith.constant 0 : index
    %99 = vector.load %arg19[%c0_51, %c0_52] : memref<8x128xf32, #tpu.memory_space<vmem>>, vector<8x128xf32>
    tpu.vector_store %arg19[%c0_51, %c0_52], %98 {strides = array<i32>} : memref<8x128xf32, #tpu.memory_space<vmem>>, vector<8x128xf32>,
    %100 = vector.shape_cast %95 : vector<8x1xi1> to vector<8x1xi1>
    %101 = vector.broadcast %100 : vector<8x1xi1> to vector<8x128xi1>
    %102 = arith.select %101, %89, %4 : vector<8x128xi1>, vector<8x128xf32>
    %c0_53 = arith.constant 0 : index
    %c0_54 = arith.constant 0 : index
    %103 = vector.load %arg20[%c0_53, %c0_54] : memref<8x128xf32, #tpu.memory_space<vmem>>, vector<8x128xf32>
    tpu.vector_store %arg20[%c0_53, %c0_54], %102 {strides = array<i32>} : memref<8x128xf32, #tpu.memory_space<vmem>>, vector<8x128xf32>,
    %104 = arith.truncf %91 : vector<8x128xf32> to vector<8x128xbf16>
    %c0_55 = arith.constant 0 : index
    %c0_56 = arith.constant 0 : index
    %c0_57 = arith.constant 0 : index
    %105 = vector.load %arg17[%c0_55, %c0_56, %c0_57] : memref<1x8x128xbf16, #tpu.memory_space<vmem>>, vector<1x8x128xbf16>
    %106 = vector.shape_cast %105 : vector<1x8x128xbf16> to vector<8x128xbf16>
    %107 = vector.shape_cast %104 : vector<8x128xbf16> to vector<1x8x128xbf16>
    tpu.vector_store %arg17[%c0_55, %c0_56, %c0_57], %107 {strides = array<i32>} : memref<1x8x128xbf16, #tpu.memory_space<vmem>>, vector<1x8x128xbf16>,
    %cst_58 = arith.constant 0.000000e+00 : f32
    %108 = vector.shape_cast %95 : vector<8x1xi1> to vector<8x1xi1>
    %109 = vector.broadcast %108 : vector<8x1xi1> to vector<8x128xi1>
    %110 = vector.broadcast %cst_58 : f32 to vector<8x128xf32>
    %111 = arith.select %109, %36, %110 : vector<8x128xi1>, vector<8x128xf32>
    %112 = arith.truncf %111 : vector<8x128xf32> to vector<8x128xbf16>
    %c0_59 = arith.constant 0 : index
    %c0_60 = arith.constant 0 : index
    %c0_61 = arith.constant 0 : index
    %113 = vector.load %arg18[%c0_59, %c0_60, %c0_61] : memref<1x8x128xbf16, #tpu.memory_space<vmem>>, vector<1x8x128xbf16>
    %114 = vector.shape_cast %113 : vector<1x8x128xbf16> to vector<8x128xbf16>
    %115 = vector.shape_cast %112 : vector<8x128xbf16> to vector<1x8x128xbf16>
    tpu.vector_store %arg18[%c0_59, %c0_60, %c0_61], %115 {strides = array<i32>} : memref<1x8x128xbf16, #tpu.memory_space<vmem>>, vector<1x8x128xbf16>,
    return
  }
  func.func @transform_0(%arg0: i32) -> (i32, i32, i32) {
    %c0_i32 = arith.constant 0 : i32
    %c0_i32_0 = arith.constant 0 : i32
    %c0_i32_1 = arith.constant 0 : i32
    %c0_i32_2 = arith.constant 0 : i32
    return %c0_i32, %c0_i32_0, %c0_i32_1 : i32, i32, i32
  }
  func.func @transform_1(%arg0: i32) -> (i32, i32, i32) {
    %c0_i32 = arith.constant 0 : i32
    %c0_i32_0 = arith.constant 0 : i32
    %c0_i32_1 = arith.constant 0 : i32
    %c0_i32_2 = arith.constant 0 : i32
    return %c0_i32, %c0_i32_0, %c0_i32_1 : i32, i32, i32
  }
  func.func @transform_2(%arg0: i32) -> (i32, i32, i32) {
    %c0_i32 = arith.constant 0 : i32
    %c0_i32_0 = arith.constant 0 : i32
    %c0_i32_1 = arith.constant 0 : i32
    return %arg0, %c0_i32, %c0_i32_0 : i32, i32, i32
  }
  func.func @transform_3(%arg0: i32) -> (i32, i32, i32) {
    %c0_i32 = arith.constant 0 : i32
    %c0_i32_0 = arith.constant 0 : i32
    %c0_i32_1 = arith.constant 0 : i32
    return %arg0, %c0_i32, %c0_i32_0 : i32, i32, i32
  }
  func.func @transform_4(%arg0: i32) -> (i32, i32) {
    %c0_i32 = arith.constant 0 : i32
    %c0_i32_0 = arith.constant 0 : i32
    %c0_i32_1 = arith.constant 0 : i32
    return %c0_i32, %c0_i32_0 : i32, i32
  }
  func.func @transform_5(%arg0: i32) -> (i32, i32) {
    %c0_i32 = arith.constant 0 : i32
    %c0_i32_0 = arith.constant 0 : i32
    %c0_i32_1 = arith.constant 0 : i32
    return %c0_i32, %c0_i32_0 : i32, i32
  }
  func.func @transform_6(%arg0: i32) -> (i32, i32) {
    %c0_i32 = arith.constant 0 : i32
    %c0_i32_0 = arith.constant 0 : i32
    %c0_i32_1 = arith.constant 0 : i32
    return %c0_i32, %c0_i32_0 : i32, i32
  }
  func.func @transform_7(%arg0: i32) -> (i32, i32) {
    %c0_i32 = arith.constant 0 : i32
    %c0_i32_0 = arith.constant 0 : i32
    %c0_i32_1 = arith.constant 0 : i32
    return %c0_i32, %c0_i32_0 : i32, i32
  }
  func.func @transform_8(%arg0: i32) -> (i32, i32) {
    %c0_i32 = arith.constant 0 : i32
    %c0_i32_0 = arith.constant 0 : i32
    %c0_i32_1 = arith.constant 0 : i32
    return %c0_i32, %c0_i32_0 : i32, i32
  }
  func.func @transform_9(%arg0: i32) -> (i32, i32) {
    %c0_i32 = arith.constant 0 : i32
    %c0_i32_0 = arith.constant 0 : i32
    %c0_i32_1 = arith.constant 0 : i32
    return %c0_i32, %c0_i32_0 : i32, i32
  }
  func.func @transform_10(%arg0: i32) -> (i32, i32) {
    %c0_i32 = arith.constant 0 : i32
    %c0_i32_0 = arith.constant 0 : i32
    %c0_i32_1 = arith.constant 0 : i32
    return %c0_i32, %c0_i32_0 : i32, i32
  }
  func.func @transform_11(%arg0: i32) -> (i32, i32) {
    %c0_i32 = arith.constant 0 : i32
    %c0_i32_0 = arith.constant 0 : i32
    %c0_i32_1 = arith.constant 0 : i32
    return %c0_i32, %c0_i32_0 : i32, i32
  }
  func.func @transform_12(%arg0: i32) -> (i32, i32) {
    %c0_i32 = arith.constant 0 : i32
    %c0_i32_0 = arith.constant 0 : i32
    %c0_i32_1 = arith.constant 0 : i32
    return %c0_i32, %c0_i32_0 : i32, i32
  }
  func.func @transform_13(%arg0: i32) -> (i32, i32) {
    %c0_i32 = arith.constant 0 : i32
    %c0_i32_0 = arith.constant 0 : i32
    %c0_i32_1 = arith.constant 0 : i32
    return %c0_i32, %c0_i32_0 : i32, i32
  }
  func.func @transform_14(%arg0: i32) -> (i32, i32) {
    %c0_i32 = arith.constant 0 : i32
    %c0_i32_0 = arith.constant 0 : i32
    %c0_i32_1 = arith.constant 0 : i32
    return %c0_i32, %c0_i32_0 : i32, i32
  }
  func.func @transform_15(%arg0: i32) -> (i32, i32) {
    %c0_i32 = arith.constant 0 : i32
    %c0_i32_0 = arith.constant 0 : i32
    %c0_i32_1 = arith.constant 0 : i32
    return %c0_i32, %c0_i32_0 : i32, i32
  }
  func.func @transform_16(%arg0: i32) -> (i32, i32, i32) {
    %c0_i32 = arith.constant 0 : i32
    %c0_i32_0 = arith.constant 0 : i32
    %c0_i32_1 = arith.constant 0 : i32
    return %arg0, %c0_i32, %c0_i32_0 : i32, i32, i32
  }
  func.func @transform_17(%arg0: i32) -> (i32, i32, i32) {
    %c0_i32 = arith.constant 0 : i32
    %c0_i32_0 = arith.constant 0 : i32
    %c0_i32_1 = arith.constant 0 : i32
    return %arg0, %c0_i32, %c0_i32_0 : i32, i32, i32
  }
}

</mosaic_0001>

<bundles_post_ra>
// kernel: tpu_custom_call.1
= control target key start
LH: loop header
LB: loop body
LE: loop exit
PB: predicated region body
PF: predicated region fallthrough
CT: control target
= control target key end

     0   :  { %s18306_s0 = inlined_call_operand.hbm [shape: bf16[8,128,128], index: 0, kind: input, shape index: {}]   ;;  %s18307_s1 = inlined_call_operand.hbm [shape: bf16[8,128,128], index: 1, kind: input, shape index: {}]   ;;  %s18308_s2 = inlined_call_operand.hbm [shape: bf16[7,8,128], index: 2, kind: input, shape index: {}]   ;;  %s18309_s3 = inlined_call_operand.vmem [shape: f32[7,8,1], index: 3, kind: input, shape index: {}]   ;;  %s18310_s4 = inlined_call_operand.vmem [shape: f32[1,128], index: 4, kind: input, shape index: {}]   ;;  %s18311_s5 = inlined_call_operand.vmem [shape: f32[8,128], index: 5, kind: input, shape index: {}]   ;;  %s18312_s6 = inlined_call_operand.vmem [shape: f32[8,128], index: 6, kind: input, shape index: {}]   ;;  %s18313_s7 = inlined_call_operand.vmem [shape: bf16[128,128], index: 7, kind: input, shape index: {}]   ;;  %s18314_s8 = inlined_call_operand.vmem [shape: f32[1,128], index: 8, kind: input, shape index: {}]   ;;  %s18315_s9 = inlined_call_operand.hbm [shape: bf16[128,128], index: 9, kind: input, shape index: {}]   ;;  %s18316_s10 = inlined_call_operand.hbm [shape: bf16[128,128], index: 10, kind: input, shape index: {}]   ;;  %s18317_s11 = inlined_call_operand.vmem [shape: f32[1,128], index: 11, kind: input, shape index: {}]   ;;  %s18318_s12 = inlined_call_operand.hbm [shape: bf16[128,512], index: 12, kind: input, shape index: {}]   ;;  %s18319_s13 = inlined_call_operand.hbm [shape: bf16[128,512], index: 13, kind: input, shape index: {}]   ;;  %s18320_s14 = inlined_call_operand.hbm [shape: bf16[128,512], index: 14, kind: input, shape index: {}]   ;;  %s18321_s15 = inlined_call_operand.vmem [shape: f32[1,512], index: 15, kind: input, shape index: {}]   ;;  %s18322_s16 = inlined_call_operand.hbm [shape: bf16[7,8,128], index: 16, kind: output, shape index: {0}]   ;;  %s18323_s17 = inlined_call_operand.hbm [shape: bf16[7,8,128], index: 17, kind: output, shape index: {1}]  }
   0x1   :  { %18860 = sst [smem:[#allocation237_spill]] %s18306_s0 }
   0x2   :  { %18861 = sst [smem:[#allocation238_spill]] %s18307_s1 }
   0x3   :  { %18862 = sst [smem:[#allocation239_spill]] %s18310_s4 }
   0x4   :  { %18863 = sst [smem:[#allocation240_spill]] %s18311_s5 }
   0x5   :  { %18864 = sst [smem:[#allocation241_spill]] %s18312_s6 }
   0x6   :  { %18865 = sst [smem:[#allocation242_spill]] %s18313_s7 }
   0x7   :  { %18866 = sst [smem:[#allocation243_spill]] %s18314_s8 }
   0x8   :  { %18867 = sst [smem:[#allocation244_spill]] %s18315_s9 }
   0x9   :  { %18868 = sst [smem:[#allocation245_spill]] %s18317_s11 }
   0xa   :  { %18869 = sst [smem:[#allocation246_spill]] %s18321_s15 }
   0xb   :  { %18870 = sst [smem:[#allocation247_spill]] %s18322_s16 }
   0xc   :  { %18871 = sst [smem:[#allocation248_spill]] %s18323_s17 }
   0xd   :  { %23 = vsyncpa [#allocation5], 0 }
   0xe   :  { %24 = vsyncpa [#allocation8], 0 }
   0xf   :  { %25 = vsyncpa [#allocation12], 0 }
  0x10   :  { %26 = vsyncpa [#allocation15], 0 }
  0x11   :  { %27 = vsyncpa [#allocation6], 0 }
  0x12   :  { %29 = vsyncpa [#allocation6 + $0x1], 0 }
  0x13   :  { %30 = vsyncpa [#allocation19], 0 }
  0x14   :  { %32 = vsyncpa [#allocation19 + $0x1], 0  ;;  %s12483_s24 = smov 0   ;;  %s12485_s25 = smov 0  }
  0x15   :  { %s12487_s26 = smov 0   ;;  %s12489_s27 = smov 0  }
  0x16 LB: > { %s12375_s28 = smov [#allocation4]   ;;  %s12504_s0 = sadd.s32 4294967295, %s12373_s27   ;;  %s12373_s27 = sphi %s12489_s27, %s20273_s27   ;;  %s12369_s26 = sphi %s12487_s26, %s20272_s26   ;;  %s12365_s25 = sphi %s12485_s25, %s20271_s25   ;;  %s12361_s24 = sphi %s12483_s24, %s20270_s24  }
  0x17   : > { %s453_s29 = sshll.u32 %s12375_s28, 4  ;;  %p10020_p0 = scmp.ge.s32.totalorder %s12373_s27, 1  ;;  %s12510_s29 = int_to_ptr.vmem [resolvable:$true] %s453_s29 }
  0x18   : > { %p18330_p1 = scmp.eq.s32.totalorder %s12504_s0, 0  ;;  %p441_p2 = scmp.lt.s32.totalorder %s12373_s27, 8 }
  0x19   : > { %s12376_s18 = smov [#allocation7]   ;;  %s12377_s20 = smov [#allocation11]  }
  0x1a   : > { %p12512_p4 = pnand %p10020_p0, %p441_p2  ;;  %s466_s19 = sshll.u32 %s12376_s18, 4  ;;  %s12524_s19 = int_to_ptr.vmem [resolvable:$true] %s466_s19 }
  0x1b   : > { %s507_s21 = sshll.u32 %s12377_s20, 4  ;;  %s18874_s28 = sld [smem:[#allocation237_spill]]  ;;  %s12526_s21 = int_to_ptr.vmem [resolvable:$true] %s507_s21 }
  0x1c   : > { %s18872_s30 = scalar_select %p12512_p4, 1, 0 }
  0x1d   : > { %p11100_p5 = pneg %p12512_p4 }
  0x1f   : > { %p12520_p6 = pnand %p11100_p5, %p18330_p1 }
  0x21   : > { %s12029_s16 = scalar_lea.hbm %s18874_s28, 8192  ;;  %p12536_p8 = pneg %p12520_p6 }
  0x22   : > { %p12030_p7 = scmp.ne.s32.totalorder %s18874_s28, %s12029_s16  ;;  %p12036_p11 = scmp.lt.u32.totalorder %s12029_s16, %s18874_s28 }
  0x24   : > { %p12032_p9 = pnand %p12536_p8, %p12030_p7 }
  0x26   : > { %p12033_p10 = pneg %p12032_p9 }
  0x28   : > { %p12038_p12 = pnand %p12036_p11, %p12033_p10 }
  0x2a   : > { %12041 = shalt.err (!%p12038_p12)
}
  0x2b   : > { %s12042_s15 = scalar_lea.vmem %s12510_s29, 8192  ;;  %p12050_p5 = scmp.lt.s32.totalorder %s12510_s29, %s12510_s29 }
  0x2c   : > { %p12043_p13 = scmp.ne.s32.totalorder %s12510_s29, %s12042_s15  ;;  %p12051_p3 = scmp.lt.s32.totalorder %s12042_s15, %s12042_s15 }
  0x2e   : > { %p12045_p0 = pnand %p12043_p13, %p12536_p8  ;;  %p12052_p7 = por %p12051_p3, %p12050_p5 }
  0x30   : > { %p12046_p2 = pneg %p12045_p0 }
  0x32   : > { %p12053_p9 = pnand %p12052_p7, %p12046_p2 }
  0x34   : > { %12056 = shalt.err (!%p12053_p9)
}
  0x35   : > { %s12378_s17 = smov 64   ;;  %s12379_s11 = smov 4  }
  0x36   : > { %11103 = dma.hbm_to_vmem [thread:$0]  (!%p12520_p6), %s18874_s28, 8192, %s12510_s29, [#allocation5], %s12378_s17, %s12378_s17, %s12379_s11  }
  0x37   : > { %s18876_s4 = sld [smem:[#allocation238_spill]] }
  0x3d   : > { %s12057_s15 = scalar_lea.hbm %s18876_s4, 8192 }
  0x3e   : > { %p12058_p3 = scmp.ne.s32.totalorder %s18876_s4, %s12057_s15  ;;  %p12064_p12 = scmp.lt.u32.totalorder %s12057_s15, %s18876_s4 }
  0x40   : > { %p12060_p10 = pnand %p12058_p3, %p12536_p8 }
  0x42   : > { %p12061_p11 = pneg %p12060_p10 }
  0x44   : > { %p12066_p13 = pnand %p12064_p12, %p12061_p11 }
  0x46   : > { %12069 = shalt.err (!%p12066_p13)
}
  0x47   : > { %s12070_s29 = scalar_lea.vmem %s12524_s19, 8192  ;;  %p12078_p7 = scmp.lt.s32.totalorder %s12524_s19, %s12524_s19 }
  0x48   : > { %p12071_p0 = scmp.ne.s32.totalorder %s12524_s19, %s12070_s29  ;;  %p12079_p9 = scmp.lt.s32.totalorder %s12070_s29, %s12070_s29 }
  0x4a   : > { %p12073_p2 = pnand %p12071_p0, %p12536_p8  ;;  %p12080_p3 = por %p12079_p9, %p12078_p7 }
  0x4c   : > { %p12074_p5 = pneg %p12073_p2 }
  0x4e   : > { %p12081_p10 = pnand %p12080_p3, %p12074_p5 }
  0x50   : > { %12084 = shalt.err (!%p12081_p10)
}
  0x51   : > { %11106 = dma.hbm_to_vmem [thread:$0]  (!%p12520_p6), %s18876_s4, 8192, %s12524_s19, [#allocation8], %s12378_s17, %s12378_s17, %s12379_s11  }
  0x52   : > { %s12085_s16 = scalar_lea.hbm %s18316_s10, 1024 }
  0x53   : > { %p12086_p11 = scmp.ne.s32.totalorder %s18316_s10, %s12085_s16  ;;  %p12092_p0 = scmp.lt.u32.totalorder %s12085_s16, %s18316_s10 }
  0x55   : > { %p12088_p12 = pnand %p12086_p11, %p12536_p8 }
  0x57   : > { %p12089_p13 = pneg %p12088_p12 }
  0x59   : > { %p12094_p2 = pnand %p12092_p0, %p12089_p13 }
  0x5b   : > { %12097 = shalt.err (!%p12094_p2)
}
  0x5c   : > { %s12098_s19 = scalar_lea.vmem %s12526_s21, 1024  ;;  %p12106_p3 = scmp.lt.s32.totalorder %s12526_s21, %s12526_s21 }
  0x5d   : > { %p12099_p5 = scmp.ne.s32.totalorder %s12526_s21, %s12098_s19  ;;  %p12107_p10 = scmp.lt.s32.totalorder %s12098_s19, %s12098_s19 }
  0x5f   : > { %p12101_p7 = pnand %p12099_p5, %p12536_p8  ;;  %p12108_p11 = por %p12107_p10, %p12106_p3 }
  0x61   : > { %p12102_p9 = pneg %p12101_p7 }
  0x63   : > { %p12109_p12 = pnand %p12108_p11, %p12102_p9 }
  0x65   : > { %12112 = shalt.err (!%p12109_p12)
}
  0x66   : > { %11112 = dma.hbm_to_vmem [thread:$0]  (!%p12520_p6), %s18316_s10, 1024, %s12526_s21, [#allocation12], %s12378_s17, %s12378_s17, %s12379_s11  }
  0x67   : > { %s12380_s6 = smov [#allocation14]   ;;  %s12381_s8 = smov [#allocation10]  }
  0x68   : > { %s536_s7 = sshll.u32 %s12380_s6, 4  ;;  %s494_s16 = sshll.u32 %s12381_s8, 4  ;;  %s537_s7 = int_to_ptr.vmem [resolvable:$true] %s536_s7  ;;  %s495_s16 = int_to_ptr.vmem [resolvable:$true] %s494_s16 }
  0x69   : > { %s12113_s20 = scalar_lea.hbm %s18319_s13, 4096 }
  0x6a   : > { %p12114_p13 = scmp.ne.s32.totalorder %s18319_s13, %s12113_s20  ;;  %p12120_p5 = scmp.lt.u32.totalorder %s12113_s20, %s18319_s13 }
  0x6c   : > { %p12116_p0 = pnand %p12114_p13, %p12536_p8 }
  0x6e   : > { %p12117_p2 = pneg %p12116_p0 }
  0x70   : > { %p12122_p7 = pnand %p12120_p5, %p12117_p2 }
  0x72   : > { %12125 = shalt.err (!%p12122_p7)
}
  0x73   : > { %s12126_s21 = scalar_lea.vmem %s537_s7, 4096  ;;  %p12134_p11 = scmp.lt.s32.totalorder %s537_s7, %s537_s7 }
  0x74   : > { %p12127_p9 = scmp.ne.s32.totalorder %s537_s7, %s12126_s21  ;;  %p12135_p12 = scmp.lt.s32.totalorder %s12126_s21, %s12126_s21 }
  0x76   : > { %p12129_p3 = pnand %p12127_p9, %p12536_p8  ;;  %p12136_p1 = por %p12135_p12, %p12134_p11 }
  0x78   : > { %p12130_p10 = pneg %p12129_p3 }
  0x7a   : > { %p12137_p4 = pnand %p12136_p1, %p12130_p10 }
  0x7c   : > { %12140 = shalt.err (!%p12137_p4)
}
  0x7d   : > { %s18332_s5 = smov 256   ;;  %s18334_s6 = smov 16  }
  0x7e   : > { %11118 = dma.hbm_to_vmem [thread:$0]  (!%p12520_p6), %s18319_s13, 4096, %s537_s7, [#allocation15], %s18332_s5, %s18332_s5, %s18334_s6  }
  0x7f   : > { %s18877_s9 = sld [smem:[#allocation244_spill]] }
  0x85   : > { %s12141_s20 = scalar_lea.hbm %s18877_s9, 1024 }
  0x86   : > { %p12142_p1 = scmp.ne.s32.totalorder %s18877_s9, %s12141_s20  ;;  %p12148_p0 = scmp.lt.u32.totalorder %s12141_s20, %s18877_s9 }
  0x88   : > { %p12144_p4 = pnand %p12142_p1, %p12536_p8 }
  0x8a   : > { %p12145_p13 = pneg %p12144_p4 }
  0x8c   : > { %p12150_p2 = pnand %p12148_p0, %p12145_p13 }
  0x8e   : > { %12153 = shalt.err (!%p12150_p2)
}
  0x8f   : > { %s12154_s4 = scalar_lea.vmem %s495_s16, 1024  ;;  %p12162_p3 = scmp.lt.s32.totalorder %s495_s16, %s495_s16 }
  0x90   : > { %p12155_p5 = scmp.ne.s32.totalorder %s495_s16, %s12154_s4  ;;  %p12163_p10 = scmp.lt.s32.totalorder %s12154_s4, %s12154_s4 }
  0x92   : > { %p12157_p7 = pnand %p12155_p5, %p12536_p8  ;;  %p12164_p11 = por %p12163_p10, %p12162_p3 }
  0x94   : > { %p12158_p9 = pneg %p12157_p7 }
  0x96   : > { %p12165_p12 = pnand %p12164_p11, %p12158_p9 }
  0x98   : > { %12168 = shalt.err (!%p12165_p12)
}
  0x99   : > { %11109 = dma.hbm_to_vmem [thread:$0]  (!%p12520_p6), %s18877_s9, 1024, %s495_s16, [#allocation8], %s12378_s17, %s12378_s17, %s12379_s11  }
  0x9a   : > { %s12384_s22 = smov [#allocation13]   ;;  %s12385_s20 = smov [#allocation16]  }
  0x9b   : > { %s523_s23 = sshll.u32 %s12384_s22, 4  ;;  %s549_s15 = sshll.u32 %s12385_s20, 4  ;;  %s524_s23 = int_to_ptr.vmem [resolvable:$true] %s523_s23  ;;  %s550_s15 = int_to_ptr.vmem [resolvable:$true] %s549_s15 }
  0x9c   : > { %s12169_s21 = scalar_lea.hbm %s18318_s12, 4096 }
  0x9d   : > { %p12170_p1 = scmp.ne.s32.totalorder %s18318_s12, %s12169_s21  ;;  %p12176_p0 = scmp.lt.u32.totalorder %s12169_s21, %s18318_s12 }
  0x9f   : > { %p12172_p4 = pnand %p12170_p1, %p12536_p8 }
  0xa1   : > { %p12173_p13 = pneg %p12172_p4 }
  0xa3   : > { %p12178_p2 = pnand %p12176_p0, %p12173_p13 }
  0xa5   : > { %12181 = shalt.err (!%p12178_p2)
}
  0xa6   : > { %s12182_s17 = scalar_lea.vmem %s524_s23, 4096  ;;  %p12190_p3 = scmp.lt.s32.totalorder %s524_s23, %s524_s23 }
  0xa7   : > { %p12183_p5 = scmp.ne.s32.totalorder %s524_s23, %s12182_s17  ;;  %p12191_p10 = scmp.lt.s32.totalorder %s12182_s17, %s12182_s17 }
  0xa9   : > { %p12185_p7 = pnand %p12183_p5, %p12536_p8  ;;  %p12192_p11 = por %p12191_p10, %p12190_p3 }
  0xab   : > { %p12186_p9 = pneg %p12185_p7 }
  0xad   : > { %p12193_p12 = pnand %p12192_p11, %p12186_p9 }
  0xaf   : > { %12196 = shalt.err (!%p12193_p12)
}
  0xb0   : > { %s18878_s11 = smov 16   ;;  %s18879_s16 = smov 256  }
  0xb1   : > { %11115 = dma.hbm_to_vmem [thread:$0]  (!%p12520_p6), %s18318_s12, 4096, %s524_s23, [#allocation12], %s18879_s16, %s18879_s16, %s18878_s11  }
  0xb2   : > { %s12197_s20 = scalar_lea.hbm %s18320_s14, 4096 }
  0xb3   : > { %p12198_p1 = scmp.ne.s32.totalorder %s18320_s14, %s12197_s20  ;;  %p12204_p0 = scmp.lt.u32.totalorder %s12197_s20, %s18320_s14 }
  0xb5   : > { %p12200_p4 = pnand %p12198_p1, %p12536_p8 }
  0xb7   : > { %p12201_p13 = pneg %p12200_p4 }
  0xb9   : > { %p12206_p2 = pnand %p12204_p0, %p12201_p13 }
  0xbb   : > { %12209 = shalt.err (!%p12206_p2)
}
  0xbc   : > { %s12210_s7 = scalar_lea.vmem %s550_s15, 4096  ;;  %p12218_p3 = scmp.lt.s32.totalorder %s550_s15, %s550_s15 }
  0xbd   : > { %p12211_p5 = scmp.ne.s32.totalorder %s550_s15, %s12210_s7  ;;  %p12219_p10 = scmp.lt.s32.totalorder %s12210_s7, %s12210_s7 }
  0xbf   : > { %p12213_p7 = pnand %p12211_p5, %p12536_p8  ;;  %p12220_p11 = por %p12219_p10, %p12218_p3 }
  0xc1   : > { %p12214_p9 = pneg %p12213_p7 }
  0xc3   : > { %p12221_p12 = pnand %p12220_p11, %p12214_p9 }
  0xc5   : > { %12224 = shalt.err (!%p12221_p12)
}
  0xc6   : > { %11121 = dma.hbm_to_vmem [thread:$0]  (!%p12520_p6), %s18320_s14, 4096, %s550_s15, [#allocation15], %s18879_s16, %s18879_s16, %s18878_s11  }
  0xc7   : > { %s10019_s1 = sadd.s32 4294967294, %s12373_s27   ;;  %s12698_s18 = sadd.s32 1, %s12373_s27  }
  0xc8   : > { %s87_s5 = sadd.s32 1, %s12369_s26  ;;  %s84_s6 = ssub.s32 %s12373_s27, %s12698_s18 }
  0xc9   : > { %p94_p8 = scmp.ne.s32.totalorder %s12369_s26, %s12365_s25  ;;  %p85_p1 = scmp.eq.s32.totalorder %s84_s6, 0 }
  0xca   : > { %p95_p4 = scmp.eq.s32.totalorder %s12373_s27, 0  ;;  %p100_p13 = scmp.ne.s32.totalorder %s12365_s25, %s12361_s24 }
  0xcb   : > { %p402_p0 = scmp.eq.s32.totalorder %s12504_s0, 6  ;;  %p18880_p5 = scmp.eq.s32.totalorder %s12504_s0, 0 }
  0xcc   : > { %s12710_s8 = scalar_select %p85_p1, %s12369_s26, %s87_s5  }
  0xcd   : > { %p96_p2 = por %p95_p4, %p94_p8  ;;  %p12714_p7 = por %p18880_p5, %p100_p13 }
  0xce   : > { %p12718_p6 = por %p402_p0, %p94_p8  ;;  %p408_p9 = scmp.eq.s32.totalorder %s10019_s1, 6 }
  0xcf   : > { %p11140_p3 = scmp.lt.s32.totalorder %s12373_s27, 7  ;;  %s566_s16 = sand.u32 1, %s12373_s27  }
  0xd0   : > { %s18882_s11 = scalar_select %p12718_p6, 1, 0 }
  0xd1   : > { %p12724_p10 = por %p408_p9, %p100_p13  ;;  %s568_s20 = sand.u32 1, %s12369_s26  }
  0xd2   : > { %s10030_s19 = sshll.u32 %s12373_s27, 6  ;;  %s10029_s29 = sshll.u32 %s568_s20, 2 }
  0xd3   : > { %s18883_s22 = scalar_select %p12724_p10, 1, 0 }
  0xd4   : > { %s12733_s7 = scalar_lea.hbm %s18308_s2, %s10030_s19  ;;  %p12735_p11 = pnand %p11140_p3, %p96_p2 }
  0xd5   : > { %s570_s17 = scalar_lea.vmem [#allocation9], %s10029_s29  ;;  %s567_s5 = scalar_lea.sflag [#allocation5], %s566_s16 }
  0xd6   : > { %s577_s1 = sshll.u32 %s570_s17, 4  ;;  %s12225_s6 = scalar_lea.hbm %s12733_s7, 64  ;;  %s12739_s1 = int_to_ptr.vmem [resolvable:$true] %s577_s1 }
  0xd7   : > { %p12226_p12 = scmp.ne.s32.totalorder %s12733_s7, %s12225_s6  ;;  %p12227_p8 = pneg %p12735_p11 }
  0xd8   : > { %s12230_s21 = scalar_lea.hbm %s18308_s2, 448  ;;  %p12231_p13 = scmp.lt.u32.totalorder %s12733_s7, %s18308_s2 }
  0xd9   : > { %p12228_p1 = pnand %p12227_p8, %p12226_p12  ;;  %p12232_p0 = scmp.lt.u32.totalorder %s12230_s21, %s12225_s6 }
  0xda   : > { %p12234_p5 = scmp.lt.u32.totalorder %s12225_s6, %s12733_s7 }
  0xdb   : > { %p12229_p4 = pneg %p12228_p1  ;;  %p12233_p2 = por %p12232_p0, %p12231_p13 }
  0xdd   : > { %p12235_p9 = por %p12234_p5, %p12233_p2 }
  0xdf   : > { %p12236_p3 = pnand %p12235_p9, %p12229_p4 }
  0xe1   : > { %12239 = shalt.err (!%p12236_p3)
}
  0xe2   : > { %s12240_s16 = scalar_lea.vmem %s12739_s1, 64  ;;  %s12386_s29 = smov [#allocation9]  }
  0xe3   : > { %p12241_p12 = scmp.ne.s32.totalorder %s12739_s1, %s12240_s16  ;;  %s12245_s17 = sshll.u32 %s12386_s29, 4  ;;  %s12246_s17 = int_to_ptr.vmem [resolvable:$false] %s12245_s17 }
  0xe4   : > { %s12247_s9 = scalar_lea.vmem %s12246_s17, 128  ;;  %p12248_p6 = scmp.lt.s32.totalorder %s12739_s1, %s12246_s17 }
  0xe5   : > { %p12243_p1 = pnand %p12241_p12, %p12227_p8  ;;  %p12249_p13 = scmp.lt.s32.totalorder %s12247_s9, %s12240_s16 }
  0xe7   : > { %p12244_p10 = pneg %p12243_p1  ;;  %p12250_p0 = por %p12249_p13, %p12248_p6 }
  0xe9   : > { %p12251_p2 = pnand %p12250_p0, %p12244_p10 }
  0xeb   : > { %12254 = shalt.err (!%p12251_p2)
}
  0xec   : > { %11125 = dma.hbm_to_vmem [thread:$0]  (!%p12735_p11), %s12733_s7, 64, %s12739_s1, %s567_s5  }
  0xed   : > { %p18885_p4 = scmp.ne.s32.totalorder %s18872_s30, 0 }
  0xef   : > { %593 = sbr.rel (%p18885_p4) target bundleno = 3749 (0xea5), region = 84 }
  0xf6   : > { %p18886_p8 = scmp.eq.s32.totalorder %s12504_s0, 0 }
  0xf8   : > { %12328 = dma.done.wait (%p18886_p8), [#allocation5], 8192   ;;  %p18887_p5 = pmov %p18886_p8 }
  0xfa   : > { %12330 = vsyncadd (%p18887_p5), [#allocation5], 4294959104  ;;  %p18888_p9 = pmov %p18887_p5 }
  0xfb   : > { %p18889_p6 = pmov %p18887_p5 }
  0xfc   : > { %12332 = dma.done.wait (%p18888_p9), [#allocation8], 8192  }
  0xfd   : > { %12334 = vsyncadd (%p18889_p6), [#allocation8], 4294959104  ;;  %s603_s23 = sand.u32 1, %s12504_s0   ;;  %s12778_s7 = sand.u32 1, %s12365_s25  }
  0xfe   : > { %s12781_s30 = sshll.u32 %s12778_s7, 2  ;;  %s604_s1 = scalar_lea.sflag [#allocation5], %s603_s23 }
  0xff   : > { %12336 = dma.done.wait (%p12714_p7), %s604_s1, 64  }
 0x100   : > { %12338 = vsyncadd (%p12714_p7), %s604_s1, 4294967232  ;;  %p18890_p10 = pmov %p18887_p5 }
 0x101   : > { %p18891_p11 = pmov %p18887_p5 }
 0x102   : > { %12340 = dma.done.wait (%p18890_p10), [#allocation8], 1024  }
 0x103   : > { %12342 = vsyncadd (%p18891_p11), [#allocation8], 4294966272  ;;  %p18892_p3 = pmov %p18887_p5 }
 0x105   : > { %12344 = dma.done.wait (%p18892_p3), [#allocation12], 5120   ;;  %p18893_p12 = pmov %p18892_p3 }
 0x106   : > { %p18894_p1 = pmov %p18892_p3 }
 0x107   : > { %12346 = vsyncadd (%p18893_p12), [#allocation12], 4294962176 }
 0x108   : > { %12348 = dma.done.wait (%p18894_p1), [#allocation15], 8192   ;;  %p18895_p13 = pmov %p18894_p1 }
 0x109   : > { %p687_p7 = scmp.lt.s32.totalorder %s12504_s0, 6  ;;  %s686_s16 = scalar_lea.vmem [#allocation18], %s12781_s30 }
 0x10a   : > { %12350 = vsyncadd (%p18895_p13), [#allocation15], 4294959104  ;;  %p18896_p0 = scmp.ne.s32.totalorder %s12504_s0, 0 }
 0x10b   : > { %s688_s15 = scalar_select %p687_p7, %s12504_s0, 6 }
 0x10c   : > { %695 = sbr.rel (%p18896_p0) target bundleno = 277 (0x115), region = 120  ;;  %s18897_s9 = sld [smem:[#allocation240_spill]] (!%p18896_p0) }
 0x10d   : > { %s10042_s6 = sshll.u32 %s688_s15, 3  ;;  %s18898_s5 = sld [smem:[#allocation241_spill]] (!%p18896_p0) }
 0x10e   : > { %s12805_s21 = scalar_lea.vmem %s18309_s3, %s10042_s6 }
 0x112   : > { %v696_v0 = vld [vmem:[%s18897_s9] sm:$0xff] (!%p18896_p0) }
 0x113   : > { %v698_v1 = vld [vmem:[%s18898_s5] sm:$0xff]  ;;  %697 = vst [vmem:[#allocation2] sm:$0xff] %v696_v0 }
 0x114   : > { %699 = vst [vmem:[#allocation3] sm:$0xff] %v698_v1 }
 0x115 PF: > { %s18899_s6 = sld [smem:[#allocation242_spill]]  ;;  %v18339_v3 = vmov 0.0   ;;  %vm18476_vm0 = vmmov 0   ;;  %v11526_v7 = vld [vmem:[#allocation10] sm:$0xff]   ;;  %v11527_v8 = vld [vmem:[#allocation10 + $0x8] sm:$0xff]   ;;  %v11528_v10 = vld [vmem:[#allocation10 + $0x10] sm:$0xff]   ;;  %v18341_v23 = vlaneseq }
 0x116   : > { %10722 = vmatprep.subr.bf16.mxu0 %v18339_v3  ;;  %10738 = vmatprep.mubr.msk.bf16.mxu0 %vm18476_vm0, %v18339_v3  ;;  %v11529_v11 = vld [vmem:[#allocation10 + $0x18] sm:$0xff]   ;;  %v11530_v17 = vld [vmem:[#allocation10 + $0x20] sm:$0xff]   ;;  %v11531_v18 = vld [vmem:[#allocation10 + $0x28] sm:$0xff]   ;;  %v12389_v21 = vmov 1966171168   ;;  %s18902_s4 = sld [smem:[#allocation243_spill]] }
 0x117   : > { %10742 = vmatprep.subr.bf16.mxu1 %v11526_v7  ;;  %v11532_v19 = vld [vmem:[#allocation10 + $0x30] sm:$0xff]   ;;  %v11533_v20 = vld [vmem:[#allocation10 + $0x38] sm:$0xff]   ;;  %v1073_v22 = vunpack.c.l.s4 %v12389_v21  ;;  %v12859_v25 = vshrl.u32 %v18341_v23, 7  ;;  %v10497_v39 = vld [vmem:[#allocation7 + $0x8] sm:$0xff]   ;;  %s18904_s15 = sld [smem:[#allocation239_spill]]  ;;  %vm3081_vm1 = vcmask 130112  }
 0x118   : > { %10743 = vmatpush3.bf16.msra.mxu1 %v11526_v7  ;;  %v10242_v35 = vld [vmem:[#allocation7] sm:$0xff]   ;;  %v10498_v42 = vld [vmem:[#allocation7 + $0x10] sm:$0xff]   ;;  %v10247_v46 = vunpack.c.l.bf16 %v10497_v39  ;;  %v10248_v47 = vunpack.c.h.bf16 %v10497_v39  ;;  %v10499_v48 = vld [vmem:[#allocation7 + $0x18] sm:$0xff]   ;;  %vm3088_vm2 = vcmask 195712   ;;  %vm3095_vm3 = vcmask 261312   ;;  %s20251_s19 = sld [smem:[#allocation245_spill]] }
 0x119   : > { %10744 = vmatprep.subr.bf16.mxu1 %v11527_v8  ;;  %v1074_v24 = vunpack.c.0.s8 %v1073_v22  ;;  %18901 = vst [vmem:[#allocation29_spill] sm:$0xff] %v12859_v25  ;;  %v12869_v36 = vsub.s32 0, %v12859_v25  ;;  %v10243_v40 = vunpack.c.l.bf16 %v10242_v35  ;;  %v10244_v41 = vunpack.c.h.bf16 %v10242_v35  ;;  %v10500_v54 = vld [vmem:[#allocation7 + $0x20] sm:$0xff]   ;;  %s20256_s5 = scalar_lea.vmem [#allocation9], %s12781_s30  ;;  %s18859_s29 = sshll.u32 %s12504_s0, 6 }
 0x11a   : > { %v10251_v50 = vunpack.c.l.bf16 %v10498_v42  ;;  %v10252_v51 = vunpack.c.h.bf16 %v10498_v42  ;;  %v10255_v55 = vunpack.c.l.bf16 %v10499_v48  ;;  %v10256_v56 = vunpack.c.h.bf16 %v10499_v48  ;;  %v10504_v39 = vld [vmem:[#allocation7 + $0x40] sm:$0xff]   ;;  %s9839_s1 = sshll.u32 %s686_s16, 4  ;;  %p20259_p4 = scmp.ne.s32.totalorder %s18882_s11, 0  ;;  %s9840_s1 = int_to_ptr.vmem [resolvable:$true] %s9839_s1 }
 0x11b   : > { %v11518_v2 = vld [vmem:[%s18899_s6] sm:$0xff]   ;;  %v11519_v4 = vld [vmem:[%s18899_s6 + $0x8] sm:$0xff]   ;;  %v11520_v5 = vld [vmem:[%s18899_s6 + $0x10] sm:$0xff]   ;;  %v12865_v27 = vsub.s32 %v1074_v24, %v12859_v25  ;;  %18903 = vst [vmem:[#allocation30_spill] sm:$0xff] %v12869_v36  ;;  %v10259_v63 = vunpack.c.l.bf16 %v10500_v54  ;;  %v10260_v0 = vunpack.c.h.bf16 %v10500_v54  ;;  %vm3102_vm4 = vcmask 326912   ;;  %s12391_s20 = smov [#allocation18]  }
 0x11c   : > { %10723 = vmatpush3.bf16.msra.mxu0 %v11518_v2  ;;  %v11521_v6 = vld [vmem:[%s18899_s6 + $0x18] sm:$0xff]   ;;  %v11522_v9 = vld [vmem:[%s18899_s6 + $0x20] sm:$0xff]   ;;  %v11523_v12 = vld [vmem:[%s18899_s6 + $0x28] sm:$0xff]   ;;  %10745 = vmatpush3.bf16.msra.mxu1 %v11527_v8  ;;  %vm3109_vm5 = vcmask 392512   ;;  %vm3116_vm6 = vcmask 458112   ;;  %vm18483_vm7 = vcmask 523712  }
 0x11d   : > { %10724 = vmatprep.subr.bf16.mxu0 %v18339_v3  ;;  %10746 = vmatprep.subr.bf16.mxu1 %v11528_v10  ;;  %v11524_v13 = vld [vmem:[%s18899_s6 + $0x30] sm:$0xff]   ;;  %v11525_v14 = vld [vmem:[%s18899_s6 + $0x38] sm:$0xff]   ;;  %v700_v15 = vld [vmem:[#allocation2] sm:$0xff]  ;;  %vm18482_vm8 = vcmask 589312   ;;  %vm18479_vm9 = vcmask 654912   ;;  %vm18481_vm10 = vcmask 720512  }
 0x11e   : > { %v12851_v16 = vpack.c.bf16 %v700_v15, %v700_v15  ;;  %v10044_v26 = vld [vmem:[%s18902_s4] ss:$0 sm:$0xff]  ;;  %vm3151_vm11 = vcmask 786112   ;;  %vm3158_vm12 = vcmask 851712   ;;  %vm3165_vm13 = vcmask 917312   ;;  %s20258_s4 = sld [smem:[#allocation248_spill]] }
 0x11f   : > { %vm3172_vm14 = vcmask 982912   ;;  %vm3179_vm15 = vcmask 1048512  }
 0x120   : > { %10725 = vmatpush3.bf16.msra.mxu0 %v11519_v4  ;;  %10747 = vmatpush3.bf16.msra.mxu1 %v11528_v10  ;;  %18900 = vst [vmem:[#allocation28_spill] sm:$0xff] %v12851_v16  ;;  %v10501_v10 = vld [vmem:[#allocation7 + $0x28] sm:$0xff]  }
 0x121   : > { %10726 = vmatprep.subr.bf16.mxu0 %v18339_v3  ;;  %10748 = vmatprep.subr.bf16.mxu1 %v11529_v11  ;;  %v10263_v15 = vunpack.c.l.bf16 %v10501_v10 }
 0x124   : > { %10727 = vmatpush3.bf16.msra.mxu0 %v11520_v5  ;;  %10749 = vmatpush3.bf16.msra.mxu1 %v11529_v11  ;;  %s18221_s23 = scalar_lea.hbm %s20258_s4, %s18859_s29 }
 0x125   : > { %10728 = vmatprep.subr.bf16.mxu0 %v18339_v3  ;;  %10750 = vmatprep.subr.bf16.mxu1 %v11530_v17 }
 0x128   : > { %10729 = vmatpush3.bf16.msra.mxu0 %v11521_v6  ;;  %10751 = vmatpush3.bf16.msra.mxu1 %v11530_v17 }
 0x129   : > { %10730 = vmatprep.subr.bf16.mxu0 %v18339_v3  ;;  %10752 = vmatprep.subr.bf16.mxu1 %v11531_v18 }
 0x12c   : > { %10731 = vmatpush3.bf16.msra.mxu0 %v11522_v9  ;;  %10753 = vmatpush3.bf16.msra.mxu1 %v11531_v18 }
 0x12d   : > { %10732 = vmatprep.subr.bf16.mxu0 %v18339_v3  ;;  %10754 = vmatprep.subr.bf16.mxu1 %v11532_v19 }
 0x130   : > { %10733 = vmatpush3.bf16.msra.mxu0 %v11523_v12  ;;  %10755 = vmatpush3.bf16.msra.mxu1 %v11532_v19  ;;  %v10264_v19 = vunpack.c.h.bf16 %v10501_v10  ;;  %v10508_v10 = vld [vmem:[#allocation7 + $0x60] sm:$0xff]  }
 0x131   : > { %10734 = vmatprep.subr.bf16.mxu0 %v18339_v3  ;;  %10756 = vmatprep.subr.bf16.mxu1 %v11533_v20 }
 0x134   : > { %10735 = vmatpush3.bf16.msra.mxu0 %v11524_v13  ;;  %10757 = vmatpush3.bf16.msra.mxu1 %v11533_v20 }
 0x135   : > { %10736 = vmatprep.subr.bf16.mxu0 %v18339_v3  ;;  %11046 = vmatprep.subr.bf16.mxu1 %v18339_v3 }
 0x138   : > { %10737 = vmatpush3.bf16.msra.mxu0 %v11525_v14  ;;  %v10502_v14 = vld [vmem:[#allocation7 + $0x30] sm:$0xff]  }
 0x139   : > { %10886 = vmatprep.subr.bf16.mxu0 %v18339_v3  ;;  %v10267_v20 = vunpack.c.l.bf16 %v10502_v14 }
 0x13b   : > { %10739 = vmatmul.mubr.bf16.vlgmr.msra.gmra.mrb[0].mxu0 %v12851_v16 }
 0x13c   : > { %10902 = vmatprep.mubr.msk.bf16.mxu0 %vm18476_vm0, %v18339_v3 }
 0x20e   : > { %v808_v28 = vpop.f32.mrb[0].mxu0 }
 0x20f   : > { %v809_v29 = vadd.f32 %v10044_v26, %v808_v28  ;;  %v10740_v30 = vpop.f32.mrb[1].mxu0  ;;  %v10268_v26 = vunpack.c.h.bf16 %v10502_v14 }
 0x210   : > { %v811_v31 = vpop.f32.mrb[2].mxu0 }
 0x211   : > { %v1071_v32 = vcombine.high %v809_v29, %v809_v29  ;;  %v1078_v33 = vrot.slane %v809_v29, %v12865_v27  ;;  %v10741_v34 = vpop.f32.mrb[3].mxu0  ;;  %v10503_v31 = vld [vmem:[#allocation7 + $0x38] sm:$0xff]  }
 0x213   : > { %v1085_v37 = vrot.slane %v1071_v32, %v12865_v27  ;;  %v12873_v38 = vrot.slane %v1078_v33, %v12865_v27  ;;  %v1086_v21 = vcombine.high %v1078_v33, %v1078_v33  ;;  %v10271_v33 = vunpack.c.l.bf16 %v10503_v31 }
 0x215   : > { %v1087_v43 = vcombine.high %v1085_v37, %v1085_v37  ;;  %v12876_v44 = vrot.slane %v1085_v37, %v12865_v27  ;;  %v12880_v45 = vrot.slane %v12873_v38, %v12869_v36  ;;  %v12898_v32 = vrot.slane %v1086_v21, %v12865_v27 }
 0x217   : > { %v12883_v49 = vrot.slane %v1087_v43, %v12865_v27  ;;  %v1160_v52 = vadd.f32 %v10243_v40, %v12880_v45  ;;  %v1161_v53 = vadd.f32 %v10244_v41, %v12880_v45  ;;  %v1162_v59 = vadd.f32 %v10247_v46, %v12880_v45  ;;  %v12905_v40 = vld [vmem:[%s18904_s15] ss:$0 sm:$0xff]  ;;  %s9813_s15 = scalar_lea.sflag [#allocation19], %s12778_s7 }
 0x218   : > { %v1163_v60 = vadd.f32 %v10248_v47, %v12880_v45  ;;  %v1164_v61 = vadd.f32 %v10251_v50, %v12880_v45  ;;  %v1165_v62 = vadd.f32 %v10252_v51, %v12880_v45  ;;  %v1166_v8 = vadd.f32 %v10255_v55, %v12880_v45  ;;  %2356 = vbcast.lane.b32.xlu1 %v12905_v40, 264 }
 0x219   : > { %v1288_v57 = vmax.f32 %v1160_v52, 0.0  ;;  %v1289_v58 = vmax.f32 %v1161_v53, 0.0  ;;  %v1290_v2 = vmax.f32 %v1162_v59, 0.0  ;;  %v1167_v9 = vadd.f32 %v10256_v56, %v12880_v45  ;;  %2352 = vbcast.lane.b32.xlu0 %v12905_v40, 256 }
 0x21a   : > { %v1291_v4 = vmax.f32 %v1163_v60, 0.0  ;;  %v1292_v5 = vmax.f32 %v1164_v61, 0.0  ;;  %v1293_v6 = vmax.f32 %v1165_v62, 0.0  ;;  %v1168_v12 = vadd.f32 %v10259_v63, %v12880_v45 }
 0x21b   : > { %v1416_v1 = vpack.c.bf16 %v1289_v58, %v1288_v57  ;;  %v1169_v13 = vadd.f32 %v10260_v0, %v12880_v45  ;;  %v1294_v17 = vmax.f32 %v1166_v8, 0.0  ;;  %v1295_v18 = vmax.f32 %v1167_v9, 0.0  ;;  %v10505_v57 = vld [vmem:[#allocation7 + $0x48] sm:$0xff]   ;;  %v10506_v58 = vld [vmem:[#allocation7 + $0x50] sm:$0xff]   ;;  %v10507_v9 = vld [vmem:[#allocation7 + $0x58] sm:$0xff]  }
 0x21c   : > { %v1417_v7 = vpack.c.bf16 %v1291_v4, %v1290_v2  ;;  %v1418_v11 = vpack.c.bf16 %v1293_v6, %v1292_v5  ;;  %v1296_v22 = vmax.f32 %v1168_v12, 0.0  ;;  %v1170_v29 = vadd.f32 %v10263_v15, %v12880_v45  ;;  %2360 = vbcast.lane.b32.xlu1 %v12905_v40, 272 }
 0x21d   : > { %10758 = vmatprep.mubr.bf16.mxu1 %v1416_v1  ;;  %v1297_v24 = vmax.f32 %v1169_v13, 0.0  ;;  %v1419_v28 = vpack.c.bf16 %v1295_v18, %v1294_v17  ;;  %v1171_v30 = vadd.f32 %v10264_v19, %v12880_v45  ;;  %v1172_v35 = vadd.f32 %v10267_v20, %v12880_v45  ;;  %2368 = vbcast.lane.b32.xlu0 %v12905_v40, 288 }
 0x21e   : > { %10759 = vmatmul.mubr.bf16.vlgmr.msra.gmra.mrb[0].mxu1 %v1417_v7  ;;  %v1173_v37 = vadd.f32 %v10268_v26, %v12880_v45  ;;  %v1298_v41 = vmax.f32 %v1170_v29, 0.0  ;;  %v10272_v43 = vunpack.c.h.bf16 %v10503_v31  ;;  %v10275_v46 = vunpack.c.l.bf16 %v10504_v39  ;;  %v10509_v29 = vld [vmem:[#allocation7 + $0x68] sm:$0xff]  }
 0x21f   : > { %10762 = vmatprep.mubr.bf16.mxu1 %v1418_v11  ;;  %v1420_v34 = vpack.c.bf16 %v1297_v24, %v1296_v22  ;;  %v1299_v42 = vmax.f32 %v1171_v30, 0.0  ;;  %v12911_v27 = vrot.slane %v12898_v32, %v12869_v36  ;;  %v1300_v47 = vmax.f32 %v1172_v35, 0.0  ;;  %v10510_v30 = vld [vmem:[#allocation7 + $0x70] sm:$0xff]  }
 0x220   : > { %v1301_v48 = vmax.f32 %v1173_v37, 0.0  ;;  %v10276_v50 = vunpack.c.h.bf16 %v10504_v39  ;;  %v1174_v52 = vadd.f32 %v10271_v33, %v12880_v45  ;;  %v1175_v53 = vadd.f32 %v10272_v43, %v12880_v45  ;;  %2364 = vbcast.lane.b32.xlu1 %v12905_v40, 280 }
 0x221   : > { %v1421_v51 = vpack.c.bf16 %v1299_v42, %v1298_v41  ;;  %v1176_v55 = vadd.f32 %v10275_v46, %v12911_v27  ;;  %v10279_v61 = vunpack.c.l.bf16 %v10505_v57  ;;  %v10280_v62 = vunpack.c.h.bf16 %v10505_v57  ;;  %2376 = vbcast.lane.b32.xlu0 %v12905_v40, 304 }
 0x222   : > { %v1422_v54 = vpack.c.bf16 %v1301_v48, %v1300_v47  ;;  %v1177_v56 = vadd.f32 %v10276_v50, %v12911_v27  ;;  %v1302_v59 = vmax.f32 %v1174_v52, 0.0  ;;  %v1303_v60 = vmax.f32 %v1175_v53, 0.0  ;;  %v10511_v48 = vld [vmem:[#allocation7 + $0x78] sm:$0xff]  }
 0x223   : > { %v1304_v45 = vmax.f32 %v1176_v55, 0.0  ;;  %v10283_v0 = vunpack.c.l.bf16 %v10506_v58  ;;  %v10284_v1 = vunpack.c.h.bf16 %v10506_v58  ;;  %v1178_v4 = vadd.f32 %v10279_v61, %v12911_v27 }
 0x224   : > { %v1305_v63 = vmax.f32 %v1177_v56, 0.0  ;;  %v1423_v2 = vpack.c.bf16 %v1303_v60, %v1302_v59  ;;  %v1179_v5 = vadd.f32 %v10280_v62, %v12911_v27  ;;  %2372 = vbcast.lane.b32.xlu1 %v12905_v40, 296  ;;  %v10287_v13 = vunpack.c.l.bf16 %v10507_v9 }
 0x225   : > { %2384 = vbcast.lane.b32.xlu0 %v12905_v40, 320  ;;  %v1180_v7 = vadd.f32 %v10283_v0, %v12911_v27  ;;  %v1181_v8 = vadd.f32 %v10284_v1, %v12911_v27  ;;  %v1306_v11 = vmax.f32 %v1178_v4, 0.0  ;;  %v10288_v14 = vunpack.c.h.bf16 %v10507_v9 }
 0x226   : > { %10763 = vmatmul.mubr.bf16.gmra.mrb[4].mxu1 %v1419_v28  ;;  %v1424_v6 = vpack.c.bf16 %v1305_v63, %v1304_v45  ;;  %v1307_v12 = vmax.f32 %v1179_v5, 0.0  ;;  %v10291_v18 = vunpack.c.l.bf16 %v10508_v10  ;;  %v10292_v19 = vunpack.c.h.bf16 %v10508_v10  ;;  %v10513_v5 = vld [vmem:[#allocation7 + $0x88] sm:$0xff]  }
 0x227   : > { %10766 = vmatprep.mubr.bf16.mxu1 %v1420_v34  ;;  %v1308_v15 = vmax.f32 %v1180_v7, 0.0  ;;  %v1309_v17 = vmax.f32 %v1181_v8, 0.0  ;;  %v1182_v21 = vadd.f32 %v10287_v13, %v12911_v27  ;;  %v1183_v22 = vadd.f32 %v10288_v14, %v12911_v27 }
 0x228   : > { %2380 = vbcast.lane.b32.xlu1 %v12905_v40, 312  ;;  %v1425_v20 = vpack.c.bf16 %v1307_v12, %v1306_v11  ;;  %v1184_v26 = vadd.f32 %v10291_v18, %v12911_v27  ;;  %v1185_v28 = vadd.f32 %v10292_v19, %v12911_v27  ;;  %v10295_v35 = vunpack.c.l.bf16 %v10509_v29 }
 0x229   : > { %2392 = vbcast.lane.b32.xlu0 %v12905_v40, 336  ;;  %v1426_v24 = vpack.c.bf16 %v1309_v17, %v1308_v15  ;;  %v1310_v31 = vmax.f32 %v1182_v21, 0.0  ;;  %v1311_v34 = vmax.f32 %v1183_v22, 0.0  ;;  %v10296_v37 = vunpack.c.h.bf16 %v10509_v29  ;;  %v10516_v21 = vld [vmem:[#allocation7 + $0xa0] sm:$0xff]  }
 0x22a   : > { %v1312_v39 = vmax.f32 %v1184_v26, 0.0  ;;  %v1313_v33 = vmax.f32 %v1185_v28, 0.0  ;;  %v10299_v41 = vunpack.c.l.bf16 %v10510_v30  ;;  %v10300_v42 = vunpack.c.h.bf16 %v10510_v30 }
 0x22b   : > { %v1427_v43 = vpack.c.bf16 %v1311_v34, %v1310_v31  ;;  %v1186_v46 = vadd.f32 %v10295_v35, %v12911_v27  ;;  %v1187_v47 = vadd.f32 %v10296_v37, %v12911_v27  ;;  %v1116_v50 = vcombine.high %v12873_v38, %v12873_v38 }
 0x22c   : > { %2388 = vbcast.lane.b32.xlu1 %v12905_v40, 328  ;;  %v1188_v52 = vadd.f32 %v10299_v41, %v12911_v27  ;;  %v1189_v53 = vadd.f32 %v10300_v42, %v12911_v27  ;;  %v10303_v55 = vunpack.c.l.bf16 %v10511_v48  ;;  %v10304_v58 = vunpack.c.h.bf16 %v10511_v48 }
 0x22d   : > { %2400 = vbcast.lane.b32.xlu0 %v12905_v40, 352  ;;  %v1314_v56 = vmax.f32 %v1186_v46, 0.0  ;;  %v1315_v57 = vmax.f32 %v1187_v47, 0.0  ;;  %v12946_v60 = vrot.slane %v1116_v50, %v12869_v36  ;;  %v10311_v8 = vunpack.c.l.bf16 %v10513_v5  ;;  %v10518_v46 = vld [vmem:[#allocation7 + $0xb0] sm:$0xff]  }
 0x22e   : > { %10767 = vmatmul.mubr.bf16.gmra.mrb[8].mxu1 %v1421_v51  ;;  %v1428_v51 = vpack.c.bf16 %v1313_v33, %v1312_v39  ;;  %v1316_v61 = vmax.f32 %v1188_v52, 0.0  ;;  %v1317_v38 = vmax.f32 %v1189_v53, 0.0  ;;  %v1190_v63 = vadd.f32 %v10303_v55, %v12911_v27 }
 0x22f   : > { %10770 = vmatprep.mubr.bf16.mxu1 %v1422_v54  ;;  %v10512_v54 = vld [vmem:[#allocation7 + $0x80] sm:$0xff]   ;;  %v1429_v45 = vpack.c.bf16 %v1315_v57, %v1314_v56  ;;  %v1191_v0 = vadd.f32 %v10304_v58, %v12911_v27  ;;  %v10312_v9 = vunpack.c.h.bf16 %v10513_v5  ;;  %v1194_v27 = vadd.f32 %v10311_v8, %v12946_v60 }
 0x230   : > { %2396 = vbcast.lane.b32.xlu1 %v12905_v40, 344  ;;  %v10307_v59 = vunpack.c.l.bf16 %v10512_v54  ;;  %v10308_v62 = vunpack.c.h.bf16 %v10512_v54  ;;  %v1430_v1 = vpack.c.bf16 %v1317_v38, %v1316_v61  ;;  %v10323_v31 = vunpack.c.l.bf16 %v10516_v21 }
 0x231   : > { %2408 = vbcast.lane.b32.xlu0 %v12905_v40, 368  ;;  %v1319_v7 = vmax.f32 %v1191_v0, 0.0  ;;  %v1195_v15 = vadd.f32 %v10312_v9, %v12946_v60  ;;  %v1322_v22 = vmax.f32 %v1194_v27, 0.0  ;;  %v10324_v34 = vunpack.c.h.bf16 %v10516_v21  ;;  %v10522_v27 = vld [vmem:[#allocation7 + $0xd0] sm:$0xff]  }
 0x232   : > { %v1193_v4 = vadd.f32 %v10308_v62, %v12946_v60  ;;  %v1200_v41 = vadd.f32 %v10323_v31, %v12946_v60  ;;  %v10331_v54 = vunpack.c.l.bf16 %v10518_v46  ;;  %v10332_v55 = vunpack.c.h.bf16 %v10518_v46 }
 0x233   : > { %v1201_v42 = vadd.f32 %v10324_v34, %v12946_v60  ;;  %v1118_v61 = vcombine.high %v12898_v32, %v12898_v32  ;;  %v10523_v34 = vld [vmem:[#allocation7 + $0xd8] sm:$0xff]  }
 0x234   : > { %2404 = vbcast.lane.b32.xlu1 %v12905_v40, 360  ;;  %v1321_v11 = vmax.f32 %v1193_v4, 0.0  ;;  %v1328_v52 = vmax.f32 %v1200_v41, 0.0  ;;  %v1204_v62 = vadd.f32 %v10331_v54, %v12946_v60  ;;  %v10352_v41 = vunpack.c.h.bf16 %v10523_v34 }
 0x235   : > { %v1329_v53 = vmax.f32 %v1201_v42, 0.0 }
 0x236   : > { %10771 = vmatmul.mubr.bf16.gmra.mrb[12].mxu1 %v1423_v2  ;;  %v1192_v2 = vadd.f32 %v10307_v59, %v12946_v60  ;;  %v10519_v59 = vld [vmem:[#allocation7 + $0xb8] sm:$0xff]  }
 0x237   : > { %10774 = vmatprep.mubr.bf16.mxu1 %v1424_v6  ;;  %v10514_v6 = vld [vmem:[#allocation7 + $0x90] sm:$0xff]   ;;  %v1436_v38 = vpack.c.bf16 %v1329_v53, %v1328_v52  ;;  %v10335_v0 = vunpack.c.l.bf16 %v10519_v59  ;;  %v10336_v4 = vunpack.c.h.bf16 %v10519_v59 }
 0x238   : > { %2412 = vbcast.lane.b32.xlu1 %v12905_v40, 376  ;;  %v1318_v40 = vmax.f32 %v1190_v63, 0.0  ;;  %v1320_v10 = vmax.f32 %v1192_v2, 0.0  ;;  %v10315_v12 = vunpack.c.l.bf16 %v10514_v6  ;;  %v10316_v13 = vunpack.c.h.bf16 %v10514_v6  ;;  %v10520_v63 = vld [vmem:[#allocation7 + $0xc0] sm:$0xff]  }
 0x239   : > { %v10339_v5 = vunpack.c.l.bf16 %v10520_v63  ;;  %v12967_v6 = vrot.slane %v1118_v61, %v12869_v36  ;;  %v10340_v8 = vunpack.c.h.bf16 %v10520_v63  ;;  %v1206_v9 = vadd.f32 %v10335_v0, %v12946_v60 }
 0x23a   : > { %v1431_v14 = vpack.c.bf16 %v1319_v7, %v1318_v40  ;;  %v1432_v17 = vpack.c.bf16 %v1321_v11, %v1320_v10  ;;  %v1196_v18 = vadd.f32 %v10315_v12, %v12946_v60  ;;  %v1197_v19 = vadd.f32 %v10316_v13, %v12946_v60 }
 0x23b   : > { %v1332_v40 = vmax.f32 %v1204_v62, 0.0  ;;  %v1207_v10 = vadd.f32 %v10336_v4, %v12946_v60  ;;  %v1208_v12 = vadd.f32 %v10339_v5, %v12967_v6  ;;  %v1209_v13 = vadd.f32 %v10340_v8, %v12967_v6  ;;  %v10528_v4 = vld [vmem:[#allocation7 + $0x100] sm:$0xff]   ;;  %v10527_v8 = vld [vmem:[#allocation7 + $0xf8] sm:$0xff]  }
 0x23c   : > { %v1324_v29 = vmax.f32 %v1196_v18, 0.0  ;;  %v1325_v30 = vmax.f32 %v1197_v19, 0.0 }
 0x23d   : > { %v1337_v21 = vmax.f32 %v1209_v13, 0.0  ;;  %v12987_v13 = vrot.slane %v12876_v44, %v12869_v36 }
 0x23e   : > { %10775 = vmatmul.mubr.bf16.gmra.mrb[16].mxu1 %v1425_v20  ;;  %v10515_v20 = vld [vmem:[#allocation7 + $0x98] sm:$0xff]   ;;  %v1434_v33 = vpack.c.bf16 %v1325_v30, %v1324_v29 }
 0x23f   : > { %10778 = vmatprep.mubr.bf16.mxu1 %v1426_v24  ;;  %v1323_v24 = vmax.f32 %v1195_v15, 0.0  ;;  %v10319_v26 = vunpack.c.l.bf16 %v10515_v20  ;;  %v10320_v28 = vunpack.c.h.bf16 %v10515_v20  ;;  %v1334_v15 = vmax.f32 %v1206_v9, 0.0 }
 0x240   : > { %v1336_v20 = vmax.f32 %v1208_v12, 0.0  ;;  %v10368_v12 = vunpack.c.h.bf16 %v10527_v8 }
 0x241   : > { %v1433_v35 = vpack.c.bf16 %v1323_v24, %v1322_v22  ;;  %v1198_v37 = vadd.f32 %v10319_v26, %v12946_v60  ;;  %v1199_v39 = vadd.f32 %v10320_v28, %v12946_v60  ;;  %v10347_v22 = vunpack.c.l.bf16 %v10522_v27 }
 0x242   : > { %v10348_v24 = vunpack.c.h.bf16 %v10522_v27  ;;  %v1440_v29 = vpack.c.bf16 %v1337_v21, %v1336_v20 }
 0x243   : > { %v1326_v47 = vmax.f32 %v1198_v37, 0.0  ;;  %v1327_v48 = vmax.f32 %v1199_v39, 0.0  ;;  %v1212_v30 = vadd.f32 %v10347_v22, %v12967_v6 }
 0x244   : > { %v1213_v31 = vadd.f32 %v10348_v24, %v12967_v6  ;;  %v10529_v24 = vld [vmem:[#allocation7 + $0x108] sm:$0xff]  }
 0x245   : > { %v1435_v56 = vpack.c.bf16 %v1327_v48, %v1326_v47  ;;  %v1340_v42 = vmax.f32 %v1212_v30, 0.0  ;;  %v10376_v30 = vunpack.c.h.bf16 %v10529_v24 }
 0x246   : > { %10779 = vmatmul.mubr.bf16.gmra.mrb[20].mxu1 %v1427_v43  ;;  %v10517_v43 = vld [vmem:[#allocation7 + $0xa8] sm:$0xff]  }
 0x247   : > { %10782 = vmatprep.mubr.bf16.mxu1 %v1428_v51  ;;  %v10327_v50 = vunpack.c.l.bf16 %v10517_v43  ;;  %v10328_v51 = vunpack.c.h.bf16 %v10517_v43  ;;  %v1341_v43 = vmax.f32 %v1213_v31, 0.0 }
 0x249   : > { %v1202_v57 = vadd.f32 %v10327_v50, %v12946_v60  ;;  %v1203_v58 = vadd.f32 %v10328_v51, %v12946_v60  ;;  %v1215_v51 = vadd.f32 %v10352_v41, %v12967_v6  ;;  %v1442_v52 = vpack.c.bf16 %v1341_v43, %v1340_v42 }
 0x24b   : > { %v1331_v2 = vmax.f32 %v1203_v58, 0.0  ;;  %v1343_v58 = vmax.f32 %v1215_v51, 0.0 }
 0x24e   : > { %10783 = vmatmul.mubr.bf16.gmra.mrb[24].mxu1 %v1429_v45  ;;  %v1205_v45 = vadd.f32 %v10332_v55, %v12946_v60  ;;  %v10525_v55 = vld [vmem:[#allocation7 + $0xe8] sm:$0xff]  }
 0x24f   : > { %10786 = vmatprep.mubr.bf16.mxu1 %v1430_v1  ;;  %v1330_v1 = vmax.f32 %v1202_v57, 0.0  ;;  %v10359_v59 = vunpack.c.l.bf16 %v10525_v55  ;;  %v10360_v61 = vunpack.c.h.bf16 %v10525_v55 }
 0x250   : > { %v1333_v7 = vmax.f32 %v1205_v45, 0.0 }
 0x251   : > { %v1437_v32 = vpack.c.bf16 %v1331_v2, %v1330_v1  ;;  %v1218_v1 = vadd.f32 %v10359_v59, %v12967_v6  ;;  %v1219_v2 = vadd.f32 %v10360_v61, %v12967_v6 }
 0x252   : > { %v1438_v11 = vpack.c.bf16 %v1333_v7, %v1332_v40 }
 0x253   : > { %v1346_v9 = vmax.f32 %v1218_v1, 0.0 }
 0x256   : > { %10787 = vmatmul.mubr.bf16.gmra.mrb[28].mxu1 %v1431_v14  ;;  %v10521_v14 = vld [vmem:[#allocation7 + $0xc8] sm:$0xff]  }
 0x257   : > { %10790 = vmatprep.mubr.bf16.mxu1 %v1432_v17  ;;  %v1335_v17 = vmax.f32 %v1207_v10, 0.0  ;;  %v10343_v18 = vunpack.c.l.bf16 %v10521_v14  ;;  %v10344_v19 = vunpack.c.h.bf16 %v10521_v14  ;;  %v1347_v10 = vmax.f32 %v1219_v2, 0.0 }
 0x259   : > { %v1439_v26 = vpack.c.bf16 %v1335_v17, %v1334_v15  ;;  %v1210_v60 = vadd.f32 %v10343_v18, %v12967_v6  ;;  %v1211_v28 = vadd.f32 %v10344_v19, %v12967_v6  ;;  %v10372_v15 = vunpack.c.h.bf16 %v10528_v4 }
 0x25a   : > { %v1445_v17 = vpack.c.bf16 %v1347_v10, %v1346_v9  ;;  %v1223_v19 = vadd.f32 %v10368_v12, %v12967_v6 }
 0x25b   : > { %v1338_v37 = vmax.f32 %v1210_v60, 0.0  ;;  %v1339_v39 = vmax.f32 %v1211_v28, 0.0  ;;  %v1225_v22 = vadd.f32 %v10372_v15, %v12987_v13  ;;  %v10536_v15 = vld [vmem:[#allocation7 + $0x140] sm:$0xff]  }
 0x25c   : > { %v1351_v28 = vmax.f32 %v1223_v19, 0.0 }
 0x25d   : > { %v1441_v48 = vpack.c.bf16 %v1339_v39, %v1338_v37 }
 0x25e   : > { %10791 = vmatmul.mubr.bf16.gmra.mrb[32].mxu1 %v1433_v35  ;;  %v10524_v35 = vld [vmem:[#allocation7 + $0xe0] sm:$0xff]  }
 0x25f   : > { %10794 = vmatprep.mubr.bf16.mxu1 %v1434_v33  ;;  %v10351_v33 = vunpack.c.l.bf16 %v10523_v34  ;;  %v10355_v46 = vunpack.c.l.bf16 %v10524_v35  ;;  %v10356_v47 = vunpack.c.h.bf16 %v10524_v35  ;;  %v1353_v34 = vmax.f32 %v1225_v22, 0.0 }
 0x260   : > { %v13007_v22 = vrot.slane %v12883_v49, %v12869_v36 }
 0x261   : > { %v1214_v50 = vadd.f32 %v10351_v33, %v12967_v6  ;;  %v1216_v53 = vadd.f32 %v10355_v46, %v12967_v6  ;;  %v1217_v54 = vadd.f32 %v10356_v47, %v12967_v6  ;;  %v1227_v33 = vadd.f32 %v10376_v30, %v12987_v13  ;;  %v10531_v46 = vld [vmem:[#allocation7 + $0x118] sm:$0xff]   ;;  %v10532_v47 = vld [vmem:[#allocation7 + $0x120] sm:$0xff]  }
 0x262   : > { %v10383_v51 = vunpack.c.l.bf16 %v10531_v46  ;;  %v10387_v55 = vunpack.c.l.bf16 %v10532_v47 }
 0x263   : > { %v1342_v57 = vmax.f32 %v1214_v50, 0.0  ;;  %v1345_v62 = vmax.f32 %v1217_v54, 0.0  ;;  %v1355_v50 = vmax.f32 %v1227_v33, 0.0 }
 0x265   : > { %v1443_v0 = vpack.c.bf16 %v1343_v58, %v1342_v57  ;;  %v1230_v58 = vadd.f32 %v10383_v51, %v12987_v13 }
 0x266   : > { %10795 = vmatmul.mubr.bf16.gmra.mrb[36].mxu1 %v1435_v56  ;;  %v10526_v56 = vld [vmem:[#allocation7 + $0xf0] sm:$0xff]  }
 0x267   : > { %10798 = vmatprep.mubr.bf16.mxu1 %v1436_v38  ;;  %v1344_v38 = vmax.f32 %v1216_v53, 0.0  ;;  %v10363_v45 = vunpack.c.l.bf16 %v10526_v56  ;;  %v10364_v63 = vunpack.c.h.bf16 %v10526_v56  ;;  %v10388_v56 = vunpack.c.h.bf16 %v10532_v47 }
 0x269   : > { %v1444_v5 = vpack.c.bf16 %v1345_v62, %v1344_v38  ;;  %v1220_v40 = vadd.f32 %v10363_v45, %v12967_v6  ;;  %v1221_v7 = vadd.f32 %v10364_v63, %v12967_v6  ;;  %v1232_v38 = vadd.f32 %v10387_v55, %v12987_v13  ;;  %v10533_v45 = vld [vmem:[#allocation7 + $0x128] sm:$0xff]   ;;  %v10534_v63 = vld [vmem:[#allocation7 + $0x130] sm:$0xff]   ;;  %v10539_v55 = vld [vmem:[#allocation7 + $0x158] sm:$0xff]  }
 0x26a   : > { %v1233_v62 = vadd.f32 %v10388_v56, %v12987_v13  ;;  %v10391_v2 = vunpack.c.l.bf16 %v10533_v45  ;;  %v10540_v56 = vld [vmem:[#allocation7 + $0x160] sm:$0xff]  }
 0x26b   : > { %v1348_v14 = vmax.f32 %v1220_v40, 0.0  ;;  %v1349_v27 = vmax.f32 %v1221_v7, 0.0  ;;  %v10395_v7 = vunpack.c.l.bf16 %v10534_v63 }
 0x26c   : > { %v1361_v40 = vmax.f32 %v1233_v62, 0.0  ;;  %v1234_v9 = vadd.f32 %v10391_v2, %v12987_v13 }
 0x26d   : > { %v1446_v20 = vpack.c.bf16 %v1349_v27, %v1348_v14  ;;  %v1236_v14 = vadd.f32 %v10395_v7, %v12987_v13  ;;  %v10541_v7 = vld [vmem:[#allocation7 + $0x168] sm:$0xff]  }
 0x26e   : > { %10799 = vmatmul.mubr.bf16.gmra.mrb[40].mxu1 %v1437_v32  ;;  %v10371_v32 = vunpack.c.l.bf16 %v10528_v4  ;;  %v10392_v4 = vunpack.c.h.bf16 %v10533_v45  ;;  %v10419_v45 = vunpack.c.l.bf16 %v10540_v56 }
 0x26f   : > { %10802 = vmatprep.mubr.bf16.mxu1 %v1438_v11  ;;  %v10367_v11 = vunpack.c.l.bf16 %v10527_v8  ;;  %v10396_v8 = vunpack.c.h.bf16 %v10534_v63  ;;  %v10420_v63 = vunpack.c.h.bf16 %v10540_v56 }
 0x270   : > { %v1224_v21 = vadd.f32 %v10371_v32, %v12987_v13  ;;  %v1235_v10 = vadd.f32 %v10392_v4, %v12987_v13 }
 0x271   : > { %v1222_v18 = vadd.f32 %v10367_v11, %v12967_v6  ;;  %v10535_v11 = vld [vmem:[#allocation7 + $0x138] sm:$0xff]   ;;  %v1237_v27 = vadd.f32 %v10396_v8, %v12987_v13  ;;  %v10542_v8 = vld [vmem:[#allocation7 + $0x170] sm:$0xff]  }
 0x272   : > { %v1352_v31 = vmax.f32 %v1224_v21, 0.0  ;;  %v1363_v19 = vmax.f32 %v1235_v10, 0.0  ;;  %v10403_v21 = vunpack.c.l.bf16 %v10536_v15  ;;  %v10423_v10 = vunpack.c.l.bf16 %v10541_v7 }
 0x273   : > { %v1350_v60 = vmax.f32 %v1222_v18, 0.0  ;;  %v1362_v18 = vmax.f32 %v1234_v9, 0.0 }
 0x274   : > { %v1448_v41 = vpack.c.bf16 %v1353_v34, %v1352_v31  ;;  %v1240_v34 = vadd.f32 %v10403_v21, %v13007_v22  ;;  %v1117_v21 = vcombine.high %v12876_v44, %v12876_v44 }
 0x275   : > { %v1447_v39 = vpack.c.bf16 %v1351_v28, %v1350_v60  ;;  %v10404_v60 = vunpack.c.h.bf16 %v10536_v15  ;;  %v1453_v28 = vpack.c.bf16 %v1363_v19, %v1362_v18  ;;  %v10428_v15 = vunpack.c.h.bf16 %v10542_v8 }
 0x276   : > { %10803 = vmatmul.mubr.bf16.gmra.mrb[44].mxu1 %v1439_v26  ;;  %v10530_v26 = vld [vmem:[#allocation7 + $0x110] sm:$0xff]   ;;  %v1250_v18 = vadd.f32 %v10423_v10, %v13007_v22 }
 0x277   : > { %10806 = vmatprep.mubr.bf16.mxu1 %v1440_v29  ;;  %v10375_v29 = vunpack.c.l.bf16 %v10529_v24  ;;  %v10379_v35 = vunpack.c.l.bf16 %v10530_v26  ;;  %v10380_v37 = vunpack.c.h.bf16 %v10530_v26  ;;  %v1364_v24 = vmax.f32 %v1236_v14, 0.0 }
 0x278   : > { %v1365_v26 = vmax.f32 %v1237_v27, 0.0  ;;  %v10427_v27 = vunpack.c.l.bf16 %v10542_v8 }
 0x279   : > { %v1226_v6 = vadd.f32 %v10375_v29, %v12987_v13  ;;  %v1228_v42 = vadd.f32 %v10379_v35, %v12987_v13  ;;  %v1229_v43 = vadd.f32 %v10380_v37, %v12987_v13  ;;  %v1241_v35 = vadd.f32 %v10404_v60, %v13007_v22  ;;  %v10537_v37 = vld [vmem:[#allocation7 + $0x148] sm:$0xff]  }
 0x27a   : > { %v1454_v31 = vpack.c.bf16 %v1365_v26, %v1364_v24  ;;  %v1252_v26 = vadd.f32 %v10427_v27, %v13007_v22  ;;  %v1253_v60 = vadd.f32 %v10428_v15, %v13007_v22  ;;  %v10549_v27 = vld [vmem:[#allocation7 + $0x1a8] sm:$0xff]   ;;  %v10550_v15 = vld [vmem:[#allocation7 + $0x1b0] sm:$0xff]  }
 0x27b   : > { %v1356_v53 = vmax.f32 %v1228_v42, 0.0  ;;  %v1357_v54 = vmax.f32 %v1229_v43, 0.0  ;;  %v10408_v42 = vunpack.c.h.bf16 %v10537_v37  ;;  %v1368_v43 = vmax.f32 %v1240_v34, 0.0 }
 0x27d   : > { %v1450_v61 = vpack.c.bf16 %v1357_v54, %v1356_v53  ;;  %v1243_v51 = vadd.f32 %v10408_v42, %v13007_v22 }
 0x27e   : > { %10807 = vmatmul.mubr.bf16.gmra.mrb[48].mxu1 %v1441_v48  ;;  %v1354_v48 = vmax.f32 %v1226_v6, 0.0 }
 0x27f   : > { %10810 = vmatprep.mubr.bf16.mxu1 %v1442_v52  ;;  %v10384_v52 = vunpack.c.h.bf16 %v10531_v46  ;;  %v1369_v46 = vmax.f32 %v1241_v35, 0.0 }
 0x280   : > { %v1449_v57 = vpack.c.bf16 %v1355_v50, %v1354_v48 }
 0x281   : > { %v1231_v59 = vadd.f32 %v10384_v52, %v12987_v13  ;;  %v1456_v52 = vpack.c.bf16 %v1369_v46, %v1368_v43 }
 0x283   : > { %v1359_v1 = vmax.f32 %v1231_v59, 0.0  ;;  %v10415_v59 = vunpack.c.l.bf16 %v10539_v55 }
 0x286   : > { %10811 = vmatmul.mubr.bf16.gmra.mrb[52].mxu1 %v1443_v0  ;;  %v1358_v0 = vmax.f32 %v1230_v58, 0.0  ;;  %v1371_v58 = vmax.f32 %v1243_v51, 0.0 }
 0x287   : > { %10814 = vmatprep.mubr.bf16.mxu1 %v1444_v5  ;;  %v1360_v5 = vmax.f32 %v1232_v38, 0.0 }
 0x288   : > { %v1451_v32 = vpack.c.bf16 %v1359_v1, %v1358_v0  ;;  %v1246_v1 = vadd.f32 %v10415_v59, %v13007_v22 }
 0x289   : > { %v1452_v12 = vpack.c.bf16 %v1361_v40, %v1360_v5  ;;  %v1248_v5 = vadd.f32 %v10419_v45, %v13007_v22  ;;  %v1249_v40 = vadd.f32 %v10420_v63, %v13007_v22  ;;  %v10547_v45 = vld [vmem:[#allocation7 + $0x198] sm:$0xff]   ;;  %v10548_v63 = vld [vmem:[#allocation7 + $0x1a0] sm:$0xff]  }
 0x28a   : > { %v10452_v8 = vunpack.c.h.bf16 %v10548_v63 }
 0x28b   : > { %v1377_v14 = vmax.f32 %v1249_v40, 0.0 }
 0x28e   : > { %10815 = vmatmul.mubr.bf16.gmra.mrb[56].mxu1 %v1445_v17  ;;  %v10399_v17 = vunpack.c.l.bf16 %v10535_v11 }
 0x28f   : > { %10818 = vmatprep.mubr.bf16.mxu1 %v1446_v20  ;;  %v10400_v20 = vunpack.c.h.bf16 %v10535_v11  ;;  %v10424_v11 = vunpack.c.h.bf16 %v10541_v7  ;;  %v10451_v7 = vunpack.c.l.bf16 %v10548_v63 }
 0x290   : > { %v1238_v29 = vadd.f32 %v10399_v17, %v12987_v13 }
 0x291   : > { %v1239_v30 = vadd.f32 %v10400_v20, %v12987_v13  ;;  %v1251_v19 = vadd.f32 %v10424_v11, %v13007_v22  ;;  %v10543_v20 = vld [vmem:[#allocation7 + $0x178] sm:$0xff]  }
 0x292   : > { %v1366_v6 = vmax.f32 %v1238_v29, 0.0  ;;  %v10431_v29 = vunpack.c.l.bf16 %v10543_v20  ;;  %v10432_v34 = vunpack.c.h.bf16 %v10543_v20  ;;  %v10456_v20 = vunpack.c.h.bf16 %v10549_v27 }
 0x293   : > { %v1367_v33 = vmax.f32 %v1239_v30, 0.0  ;;  %v1378_v30 = vmax.f32 %v1250_v18, 0.0 }
 0x294   : > { %v1255_v42 = vadd.f32 %v10432_v34, %v13007_v22  ;;  %v1119_v34 = vcombine.high %v12883_v49, %v12883_v49 }
 0x295   : > { %v1455_v50 = vpack.c.bf16 %v1367_v33, %v1366_v6  ;;  %v1381_v6 = vmax.f32 %v1253_v60, 0.0  ;;  %v10460_v60 = vunpack.c.h.bf16 %v10550_v15 }
 0x296   : > { %10819 = vmatmul.mubr.bf16.gmra.mrb[60].mxu1 %v1447_v39  ;;  %v10538_v39 = vld [vmem:[#allocation7 + $0x150] sm:$0xff]   ;;  %v1383_v51 = vmax.f32 %v1255_v42, 0.0 }
 0x297   : > { %10822 = vmatprep.mubr.bf16.mxu1 %v1448_v41  ;;  %v10407_v41 = vunpack.c.l.bf16 %v10537_v37  ;;  %v10411_v47 = vunpack.c.l.bf16 %v10538_v39  ;;  %v10412_v48 = vunpack.c.h.bf16 %v10538_v39  ;;  %v13028_v37 = vrot.slane %v1117_v21, %v12869_v36 }
 0x298   : > { %v1380_v39 = vmax.f32 %v1252_v26, 0.0  ;;  %v10459_v26 = vunpack.c.l.bf16 %v10550_v15 }
 0x299   : > { %v1242_v13 = vadd.f32 %v10407_v41, %v13007_v22  ;;  %v1244_v53 = vadd.f32 %v10411_v47, %v13007_v22  ;;  %v1245_v54 = vadd.f32 %v10412_v48, %v13007_v22  ;;  %v1254_v41 = vadd.f32 %v10431_v29, %v13007_v22  ;;  %v10545_v48 = vld [vmem:[#allocation7 + $0x188] sm:$0xff]  }
 0x29a   : > { %v1462_v43 = vpack.c.bf16 %v1381_v6, %v1380_v39  ;;  %v1268_v39 = vadd.f32 %v10459_v26, %v13028_v37  ;;  %v1269_v6 = vadd.f32 %v10460_v60, %v13028_v37 }
 0x29b   : > { %v1372_v38 = vmax.f32 %v1244_v53, 0.0  ;;  %v1373_v62 = vmax.f32 %v1245_v54, 0.0  ;;  %v10440_v53 = vunpack.c.h.bf16 %v10545_v48 }
 0x29d   : > { %v1458_v4 = vpack.c.bf16 %v1373_v62, %v1372_v38  ;;  %v1259_v59 = vadd.f32 %v10440_v53, %v13028_v37 }
 0x29e   : > { %10823 = vmatmul.mubr.bf16.gmra.mrb[64].mxu1 %v1449_v57  ;;  %v1370_v57 = vmax.f32 %v1242_v13, 0.0  ;;  %v1382_v13 = vmax.f32 %v1254_v41, 0.0 }
 0x29f   : > { %10826 = vmatprep.mubr.bf16.mxu1 %v1450_v61  ;;  %v10416_v61 = vunpack.c.h.bf16 %v10539_v55 }
 0x2a0   : > { %v1457_v0 = vpack.c.bf16 %v1371_v58, %v1370_v57  ;;  %v1463_v58 = vpack.c.bf16 %v1383_v51, %v1382_v13 }
 0x2a1   : > { %v1247_v2 = vadd.f32 %v10416_v61, %v13007_v22 }
 0x2a3   : > { %v1375_v9 = vmax.f32 %v1247_v2, 0.0  ;;  %v10447_v2 = vunpack.c.l.bf16 %v10547_v45 }
 0x2a6   : > { %10827 = vmatmul.mubr.bf16.gmra.mrb[68].mxu1 %v1451_v32  ;;  %v1374_v32 = vmax.f32 %v1246_v1, 0.0  ;;  %v1387_v1 = vmax.f32 %v1259_v59, 0.0 }
 0x2a7   : > { %10830 = vmatprep.mubr.bf16.mxu1 %v1452_v12  ;;  %v1376_v12 = vmax.f32 %v1248_v5, 0.0 }
 0x2a8   : > { %v1459_v17 = vpack.c.bf16 %v1375_v9, %v1374_v32  ;;  %v1262_v9 = vadd.f32 %v10447_v2, %v13028_v37 }
 0x2a9   : > { %v1460_v24 = vpack.c.bf16 %v1377_v14, %v1376_v12  ;;  %v1264_v12 = vadd.f32 %v10451_v7, %v13028_v37  ;;  %v1265_v14 = vadd.f32 %v10452_v8, %v13028_v37 }
 0x2ab   : > { %v1392_v21 = vmax.f32 %v1264_v12, 0.0 }
 0x2ae   : > { %10831 = vmatmul.mubr.bf16.gmra.mrb[72].mxu1 %v1453_v28  ;;  %v10544_v28 = vld [vmem:[#allocation7 + $0x180] sm:$0xff]  }
 0x2af   : > { %10834 = vmatprep.mubr.bf16.mxu1 %v1454_v31  ;;  %v1379_v31 = vmax.f32 %v1251_v19, 0.0  ;;  %v10435_v35 = vunpack.c.l.bf16 %v10544_v28  ;;  %v10436_v33 = vunpack.c.h.bf16 %v10544_v28  ;;  %v10455_v19 = vunpack.c.l.bf16 %v10549_v27 }
 0x2b1   : > { %v1461_v44 = vpack.c.bf16 %v1379_v31, %v1378_v30  ;;  %v1256_v46 = vadd.f32 %v10435_v35, %v13028_v37  ;;  %v1257_v47 = vadd.f32 %v10436_v33, %v13028_v37  ;;  %v1266_v29 = vadd.f32 %v10455_v19, %v13028_v37  ;;  %v10551_v31 = vld [vmem:[#allocation7 + $0x1b8] sm:$0xff]   ;;  %v10552_v33 = vld [vmem:[#allocation7 + $0x1c0] sm:$0xff]  }
 0x2b2   : > { %v1267_v30 = vadd.f32 %v10456_v20, %v13028_v37  ;;  %v10468_v13 = vunpack.c.h.bf16 %v10552_v33 }
 0x2b3   : > { %v1384_v54 = vmax.f32 %v1256_v46, 0.0  ;;  %v1385_v55 = vmax.f32 %v1257_v47, 0.0  ;;  %v1394_v41 = vmax.f32 %v1266_v29, 0.0  ;;  %v10467_v46 = vunpack.c.l.bf16 %v10552_v33 }
 0x2b4   : > { %v1395_v42 = vmax.f32 %v1267_v30, 0.0  ;;  %v13049_v47 = vrot.slane %v1119_v34, %v12869_v36 }
 0x2b5   : > { %v1464_v61 = vpack.c.bf16 %v1385_v55, %v1384_v54 }
 0x2b6   : > { %10835 = vmatmul.mubr.bf16.gmra.mrb[76].mxu1 %v1455_v50  ;;  %v10546_v50 = vld [vmem:[#allocation7 + $0x190] sm:$0xff]   ;;  %v1469_v49 = vpack.c.bf16 %v1395_v42, %v1394_v41  ;;  %v1272_v54 = vadd.f32 %v10467_v46, %v13049_v47  ;;  %v1273_v55 = vadd.f32 %v10468_v13, %v13049_v47 }
 0x2b7   : > { %10838 = vmatprep.mubr.bf16.mxu1 %v1456_v52  ;;  %v10439_v52 = vunpack.c.l.bf16 %v10545_v48  ;;  %v10443_v56 = vunpack.c.l.bf16 %v10546_v50  ;;  %v10444_v57 = vunpack.c.h.bf16 %v10546_v50  ;;  %v1396_v48 = vmax.f32 %v1268_v39, 0.0  ;;  %v10558_v39 = vld [vmem:[#allocation7 + $0x1f0] sm:$0xff]  }
 0x2b8   : > { %v1397_v50 = vmax.f32 %v1269_v6, 0.0 }
 0x2b9   : > { %v1258_v22 = vadd.f32 %v10439_v52, %v13028_v37  ;;  %v1260_v38 = vadd.f32 %v10443_v56, %v13028_v37  ;;  %v1261_v62 = vadd.f32 %v10444_v57, %v13028_v37  ;;  %v10553_v56 = vld [vmem:[#allocation7 + $0x1c8] sm:$0xff]   ;;  %v10554_v57 = vld [vmem:[#allocation7 + $0x1d0] sm:$0xff]  }
 0x2ba   : > { %v1470_v53 = vpack.c.bf16 %v1397_v50, %v1396_v48  ;;  %v10471_v59 = vunpack.c.l.bf16 %v10553_v56  ;;  %v10475_v63 = vunpack.c.l.bf16 %v10554_v57  ;;  %v10491_v48 = vunpack.c.l.bf16 %v10558_v39 }
 0x2bb   : > { %v1388_v5 = vmax.f32 %v1260_v38, 0.0  ;;  %v1389_v40 = vmax.f32 %v1261_v62, 0.0  ;;  %v1400_v62 = vmax.f32 %v1272_v54, 0.0  ;;  %v10492_v50 = vunpack.c.h.bf16 %v10558_v39 }
 0x2bc   : > { %v1276_v8 = vadd.f32 %v10475_v63, %v13049_v47 }
 0x2bd   : > { %v1466_v11 = vpack.c.bf16 %v1389_v40, %v1388_v5  ;;  %v1274_v5 = vadd.f32 %v10471_v59, %v13049_v47 }
 0x2be   : > { %10839 = vmatmul.mubr.bf16.gmra.mrb[80].mxu1 %v1457_v0  ;;  %v1386_v0 = vmax.f32 %v1258_v22, 0.0 }
 0x2bf   : > { %10842 = vmatprep.mubr.bf16.mxu1 %v1458_v4  ;;  %v10448_v4 = vunpack.c.h.bf16 %v10547_v45  ;;  %v1401_v45 = vmax.f32 %v1273_v55, 0.0 }
 0x2c0   : > { %v1465_v32 = vpack.c.bf16 %v1387_v1, %v1386_v0  ;;  %v10476_v0 = vunpack.c.h.bf16 %v10554_v57  ;;  %v1285_v57 = vadd.f32 %v10492_v50, %v13049_v47 }
 0x2c1   : > { %v1263_v10 = vadd.f32 %v10448_v4, %v13028_v37  ;;  %v1472_v7 = vpack.c.bf16 %v1401_v45, %v1400_v62 }
 0x2c2   : > { %v1413_v63 = vmax.f32 %v1285_v57, 0.0 }
 0x2c3   : > { %v1391_v18 = vmax.f32 %v1263_v10, 0.0  ;;  %v10556_v10 = vld [vmem:[#allocation7 + $0x1e0] sm:$0xff]  }
 0x2c4   : > { %v10483_v19 = vunpack.c.l.bf16 %v10556_v10  ;;  %v10484_v20 = vunpack.c.h.bf16 %v10556_v10 }
 0x2c6   : > { %10843 = vmatmul.mubr.bf16.gmra.mrb[84].mxu1 %v1459_v17  ;;  %v1390_v17 = vmax.f32 %v1262_v9, 0.0  ;;  %v10555_v9 = vld [vmem:[#allocation7 + $0x1d8] sm:$0xff]   ;;  %v1281_v34 = vadd.f32 %v10484_v20, %v13049_v47 }
 0x2c7   : > { %10846 = vmatprep.mubr.bf16.mxu1 %v1460_v24  ;;  %v1393_v24 = vmax.f32 %v1265_v14, 0.0  ;;  %v10479_v14 = vunpack.c.l.bf16 %v10555_v9  ;;  %v10480_v27 = vunpack.c.h.bf16 %v10555_v9 }
 0x2c8   : > { %v1467_v28 = vpack.c.bf16 %v1391_v18, %v1390_v17  ;;  %v1404_v17 = vmax.f32 %v1276_v8, 0.0  ;;  %v1409_v46 = vmax.f32 %v1281_v34, 0.0 }
 0x2c9   : > { %v1468_v35 = vpack.c.bf16 %v1393_v24, %v1392_v21  ;;  %v1279_v29 = vadd.f32 %v10480_v27, %v13049_v47 }
 0x2cb   : > { %v1407_v33 = vmax.f32 %v1279_v29, 0.0 }
 0x2ce   : > { %10847 = vmatmul.mubr.bf16.gmra.mrb[88].mxu1 %v1461_v44  ;;  %v10463_v44 = vunpack.c.l.bf16 %v10551_v31 }
 0x2cf   : > { %10850 = vmatprep.mubr.bf16.mxu1 %v1462_v43  ;;  %v10464_v43 = vunpack.c.h.bf16 %v10551_v31  ;;  %v1280_v31 = vadd.f32 %v10483_v19, %v13049_v47 }
 0x2d0   : > { %v1270_v51 = vadd.f32 %v10463_v44, %v13028_v37 }
 0x2d1   : > { %v1271_v52 = vadd.f32 %v10464_v43, %v13028_v37  ;;  %v1408_v43 = vmax.f32 %v1280_v31, 0.0 }
 0x2d3   : > { %v1399_v22 = vmax.f32 %v1271_v52, 0.0  ;;  %v1476_v55 = vpack.c.bf16 %v1409_v46, %v1408_v43 }
 0x2d6   : > { %10851 = vmatmul.mubr.bf16.gmra.mrb[92].mxu1 %v1463_v58  ;;  %v1398_v58 = vmax.f32 %v1270_v51, 0.0 }
 0x2d7   : > { %10854 = vmatprep.mubr.bf16.mxu1 %v1464_v61  ;;  %v10472_v61 = vunpack.c.h.bf16 %v10553_v56  ;;  %v1284_v56 = vadd.f32 %v10491_v48, %v13049_v47 }
 0x2d8   : > { %v1471_v4 = vpack.c.bf16 %v1399_v22, %v1398_v58  ;;  %v10559_v58 = vld [vmem:[#allocation7 + $0x1f8] sm:$0xff]  }
 0x2d9   : > { %v1275_v40 = vadd.f32 %v10472_v61, %v13049_v47  ;;  %v10495_v61 = vunpack.c.l.bf16 %v10559_v58  ;;  %v1412_v45 = vmax.f32 %v1284_v56, 0.0 }
 0x2db   : > { %v1403_v12 = vmax.f32 %v1275_v40, 0.0  ;;  %v1478_v40 = vpack.c.bf16 %v1413_v63, %v1412_v45 }
 0x2de   : > { %10855 = vmatmul.mubr.bf16.gmra.mrb[96].mxu1 %v1465_v32  ;;  %v1277_v32 = vadd.f32 %v10476_v0, %v13049_v47 }
 0x2df   : > { %10858 = vmatprep.mubr.bf16.mxu1 %v1466_v11  ;;  %v1402_v11 = vmax.f32 %v1274_v5, 0.0 }
 0x2e0   : > { %v1405_v18 = vmax.f32 %v1277_v32, 0.0  ;;  %v18337_v32 = vmov 0  }
 0x2e1   : > { %v1473_v60 = vpack.c.bf16 %v1403_v12, %v1402_v11  ;;  %11197 = vset.pattern.permute.xlu0 %v18337_v32  ;;  %11196 = vset.pattern.permute.xlu1 %v18337_v32 }
 0x2e2   : > { %v1474_v30 = vpack.c.bf16 %v1405_v18, %v1404_v17 }
 0x2e6   : > { %10859 = vmatmul.mubr.bf16.gmra.mrb[100].mxu1 %v1467_v28  ;;  %v1278_v28 = vadd.f32 %v10479_v14, %v13049_v47 }
 0x2e7   : > { %10862 = vmatprep.mubr.bf16.mxu1 %v1468_v35  ;;  %v10557_v35 = vld [vmem:[#allocation7 + $0x1e8] sm:$0xff]  }
 0x2e8   : > { %v1406_v6 = vmax.f32 %v1278_v28, 0.0  ;;  %v10487_v44 = vunpack.c.l.bf16 %v10557_v35  ;;  %v10488_v41 = vunpack.c.h.bf16 %v10557_v35 }
 0x2ea   : > { %v1475_v52 = vpack.c.bf16 %v1407_v33, %v1406_v6  ;;  %v1283_v54 = vadd.f32 %v10488_v41, %v13049_v47 }
 0x2ec   : > { %v1411_v59 = vmax.f32 %v1283_v54, 0.0  ;;  %v13073_v54 = vpop.permute.xlu1 %2356 }
 0x2ee   : > { %10863 = vmatmul.mubr.bf16.gmra.mrb[104].mxu1 %v1469_v49 }
 0x2ef   : > { %10866 = vmatprep.mubr.bf16.mxu1 %v1470_v53  ;;  %v1282_v53 = vadd.f32 %v10487_v44, %v13049_v47 }
 0x2f1   : > { %v10760_v38 = vpop.f32.mrb[0].mxu1  ;;  %v1410_v22 = vmax.f32 %v1282_v53, 0.0 }
 0x2f2   : > { %2093 = vadd.xlane.f32.xlu1 %v10760_v38  ;;  %v1578_v37 = vpop.f32.mrb[1].mxu1  ;;  %v10496_v38 = vunpack.c.h.bf16 %v10559_v58 }
 0x2f3   : > { %2089 = vadd.xlane.f32.xlu0 %v1578_v37  ;;  %v10761_v1 = vpop.f32.mrb[2].mxu1 }
 0x2f4   : > { %v1581_v2 = vpop.f32.mrb[3].mxu1  ;;  %v1287_v5 = vadd.f32 %v10496_v38, %v13049_v47 }
 0x2f6   : > { %2095 = vadd.xlane.f32.xlu1 %v10761_v1  ;;  %10867 = vmatmul.mubr.bf16.gmra.mrb[108].mxu1 %v1471_v4  ;;  %v1286_v4 = vadd.f32 %v10495_v61, %v13049_v47  ;;  %v1415_v8 = vmax.f32 %v1287_v5, 0.0  ;;  %v13083_v5 = vpop.permute.xlu0 %2352 }
 0x2f7   : > { %2091 = vadd.xlane.f32.xlu0 %v1581_v2  ;;  %10870 = vmatprep.mubr.bf16.mxu1 %v1472_v7  ;;  %v1477_v2 = vpack.c.bf16 %v1411_v59, %v1410_v22  ;;  %v13075_v22 = vpop.permute.xlu1 %2360 }
 0x2f8   : > { %v1414_v7 = vmax.f32 %v1286_v4, 0.0 }
 0x2f9   : > { %v10764_v15 = vpop.f32.mrb[4].mxu1 }
 0x2fa   : > { %v1594_v21 = vpop.f32.mrb[5].mxu1  ;;  %v1479_v14 = vpack.c.bf16 %v1415_v8, %v1414_v7 }
 0x2fb   : > { %2101 = vadd.xlane.f32.xlu0 %v10764_v15  ;;  %v10765_v24 = vpop.f32.mrb[6].mxu1  ;;  %v13077_v38 = vpop.permute.xlu1 %2364 }
 0x2fc   : > { %2103 = vadd.xlane.f32.xlu1 %v10765_v24  ;;  %v1597_v26 = vpop.f32.mrb[7].mxu1 }
 0x2fe   : > { %10871 = vmatmul.mubr.bf16.gmra.mrb[112].mxu1 %v1473_v60 }
 0x2ff   : > { %2097 = vadd.xlane.f32.xlu0 %v1594_v21  ;;  %10874 = vmatprep.mubr.bf16.mxu1 %v1474_v30  ;;  %v13079_v63 = vpop.permute.xlu1 %2372 }
 0x300   : > { %2099 = vadd.xlane.f32.xlu1 %v1597_v26 }
 0x301   : > { %v10768_v42 = vpop.f32.mrb[8].mxu1 }
 0x302   : > { %v1610_v13 = vpop.f32.mrb[9].mxu1 }
 0x303   : > { %2109 = vadd.xlane.f32.xlu0 %v10768_v42  ;;  %v10769_v49 = vpop.f32.mrb[10].mxu1  ;;  %v13081_v4 = vpop.permute.xlu1 %2380 }
 0x304   : > { %2111 = vadd.xlane.f32.xlu1 %v10769_v49  ;;  %v1613_v51 = vpop.f32.mrb[11].mxu1 }
 0x306   : > { %10875 = vmatmul.mubr.bf16.gmra.mrb[116].mxu1 %v1475_v52 }
 0x307   : > { %2105 = vadd.xlane.f32.xlu0 %v1610_v13  ;;  %10878 = vmatprep.mubr.bf16.mxu1 %v1476_v55 }
 0x308   : > { %2107 = vadd.xlane.f32.xlu1 %v1613_v51 }
 0x309   : > { %v10772_v62 = vpop.f32.mrb[12].mxu1 }
 0x30a   : > { %v1626_v0 = vpop.f32.mrb[13].mxu1 }
 0x30b   : > { %2117 = vadd.xlane.f32.xlu0 %v10772_v62  ;;  %v10773_v37 = vpop.f32.mrb[14].mxu1 }
 0x30c   : > { %2119 = vadd.xlane.f32.xlu1 %v10773_v37  ;;  %v1629_v1 = vpop.f32.mrb[15].mxu1 }
 0x30e   : > { %10879 = vmatmul.mubr.bf16.gmra.mrb[120].mxu1 %v1477_v2 }
 0x30f   : > { %2113 = vadd.xlane.f32.xlu0 %v1626_v0  ;;  %10882 = vmatprep.mubr.bf16.mxu1 %v1478_v40 }
 0x310   : > { %2115 = vadd.xlane.f32.xlu1 %v1629_v1 }
 0x311   : > { %v10776_v9 = vpop.f32.mrb[16].mxu1 }
 0x312   : > { %v1642_v10 = vpop.f32.mrb[17].mxu1 }
 0x313   : > { %2125 = vadd.xlane.f32.xlu0 %v10776_v9  ;;  %v10777_v11 = vpop.f32.mrb[18].mxu1 }
 0x314   : > { %2127 = vadd.xlane.f32.xlu1 %v10777_v11  ;;  %v1645_v12 = vpop.f32.mrb[19].mxu1  ;;  %v13087_v11 = vpop.permute.xlu0 %2368 }
 0x316   : > { %10883 = vmatmul.mubr.bf16.gmra.mrb[124].mxu1 %v1479_v14 }
 0x317   : > { %2121 = vadd.xlane.f32.xlu0 %v1642_v10  ;;  %11062 = vmatprep.mubr.msk.bf16.mxu1 %vm18476_vm0, %v18339_v3  ;;  %v13085_v10 = vpop.permute.xlu1 %2388  ;;  %vm18478_vm0 = vcmask 1041409  }
 0x318   : > { %2123 = vadd.xlane.f32.xlu1 %v1645_v12 }
 0x319   : > { %v10780_v47 = vpop.f32.mrb[20].mxu1 }
 0x31a   : > { %v1658_v27 = vpop.f32.mrb[21].mxu1 }
 0x31b   : > { %2133 = vadd.xlane.f32.xlu0 %v10780_v47  ;;  %v10781_v15 = vpop.f32.mrb[22].mxu1  ;;  %v13089_v47 = vpop.permute.xlu1 %2396 }
 0x31c   : > { %2135 = vadd.xlane.f32.xlu1 %v10781_v15  ;;  %v1661_v17 = vpop.f32.mrb[23].mxu1  ;;  %v13091_v15 = vpop.permute.xlu0 %2376 }
 0x31f   : > { %2129 = vadd.xlane.f32.xlu0 %v1658_v27 }
 0x320   : > { %2131 = vadd.xlane.f32.xlu1 %v1661_v17 }
 0x321   : > { %v10784_v18 = vpop.f32.mrb[24].mxu1 }
 0x322   : > { %v1674_v19 = vpop.f32.mrb[25].mxu1 }
 0x323   : > { %2141 = vadd.xlane.f32.xlu0 %v10784_v18  ;;  %v10785_v20 = vpop.f32.mrb[26].mxu1  ;;  %v13093_v18 = vpop.permute.xlu1 %2404 }
 0x324   : > { %2143 = vadd.xlane.f32.xlu1 %v10785_v20  ;;  %v1677_v21 = vpop.f32.mrb[27].mxu1  ;;  %v13095_v20 = vpop.permute.xlu0 %2384 }
 0x327   : > { %2137 = vadd.xlane.f32.xlu0 %v1674_v19 }
 0x328   : > { %2139 = vadd.xlane.f32.xlu1 %v1677_v21 }
 0x329   : > { %v10788_v24 = vpop.f32.mrb[28].mxu1 }
 0x32a   : > { %v1690_v26 = vpop.f32.mrb[29].mxu1 }
 0x32b   : > { %2149 = vadd.xlane.f32.xlu0 %v10788_v24  ;;  %v10789_v60 = vpop.f32.mrb[30].mxu1 }
 0x32c   : > { %2151 = vadd.xlane.f32.xlu1 %v10789_v60  ;;  %v1693_v28 = vpop.f32.mrb[31].mxu1  ;;  %v13097_v60 = vpop.permute.xlu1 %2412 }
 0x32f   : > { %2145 = vadd.xlane.f32.xlu0 %v1690_v26 }
 0x330   : > { %2147 = vadd.xlane.f32.xlu1 %v1693_v28  ;;  %v13099_v28 = vpop.permute.xlu0 %2392 }
 0x331   : > { %v10792_v29 = vpop.f32.mrb[32].mxu1 }
 0x332   : > { %v1706_v30 = vpop.f32.mrb[33].mxu1 }
 0x333   : > { %2157 = vadd.xlane.f32.xlu0 %v10792_v29  ;;  %v10793_v31 = vpop.f32.mrb[34].mxu1 }
 0x334   : > { %2159 = vadd.xlane.f32.xlu1 %v10793_v31  ;;  %v1709_v34 = vpop.f32.mrb[35].mxu1 }
 0x337   : > { %2153 = vadd.xlane.f32.xlu0 %v1706_v30 }
 0x338   : > { %2155 = vadd.xlane.f32.xlu1 %v1709_v34 }
 0x339   : > { %v10796_v35 = vpop.f32.mrb[36].mxu1 }
 0x33a   : > { %v1722_v39 = vpop.f32.mrb[37].mxu1 }
 0x33b   : > { %2165 = vadd.xlane.f32.xlu0 %v10796_v35  ;;  %v10797_v6 = vpop.f32.mrb[38].mxu1 }
 0x33c   : > { %2167 = vadd.xlane.f32.xlu1 %v10797_v6  ;;  %v1725_v33 = vpop.f32.mrb[39].mxu1 }
 0x33f   : > { %2161 = vadd.xlane.f32.xlu0 %v1722_v39  ;;  %v13105_v39 = vpop.permute.xlu0 %2400 }
 0x340   : > { %2163 = vadd.xlane.f32.xlu1 %v1725_v33 }
 0x341   : > { %v10800_v44 = vpop.f32.mrb[40].mxu1 }
 0x342   : > { %v1738_v41 = vpop.f32.mrb[41].mxu1 }
 0x343   : > { %2173 = vadd.xlane.f32.xlu0 %v10800_v44  ;;  %v10801_v42 = vpop.f32.mrb[42].mxu1 }
 0x344   : > { %2175 = vadd.xlane.f32.xlu1 %v10801_v42  ;;  %v1741_v43 = vpop.f32.mrb[43].mxu1  ;;  %v13117_v42 = vpop.permute.xlu0 %2408 }
 0x347   : > { %2169 = vadd.xlane.f32.xlu0 %v1738_v41 }
 0x348   : > { %2171 = vadd.xlane.f32.xlu1 %v1741_v43 }
 0x349   : > { %v10804_v46 = vpop.f32.mrb[44].mxu1 }
 0x34a   : > { %v1754_v48 = vpop.f32.mrb[45].mxu1 }
 0x34b   : > { %2181 = vadd.xlane.f32.xlu0 %v10804_v46  ;;  %v10805_v50 = vpop.f32.mrb[46].mxu1 }
 0x34c   : > { %2183 = vadd.xlane.f32.xlu1 %v10805_v50  ;;  %v1757_v13 = vpop.f32.mrb[47].mxu1 }
 0x34f   : > { %2177 = vadd.xlane.f32.xlu0 %v1754_v48 }
 0x350   : > { %2179 = vadd.xlane.f32.xlu1 %v1757_v13 }
 0x351   : > { %v10808_v49 = vpop.f32.mrb[48].mxu1 }
 0x352   : > { %v1770_v51 = vpop.f32.mrb[49].mxu1 }
 0x353   : > { %2189 = vadd.xlane.f32.xlu0 %v10808_v49  ;;  %v10809_v52 = vpop.f32.mrb[50].mxu1 }
 0x354   : > { %2191 = vadd.xlane.f32.xlu1 %v10809_v52  ;;  %v1773_v53 = vpop.f32.mrb[51].mxu1 }
 0x357   : > { %2185 = vadd.xlane.f32.xlu0 %v1770_v51 }
 0x358   : > { %2187 = vadd.xlane.f32.xlu1 %v1773_v53 }
 0x359   : > { %v10812_v55 = vpop.f32.mrb[52].mxu1 }
 0x35a   : > { %v1786_v56 = vpop.f32.mrb[53].mxu1 }
 0x35b   : > { %2197 = vadd.xlane.f32.xlu0 %v10812_v55  ;;  %v10813_v57 = vpop.f32.mrb[54].mxu1 }
 0x35c   : > { %2199 = vadd.xlane.f32.xlu1 %v10813_v57  ;;  %v1789_v58 = vpop.f32.mrb[55].mxu1 }
 0x35f   : > { %2193 = vadd.xlane.f32.xlu0 %v1786_v56 }
 0x360   : > { %2195 = vadd.xlane.f32.xlu1 %v1789_v58 }
 0x361   : > { %v10816_v59 = vpop.f32.mrb[56].mxu1 }
 0x362   : > { %v1802_v61 = vpop.f32.mrb[57].mxu1 }
 0x363   : > { %2205 = vadd.xlane.f32.xlu0 %v10816_v59  ;;  %v10817_v62 = vpop.f32.mrb[58].mxu1 }
 0x364   : > { %2207 = vadd.xlane.f32.xlu1 %v10817_v62  ;;  %v1805_v45 = vpop.f32.mrb[59].mxu1 }
 0x367   : > { %2201 = vadd.xlane.f32.xlu0 %v1802_v61 }
 0x368   : > { %2203 = vadd.xlane.f32.xlu1 %v1805_v45 }
 0x369   : > { %v10820_v0 = vpop.f32.mrb[60].mxu1 }
 0x36a   : > { %v1818_v37 = vpop.f32.mrb[61].mxu1 }
 0x36b   : > { %2213 = vadd.xlane.f32.xlu0 %v10820_v0  ;;  %v10821_v1 = vpop.f32.mrb[62].mxu1 }
 0x36c   : > { %2215 = vadd.xlane.f32.xlu1 %v10821_v1  ;;  %v1821_v2 = vpop.f32.mrb[63].mxu1 }
 0x36f   : > { %2209 = vadd.xlane.f32.xlu0 %v1818_v37 }
 0x370   : > { %2211 = vadd.xlane.f32.xlu1 %v1821_v2 }
 0x371   : > { %v10824_v40 = vpop.f32.mrb[64].mxu1 }
 0x372   : > { %v1834_v7 = vpop.f32.mrb[65].mxu1 }
 0x373   : > { %2221 = vadd.xlane.f32.xlu0 %v10824_v40  ;;  %v10825_v8 = vpop.f32.mrb[66].mxu1 }
 0x374   : > { %2223 = vadd.xlane.f32.xlu1 %v10825_v8  ;;  %v1837_v9 = vpop.f32.mrb[67].mxu1 }
 0x377   : > { %2217 = vadd.xlane.f32.xlu0 %v1834_v7 }
 0x378   : > { %2219 = vadd.xlane.f32.xlu1 %v1837_v9 }
 0x379   : > { %v10828_v12 = vpop.f32.mrb[68].mxu1 }
 0x37a   : > { %v1850_v14 = vpop.f32.mrb[69].mxu1 }
 0x37b   : > { %2229 = vadd.xlane.f32.xlu0 %v10828_v12  ;;  %v10829_v27 = vpop.f32.mrb[70].mxu1 }
 0x37c   : > { %2231 = vadd.xlane.f32.xlu1 %v10829_v27  ;;  %v1853_v17 = vpop.f32.mrb[71].mxu1 }
 0x37f   : > { %2225 = vadd.xlane.f32.xlu0 %v1850_v14  ;;  %v2094_v34 = vpop.xlane.xlu1 %2093 }
 0x380   : > { %2227 = vadd.xlane.f32.xlu1 %v1853_v17  ;;  %v13108_v6 = vadd.f32 %v13075_v22, %v2094_v34  ;;  %v2090_v46 = vpop.xlane.xlu0 %2089 }
 0x381   : > { %v10832_v19 = vpop.f32.mrb[72].mxu1  ;;  %v13126_v13 = vadd.f32 %v13083_v5, %v2090_v46 }
 0x382   : > { %v1866_v21 = vpop.f32.mrb[73].mxu1  ;;  %18905 = vst [vmem:[#allocation31_spill] sm:$0xff] %v13108_v6 }
 0x383   : > { %2237 = vadd.xlane.f32.xlu0 %v10832_v19  ;;  %v10833_v24 = vpop.f32.mrb[74].mxu1  ;;  %18906 = vst [vmem:[#allocation32_spill] sm:$0xff] %v13126_v13  ;;  %v2096_v51 = vpop.xlane.xlu1 %2095 }
 0x384   : > { %v1869_v26 = vpop.f32.mrb[75].mxu1  ;;  %v13134_v53 = vadd.f32 %v13077_v38, %v2096_v51  ;;  %v2092_v12 = vpop.xlane.xlu0 %2091 }
 0x386   : > { %18907 = vst [vmem:[#allocation33_spill] sm:$0xff] %v13134_v53 }
 0x387   : > { %2233 = vadd.xlane.f32.xlu0 %v1866_v21 }
 0x388   : > { %v2102_v21 = vpop.xlane.xlu0 %2101 }
 0x389   : > { %v10836_v29 = vpop.f32.mrb[76].mxu1  ;;  %v13188_v46 = vadd.f32 %v13091_v15, %v2102_v21  ;;  %v2104_v23 = vpop.xlane.xlu1 %2103 }
 0x38a   : > { %v1882_v30 = vpop.f32.mrb[77].mxu1  ;;  %v13206_v21 = vadd.f32 %v13081_v4, %v2104_v23 }
 0x38b   : > { %v13101_v31 = vpop.f32.mrb[78].mxu1  ;;  %18909 = vst [vmem:[#allocation35_spill] sm:$0xff] %v13188_v46 }
 0x38c   : > { %v13103_v35 = vpop.f32.mrb[79].mxu1  ;;  %18911 = vst [vmem:[#allocation37_spill] sm:$0xff] %v13206_v21 }
 0x391   : > { %2693 = vperm.xlu1 %11196, %v13108_v6   ;;  %v13111_v33 = vpop.f32.mrb[80].mxu1  ;;  %v2100_v6 = vpop.xlane.xlu1 %2099 }
 0x392   : > { %v13113_v44 = vpop.f32.mrb[81].mxu1 }
 0x393   : > { %v13115_v41 = vpop.f32.mrb[82].mxu1 }
 0x394   : > { %v13119_v43 = vpop.f32.mrb[83].mxu1 }
 0x399   : > { %v13121_v48 = vpop.f32.mrb[84].mxu1 }
 0x39a   : > { %v13123_v50 = vpop.f32.mrb[85].mxu1 }
 0x39b   : > { %v13128_v49 = vpop.f32.mrb[86].mxu1 }
 0x39c   : > { %v13130_v52 = vpop.f32.mrb[87].mxu1 }
 0x39d   : > { %2687 = vperm.xlu0 %11197, %v13126_v13  }
 0x3a1   : > { %2696 = vperm.xlu0 %11197, %v13134_v53   ;;  %v13137_v55 = vpop.f32.mrb[88].mxu1 }
 0x3a2   : > { %v13139_v56 = vpop.f32.mrb[89].mxu1 }
 0x3a3   : > { %v13141_v57 = vpop.f32.mrb[90].mxu1 }
 0x3a4   : > { %v13143_v58 = vpop.f32.mrb[91].mxu1 }
 0x3a9   : > { %v13145_v59 = vpop.f32.mrb[92].mxu1 }
 0x3aa   : > { %v13147_v61 = vpop.f32.mrb[93].mxu1 }
 0x3ab   : > { %v13149_v62 = vpop.f32.mrb[94].mxu1 }
 0x3ac   : > { %v13151_v45 = vpop.f32.mrb[95].mxu1 }
 0x3b1   : > { %v13153_v0 = vpop.f32.mrb[96].mxu1 }
 0x3b2   : > { %v13155_v37 = vpop.f32.mrb[97].mxu1 }
 0x3b3   : > { %v13157_v1 = vpop.f32.mrb[98].mxu1 }
 0x3b4   : > { %v13159_v2 = vpop.f32.mrb[99].mxu1 }
 0x3b5   : > { %2239 = vadd.xlane.f32.xlu1 %v10833_v24  ;;  %v13178_v24 = vadd.f32 %v13073_v54, %v2092_v12 }
 0x3b7   : > { %18908 = vst [vmem:[#allocation34_spill] sm:$0xff] %v13178_v24 }
 0x3b9   : > { %2235 = vadd.xlane.f32.xlu1 %v1869_v26  ;;  %v13161_v40 = vpop.f32.mrb[100].mxu1 }
 0x3ba   : > { %v13163_v7 = vpop.f32.mrb[101].mxu1 }
 0x3bb   : > { %v13165_v8 = vpop.f32.mrb[102].mxu1 }
 0x3bc   : > { %v13167_v9 = vpop.f32.mrb[103].mxu1 }
 0x3c0   : > { %2245 = vadd.xlane.f32.xlu0 %v10836_v29 }
 0x3c1   : > { %v13169_v14 = vpop.f32.mrb[104].mxu1 }
 0x3c2   : > { %v13171_v27 = vpop.f32.mrb[105].mxu1 }
 0x3c3   : > { %v13173_v17 = vpop.f32.mrb[106].mxu1 }
 0x3c4   : > { %2241 = vadd.xlane.f32.xlu0 %v1882_v30  ;;  %v13175_v19 = vpop.f32.mrb[107].mxu1  ;;  %v2098_v30 = vpop.xlane.xlu0 %2097 }
 0x3c5   : > { %v13194_v32 = vadd.f32 %v13087_v11, %v2098_v30 }
 0x3c7   : > { %18910 = vst [vmem:[#allocation36_spill] sm:$0xff] %v13194_v32 }
 0x3c9   : > { %v13180_v26 = vpop.f32.mrb[108].mxu1 }
 0x3ca   : > { %2690 = vperm.xlu1 %11196, %v13178_v24   ;;  %v13183_v34 = vpop.f32.mrb[109].mxu1 }
 0x3cb   : > { %v13185_v29 = vpop.f32.mrb[110].mxu1 }
 0x3cc   : > { %v13190_v51 = vpop.f32.mrb[111].mxu1 }
 0x3ce   : > { %2705 = vperm.xlu1 %11196, %v13188_v46  }
 0x3d1   : > { %v13196_v12 = vpop.f32.mrb[112].mxu1 }
 0x3d2   : > { %2699 = vperm.xlu1 %11196, %v13194_v32   ;;  %v13199_v3 = vpop.f32.mrb[113].mxu1  ;;  %v13216_v32 = vadd.f32 %v13079_v63, %v2100_v6 }
 0x3d3   : > { %v13201_v16 = vpop.f32.mrb[114].mxu1 }
 0x3d4   : > { %v13203_v53 = vpop.f32.mrb[115].mxu1  ;;  %18915 = vst [vmem:[#allocation41_spill] sm:$0xff] %v13216_v32 }
 0x3d9   : > { %v13208_v24 = vpop.f32.mrb[116].mxu1 }
 0x3da   : > { %18912 = vst [vmem:[#allocation38_spill] sm:$0xff] %v13208_v24  ;;  %2708 = vperm.xlu0 %11197, %v13206_v21   ;;  %v13211_v30 = vpop.f32.mrb[117].mxu1 }
 0x3db   : > { %18913 = vst [vmem:[#allocation39_spill] sm:$0xff] %v13211_v30  ;;  %v13213_v46 = vpop.f32.mrb[118].mxu1 }
 0x3dc   : > { %18914 = vst [vmem:[#allocation40_spill] sm:$0xff] %v13213_v46  ;;  %v13218_v13 = vpop.f32.mrb[119].mxu1 }
 0x3de   : > { %2702 = vperm.xlu0 %11197, %v13216_v32   ;;  %v2110_v32 = vpop.xlane.xlu0 %2109 }
 0x3e1   : > { %v13221_v36 = vpop.f32.mrb[120].mxu1 }
 0x3e2   : > { %v13223_v23 = vpop.f32.mrb[121].mxu1 }
 0x3e3   : > { %v13225_v25 = vpop.f32.mrb[122].mxu1 }
 0x3e4   : > { %18916 = vst [vmem:[#allocation42_spill] sm:$0xff] %v13225_v25  ;;  %v13227_v24 = vpop.f32.mrb[123].mxu1  ;;  %v13242_v25 = vadd.f32 %v13099_v28, %v2110_v32 }
 0x3e5   : > { %18917 = vst [vmem:[#allocation43_spill] sm:$0xff] %v13227_v24  ;;  %v2106_v24 = vpop.xlane.xlu0 %2105 }
 0x3e6   : > { %18920 = vst [vmem:[#allocation46_spill] sm:$0xff] %v13242_v25 }
 0x3e9   : > { %v13229_v21 = vpop.f32.mrb[124].mxu1  ;;  %v2118_v32 = vpop.xlane.xlu0 %2117 }
 0x3ea   : > { %v13231_v30 = vpop.f32.mrb[125].mxu1 }
 0x3eb   : > { %18918 = vst [vmem:[#allocation44_spill] sm:$0xff] %v13231_v30  ;;  %v13233_v46 = vpop.f32.mrb[126].mxu1  ;;  %v13246_v30 = vadd.f32 %v13095_v20, %v2106_v24 }
 0x3ec   : > { %v13235_v6 = vpop.f32.mrb[127].mxu1 }
 0x3ed   : > { %18919 = vst [vmem:[#allocation45_spill] sm:$0xff] %v13235_v6  ;;  %18921 = vst [vmem:[#allocation47_spill] sm:$0xff] %v13246_v30  ;;  %v2112_v6 = vpop.xlane.xlu1 %2111  ;;  %v2114_v24 = vpop.xlane.xlu0 %2113 }
 0x3f6   : > { %2247 = vadd.xlane.f32.xlu1 %v13101_v31  ;;  %v13250_v31 = vadd.f32 %v13089_v47, %v2112_v6  ;;  %v13266_v6 = vadd.f32 %v13105_v39, %v2114_v24 }
 0x3f8   : > { %18922 = vst [vmem:[#allocation48_spill] sm:$0xff] %v13250_v31  ;;  %18925 = vst [vmem:[#allocation51_spill] sm:$0xff] %v13266_v6 }
 0x3fa   : > { %2243 = vadd.xlane.f32.xlu1 %v13103_v35  ;;  %v2108_v35 = vpop.xlane.xlu1 %2107 }
 0x3fd   : > { %2253 = vadd.xlane.f32.xlu0 %v13111_v33  ;;  %v13254_v33 = vadd.f32 %v13085_v10, %v2108_v35 }
 0x3fe   : > { %v2120_v35 = vpop.xlane.xlu1 %2119 }
 0x3ff   : > { %18923 = vst [vmem:[#allocation49_spill] sm:$0xff] %v13254_v33 }
 0x401   : > { %2249 = vadd.xlane.f32.xlu0 %v13113_v44  ;;  %v13262_v44 = vadd.f32 %v13117_v42, %v2118_v32 }
 0x403   : > { %18924 = vst [vmem:[#allocation50_spill] sm:$0xff] %v13262_v44 }
 0x40b   : > { %2717 = vperm.xlu1 %11196, %v13242_v25  }
 0x40f   : > { %2711 = vperm.xlu1 %11196, %v13246_v30  }
 0x417   : > { %2720 = vperm.xlu0 %11197, %v13250_v31  }
 0x41b   : > { %2714 = vperm.xlu0 %11197, %v13254_v33  }
 0x433   : > { %2255 = vadd.xlane.f32.xlu1 %v13115_v41  ;;  %v13270_v41 = vadd.f32 %v13097_v60, %v2120_v35 }
 0x435   : > { %18926 = vst [vmem:[#allocation52_spill] sm:$0xff] %v13270_v41 }
 0x437   : > { %2251 = vadd.xlane.f32.xlu1 %v13119_v43  ;;  %v2116_v43 = vpop.xlane.xlu1 %2115 }
 0x43a   : > { %2261 = vadd.xlane.f32.xlu0 %v13121_v48  ;;  %v13274_v48 = vadd.f32 %v13093_v18, %v2116_v43 }
 0x43b   : > { %v2128_v43 = vpop.xlane.xlu1 %2127 }
 0x43c   : > { %18927 = vst [vmem:[#allocation53_spill] sm:$0xff] %v13274_v48 }
 0x43e   : > { %2257 = vadd.xlane.f32.xlu0 %v13123_v50  ;;  %v2126_v50 = vpop.xlane.xlu0 %2125 }
 0x43f   : > { %v13282_v32 = vadd.f32 %v13075_v22, %v2126_v50 }
 0x441   : > { %18928 = vst [vmem:[#allocation54_spill] sm:$0xff] %v13282_v32 }
 0x442   : > { %v2122_v24 = vpop.xlane.xlu0 %2121 }
 0x443   : > { %v13286_v35 = vadd.f32 %v13083_v5, %v2122_v24 }
 0x445   : > { %18929 = vst [vmem:[#allocation55_spill] sm:$0xff] %v13286_v35 }
 0x448   : > { %2729 = vperm.xlu1 %11196, %v13262_v44  }
 0x44c   : > { %2723 = vperm.xlu1 %11196, %v13266_v6  }
 0x454   : > { %2732 = vperm.xlu0 %11197, %v13270_v41  }
 0x458   : > { %2726 = vperm.xlu0 %11197, %v13274_v48  }
 0x470   : > { %2263 = vadd.xlane.f32.xlu1 %v13128_v49  ;;  %v13290_v49 = vadd.f32 %v13077_v38, %v2128_v43 }
 0x472   : > { %18930 = vst [vmem:[#allocation56_spill] sm:$0xff] %v13290_v49 }
 0x474   : > { %2259 = vadd.xlane.f32.xlu1 %v13130_v52  ;;  %v2124_v52 = vpop.xlane.xlu1 %2123 }
 0x477   : > { %2269 = vadd.xlane.f32.xlu0 %v13137_v55  ;;  %v13294_v55 = vadd.f32 %v13073_v54, %v2124_v52 }
 0x478   : > { %v2136_v52 = vpop.xlane.xlu1 %2135 }
 0x479   : > { %18931 = vst [vmem:[#allocation57_spill] sm:$0xff] %v13294_v55 }
 0x47b   : > { %2265 = vadd.xlane.f32.xlu0 %v13139_v56  ;;  %v2134_v56 = vpop.xlane.xlu0 %2133 }
 0x47c   : > { %v13302_v50 = vadd.f32 %v13091_v15, %v2134_v56 }
 0x47e   : > { %18932 = vst [vmem:[#allocation58_spill] sm:$0xff] %v13302_v50 }
 0x47f   : > { %v2130_v24 = vpop.xlane.xlu0 %2129 }
 0x480   : > { %v13306_v43 = vadd.f32 %v13087_v11, %v2130_v24 }
 0x482   : > { %18933 = vst [vmem:[#allocation59_spill] sm:$0xff] %v13306_v43 }
 0x485   : > { %2741 = vperm.xlu1 %11196, %v13282_v32  }
 0x489   : > { %2735 = vperm.xlu1 %11196, %v13286_v35  }
 0x491   : > { %2744 = vperm.xlu0 %11197, %v13290_v49  }
 0x495   : > { %2738 = vperm.xlu0 %11197, %v13294_v55  }
 0x4ad   : > { %2271 = vadd.xlane.f32.xlu1 %v13141_v57  ;;  %v13310_v57 = vadd.f32 %v13081_v4, %v2136_v52 }
 0x4af   : > { %18934 = vst [vmem:[#allocation60_spill] sm:$0xff] %v13310_v57 }
 0x4b1   : > { %2267 = vadd.xlane.f32.xlu1 %v13143_v58  ;;  %v2132_v58 = vpop.xlane.xlu1 %2131 }
 0x4b4   : > { %2277 = vadd.xlane.f32.xlu0 %v13145_v59  ;;  %v13314_v59 = vadd.f32 %v13079_v63, %v2132_v58 }
 0x4b5   : > { %v2144_v58 = vpop.xlane.xlu1 %2143 }
 0x4b6   : > { %18935 = vst [vmem:[#allocation61_spill] sm:$0xff] %v13314_v59 }
 0x4b8   : > { %2273 = vadd.xlane.f32.xlu0 %v13147_v61  ;;  %v2142_v61 = vpop.xlane.xlu0 %2141 }
 0x4b9   : > { %v13322_v56 = vadd.f32 %v13099_v28, %v2142_v61 }
 0x4bb   : > { %18936 = vst [vmem:[#allocation62_spill] sm:$0xff] %v13322_v56 }
 0x4bc   : > { %v2138_v24 = vpop.xlane.xlu0 %2137 }
 0x4bd   : > { %v13326_v52 = vadd.f32 %v13095_v20, %v2138_v24 }
 0x4bf   : > { %18937 = vst [vmem:[#allocation63_spill] sm:$0xff] %v13326_v52 }
 0x4c2   : > { %2753 = vperm.xlu1 %11196, %v13302_v50  }
 0x4c6   : > { %2747 = vperm.xlu1 %11196, %v13306_v43  }
 0x4ce   : > { %2756 = vperm.xlu0 %11197, %v13310_v57  }
 0x4d2   : > { %2750 = vperm.xlu0 %11197, %v13314_v59  }
 0x4ea   : > { %2279 = vadd.xlane.f32.xlu1 %v13149_v62  ;;  %v13330_v62 = vadd.f32 %v13089_v47, %v2144_v58 }
 0x4ec   : > { %18938 = vst [vmem:[#allocation64_spill] sm:$0xff] %v13330_v62 }
 0x4ee   : > { %2275 = vadd.xlane.f32.xlu1 %v13151_v45  ;;  %v2140_v45 = vpop.xlane.xlu1 %2139 }
 0x4f1   : > { %2285 = vadd.xlane.f32.xlu0 %v13153_v0  ;;  %v13334_v0 = vadd.f32 %v13085_v10, %v2140_v45 }
 0x4f2   : > { %v2152_v61 = vpop.xlane.xlu1 %2151 }
 0x4f3   : > { %18939 = vst [vmem:[#allocation65_spill] sm:$0xff] %v13334_v0 }
 0x4f5   : > { %2281 = vadd.xlane.f32.xlu0 %v13155_v37  ;;  %v2150_v37 = vpop.xlane.xlu0 %2149 }
 0x4f6   : > { %v13342_v58 = vadd.f32 %v13117_v42, %v2150_v37 }
 0x4f8   : > { %18940 = vst [vmem:[#allocation66_spill] sm:$0xff] %v13342_v58 }
 0x4f9   : > { %v2146_v24 = vpop.xlane.xlu0 %2145 }
 0x4fa   : > { %v13346_v45 = vadd.f32 %v13105_v39, %v2146_v24 }
 0x4fc   : > { %18941 = vst [vmem:[#allocation67_spill] sm:$0xff] %v13346_v45 }
 0x4ff   : > { %2765 = vperm.xlu1 %11196, %v13322_v56   ;;  %v2158_v56 = vpop.xlane.xlu0 %2157 }
 0x503   : > { %2759 = vperm.xlu1 %11196, %v13326_v52   ;;  %v2148_v52 = vpop.xlane.xlu1 %2147 }
 0x507   : > { %v2160_v50 = vpop.xlane.xlu1 %2159 }
 0x50b   : > { %2768 = vperm.xlu0 %11197, %v13330_v62   ;;  %v2156_v37 = vpop.xlane.xlu1 %2155 }
 0x50f   : > { %2762 = vperm.xlu0 %11197, %v13334_v0   ;;  %v2168_v24 = vpop.xlane.xlu1 %2167 }
 0x527   : > { %2287 = vadd.xlane.f32.xlu1 %v13157_v1  ;;  %v13350_v1 = vadd.f32 %v13097_v60, %v2152_v61 }
 0x529   : > { %18942 = vst [vmem:[#allocation68_spill] sm:$0xff] %v13350_v1 }
 0x52b   : > { %2283 = vadd.xlane.f32.xlu1 %v13159_v2  ;;  %v2154_v2 = vpop.xlane.xlu0 %2153 }
 0x52c   : > { %v13366_v43 = vadd.f32 %v13083_v5, %v2154_v2 }
 0x52e   : > { %2293 = vadd.xlane.f32.xlu0 %v13161_v40  ;;  %v13354_v40 = vadd.f32 %v13093_v18, %v2148_v52  ;;  %v2164_v52 = vpop.xlane.xlu1 %2163  ;;  %18945 = vst [vmem:[#allocation71_spill] sm:$0xff] %v13366_v43 }
 0x530   : > { %18943 = vst [vmem:[#allocation69_spill] sm:$0xff] %v13354_v40 }
 0x532   : > { %2289 = vadd.xlane.f32.xlu0 %v13163_v7  ;;  %v2166_v7 = vpop.xlane.xlu0 %2165  ;;  %v2176_v32 = vpop.xlane.xlu1 %2175 }
 0x53c   : > { %2777 = vperm.xlu1 %11196, %v13342_v58   ;;  %v2162_v58 = vpop.xlane.xlu0 %2161 }
 0x540   : > { %2771 = vperm.xlu1 %11196, %v13346_v45   ;;  %v2174_v61 = vpop.xlane.xlu0 %2173  ;;  %v13362_v45 = vadd.f32 %v13075_v22, %v2158_v56  ;;  %v2172_v56 = vpop.xlane.xlu1 %2171 }
 0x541   : > { %v13424_v44 = vadd.f32 %v13099_v28, %v2174_v61  ;;  %v13442_v61 = vadd.f32 %v13085_v10, %v2172_v56 }
 0x542   : > { %18944 = vst [vmem:[#allocation70_spill] sm:$0xff] %v13362_v45 }
 0x543   : > { %18952 = vst [vmem:[#allocation78_spill] sm:$0xff] %v13424_v44  ;;  %18955 = vst [vmem:[#allocation81_spill] sm:$0xff] %v13442_v61 }
 0x544   : > { %v13378_v2 = vpop.xlane.xlu1 %2183 }
 0x545   : > { %v13499_v59 = vadd.f32 %v13097_v60, %v13378_v2 }
 0x547   : > { %18964 = vst [vmem:[#allocation86_spill] sm:$0xff] %v13499_v59 }
 0x548   : > { %2780 = vperm.xlu0 %11197, %v13350_v1   ;;  %v18958_v1 = vld [vmem:[#allocation39_spill] sm:$0xff] }
 0x54c   : > { %2774 = vperm.xlu0 %11197, %v13354_v40  }
 0x564   : > { %2295 = vadd.xlane.f32.xlu1 %v13165_v8  ;;  %v13370_v8 = vadd.f32 %v13077_v38, %v2160_v50 }
 0x566   : > { %18946 = vst [vmem:[#allocation72_spill] sm:$0xff] %v13370_v8 }
 0x568   : > { %2291 = vadd.xlane.f32.xlu1 %v13167_v9  ;;  %v2170_v9 = vpop.xlane.xlu0 %2169 }
 0x56b   : > { %2301 = vadd.xlane.f32.xlu0 %v13169_v14  ;;  %v13374_v14 = vadd.f32 %v13073_v54, %v2156_v37  ;;  %v13386_v37 = vadd.f32 %v13091_v15, %v2166_v7 }
 0x56d   : > { %18947 = vst [vmem:[#allocation73_spill] sm:$0xff] %v13374_v14  ;;  %18948 = vst [vmem:[#allocation74_spill] sm:$0xff] %v13386_v37 }
 0x56f   : > { %2297 = vadd.xlane.f32.xlu0 %v13171_v27  ;;  %v2182_v27 = vpop.xlane.xlu0 %2181 }
 0x579   : > { %2789 = vperm.xlu1 %11196, %v13362_v45   ;;  %v2178_v45 = vpop.xlane.xlu0 %2177 }
 0x57d   : > { %2783 = vperm.xlu1 %11196, %v13366_v43   ;;  %v13382_v50 = vpop.xlane.xlu0 %2189  ;;  %v13388_v43 = vpop.xlane.xlu1 %2179 }
 0x581   : > { %v13394_v35 = vpop.xlane.xlu1 %2191 }
 0x585   : > { %2792 = vperm.xlu0 %11197, %v13370_v8  }
 0x589   : > { %2786 = vperm.xlu0 %11197, %v13374_v14   ;;  %v18956_v14 = vld [vmem:[#allocation38_spill] sm:$0xff] }
 0x5a1   : > { %2303 = vadd.xlane.f32.xlu1 %v13173_v17  ;;  %v13392_v17 = vadd.f32 %v13087_v11, %v2162_v58  ;;  %v13409_v58 = vpop.xlane.xlu1 %2187 }
 0x5a3   : > { %18949 = vst [vmem:[#allocation75_spill] sm:$0xff] %v13392_v17 }
 0x5a5   : > { %2299 = vadd.xlane.f32.xlu1 %v13175_v19  ;;  %v13398_v19 = vadd.f32 %v13081_v4, %v2168_v24 }
 0x5a7   : > { %18950 = vst [vmem:[#allocation76_spill] sm:$0xff] %v13398_v19 }
 0x5a8   : > { %2309 = vadd.xlane.f32.xlu0 %v13180_v26  ;;  %v13400_v26 = vpop.xlane.xlu0 %2185 }
 0x5ac   : > { %2305 = vadd.xlane.f32.xlu0 %v13183_v34  ;;  %v13404_v34 = vadd.f32 %v13079_v63, %v2164_v52  ;;  %v13406_v7 = vpop.xlane.xlu0 %2197 }
 0x5ae   : > { %18951 = vst [vmem:[#allocation77_spill] sm:$0xff] %v13404_v34 }
 0x5b0   : > { %v13415_v24 = vpop.xlane.xlu0 %2193 }
 0x5b6   : > { %2801 = vperm.xlu1 %11196, %v13386_v37   ;;  %v13412_v37 = vpop.xlane.xlu1 %2199 }
 0x5ba   : > { %2795 = vperm.xlu1 %11196, %v13392_v17   ;;  %v13418_v17 = vpop.xlane.xlu0 %2205  ;;  %v13421_v52 = vpop.xlane.xlu1 %2195 }
 0x5c2   : > { %2804 = vperm.xlu0 %11197, %v13398_v19   ;;  %v13430_v19 = vpop.xlane.xlu1 %2207 }
 0x5c6   : > { %2798 = vperm.xlu0 %11197, %v13404_v34  }
 0x5de   : > { %2311 = vadd.xlane.f32.xlu1 %v13185_v29  ;;  %v13428_v29 = vadd.f32 %v13095_v20, %v2170_v9 }
 0x5e0   : > { %18953 = vst [vmem:[#allocation79_spill] sm:$0xff] %v13428_v29 }
 0x5e2   : > { %2307 = vadd.xlane.f32.xlu1 %v13190_v51  ;;  %v13433_v51 = vpop.xlane.xlu1 %2203 }
 0x5e5   : > { %2317 = vadd.xlane.f32.xlu0 %v13196_v12  ;;  %v13436_v12 = vadd.f32 %v13089_v47, %v2176_v32 }
 0x5e7   : > { %18954 = vst [vmem:[#allocation80_spill] sm:$0xff] %v13436_v12 }
 0x5e9   : > { %2313 = vadd.xlane.f32.xlu0 %v13199_v3  ;;  %v13438_v3 = vpop.xlane.xlu0 %2201 }
 0x5ed   : > { %v13446_v9 = vpop.xlane.xlu0 %2213 }
 0x5f3   : > { %2813 = vperm.xlu1 %11196, %v13424_v44   ;;  %v13444_v44 = vpop.xlane.xlu1 %2215 }
 0x5f7   : > { %2807 = vperm.xlu1 %11196, %v13428_v29   ;;  %v13449_v48 = vpop.xlane.xlu1 %2211  ;;  %v13451_v29 = vpop.xlane.xlu0 %2209 }
 0x5fb   : > { %v13453_v34 = vpop.xlane.xlu1 %2223  ;;  %v13455_v32 = vpop.xlane.xlu0 %2221 }
 0x5ff   : > { %2816 = vperm.xlu0 %11197, %v13436_v12   ;;  %v13457_v6 = vpop.xlane.xlu1 %2219  ;;  %v13459_v12 = vpop.xlane.xlu0 %2217 }
 0x603   : > { %2810 = vperm.xlu0 %11197, %v13442_v61   ;;  %v13461_v56 = vpop.xlane.xlu1 %2231  ;;  %v13463_v8 = vpop.xlane.xlu0 %2229 }
 0x607   : > { %v13466_v31 = vpop.xlane.xlu1 %2227  ;;  %v13469_v61 = vpop.xlane.xlu0 %2225 }
 0x60b   : > { %v13472_v25 = vpop.permute.xlu1 %2693  ;;  %v13475_v30 = vpop.xlane.xlu0 %2237 }
 0x60c   : > { %18957 = vst [vmem:[#allocation38_spill] sm:$0xff] %v13472_v25 }
 0x60f   : > { %v13477_v40 = vpop.xlane.xlu1 %2239  ;;  %v13479_v62 = vpop.xlane.xlu0 %2233 }
 0x613   : > { %v13484_v0 = vpop.xlane.xlu1 %2235 }
 0x61b   : > { %2319 = vadd.xlane.f32.xlu1 %v13201_v16  ;;  %v13482_v16 = vadd.f32 %v13117_v42, %v2182_v27 }
 0x61d   : > { %18959 = vst [vmem:[#allocation39_spill] sm:$0xff] %v13482_v16 }
 0x61f   : > { %2315 = vadd.xlane.f32.xlu1 %v13203_v53  ;;  %v13487_v53 = vpop.permute.xlu0 %2687 }
 0x620   : > { %18960 = vst [vmem:[#allocation82_spill] sm:$0xff] %v13487_v53 }
 0x622   : > { %2325 = vadd.xlane.f32.xlu0 %v18956_v14  ;;  %v13490_v14 = vadd.f32 %v13105_v39, %v2178_v45  ;;  %v13508_v45 = vadd.f32 %v13093_v18, %v13388_v43 }
 0x623   : > { %v13495_v57 = vpop.permute.xlu0 %2696 }
 0x624   : > { %18961 = vst [vmem:[#allocation83_spill] sm:$0xff] %v13490_v14  ;;  %18963 = vst [vmem:[#allocation85_spill] sm:$0xff] %v13495_v57 }
 0x625   : > { %18966 = vst [vmem:[#allocation88_spill] sm:$0xff] %v13508_v45 }
 0x626   : > { %2321 = vadd.xlane.f32.xlu0 %v18958_v1  ;;  %v13493_v1 = vpop.permute.xlu1 %2690 }
 0x627   : > { %18962 = vst [vmem:[#allocation84_spill] sm:$0xff] %v13493_v1  ;;  %v13501_v27 = vpop.xlane.xlu0 %2245 }
 0x62a   : > { %v13503_v49 = vpop.permute.xlu1 %2705 }
 0x62b   : > { %18965 = vst [vmem:[#allocation87_spill] sm:$0xff] %v13503_v49 }
 0x630   : > { %2825 = vperm.xlu1 %11196, %v13482_v16   ;;  %v13511_v16 = vpop.xlane.xlu0 %2241 }
 0x634   : > { %2819 = vperm.xlu1 %11196, %v13490_v14   ;;  %v13513_v14 = vpop.permute.xlu1 %2699  ;;  %v13515_v55 = vpop.permute.xlu0 %2708 }
 0x635   : > { %18967 = vst [vmem:[#allocation89_spill] sm:$0xff] %v13513_v14  ;;  %18968 = vst [vmem:[#allocation90_spill] sm:$0xff] %v13515_v55 }
 0x638   : > { %v13517_v2 = vpop.xlane.xlu1 %2247  ;;  %v13519_v41 = vpop.permute.xlu0 %2702 }
 0x639   : > { %18969 = vst [vmem:[#allocation91_spill] sm:$0xff] %v13519_v41 }
 0x63c   : > { %2828 = vperm.xlu0 %11197, %v13499_v59   ;;  %v13521_v33 = vpop.xlane.xlu1 %2243  ;;  %v13523_v49 = vpop.xlane.xlu0 %2253 }
 0x640   : > { %2822 = vperm.xlu0 %11197, %v13508_v45   ;;  %v13525_v59 = vpop.permute.xlu1 %2717  ;;  %v13527_v43 = vpop.xlane.xlu0 %2249  ;;  %v18972_v45 = vld [vmem:[#allocation40_spill] sm:$0xff] }
 0x641   : > { %18970 = vst [vmem:[#allocation92_spill] sm:$0xff] %v13525_v59 }
 0x644   : > { %v13529_v57 = vpop.permute.xlu1 %2711  ;;  %v13532_v25 = vpop.permute.xlu0 %2720 }
 0x645   : > { %18971 = vst [vmem:[#allocation93_spill] sm:$0xff] %v13529_v57  ;;  %18973 = vst [vmem:[#allocation40_spill] sm:$0xff] %v13532_v25 }
 0x648   : > { %v13534_v14 = vpop.xlane.xlu1 %2255  ;;  %v13537_v55 = vpop.permute.xlu0 %2714 }
 0x649   : > { %18974 = vst [vmem:[#allocation94_spill] sm:$0xff] %v13537_v55 }
 0x64c   : > { %v13540_v41 = vpop.xlane.xlu1 %2251  ;;  %v13542_v53 = vpop.xlane.xlu0 %2261 }
 0x64d   : > { %18975 = vst [vmem:[#allocation95_spill] sm:$0xff] %v13542_v53  ;;  %v18999_v53 = vld [vmem:[#allocation44_spill] sm:$0xff] }
 0x650   : > { %v13545_v59 = vpop.permute.xlu1 %2729  ;;  %v13547_v57 = vpop.xlane.xlu0 %2257 }
 0x651   : > { %18976 = vst [vmem:[#allocation96_spill] sm:$0xff] %v13545_v59  ;;  %18977 = vst [vmem:[#allocation97_spill] sm:$0xff] %v13547_v57 }
 0x654   : > { %v13553_v25 = vpop.permute.xlu1 %2723 }
 0x655   : > { %18979 = vst [vmem:[#allocation99_spill] sm:$0xff] %v13553_v25 }
 0x658   : > { %2327 = vadd.xlane.f32.xlu1 %v18972_v45  ;;  %v13551_v45 = vadd.f32 %v13075_v22, %v13382_v50  ;;  %v13562_v55 = vpop.xlane.xlu1 %2263  ;;  %v13569_v50 = vadd.f32 %v13077_v38, %v13394_v35 }
 0x65a   : > { %18978 = vst [vmem:[#allocation98_spill] sm:$0xff] %v13551_v45  ;;  %18983 = vst [vmem:[#allocation103_spill] sm:$0xff] %v13569_v50 }
 0x65c   : > { %2323 = vadd.xlane.f32.xlu1 %v13218_v13  ;;  %v13555_v13 = vpop.permute.xlu0 %2732  ;;  %v13571_v59 = vpop.xlane.xlu1 %2259 }
 0x65d   : > { %18980 = vst [vmem:[#allocation100_spill] sm:$0xff] %v13555_v13 }
 0x65f   : > { %2333 = vadd.xlane.f32.xlu0 %v13221_v36  ;;  %v13560_v36 = vadd.f32 %v13083_v5, %v13400_v26  ;;  %v13578_v26 = vadd.f32 %v13073_v54, %v13409_v58 }
 0x661   : > { %18981 = vst [vmem:[#allocation101_spill] sm:$0xff] %v13560_v36  ;;  %18985 = vst [vmem:[#allocation105_spill] sm:$0xff] %v13578_v26 }
 0x663   : > { %2329 = vadd.xlane.f32.xlu0 %v13223_v23  ;;  %v13565_v23 = vpop.permute.xlu0 %2726 }
 0x664   : > { %18982 = vst [vmem:[#allocation102_spill] sm:$0xff] %v13565_v23 }
 0x667   : > { %v13573_v25 = vpop.xlane.xlu0 %2269 }
 0x668   : > { %18984 = vst [vmem:[#allocation104_spill] sm:$0xff] %v13573_v25 }
 0x66b   : > { %v13582_v13 = vpop.xlane.xlu0 %2265 }
 0x66c   : > { %18987 = vst [vmem:[#allocation107_spill] sm:$0xff] %v13582_v13  ;;  %v18995_v13 = vld [vmem:[#allocation42_spill] sm:$0xff] }
 0x66d   : > { %2837 = vperm.xlu1 %11196, %v13551_v45   ;;  %v13580_v45 = vpop.permute.xlu1 %2741 }
 0x66e   : > { %18986 = vst [vmem:[#allocation106_spill] sm:$0xff] %v13580_v45 }
 0x671   : > { %2831 = vperm.xlu1 %11196, %v13560_v36   ;;  %v13585_v36 = vpop.permute.xlu0 %2744  ;;  %v13587_v35 = vpop.permute.xlu1 %2735 }
 0x672   : > { %18988 = vst [vmem:[#allocation108_spill] sm:$0xff] %v13585_v36  ;;  %18989 = vst [vmem:[#allocation109_spill] sm:$0xff] %v13587_v35  ;;  %v18997_v36 = vld [vmem:[#allocation43_spill] sm:$0xff] }
 0x675   : > { %v13589_v23 = vpop.permute.xlu0 %2738  ;;  %v13591_v1 = vpop.xlane.xlu1 %2271 }
 0x676   : > { %18990 = vst [vmem:[#allocation110_spill] sm:$0xff] %v13589_v23 }
 0x679   : > { %2840 = vperm.xlu0 %11197, %v13569_v50   ;;  %v13593_v25 = vpop.xlane.xlu0 %2277  ;;  %v13595_v50 = vpop.xlane.xlu1 %2267 }
 0x67a   : > { %18991 = vst [vmem:[#allocation111_spill] sm:$0xff] %v13593_v25 }
 0x67d   : > { %2834 = vperm.xlu0 %11197, %v13578_v26   ;;  %v13597_v58 = vpop.xlane.xlu0 %2273  ;;  %v13599_v57 = vpop.permute.xlu1 %2753 }
 0x67e   : > { %18992 = vst [vmem:[#allocation112_spill] sm:$0xff] %v13597_v58  ;;  %18993 = vst [vmem:[#allocation113_spill] sm:$0xff] %v13599_v57 }
 0x681   : > { %v13601_v45 = vpop.permute.xlu0 %2756  ;;  %v13604_v26 = vpop.permute.xlu1 %2747 }
 0x682   : > { %18994 = vst [vmem:[#allocation114_spill] sm:$0xff] %v13601_v45  ;;  %18996 = vst [vmem:[#allocation42_spill] sm:$0xff] %v13604_v26 }
 0x685   : > { %v13607_v35 = vpop.permute.xlu0 %2750  ;;  %v13610_v23 = vpop.xlane.xlu1 %2279 }
 0x686   : > { %18998 = vst [vmem:[#allocation43_spill] sm:$0xff] %v13607_v35 }
 0x689   : > { %v13612_v25 = vpop.xlane.xlu0 %2285  ;;  %v13615_v58 = vpop.xlane.xlu1 %2275 }
 0x68d   : > { %v13617_v57 = vpop.xlane.xlu0 %2281  ;;  %v13623_v45 = vpop.permute.xlu1 %2765 }
 0x68e   : > { %19001 = vst [vmem:[#allocation115_spill] sm:$0xff] %v13623_v45  ;;  %v13643_v45 = vadd.f32 %v13081_v4, %v13412_v37 }
 0x690   : > { %19005 = vst [vmem:[#allocation119_spill] sm:$0xff] %v13643_v45 }
 0x695   : > { %2335 = vadd.xlane.f32.xlu1 %v18995_v13  ;;  %v13621_v13 = vadd.f32 %v13091_v15, %v13406_v7 }
 0x697   : > { %19000 = vst [vmem:[#allocation44_spill] sm:$0xff] %v13621_v13 }
 0x699   : > { %2331 = vadd.xlane.f32.xlu1 %v18997_v36  ;;  %v13625_v36 = vpop.permute.xlu0 %2768 }
 0x69a   : > { %19002 = vst [vmem:[#allocation116_spill] sm:$0xff] %v13625_v36  ;;  %v13657_v36 = vadd.f32 %v13089_v47, %v13430_v19 }
 0x69c   : > { %2341 = vadd.xlane.f32.xlu0 %v13229_v21  ;;  %v13630_v21 = vadd.f32 %v13087_v11, %v13415_v24  ;;  %v13648_v24 = vadd.f32 %v13079_v63, %v13421_v52  ;;  %19007 = vst [vmem:[#allocation121_spill] sm:$0xff] %v13657_v36  ;;  %v13666_v52 = vadd.f32 %v13085_v10, %v13433_v51 }
 0x69d   : > { %v13635_v35 = vpop.permute.xlu0 %2762 }
 0x69e   : > { %19003 = vst [vmem:[#allocation117_spill] sm:$0xff] %v13630_v21  ;;  %19004 = vst [vmem:[#allocation118_spill] sm:$0xff] %v13635_v35 }
 0x69f   : > { %19006 = vst [vmem:[#allocation120_spill] sm:$0xff] %v13648_v24  ;;  %19010 = vst [vmem:[#allocation124_spill] sm:$0xff] %v13666_v52 }
 0x6a0   : > { %2337 = vadd.xlane.f32.xlu0 %v18999_v53  ;;  %v13633_v53 = vpop.permute.xlu1 %2759 }
 0x6a1   : > { %v13639_v7 = vpop.xlane.xlu0 %2293 }
 0x6a4   : > { %v13637_v26 = vpop.xlane.xlu1 %2287 }
 0x6aa   : > { %2849 = vperm.xlu1 %11196, %v13621_v13   ;;  %v13650_v13 = vpop.xlane.xlu1 %2283 }
 0x6ae   : > { %2843 = vperm.xlu1 %11196, %v13630_v21   ;;  %v13652_v21 = vpop.xlane.xlu0 %2289  ;;  %v13662_v37 = vpop.permute.xlu1 %2777 }
 0x6af   : > { %19009 = vst [vmem:[#allocation123_spill] sm:$0xff] %v13662_v37 }
 0x6b2   : > { %v13659_v35 = vpop.permute.xlu0 %2780  ;;  %v13675_v19 = vpop.permute.xlu1 %2771 }
 0x6b3   : > { %19008 = vst [vmem:[#allocation122_spill] sm:$0xff] %v13659_v35  ;;  %19013 = vst [vmem:[#allocation127_spill] sm:$0xff] %v13675_v19 }
 0x6b6   : > { %2852 = vperm.xlu0 %11197, %v13643_v45   ;;  %v13669_v45 = vpop.permute.xlu0 %2774  ;;  %v13684_v51 = vpop.xlane.xlu1 %2295 }
 0x6b7   : > { %19011 = vst [vmem:[#allocation125_spill] sm:$0xff] %v13669_v45 }
 0x6ba   : > { %2846 = vperm.xlu0 %11197, %v13648_v24   ;;  %v13673_v24 = vadd.f32 %v13097_v60, %v13444_v44  ;;  %v13678_v35 = vpop.xlane.xlu0 %2301  ;;  %v13694_v37 = vpop.xlane.xlu1 %2291 }
 0x6bc   : > { %19012 = vst [vmem:[#allocation126_spill] sm:$0xff] %v13673_v24 }
 0x6be   : > { %2864 = vperm.xlu0 %11197, %v13657_v36   ;;  %v13682_v36 = vadd.f32 %v13093_v18, %v13449_v48  ;;  %v13691_v44 = vpop.xlane.xlu0 %2297 }
 0x6c0   : > { %19014 = vst [vmem:[#allocation128_spill] sm:$0xff] %v13682_v36 }
 0x6c2   : > { %2858 = vperm.xlu0 %11197, %v13666_v52   ;;  %v13689_v52 = vadd.f32 %v13077_v38, %v13453_v34  ;;  %v13700_v48 = vpop.permute.xlu0 %2792  ;;  %v13706_v34 = vadd.f32 %v13081_v4, %v13461_v56  ;;  %v13725_v56 = vadd.f32 %v13089_v47, %v13477_v40  ;;  %v13743_v40 = vadd.f32 %v13099_v28, %v13418_v17 }
 0x6c4   : > { %19015 = vst [vmem:[#allocation129_spill] sm:$0xff] %v13689_v52  ;;  %19017 = vst [vmem:[#allocation131_spill] sm:$0xff] %v13706_v34 }
 0x6c5   : > { %19020 = vst [vmem:[#allocation132_spill] sm:$0xff] %v13725_v56  ;;  %19023 = vst [vmem:[#allocation135_spill] sm:$0xff] %v13743_v40 }
 0x6c6   : > { %2876 = vperm.xlu0 %11197, %v13673_v24   ;;  %v13698_v24 = vadd.f32 %v13073_v54, %v13457_v6  ;;  %v13712_v45 = vpop.permute.xlu0 %2786  ;;  %v13716_v6 = vadd.f32 %v13079_v63, %v13466_v31 }
 0x6c8   : > { %19016 = vst [vmem:[#allocation130_spill] sm:$0xff] %v13698_v24 }
 0x6ca   : > { %2870 = vperm.xlu0 %11197, %v13682_v36   ;;  %v13708_v36 = vpop.permute.xlu1 %2789 }
 0x6ce   : > { %2888 = vperm.xlu0 %11197, %v13689_v52   ;;  %v19018_v52 = vld [vmem:[#allocation45_spill] sm:$0xff] }
 0x6cf   : > { %19019 = vst [vmem:[#allocation45_spill] sm:$0xff] %v13716_v6 }
 0x6d2   : > { %2882 = vperm.xlu0 %11197, %v13698_v24   ;;  %2343 = vadd.xlane.f32.xlu1 %v13233_v46  ;;  %v13719_v24 = vpop.permute.xlu1 %2783  ;;  %v13721_v46 = vpop.xlane.xlu0 %2309 }
 0x6d6   : > { %2900 = vperm.xlu0 %11197, %v13706_v34   ;;  %2339 = vadd.xlane.f32.xlu1 %v19018_v52  ;;  %v13728_v34 = vpop.xlane.xlu1 %2303  ;;  %v13732_v52 = vadd.f32 %v13085_v10, %v13484_v0  ;;  %v13734_v31 = vpop.xlane.xlu0 %2305  ;;  %v13753_v0 = vadd.f32 %v13093_v18, %v13521_v33  ;;  %v13771_v33 = vadd.f32 %v13117_v42, %v13446_v9 }
 0x6d7   : > { %v13791_v9 = vadd.f32 %v13081_v4, %v13562_v55  ;;  %v13809_v55 = vadd.f32 %v13083_v5, %v13459_v12 }
 0x6d8   : > { %19021 = vst [vmem:[#allocation133_spill] sm:$0xff] %v13732_v52  ;;  %19024 = vst [vmem:[#allocation136_spill] sm:$0xff] %v13753_v0 }
 0x6d9   : > { %19027 = vst [vmem:[#allocation139_spill] sm:$0xff] %v13771_v33  ;;  %19030 = vst [vmem:[#allocation142_spill] sm:$0xff] %v13791_v9 }
 0x6da   : > { %2894 = vperm.xlu0 %11197, %v13716_v6   ;;  %v13739_v6 = vadd.f32 %v13097_v60, %v13517_v2  ;;  %v13745_v19 = vpop.xlane.xlu1 %2299  ;;  %v13757_v2 = vadd.f32 %v13095_v20, %v13438_v3  ;;  %19033 = vst [vmem:[#allocation145_spill] sm:$0xff] %v13809_v55 }
 0x6dc   : > { %19022 = vst [vmem:[#allocation134_spill] sm:$0xff] %v13739_v6  ;;  %19025 = vst [vmem:[#allocation137_spill] sm:$0xff] %v13757_v2 }
 0x6de   : > { %2912 = vperm.xlu0 %11197, %v13725_v56   ;;  %v13747_v56 = vpop.permute.xlu0 %2804  ;;  %v13760_v17 = vpop.permute.xlu1 %2801 }
 0x6e2   : > { %2906 = vperm.xlu0 %11197, %v13732_v52   ;;  %v13762_v52 = vpop.permute.xlu0 %2798 }
 0x6e6   : > { %2924 = vperm.xlu0 %11197, %v13739_v6   ;;  %v13767_v6 = vadd.f32 %v13077_v38, %v13534_v14  ;;  %v13774_v3 = vpop.xlane.xlu0 %2317  ;;  %v13785_v14 = vpop.permute.xlu1 %2795 }
 0x6e7   : > { %2861 = vperm.xlu1 %11196, %v13743_v40   ;;  %v13779_v40 = vadd.f32 %v13073_v54, %v13540_v41 }
 0x6e8   : > { %19026 = vst [vmem:[#allocation138_spill] sm:$0xff] %v13767_v6 }
 0x6e9   : > { %19028 = vst [vmem:[#allocation140_spill] sm:$0xff] %v13779_v40 }
 0x6ea   : > { %2918 = vperm.xlu0 %11197, %v13753_v0   ;;  %v13797_v41 = vpop.xlane.xlu1 %2311 }
 0x6eb   : > { %2855 = vperm.xlu1 %11196, %v13757_v2   ;;  %v13783_v2 = vadd.f32 %v13105_v39, %v13451_v29  ;;  %v13805_v29 = vadd.f32 %v13079_v63, %v13571_v59  ;;  %v13823_v59 = vadd.f32 %v13091_v15, %v13463_v8 }
 0x6ed   : > { %19029 = vst [vmem:[#allocation141_spill] sm:$0xff] %v13783_v2  ;;  %19032 = vst [vmem:[#allocation144_spill] sm:$0xff] %v13805_v29 }
 0x6ee   : > { %2936 = vperm.xlu0 %11197, %v13767_v6   ;;  %v13799_v6 = vpop.xlane.xlu0 %2313  ;;  %19035 = vst [vmem:[#allocation147_spill] sm:$0xff] %v13823_v59 }
 0x6ef   : > { %2873 = vperm.xlu1 %11196, %v13771_v33   ;;  %v13795_v33 = vadd.f32 %v13075_v22, %v13455_v32  ;;  %v13814_v32 = vpop.xlane.xlu1 %2307 }
 0x6f1   : > { %19031 = vst [vmem:[#allocation143_spill] sm:$0xff] %v13795_v33 }
 0x6f2   : > { %2930 = vperm.xlu0 %11197, %v13779_v40  }
 0x6f3   : > { %2867 = vperm.xlu1 %11196, %v13783_v2   ;;  %v13811_v2 = vpop.permute.xlu0 %2816 }
 0x6f6   : > { %2948 = vperm.xlu0 %11197, %v13791_v9   ;;  %v13819_v9 = vadd.f32 %v13089_v47, %v13591_v1  ;;  %v13837_v1 = vpop.permute.xlu1 %2813 }
 0x6f7   : > { %2885 = vperm.xlu1 %11196, %v13795_v33   ;;  %v13826_v12 = vpop.permute.xlu0 %2810  ;;  %v13831_v33 = vadd.f32 %v13085_v10, %v13595_v50  ;;  %v13849_v50 = vadd.f32 %v13099_v28, %v13475_v30 }
 0x6f8   : > { %19034 = vst [vmem:[#allocation146_spill] sm:$0xff] %v13819_v9 }
 0x6f9   : > { %19036 = vst [vmem:[#allocation148_spill] sm:$0xff] %v13831_v33  ;;  %19039 = vst [vmem:[#allocation151_spill] sm:$0xff] %v13849_v50 }
 0x6fa   : > { %2942 = vperm.xlu0 %11197, %v13805_v29  }
 0x6fb   : > { %2879 = vperm.xlu1 %11196, %v13809_v55   ;;  %v13835_v55 = vadd.f32 %v13087_v11, %v13469_v61  ;;  %v13840_v8 = vpop.xlane.xlu0 %2325  ;;  %v13852_v61 = vpop.permute.xlu1 %2807 }
 0x6fd   : > { %19037 = vst [vmem:[#allocation149_spill] sm:$0xff] %v13835_v55 }
 0x6fe   : > { %2960 = vperm.xlu0 %11197, %v13819_v9   ;;  %v13845_v9 = vadd.f32 %v13097_v60, %v13610_v23 }
 0x6ff   : > { %2897 = vperm.xlu1 %11196, %v13823_v59   ;;  %v13857_v59 = vadd.f32 %v13093_v18, %v13615_v58  ;;  %v13863_v23 = vpop.xlane.xlu0 %2321  ;;  %v2320_v30 = vpop.xlane.xlu1 %2319 }
 0x700   : > { %19038 = vst [vmem:[#allocation150_spill] sm:$0xff] %v13845_v9 }
 0x701   : > { %19040 = vst [vmem:[#allocation152_spill] sm:$0xff] %v13857_v59 }
 0x702   : > { %2954 = vperm.xlu0 %11197, %v13831_v33  }
 0x703   : > { %2891 = vperm.xlu1 %11196, %v13835_v55   ;;  %v13861_v55 = vadd.f32 %v13095_v20, %v13479_v62  ;;  %v13875_v58 = vpop.permute.xlu0 %2828  ;;  %v13881_v62 = vadd.f32 %v13073_v54, %v13650_v13 }
 0x704   : > { %19044 = vst [vmem:[#allocation156_spill] sm:$0xff] %v13875_v58 }
 0x705   : > { %19041 = vst [vmem:[#allocation153_spill] sm:$0xff] %v13861_v55  ;;  %19045 = vst [vmem:[#allocation157_spill] sm:$0xff] %v13881_v62 }
 0x706   : > { %2972 = vperm.xlu0 %11197, %v13845_v9   ;;  %v13869_v9 = vadd.f32 %v13077_v38, %v13637_v26  ;;  %v2316_v26 = vpop.xlane.xlu1 %2315 }
 0x707   : > { %2909 = vperm.xlu1 %11196, %v13849_v50   ;;  %v13873_v50 = vadd.f32 %v13117_v42, %v13501_v27  ;;  %v13893_v27 = vadd.f32 %v13081_v4, %v13684_v51  ;;  %v13911_v51 = vadd.f32 %v13083_v5, %v13527_v43  ;;  %v13931_v43 = vadd.f32 %v13085_v10, %v13745_v19 }
 0x708   : > { %19042 = vst [vmem:[#allocation154_spill] sm:$0xff] %v13869_v9 }
 0x709   : > { %19043 = vst [vmem:[#allocation155_spill] sm:$0xff] %v13873_v50  ;;  %19047 = vst [vmem:[#allocation159_spill] sm:$0xff] %v13893_v27 }
 0x70a   : > { %2966 = vperm.xlu0 %11197, %v13857_v59   ;;  %v13888_v59 = vpop.permute.xlu0 %2822  ;;  %v13900_v13 = vpop.permute.xlu1 %2825  ;;  %19050 = vst [vmem:[#allocation162_spill] sm:$0xff] %v13911_v51  ;;  %19054 = vst [vmem:[#allocation164_spill] sm:$0xff] %v13931_v43 }
 0x70b   : > { %2903 = vperm.xlu1 %11196, %v13861_v55   ;;  %v13885_v55 = vadd.f32 %v13105_v39, %v13511_v16 }
 0x70d   : > { %19046 = vst [vmem:[#allocation158_spill] sm:$0xff] %v13885_v55 }
 0x70e   : > { %2984 = vperm.xlu0 %11197, %v13869_v9   ;;  %v13902_v16 = vpop.xlane.xlu0 %2333  ;;  %v13907_v9 = vadd.f32 %v13079_v63, %v13694_v37 }
 0x70f   : > { %2921 = vperm.xlu1 %11196, %v13873_v50   ;;  %v13897_v50 = vadd.f32 %v13075_v22, %v13523_v49  ;;  %v13917_v49 = vadd.f32 %v13089_v47, %v13728_v34 }
 0x710   : > { %19049 = vst [vmem:[#allocation161_spill] sm:$0xff] %v13907_v9 }
 0x711   : > { %19048 = vst [vmem:[#allocation160_spill] sm:$0xff] %v13897_v50  ;;  %19051 = vst [vmem:[#allocation163_spill] sm:$0xff] %v13917_v49 }
 0x712   : > { %2978 = vperm.xlu0 %11197, %v13881_v62   ;;  %v13925_v37 = vpop.xlane.xlu0 %2329 }
 0x713   : > { %2915 = vperm.xlu1 %11196, %v13885_v55  }
 0x716   : > { %2996 = vperm.xlu0 %11197, %v13893_v27   ;;  %v19052_v27 = vld [vmem:[#allocation95_spill] sm:$0xff]  ;;  %v13937_v62 = vpop.permute.xlu0 %2840 }
 0x717   : > { %2933 = vperm.xlu1 %11196, %v13897_v50   ;;  %v13921_v55 = vadd.f32 %v13091_v15, %v19052_v27  ;;  %v13923_v50 = vpop.permute.xlu1 %2819  ;;  %v13943_v27 = vadd.f32 %v13097_v60, %v13797_v41 }
 0x719   : > { %19053 = vst [vmem:[#allocation95_spill] sm:$0xff] %v13921_v55  ;;  %19057 = vst [vmem:[#allocation165_spill] sm:$0xff] %v13943_v27 }
 0x71a   : > { %2990 = vperm.xlu0 %11197, %v13907_v9  }
 0x71b   : > { %2927 = vperm.xlu1 %11196, %v13911_v51   ;;  %v19055_v51 = vld [vmem:[#allocation97_spill] sm:$0xff]  ;;  %v2328_v9 = vpop.xlane.xlu1 %2327 }
 0x71c   : > { %v13935_v34 = vadd.f32 %v13087_v11, %v19055_v51  ;;  %v13950_v51 = vpop.permute.xlu0 %2834 }
 0x71e   : > { %3008 = vperm.xlu0 %11197, %v13917_v49   ;;  %19056 = vst [vmem:[#allocation97_spill] sm:$0xff] %v13935_v34 }
 0x71f   : > { %2945 = vperm.xlu1 %11196, %v13921_v55   ;;  %v19058_v55 = vld [vmem:[#allocation104_spill] sm:$0xff]  ;;  %v2324_v19 = vpop.xlane.xlu1 %2323 }
 0x720   : > { %v13947_v49 = vadd.f32 %v13099_v28, %v19058_v55  ;;  %v13966_v55 = vadd.f32 %v13077_v38, %v2320_v30  ;;  %v13990_v30 = vadd.f32 %v13081_v4, %v2328_v9  ;;  %v14016_v9 = vadd.f32 %v13091_v15, %v13639_v7 }
 0x721   : > { %v14035_v7 = vadd.f32 %v13099_v28, %v13678_v35  ;;  %v14056_v35 = vadd.f32 %v13105_v39, %v13734_v31 }
 0x722   : > { %3002 = vperm.xlu0 %11197, %v13931_v43   ;;  %19059 = vst [vmem:[#allocation104_spill] sm:$0xff] %v13947_v49  ;;  %v13955_v43 = vadd.f32 %v13093_v18, %v13814_v32  ;;  %19063 = vst [vmem:[#allocation167_spill] sm:$0xff] %v13966_v55  ;;  %v13977_v32 = vadd.f32 %v13073_v54, %v2316_v26 }
 0x723   : > { %2939 = vperm.xlu1 %11196, %v13935_v34   ;;  %v19061_v34 = vld [vmem:[#allocation107_spill] sm:$0xff]  ;;  %v13972_v29 = vpop.permute.xlu1 %2837  ;;  %19069 = vst [vmem:[#allocation169_spill] sm:$0xff] %v13990_v30  ;;  %19075 = vst [vmem:[#allocation175_spill] sm:$0xff] %v14016_v9 }
 0x724   : > { %19060 = vst [vmem:[#allocation166_spill] sm:$0xff] %v13955_v43  ;;  %v13959_v33 = vadd.f32 %v13095_v20, %v19061_v34  ;;  %19066 = vst [vmem:[#allocation168_spill] sm:$0xff] %v13977_v32  ;;  %v19067_v34 = vld [vmem:[#allocation112_spill] sm:$0xff] }
 0x725   : > { %19080 = vst [vmem:[#allocation180_spill] sm:$0xff] %v14035_v7  ;;  %19086 = vst [vmem:[#allocation186_spill] sm:$0xff] %v14056_v35 }
 0x726   : > { %3020 = vperm.xlu0 %11197, %v13943_v27   ;;  %19062 = vst [vmem:[#allocation107_spill] sm:$0xff] %v13959_v33  ;;  %v19064_v27 = vld [vmem:[#allocation111_spill] sm:$0xff] }
 0x727   : > { %2957 = vperm.xlu1 %11196, %v13947_v49   ;;  %v13970_v49 = vadd.f32 %v13117_v42, %v19064_v27  ;;  %v13986_v38 = vpop.permute.xlu1 %2831  ;;  %v13994_v27 = vadd.f32 %v13075_v22, %v13612_v25 }
 0x729   : > { %v13962_v41 = vpop.xlane.xlu0 %2341  ;;  %19065 = vst [vmem:[#allocation111_spill] sm:$0xff] %v13970_v49  ;;  %19070 = vst [vmem:[#allocation170_spill] sm:$0xff] %v13994_v27 }
 0x72a   : > { %3014 = vperm.xlu0 %11197, %v13955_v43   ;;  %v13981_v43 = vadd.f32 %v13105_v39, %v19067_v34  ;;  %v14001_v34 = vadd.f32 %v13079_v63, %v2324_v19  ;;  %v14027_v19 = vadd.f32 %v13087_v11, %v13652_v21 }
 0x72b   : > { %2951 = vperm.xlu1 %11196, %v13959_v33   ;;  %v2336_v26 = vpop.xlane.xlu1 %2335 }
 0x72c   : > { %19068 = vst [vmem:[#allocation112_spill] sm:$0xff] %v13981_v43  ;;  %19072 = vst [vmem:[#allocation172_spill] sm:$0xff] %v14001_v34  ;;  %v14012_v25 = vadd.f32 %v13089_v47, %v2336_v26 }
 0x72d   : > { %v13983_v33 = vpop.xlane.xlu0 %2337  ;;  %19078 = vst [vmem:[#allocation178_spill] sm:$0xff] %v14027_v19 }
 0x72e   : > { %3032 = vperm.xlu0 %11197, %v13966_v55   ;;  %19074 = vst [vmem:[#allocation174_spill] sm:$0xff] %v14012_v25  ;;  %v19121_v55 = vlaneseq }
 0x72f   : > { %2969 = vperm.xlu1 %11196, %v13970_v49   ;;  %v14005_v49 = vadd.f32 %v13083_v5, %v13617_v57 }
 0x731   : > { %19073 = vst [vmem:[#allocation173_spill] sm:$0xff] %v14005_v49 }
 0x732   : > { %3026 = vperm.xlu0 %11197, %v13977_v32   ;;  %v14172_v32 = vand.u32 127, %v19121_v55 }
 0x733   : > { %2963 = vperm.xlu1 %11196, %v13981_v43  }
 0x735   : > { %v13996_v54 = vpop.permute.xlu0 %2852 }
 0x736   : > { %19071 = vst [vmem:[#allocation171_spill] sm:$0xff] %v13996_v54  ;;  %3044 = vperm.xlu0 %11197, %v13990_v30  }
 0x737   : > { %2981 = vperm.xlu1 %11196, %v13994_v27   ;;  %v2332_v27 = vpop.xlane.xlu1 %2331 }
 0x738   : > { %v14023_v57 = vadd.f32 %v13085_v10, %v2332_v27  ;;  %v14042_v10 = vadd.f32 %v13095_v20, %v13691_v44  ;;  %v14049_v27 = vadd.f32 %v13117_v42, %v13721_v46  ;;  %v14063_v44 = vadd.f32 %v13075_v22, %v13774_v3 }
 0x739   : > { %v14007_v4 = vpop.permute.xlu0 %2846  ;;  %v14081_v22 = vadd.f32 %v13091_v15, %v13840_v8 }
 0x73a   : > { %3038 = vperm.xlu0 %11197, %v14001_v34   ;;  %19077 = vst [vmem:[#allocation177_spill] sm:$0xff] %v14023_v57  ;;  %19082 = vst [vmem:[#allocation182_spill] sm:$0xff] %v14042_v10 }
 0x73b   : > { %2975 = vperm.xlu1 %11196, %v14005_v49   ;;  %19084 = vst [vmem:[#allocation184_spill] sm:$0xff] %v14049_v27  ;;  %19087 = vst [vmem:[#allocation187_spill] sm:$0xff] %v14063_v44 }
 0x73c   : > { %19092 = vst [vmem:[#allocation192_spill] sm:$0xff] %v14081_v22 }
 0x73d   : > { %v14018_v63 = vpop.permute.xlu0 %2864 }
 0x73e   : > { %19076 = vst [vmem:[#allocation176_spill] sm:$0xff] %v14018_v63  ;;  %3056 = vperm.xlu0 %11197, %v14012_v25  }
 0x73f   : > { %2993 = vperm.xlu1 %11196, %v14016_v9  }
 0x741   : > { %v14029_v47 = vpop.permute.xlu0 %2858 }
 0x742   : > { %19079 = vst [vmem:[#allocation179_spill] sm:$0xff] %v14029_v47  ;;  %3050 = vperm.xlu0 %11197, %v14023_v57  }
 0x743   : > { %2987 = vperm.xlu1 %11196, %v14027_v19  }
 0x745   : > { %v14037_v26 = vpop.permute.xlu0 %2876 }
 0x746   : > { %19081 = vst [vmem:[#allocation181_spill] sm:$0xff] %v14037_v26  ;;  %v19124_v26 = vld [vmem:[#allocation29_spill] sm:$0xff] }
 0x747   : > { %3005 = vperm.xlu1 %11196, %v14035_v7  }
 0x749   : > { %v14044_v21 = vpop.permute.xlu0 %2870 }
 0x74a   : > { %19083 = vst [vmem:[#allocation183_spill] sm:$0xff] %v14044_v21  ;;  %v3097_v21 = vadd.s32 4294967264, %v14172_v32 }
 0x74b   : > { %2999 = vperm.xlu1 %11196, %v14042_v10   ;;  %v14065_v10 = vpop.permute.xlu1 %2849 }
 0x74c   : > { %19088 = vst [vmem:[#allocation188_spill] sm:$0xff] %v14065_v10 }
 0x74d   : > { %v14051_v9 = vpop.permute.xlu0 %2888 }
 0x74e   : > { %19085 = vst [vmem:[#allocation185_spill] sm:$0xff] %v14051_v9 }
 0x74f   : > { %3017 = vperm.xlu1 %11196, %v14049_v27   ;;  %v14072_v27 = vadd.f32 %v13083_v5, %v13799_v6  ;;  %v14076_v19 = vpop.permute.xlu1 %2843  ;;  %v14091_v5 = vadd.f32 %v13087_v11, %v13863_v23  ;;  %v14112_v23 = vadd.f32 %v13095_v20, %v13925_v37  ;;  %v14130_v20 = vadd.f32 %v13105_v39, %v13983_v33 }
 0x751   : > { %v14058_v7 = vpop.permute.xlu0 %2882  ;;  %19090 = vst [vmem:[#allocation190_spill] sm:$0xff] %v14072_v27  ;;  %19095 = vst [vmem:[#allocation195_spill] sm:$0xff] %v14091_v5 }
 0x752   : > { %19101 = vst [vmem:[#allocation201_spill] sm:$0xff] %v14112_v23  ;;  %19107 = vst [vmem:[#allocation207_spill] sm:$0xff] %v14130_v20 }
 0x753   : > { %3011 = vperm.xlu1 %11196, %v14056_v35  }
 0x755   : > { %v14067_v46 = vpop.permute.xlu0 %2900 }
 0x756   : > { %19089 = vst [vmem:[#allocation189_spill] sm:$0xff] %v14067_v46  ;;  %v19138_v46 = vld [vmem:[#allocation110_spill] sm:$0xff] }
 0x757   : > { %3029 = vperm.xlu1 %11196, %v14063_v44  }
 0x759   : > { %v14074_v31 = vpop.permute.xlu0 %2894 }
 0x75a   : > { %19091 = vst [vmem:[#allocation191_spill] sm:$0xff] %v14074_v31 }
 0x75b   : > { %3023 = vperm.xlu1 %11196, %v14072_v27  }
 0x75d   : > { %v14083_v3 = vpop.permute.xlu0 %2912 }
 0x75e   : > { %19093 = vst [vmem:[#allocation193_spill] sm:$0xff] %v14083_v3  ;;  %v19129_v3 = vld [vmem:[#allocation84_spill] sm:$0xff] }
 0x75f   : > { %v2344_v35 = vpop.xlane.xlu1 %2343  ;;  %3041 = vperm.xlu1 %11196, %v14081_v22   ;;  %v14102_v22 = vadd.f32 %v13099_v28, %v13902_v16  ;;  %v14121_v28 = vadd.f32 %v13117_v42, %v13962_v41 }
 0x760   : > { %v14087_v44 = vadd.f32 %v13097_v60, %v2344_v35 }
 0x761   : > { %v14093_v6 = vpop.permute.xlu0 %2906  ;;  %19098 = vst [vmem:[#allocation198_spill] sm:$0xff] %v14102_v22  ;;  %19104 = vst [vmem:[#allocation204_spill] sm:$0xff] %v14121_v28 }
 0x762   : > { %19094 = vst [vmem:[#allocation194_spill] sm:$0xff] %v14087_v44  ;;  %19096 = vst [vmem:[#allocation196_spill] sm:$0xff] %v14093_v6  ;;  %3068 = vperm.xlu0 %11197, %v14087_v44  }
 0x763   : > { %3035 = vperm.xlu1 %11196, %v14091_v5   ;;  %v2340_v15 = vpop.xlane.xlu1 %2339 }
 0x764   : > { %v14098_v8 = vadd.f32 %v13093_v18, %v2340_v15 }
 0x765   : > { %v14104_v60 = vpop.permute.xlu0 %2924 }
 0x766   : > { %19097 = vst [vmem:[#allocation197_spill] sm:$0xff] %v14098_v8  ;;  %19099 = vst [vmem:[#allocation199_spill] sm:$0xff] %v14104_v60  ;;  %3062 = vperm.xlu0 %11197, %v14098_v8  }
 0x767   : > { %3053 = vperm.xlu1 %11196, %v14102_v22   ;;  %v14108_v11 = vpop.permute.xlu1 %2861 }
 0x768   : > { %19100 = vst [vmem:[#allocation200_spill] sm:$0xff] %v14108_v11 }
 0x769   : > { %v14114_v35 = vpop.permute.xlu0 %2918 }
 0x76a   : > { %19102 = vst [vmem:[#allocation202_spill] sm:$0xff] %v14114_v35  ;;  %v14189_v35 = vsub.s32 %v14172_v32, %v19124_v26 }
 0x76b   : > { %3047 = vperm.xlu1 %11196, %v14112_v23   ;;  %v14117_v18 = vpop.permute.xlu1 %2855 }
 0x76c   : > { %19103 = vst [vmem:[#allocation203_spill] sm:$0xff] %v14117_v18  ;;  %19127 = vst [vmem:[#allocation225_spill] sm:$0xff] %v14189_v35  ;;  %v19149_v18 = vld [vmem:[#allocation106_spill] sm:$0xff] }
 0x76d   : > { %v14123_v16 = vpop.permute.xlu0 %2936 }
 0x76e   : > { %19105 = vst [vmem:[#allocation205_spill] sm:$0xff] %v14123_v16 }
 0x76f   : > { %3065 = vperm.xlu1 %11196, %v14121_v28   ;;  %v14126_v15 = vpop.permute.xlu1 %2873 }
 0x770   : > { %19106 = vst [vmem:[#allocation206_spill] sm:$0xff] %v14126_v15  ;;  %v3083_v15 = vadd.s32 4294967280, %v14172_v32 }
 0x771   : > { %v14132_v37 = vpop.permute.xlu0 %2930 }
 0x773   : > { %3059 = vperm.xlu1 %11196, %v14130_v20   ;;  %v14135_v22 = vpop.permute.xlu1 %2867 }
 0x774   : > { %19108 = vst [vmem:[#allocation208_spill] sm:$0xff] %v14135_v22  ;;  %v19131_v22 = vld [vmem:[#allocation82_spill] sm:$0xff] }
 0x775   : > { %v14137_v23 = vpop.permute.xlu0 %2948 }
 0x776   : > { %19109 = vst [vmem:[#allocation209_spill] sm:$0xff] %v14137_v23  ;;  %v3125_v23 = vadd.s32 4294967232, %v14172_v32 }
 0x777   : > { %v14139_v42 = vpop.permute.xlu1 %2885 }
 0x779   : > { %v14143_v5 = vpop.permute.xlu0 %2942 }
 0x77a   : > { %19110 = vst [vmem:[#allocation210_spill] sm:$0xff] %v14143_v5  ;;  %v19143_v5 = vld [vmem:[#allocation109_spill] sm:$0xff] }
 0x77b   : > { %v14141_v41 = vpop.permute.xlu1 %2879 }
 0x77d   : > { %v14147_v27 = vpop.permute.xlu0 %2960 }
 0x77e   : > { %19112 = vst [vmem:[#allocation212_spill] sm:$0xff] %v14147_v27  ;;  %v3090_v27 = vadd.s32 4294967272, %v14172_v32 }
 0x77f   : > { %v14145_v28 = vpop.permute.xlu1 %2897 }
 0x780   : > { %19111 = vst [vmem:[#allocation211_spill] sm:$0xff] %v14145_v28  ;;  %v14211_v63 = vsub.s32 %v3090_v27, %v19124_v26 }
 0x781   : > { %v14153_v44 = vpop.permute.xlu0 %2954 }
 0x782   : > { %19114 = vst [vmem:[#allocation214_spill] sm:$0xff] %v14153_v44  ;;  %v3075_v44 = vrot.slane %v19131_v22, %v14189_v35  ;;  %19135 = vst [vmem:[#allocation229_spill] sm:$0xff] %v14211_v63  ;;  %v3118_v22 = vadd.s32 4294967240, %v14172_v32 }
 0x783   : > { %v14149_v39 = vpop.permute.xlu1 %2891 }
 0x784   : > { %v14240_v54 = vsub.s32 %v3118_v22, %v19124_v26  ;;  %v3160_v22 = vadd.s32 4294967192, %v14172_v32 }
 0x785   : > { %v14157_v8 = vpop.permute.xlu0 %2972 }
 0x786   : > { %19116 = vst [vmem:[#allocation216_spill] sm:$0xff] %v14157_v8  ;;  %v3076_v8 = vadd.s32 4294967288, %v14172_v32 }
 0x787   : > { %v14151_v33 = vpop.permute.xlu1 %2909 }
 0x788   : > { %19113 = vst [vmem:[#allocation213_spill] sm:$0xff] %v14151_v33  ;;  %v14199_v33 = vsub.s32 %v3083_v15, %v19124_v26  ;;  %v3111_v15 = vadd.s32 4294967248, %v14172_v32 }
 0x789   : > { %v14163_v57 = vpop.permute.xlu0 %2966 }
 0x78a   : > { %19119 = vst [vmem:[#allocation219_spill] sm:$0xff] %v14163_v57  ;;  %19130 = vst [vmem:[#allocation84_spill] sm:$0xff] %v14199_v33  ;;  %v3193_v31 = vrot.slane %v19149_v18, %v14199_v33 }
 0x78b   : > { %v14155_v20 = vpop.permute.xlu1 %2903 }
 0x78c   : > { %19115 = vst [vmem:[#allocation215_spill] sm:$0xff] %v14155_v20 }
 0x78d   : > { %v14167_v43 = vpop.permute.xlu0 %2984 }
 0x78e   : > { %19120 = vst [vmem:[#allocation220_spill] sm:$0xff] %v14167_v43 }
 0x78f   : > { %v14159_v25 = vpop.permute.xlu1 %2921 }
 0x790   : > { %19117 = vst [vmem:[#allocation217_spill] sm:$0xff] %v14159_v25  ;;  %v14182_v25 = vsub.s32 %v3076_v8, %v19124_v26 }
 0x791   : > { %v14176_v0 = vpop.permute.xlu0 %2978 }
 0x792   : > { %19125 = vst [vmem:[#allocation223_spill] sm:$0xff] %v14182_v25  ;;  %v3080_v8 = vrot.slane %v19129_v3, %v14182_v25  ;;  %v3188_v47 = vrot.slane %v19138_v46, %v14182_v25  ;;  %v3184_v46 = vrot.slane %v19143_v5, %v14189_v35 }
 0x793   : > { %v14161_v49 = vpop.permute.xlu1 %2915 }
 0x794   : > { %19118 = vst [vmem:[#allocation218_spill] sm:$0xff] %v14161_v49  ;;  %v3104_v49 = vadd.s32 4294967256, %v14172_v32  ;;  %v3082_v3 = vsel %vm3081_vm1, %v3080_v8, %v3075_v44  ;;  %v19140_v44 = vld [vmem:[#allocation89_spill] sm:$0xff]  ;;  %v3189_v5 = vsel %vm3081_vm1, %v3188_v47, %v3184_v46  ;;  %v3267_v47 = vrot.slane %v13712_v45, %v14182_v25 }
 0x795   : > { %v14185_v57 = vpop.permute.xlu0 %2996  ;;  %19145 = vst [vmem:[#allocation89_spill] sm:$0xff] %v14240_v54  ;;  %v3263_v45 = vrot.slane %v13719_v24, %v14189_v35 }
 0x796   : > { %19126 = vst [vmem:[#allocation224_spill] sm:$0xff] %v14185_v57  ;;  %v14214_v57 = vsub.s32 %v3104_v49, %v19124_v26  ;;  %v3132_v49 = vadd.s32 4294967224, %v14172_v32 }
 0x797   : > { %v14165_v30 = vpop.permute.xlu1 %2933  ;;  %v3268_v24 = vsel %vm3081_vm1, %v3267_v47, %v3263_v45  ;;  %v19163_v47 = vld [vmem:[#allocation113_spill] sm:$0xff]  ;;  %v3174_v45 = vadd.s32 4294967176, %v14172_v32 }
 0x798   : > { %19136 = vst [vmem:[#allocation230_spill] sm:$0xff] %v14214_v57 }
 0x799   : > { %v14208_v11 = vpop.permute.xlu0 %2990 }
 0x79a   : > { %19134 = vst [vmem:[#allocation228_spill] sm:$0xff] %v14208_v11  ;;  %v19142_v11 = vld [vmem:[#allocation91_spill] sm:$0xff] }
 0x79b   : > { %v14169_v34 = vpop.permute.xlu1 %2927 }
 0x79f   : > { %v14174_v40 = vpop.permute.xlu1 %2945 }
 0x7a0   : > { %19122 = vst [vmem:[#allocation221_spill] sm:$0xff] %v14174_v40  ;;  %v19141_v40 = vld [vmem:[#allocation85_spill] sm:$0xff] }
 0x7a1   : > { %v3094_v28 = vrot.slane %v19141_v40, %v14211_v63  ;;  %v3139_v40 = vadd.s32 4294967216, %v14172_v32 }
 0x7a3   : > { %v14179_v60 = vpop.permute.xlu1 %2939  ;;  %v14271_v18 = vsub.s32 %v3139_v40, %v19124_v26 }
 0x7a4   : > { %19123 = vst [vmem:[#allocation222_spill] sm:$0xff] %v14179_v60  ;;  %v19159_v60 = vld [vmem:[#allocation94_spill] sm:$0xff] }
 0x7a7   : > { %v14191_v55 = vpop.permute.xlu1 %2957 }
 0x7a8   : > { %19128 = vst [vmem:[#allocation226_spill] sm:$0xff] %v14191_v55  ;;  %v14206_v55 = vsub.s32 %v3097_v21, %v19124_v26  ;;  %v19137_v21 = vld [vmem:[#allocation38_spill] sm:$0xff] }
 0x7aa   : > { %19133 = vst [vmem:[#allocation227_spill] sm:$0xff] %v14206_v55  ;;  %v3101_v8 = vrot.slane %v19140_v44, %v14206_v55  ;;  %v3146_v44 = vadd.s32 4294967208, %v14172_v32 }
 0x7ab   : > { %v14203_v6 = vpop.permute.xlu1 %2951 }
 0x7ac   : > { %19132 = vst [vmem:[#allocation82_spill] sm:$0xff] %v14203_v6  ;;  %v3087_v6 = vrot.slane %v19137_v21, %v14199_v33  ;;  %v3108_v21 = vrot.slane %v19142_v11, %v14214_v57 }
 0x7ae   : > { %v3089_v20 = vsel %vm3088_vm2, %v3087_v6, %v3082_v3  ;;  %v14243_v6 = vsub.s32 %v3125_v23, %v19124_v26  ;;  %v14245_v3 = vpop.permute.xlu0 %3008 }
 0x7af   : > { %v14224_v27 = vpop.permute.xlu1 %2969  ;;  %19147 = vst [vmem:[#allocation91_spill] sm:$0xff] %v14245_v3  ;;  %v3096_v11 = vsel %vm3095_vm3, %v3094_v28, %v3089_v20  ;;  %v14259_v3 = vsub.s32 %v3132_v49, %v19124_v26  ;;  %v3167_v28 = vadd.s32 4294967184, %v14172_v32  ;;  %v19151_v20 = vld [vmem:[#allocation87_spill] sm:$0xff]  ;;  %v19154_v49 = vld [vmem:[#allocation108_spill] sm:$0xff] }
 0x7b0   : > { %19139 = vst [vmem:[#allocation38_spill] sm:$0xff] %v14224_v27  ;;  %v14237_v27 = vsub.s32 %v3111_v15, %v19124_v26  ;;  %19146 = vst [vmem:[#allocation85_spill] sm:$0xff] %v14243_v6  ;;  %v3153_v15 = vadd.s32 4294967200, %v14172_v32  ;;  %v3103_v23 = vsel %vm3102_vm4, %v3101_v8, %v3096_v11  ;;  %v19152_v8 = vld [vmem:[#allocation42_spill] sm:$0xff]  ;;  %v3198_v16 = vrot.slane %v19154_v49, %v14211_v63 }
 0x7b1   : > { %19150 = vst [vmem:[#allocation106_spill] sm:$0xff] %v14259_v3  ;;  %v3110_v43 = vsel %vm3109_vm5, %v3108_v21, %v3103_v23  ;;  %v3203_v11 = vrot.slane %v19152_v8, %v14206_v55  ;;  %19153 = vst [vmem:[#allocation87_spill] sm:$0xff] %v14271_v18  ;;  %v19155_v21 = vld [vmem:[#allocation43_spill] sm:$0xff]  ;;  %v19158_v8 = vld [vmem:[#allocation90_spill] sm:$0xff] }
 0x7b2   : > { %19144 = vst [vmem:[#allocation110_spill] sm:$0xff] %v14237_v27  ;;  %v3115_v46 = vrot.slane %v19151_v20, %v14237_v27  ;;  %v3208_v23 = vrot.slane %v19155_v21, %v14214_v57  ;;  %v14284_v40 = vpop.permute.xlu0 %3002  ;;  %v3122_v49 = vrot.slane %v19158_v8, %v14240_v54  ;;  %v3136_v21 = vrot.slane %v19159_v60, %v14259_v3 }
 0x7b3   : > { %v14251_v58 = vpop.permute.xlu1 %2963  ;;  %v14302_v8 = vsub.s32 %v3160_v22, %v19124_v26  ;;  %v3277_v22 = vrot.slane %v13700_v48, %v14211_v63  ;;  %v19166_v48 = vld [vmem:[#allocation118_spill] sm:$0xff] }
 0x7b4   : > { %19148 = vst [vmem:[#allocation109_spill] sm:$0xff] %v14251_v58  ;;  %v3194_v58 = vsel %vm3088_vm2, %v3193_v31, %v3189_v5  ;;  %v3117_v20 = vsel %vm3116_vm6, %v3115_v46, %v3110_v43  ;;  %v19157_v31 = vld [vmem:[#allocation93_spill] sm:$0xff]  ;;  %v3272_v46 = vrot.slane %v13708_v36, %v14199_v33  ;;  %v3282_v36 = vrot.slane %v13785_v14, %v14206_v55 }
 0x7b5   : > { %v3129_v5 = vrot.slane %v19157_v31, %v14243_v6  ;;  %v3199_v9 = vsel %vm3095_vm3, %v3198_v16, %v3194_v58  ;;  %v14299_v31 = vsub.s32 %v3153_v15, %v19124_v26  ;;  %19162 = vst [vmem:[#allocation93_spill] sm:$0xff] %v14302_v8  ;;  %v3124_v60 = vsel %vm18483_vm7, %v3122_v49, %v3117_v20  ;;  %v19164_v20 = vld [vmem:[#allocation92_spill] sm:$0xff] }
 0x7b6   : > { %v3204_v43 = vsel %vm3102_vm4, %v3203_v11, %v3199_v9  ;;  %v3213_v9 = vrot.slane %v19163_v47, %v14237_v27  ;;  %v3273_v11 = vsel %vm3088_vm2, %v3272_v46, %v3268_v24  ;;  %v3223_v24 = vrot.slane %v13633_v53, %v14243_v6  ;;  %v14325_v14 = vpop.permute.xlu0 %3020  ;;  %v19168_v47 = vld [vmem:[#allocation40_spill] sm:$0xff] }
 0x7b7   : > { %v14279_v10 = vpop.permute.xlu1 %2981  ;;  %19161 = vst [vmem:[#allocation43_spill] sm:$0xff] %v14299_v31  ;;  %v3209_v58 = vsel %vm3109_vm5, %v3208_v23, %v3204_v43  ;;  %v3287_v23 = vrot.slane %v13762_v52, %v14214_v57  ;;  %v3228_v46 = vrot.slane %v19166_v48, %v14259_v3  ;;  %v3278_v52 = vsel %vm3095_vm3, %v3277_v22, %v3273_v11 }
 0x7b8   : > { %19156 = vst [vmem:[#allocation42_spill] sm:$0xff] %v14279_v10  ;;  %v14293_v10 = vsub.s32 %v3146_v44, %v19124_v26  ;;  %v3131_v44 = vsel %vm18482_vm8, %v3129_v5, %v3124_v60  ;;  %v3143_v5 = vrot.slane %v19164_v20, %v14271_v18  ;;  %v3214_v49 = vsel %vm3116_vm6, %v3213_v9, %v3209_v58  ;;  %v19167_v58 = vld [vmem:[#allocation99_spill] sm:$0xff]  ;;  %v19169_v20 = vld [vmem:[#allocation102_spill] sm:$0xff] }
 0x7b9   : > { %v3138_v15 = vsel %vm18479_vm9, %v3136_v21, %v3131_v44  ;;  %v19165_v21 = vld [vmem:[#allocation114_spill] sm:$0xff]  ;;  %v3157_v44 = vrot.slane %v19167_v58, %v14299_v31  ;;  %v3283_v53 = vsel %vm3102_vm4, %v3282_v36, %v3278_v52  ;;  %v14345_v22 = vsub.s32 %v3167_v28, %v19124_v26  ;;  %v19172_v28 = vld [vmem:[#allocation115_spill] sm:$0xff] }
 0x7ba   : > { %19160 = vst [vmem:[#allocation108_spill] sm:$0xff] %v14293_v10  ;;  %v3218_v43 = vrot.slane %v19165_v21, %v14240_v54  ;;  %v3145_v60 = vsel %vm18481_vm10, %v3143_v5, %v3138_v15  ;;  %v3150_v9 = vrot.slane %v19168_v47, %v14293_v10  ;;  %v3164_v21 = vrot.slane %v19169_v20, %v14302_v8  ;;  %v19174_v20 = vld [vmem:[#allocation127_spill] sm:$0xff] }
 0x7bb   : > { %v14306_v16 = vpop.permute.xlu1 %2975  ;;  %v3288_v11 = vsel %vm3109_vm5, %v3287_v23, %v3283_v53  ;;  %19170 = vst [vmem:[#allocation90_spill] sm:$0xff] %v14345_v22  ;;  %v3292_v5 = vrot.slane %v13760_v17, %v14237_v27  ;;  %v14351_v36 = vsub.s32 %v3174_v45, %v19124_v26  ;;  %v14363_v17 = vpop.permute.xlu0 %3014 }
 0x7bc   : > { %v3219_v48 = vsel %vm18483_vm7, %v3218_v43, %v3214_v49  ;;  %v3152_v52 = vsel %vm3151_vm11, %v3150_v9, %v3145_v60  ;;  %v3233_v49 = vrot.slane %v19172_v28, %v14271_v18  ;;  %v3307_v60 = vrot.slane %v13826_v12, %v14259_v3 }
 0x7bd   : > { %v3224_v15 = vsel %vm18482_vm8, %v3223_v24, %v3219_v48  ;;  %19171 = vst [vmem:[#allocation94_spill] sm:$0xff] %v14351_v36  ;;  %v3159_v23 = vsel %vm3158_vm12, %v3157_v44, %v3152_v52  ;;  %v3293_v43 = vsel %vm3116_vm6, %v3292_v5, %v3288_v11  ;;  %v3302_v24 = vrot.slane %v13852_v61, %v14243_v6  ;;  %v19173_v44 = vld [vmem:[#allocation96_spill] sm:$0xff] }
 0x7be   : > { %v3229_v58 = vsel %vm18479_vm9, %v3228_v46, %v3224_v15  ;;  %v3166_v45 = vsel %vm3165_vm13, %v3164_v21, %v3159_v23  ;;  %v3297_v46 = vrot.slane %v13747_v56, %v14240_v54  ;;  %v3171_v53 = vrot.slane %v19173_v44, %v14345_v22  ;;  %v19175_v61 = vld [vmem:[#allocation116_spill] sm:$0xff]  ;;  %v19176_v15 = vld [vmem:[#allocation125_spill] sm:$0xff] }
 0x7bf   : > { %v14332_v32 = vpop.permute.xlu1 %2993  ;;  %v3234_v9 = vsel %vm18481_vm10, %v3233_v49, %v3229_v58  ;;  %v3243_v48 = vrot.slane %v19174_v20, %v14299_v31  ;;  %v3238_v11 = vrot.slane %v19175_v61, %v14293_v10  ;;  %v3248_v21 = vrot.slane %v19176_v15, %v14302_v8  ;;  %v19177_v23 = vld [vmem:[#allocation100_spill] sm:$0xff] }
 0x7c0   : > { %v3298_v5 = vsel %vm18483_vm7, %v3297_v46, %v3293_v43  ;;  %v3173_v12 = vsel %vm3172_vm14, %v3171_v53, %v3166_v45  ;;  %v3346_v58 = vrot.slane %v13950_v51, %v14182_v25  ;;  %v3178_v28 = vrot.slane %v19177_v23, %v14351_v36  ;;  %v14395_v46 = vpop.permute.xlu0 %3032  ;;  %v19178_v51 = vld [vmem:[#allocation123_spill] sm:$0xff] }
 0x7c1   : > { %v3303_v52 = vsel %vm18482_vm8, %v3302_v24, %v3298_v5  ;;  %v3239_v49 = vsel %vm3151_vm11, %v3238_v11, %v3234_v9  ;;  %v3312_v43 = vrot.slane %v13837_v1, %v14271_v18  ;;  %v3342_v45 = vrot.slane %v13986_v38, %v14189_v35 }
 0x7c2   : > { %v3308_v44 = vsel %vm18479_vm9, %v3307_v60, %v3303_v52  ;;  %v3244_v20 = vsel %vm3158_vm12, %v3243_v48, %v3239_v49  ;;  %v14398_v24 = vsel %vm3179_vm15, %v3178_v28, %v3173_v12  ;;  %v3253_v53 = vrot.slane %v19178_v51, %v14345_v22  ;;  %v19179_v60 = vld [vmem:[#allocation122_spill] sm:$0xff] }
 0x7c3   : > { %v14355_v47 = vpop.permute.xlu1 %2987  ;;  %v3249_v9 = vsel %vm3165_vm13, %v3248_v21, %v3244_v20  ;;  %v3258_v48 = vrot.slane %v19179_v60, %v14351_v36  ;;  %v3313_v1 = vsel %vm18481_vm10, %v3312_v43, %v3308_v44  ;;  %v3347_v11 = vsel %vm3081_vm1, %v3346_v58, %v3342_v45 }
 0x7c4   : > { %v3421_v38 = vrot.slane %v14141_v41, %v14189_v35  ;;  %v3317_v15 = vrot.slane %v13811_v2, %v14293_v10  ;;  %v3322_v5 = vrot.slane %v13923_v50, %v14299_v31  ;;  %v3351_v21 = vrot.slane %v13972_v29, %v14199_v33  ;;  %v14441_v44 = vpop.permute.xlu0 %3026 }
 0x7c5   : > { %v3500_v12 = vrot.slane %v14169_v34, %v14189_v35  ;;  %v3254_v52 = vsel %vm3172_vm14, %v3253_v53, %v3249_v9  ;;  %v3327_v58 = vrot.slane %v13888_v59, %v14302_v8  ;;  %v3425_v41 = vrot.slane %v14058_v7, %v14182_v25 }
 0x7c6   : > { %v3579_v2 = vrot.slane %v14306_v16, %v14189_v35  ;;  %v3318_v23 = vsel %vm3151_vm11, %v3317_v15, %v3313_v1  ;;  %v3352_v50 = vsel %vm3088_vm2, %v3351_v21, %v3347_v11  ;;  %v3361_v29 = vrot.slane %v14076_v19, %v14206_v55  ;;  %v19181_v11 = vld [vmem:[#allocation185_spill] sm:$0xff]  ;;  %v19182_v15 = vld [vmem:[#allocation222_spill] sm:$0xff]  ;;  %v19183_v21 = vld [vmem:[#allocation188_spill] sm:$0xff] }
 0x7c7   : > { %v14380_v56 = vpop.permute.xlu1 %3005  ;;  %v3504_v34 = vrot.slane %v14132_v37, %v14182_v25  ;;  %v3356_v59 = vrot.slane %v13937_v62, %v14211_v63  ;;  %v3366_v7 = vrot.slane %v14007_v4, %v14214_v57  ;;  %v3426_v16 = vsel %vm3081_vm1, %v3425_v41, %v3421_v38 }
 0x7c8   : > { %v3583_v49 = vrot.slane %v14176_v0, %v14182_v25  ;;  %v3332_v19 = vrot.slane %v13900_v13, %v14345_v22  ;;  %v3323_v37 = vsel %vm3158_vm12, %v3322_v5, %v3318_v23  ;;  %v3430_v20 = vrot.slane %v14139_v42, %v14199_v33  ;;  %v19180_v42 = vld [vmem:[#allocation42_spill] sm:$0xff] }
 0x7c9   : > { %v3505_v62 = vsel %vm3081_vm1, %v3504_v34, %v3500_v12  ;;  %v3328_v43 = vsel %vm3165_vm13, %v3327_v58, %v3323_v37  ;;  %v3357_v4 = vsel %vm3095_vm3, %v3356_v59, %v3352_v50  ;;  %v3509_v45 = vrot.slane %v14165_v30, %v14199_v33  ;;  %v14479_v59 = vpop.permute.xlu0 %3044 }
 0x7ca   : > { %v3584_v0 = vsel %vm3081_vm1, %v3583_v49, %v3579_v2  ;;  %v3362_v51 = vsel %vm3102_vm4, %v3361_v29, %v3357_v4  ;;  %v3431_v13 = vsel %vm3088_vm2, %v3430_v20, %v3426_v16  ;;  %v3440_v53 = vrot.slane %v14149_v39, %v14206_v55  ;;  %v19184_v39 = vld [vmem:[#allocation205_spill] sm:$0xff]  ;;  %v19185_v29 = vld [vmem:[#allocation220_spill] sm:$0xff] }
 0x7cb   : > { %v14403_v61 = vpop.permute.xlu1 %2999  ;;  %v3588_v9 = vrot.slane %v19180_v42, %v14199_v33  ;;  %v3367_v1 = vsel %vm3109_vm5, %v3366_v7, %v3362_v51  ;;  %v3435_v38 = vrot.slane %v19181_v11, %v14211_v63  ;;  %v3510_v30 = vsel %vm3088_vm2, %v3509_v45, %v3505_v62  ;;  %v19191_v11 = vld [vmem:[#allocation228_spill] sm:$0xff] }
 0x7cc   : > { %v3519_v5 = vrot.slane %v19182_v15, %v14206_v55  ;;  %v3371_v12 = vrot.slane %v19183_v21, %v14237_v27  ;;  %v3514_v58 = vrot.slane %v19184_v39, %v14211_v63  ;;  %v3598_v2 = vrot.slane %v14355_v47, %v14206_v55  ;;  %v19186_v47 = vld [vmem:[#allocation191_spill] sm:$0xff] }
 0x7cd   : > { %v3589_v41 = vsel %vm3088_vm2, %v3588_v9, %v3584_v0  ;;  %v3259_v23 = vsel %vm3179_vm15, %v3258_v48, %v3254_v52  ;;  %v3436_v50 = vsel %vm3095_vm3, %v3435_v38, %v3431_v13  ;;  %v3593_v34 = vrot.slane %v19185_v29, %v14211_v63  ;;  %v19187_v48 = vld [vmem:[#allocation203_spill] sm:$0xff]  ;;  %v19188_v0 = vld [vmem:[#allocation156_spill] sm:$0xff]  ;;  %v19190_v13 = vld [vmem:[#allocation210_spill] sm:$0xff] }
 0x7ce   : > { %v3333_v7 = vsel %vm3172_vm14, %v3332_v19, %v3328_v43  ;;  %v3372_v16 = vsel %vm3116_vm6, %v3371_v12, %v3367_v1  ;;  %v3441_v49 = vsel %vm3102_vm4, %v3440_v53, %v3436_v50  ;;  %v3515_v37 = vsel %vm3095_vm3, %v3514_v58, %v3510_v30  ;;  %v19189_v43 = vld [vmem:[#allocation171_spill] sm:$0xff] }
 0x7cf   : > { %v14432_v28 = vpop.permute.xlu1 %3017  ;;  %v3445_v62 = vrot.slane %v19186_v47, %v14214_v57  ;;  %v3381_v52 = vrot.slane %v19187_v48, %v14243_v6  ;;  %v3520_v4 = vsel %vm3102_vm4, %v3519_v5, %v3515_v37  ;;  %v3594_v45 = vsel %vm3095_vm3, %v3593_v34, %v3589_v41  ;;  %v19192_v5 = vld [vmem:[#allocation211_spill] sm:$0xff] }
 0x7d0   : > { %v3337_v19 = vrot.slane %v19188_v0, %v14351_v36  ;;  %v3376_v51 = vrot.slane %v19189_v43, %v14240_v54  ;;  %v3524_v53 = vrot.slane %v19190_v13, %v14214_v57  ;;  %v3599_v42 = vsel %vm3102_vm4, %v3598_v2, %v3594_v45  ;;  %v3039_v2 = vpop.permute.xlu0 %3038  ;;  %v19194_v34 = vld [vmem:[#allocation215_spill] sm:$0xff]  ;;  %v19198_v0 = vld [vmem:[#allocation209_spill] sm:$0xff] }
 0x7d1   : > { %v14500_v9 = vsel %vm18478_vm0, %v3259_v23, %v14398_v24  ;;  %v3446_v1 = vsel %vm3109_vm5, %v3445_v62, %v3441_v49  ;;  %v3603_v38 = vrot.slane %v19191_v11, %v14214_v57  ;;  %v3450_v21 = vrot.slane %v19192_v5, %v14237_v27  ;;  %v19193_v24 = vld [vmem:[#allocation221_spill] sm:$0xff]  ;;  %v19195_v37 = vld [vmem:[#allocation179_spill] sm:$0xff]  ;;  %v19201_v5 = vld [vmem:[#allocation200_spill] sm:$0xff] }
 0x7d2   : > { %v14506_v30 = vsel %vm3179_vm15, %v3337_v19, %v3333_v7  ;;  %v3377_v15 = vsel %vm18483_vm7, %v3376_v51, %v3372_v16  ;;  %v3525_v12 = vsel %vm3109_vm5, %v3524_v53, %v3520_v4  ;;  %v3529_v41 = vrot.slane %v19193_v24, %v14237_v27  ;;  %v19196_v62 = vld [vmem:[#allocation189_spill] sm:$0xff]  ;;  %v19197_v4 = vld [vmem:[#allocation82_spill] sm:$0xff] }
 0x7d3   : > { %v14460_v60 = vpop.permute.xlu1 %3011  ;;  %v3382_v58 = vsel %vm18482_vm8, %v3381_v52, %v3377_v15  ;;  %v3604_v23 = vsel %vm3109_vm5, %v3603_v38, %v3599_v42  ;;  %v3451_v29 = vsel %vm3116_vm6, %v3450_v21, %v3446_v1  ;;  %v3460_v7 = vrot.slane %v19194_v34, %v14243_v6  ;;  %v19199_v42 = vld [vmem:[#allocation224_spill] sm:$0xff] }
 0x7d4   : > { %v3662_v16 = vrot.slane %v14441_v44, %v14182_v25  ;;  %v3608_v49 = vrot.slane %v14332_v32, %v14237_v27  ;;  %v3386_v47 = vrot.slane %v19195_v37, %v14259_v3  ;;  %v3455_v48 = vrot.slane %v19196_v62, %v14240_v54  ;;  %v19200_v38 = vld [vmem:[#allocation176_spill] sm:$0xff] }
 0x7d5   : > { %v3530_v52 = vsel %vm3116_vm6, %v3529_v41, %v3525_v12  ;;  %v3539_v45 = vrot.slane %v19197_v4, %v14243_v6  ;;  %v3534_v19 = vrot.slane %v19198_v0, %v14240_v54  ;;  %v3618_v44 = vrot.slane %v14403_v61, %v14243_v6  ;;  %v14551_v41 = vpop.permute.xlu0 %3056  ;;  %v19204_v37 = vld [vmem:[#allocation208_spill] sm:$0xff]  ;;  %v19205_v4 = vld [vmem:[#allocation213_spill] sm:$0xff] }
 0x7d6   : > { %v3609_v43 = vsel %vm3116_vm6, %v3608_v49, %v3604_v23  ;;  %v3387_v13 = vsel %vm18479_vm9, %v3386_v47, %v3382_v58  ;;  %v3456_v53 = vsel %vm18483_vm7, %v3455_v48, %v3451_v29  ;;  %v3613_v1 = vrot.slane %v19199_v42, %v14240_v54  ;;  %v19203_v29 = vld [vmem:[#allocation214_spill] sm:$0xff] }
 0x7d7   : > { %v3030_v20 = vpop.permute.xlu1 %3029  ;;  %v3396_v15 = vrot.slane %v19200_v38, %v14293_v10  ;;  %v3391_v21 = vrot.slane %v19201_v5, %v14271_v18  ;;  %v3461_v61 = vsel %vm18482_vm8, %v3460_v7, %v3456_v53  ;;  %v3535_v12 = vsel %vm18483_vm7, %v3534_v19, %v3530_v52 }
 0x7d8   : > { %v3667_v11 = vrot.slane %v3030_v20, %v14199_v33  ;;  %v3540_v24 = vsel %vm18482_vm8, %v3539_v45, %v3535_v12  ;;  %v3614_v23 = vsel %vm18483_vm7, %v3613_v1, %v3609_v43  ;;  %v3544_v34 = vrot.slane %v19203_v29, %v14259_v3  ;;  %v19206_v43 = vld [vmem:[#allocation193_spill] sm:$0xff]  ;;  %v19208_v1 = vld [vmem:[#allocation218_spill] sm:$0xff] }
 0x7d9   : > { %v3672_v7 = vrot.slane %v14395_v46, %v14211_v63  ;;  %v3401_v47 = vrot.slane %v19204_v37, %v14299_v31  ;;  %v3623_v48 = vrot.slane %v14284_v40, %v14259_v3  ;;  %vm18480_vm0 = vcmask 1042434   ;;  %v19209_v12 = vld [vmem:[#allocation109_spill] sm:$0xff]  ;;  %v19213_v37 = vld [vmem:[#allocation202_spill] sm:$0xff] }
 0x7da   : > { %v3470_v45 = vrot.slane %v19205_v4, %v14271_v18  ;;  %v3545_v0 = vsel %vm18479_vm9, %v3544_v34, %v3540_v24  ;;  %v3682_v46 = vrot.slane %v3039_v2, %v14214_v57  ;;  %v3628_v2 = vrot.slane %v14380_v56, %v14271_v18 }
 0x7db   : > { %v3024_v39 = vpop.permute.xlu1 %3023  ;;  %v3638_v34 = vrot.slane %v14460_v60, %v14299_v31  ;;  %v3692_v60 = vrot.slane %v14479_v59, %v14240_v54  ;;  %v19215_v59 = vld [vmem:[#allocation206_spill] sm:$0xff] }
 0x7dc   : > { %v3658_v50 = vrot.slane %v3024_v39, %v14189_v35  ;;  %v19202_v39 = vld [vmem:[#allocation196_spill] sm:$0xff] }
 0x7dd   : > { %v3465_v58 = vrot.slane %v19202_v39, %v14259_v3  ;;  %v3559_v39 = vrot.slane %v19209_v12, %v14299_v31 }
 0x7de   : > { %v3663_v32 = vsel %vm3081_vm1, %v3662_v16, %v3658_v50  ;;  %v3392_v50 = vsel %vm18481_vm10, %v3391_v21, %v3387_v13  ;;  %v3619_v16 = vsel %vm18482_vm8, %v3618_v44, %v3614_v23  ;;  %v3475_v44 = vrot.slane %v19206_v43, %v14293_v10  ;;  %v19214_v43 = vld [vmem:[#allocation219_spill] sm:$0xff] }
 0x7df   : > { %v3042_v51 = vpop.permute.xlu1 %3041  ;;  %v3668_v20 = vsel %vm3088_vm2, %v3667_v11, %v3663_v32  ;;  %v3466_v62 = vsel %vm18479_vm9, %v3465_v58, %v3461_v61  ;;  %v19207_v32 = vld [vmem:[#allocation226_spill] sm:$0xff]  ;;  %v3624_v40 = vsel %vm18479_vm9, %v3623_v48, %v3619_v16  ;;  %v3480_v11 = vrot.slane %v19208_v1, %v14299_v31  ;;  %v3051_v58 = vpop.permute.xlu0 %3050  ;;  %v19212_v16 = vld [vmem:[#allocation91_spill] sm:$0xff] }
 0x7e0   : > { %v3673_v19 = vsel %vm3095_vm3, %v3672_v7, %v3668_v20  ;;  %v3549_v13 = vrot.slane %v19207_v32, %v14271_v18  ;;  %v3471_v42 = vsel %vm18481_vm10, %v3470_v45, %v3466_v62  ;;  %v3397_v21 = vsel %vm3151_vm11, %v3396_v15, %v3392_v50  ;;  %v19210_v20 = vld [vmem:[#allocation212_spill] sm:$0xff]  ;;  %v19211_v15 = vld [vmem:[#allocation183_spill] sm:$0xff] }
 0x7e1   : > { %v3687_v24 = vrot.slane %v3042_v51, %v14237_v27  ;;  %v3402_v23 = vsel %vm3158_vm12, %v3401_v47, %v3397_v21  ;;  %v3554_v29 = vrot.slane %v19210_v20, %v14293_v10  ;;  %v3629_v56 = vsel %vm18481_vm10, %v3628_v2, %v3624_v40  ;;  %v19216_v2 = vld [vmem:[#allocation217_spill] sm:$0xff] }
 0x7e2   : > { %v3550_v61 = vsel %vm18481_vm10, %v3549_v13, %v3545_v0  ;;  %v3406_v50 = vrot.slane %v19211_v15, %v14302_v8  ;;  %v3476_v7 = vsel %vm3151_vm11, %v3475_v44, %v3471_v42  ;;  %v3485_v47 = vrot.slane %v19213_v37, %v14302_v8 }
 0x7e3   : > { %v3036_v49 = vpop.permute.xlu1 %3035  ;;  %v3481_v62 = vsel %vm3158_vm12, %v3480_v11, %v3476_v7  ;;  %v3555_v48 = vsel %vm3151_vm11, %v3554_v29, %v3550_v61  ;;  %v3564_v44 = vrot.slane %v19214_v43, %v14302_v8  ;;  %v3702_v32 = vrot.slane %v3051_v58, %v14259_v3  ;;  %v19218_v29 = vld [vmem:[#allocation181_spill] sm:$0xff] }
 0x7e4   : > { %v3677_v52 = vrot.slane %v3036_v49, %v14206_v55  ;;  %v3633_v49 = vrot.slane %v19212_v16, %v14293_v10  ;;  %v3407_v4 = vsel %vm3165_vm13, %v3406_v50, %v3402_v23  ;;  %v3560_v45 = vsel %vm3158_vm12, %v3559_v39, %v3555_v48 }
 0x7e5   : > { %v3486_v42 = vsel %vm3165_vm13, %v3485_v47, %v3481_v62  ;;  %v3643_v1 = vrot.slane %v14363_v17, %v14302_v8  ;;  %v3565_v21 = vsel %vm3165_vm13, %v3564_v44, %v3560_v45  ;;  %v3737_v39 = vsel %vm18480_vm0, %v14506_v30, %v14500_v9  ;;  %v19219_v9 = vld [vmem:[#allocation199_spill] sm:$0xff] }
 0x7e6   : > { %v3678_v53 = vsel %vm3102_vm4, %v3677_v52, %v3673_v19  ;;  %v3634_v0 = vsel %vm3151_vm11, %v3633_v49, %v3629_v56  ;;  %v3416_v56 = vrot.slane %v19218_v29, %v14351_v36  ;;  %v3648_v15 = vrot.slane %v14432_v28, %v14345_v22 }
 0x7e7   : > { %v3683_v38 = vsel %vm3109_vm5, %v3682_v46, %v3678_v53  ;;  %v3054_v5 = vpop.permute.xlu1 %3053  ;;  %v3069_v46 = vpop.permute.xlu0 %3068  ;;  %v3639_v13 = vsel %vm3158_vm12, %v3638_v34, %v3634_v0  ;;  %v3411_v53 = vrot.slane %v19215_v59, %v14345_v22  ;;  %v3495_v30 = vrot.slane %v19219_v9, %v14351_v36 }
 0x7e8   : > { %v3688_v51 = vsel %vm3116_vm6, %v3687_v24, %v3683_v38  ;;  %v3490_v38 = vrot.slane %v19216_v2, %v14345_v22  ;;  %v19217_v24 = vld [vmem:[#allocation38_spill] sm:$0xff]  ;;  %v3644_v17 = vsel %vm3165_vm13, %v3643_v1, %v3639_v13  ;;  %v3707_v20 = vrot.slane %v3054_v5, %v14271_v18  ;;  %v19220_v5 = vld [vmem:[#allocation216_spill] sm:$0xff] }
 0x7e9   : > { %v3693_v40 = vsel %vm18483_vm7, %v3692_v60, %v3688_v51  ;;  %v3412_v58 = vsel %vm3172_vm14, %v3411_v53, %v3407_v4  ;;  %v3569_v23 = vrot.slane %v19217_v24, %v14345_v22  ;;  %vm18637_vm0 = vcmask 1044484  }
 0x7ea   : > { %v3491_v34 = vsel %vm3172_vm14, %v3490_v38, %v3486_v42  ;;  %v3574_v49 = vrot.slane %v19220_v5, %v14351_v36  ;;  %v3712_v51 = vrot.slane %v14551_v41, %v14293_v10  ;;  %v3417_v47 = vsel %vm3179_vm15, %v3416_v56, %v3412_v58  ;;  %v19225_v58 = vld [vmem:[#allocation52_spill] sm:$0xff] }
 0x7eb   : > { %v3048_v52 = vpop.permute.xlu1 %3047  ;;  %v3063_v50 = vpop.permute.xlu0 %3062  ;;  %v3570_v16 = vsel %vm3172_vm14, %v3569_v23, %v3565_v21  ;;  %v3649_v28 = vsel %vm3172_vm14, %v3648_v15, %v3644_v17  ;;  %v3653_v62 = vrot.slane %v14325_v14, %v14351_v36  ;;  %v3496_v60 = vsel %vm3179_vm15, %v3495_v30, %v3491_v34  ;;  %v19223_v21 = vld [vmem:[#allocation49_spill] sm:$0xff]  ;;  %v19226_v23 = vld [vmem:[#allocation34_spill] sm:$0xff]  ;;  %v19228_v30 = vld [vmem:[#allocation31_spill] sm:$0xff] }
 0x7ec   : > { %v3697_v19 = vrot.slane %v3048_v52, %v14243_v6  ;;  %v3722_v52 = vrot.slane %v3063_v50, %v14302_v8  ;;  %v3575_v45 = vsel %vm3179_vm15, %v3574_v49, %v3570_v16  ;;  %v3732_v43 = vrot.slane %v3069_v46, %v14351_v36  ;;  %v19227_v34 = vld [vmem:[#allocation57_spill] sm:$0xff]  ;;  %v19229_v16 = vld [vmem:[#allocation56_spill] sm:$0xff] }
 0x7ed   : > { %vm18634_vm7 = vcmask 1047559   ;;  %v14669_v1 = vsub.s32 1, %v19124_v26 }
 0x7ee   : > { %v3698_v11 = vsel %vm18482_vm8, %v3697_v19, %v3693_v40  ;;  %vm18635_vm8 = vcmask 1046534   ;;  %v3654_v19 = vsel %vm3179_vm15, %v3653_v62, %v3649_v28  ;;  %v19231_v28 = vld [vmem:[#allocation61_spill] sm:$0xff] }
 0x7ef   : > { %v3703_v61 = vsel %vm18479_vm9, %v3702_v32, %v3698_v11  ;;  %v3066_v12 = vpop.permute.xlu1 %3065  ;;  %vm3738_vm9 = vcmask 1043459   ;;  %19221 = vst [vmem:[#allocation113_spill] sm:$0xff] %v14669_v1  ;;  %v19222_v11 = vld [vmem:[#allocation30_spill] sm:$0xff] }
 0x7f0   : > { %v3708_v7 = vsel %vm18481_vm10, %v3707_v20, %v3703_v61  ;;  %vm18636_vm10 = vcmask 1045509   ;;  %v3727_v41 = vrot.slane %v3066_v12, %v14345_v22  ;;  %v3739_v14 = vsel %vm3738_vm9, %v3417_v47, %v3737_v39  ;;  %v19224_v12 = vld [vmem:[#allocation32_spill] sm:$0xff] }
 0x7f1   : > { %v3713_v4 = vsel %vm3151_vm11, %v3712_v51, %v3708_v7  ;;  %v3741_v32 = vsel %vm18637_vm0, %v3496_v60, %v3739_v14  ;;  %v19230_v51 = vld [vmem:[#allocation33_spill] sm:$0xff]  ;;  %v19232_v60 = vld [vmem:[#allocation36_spill] sm:$0xff] }
 0x7f2   : > { %v3743_v40 = vsel %vm18636_vm10, %v3575_v45, %v3741_v32 }
 0x7f3   : > { %v3060_v37 = vpop.permute.xlu1 %3059  ;;  %v3745_v53 = vsel %vm18635_vm8, %v3654_v19, %v3743_v40  ;;  %vm19540_vm8 = vcmask 589312  }
 0x7f4   : > { %v3717_v48 = vrot.slane %v3060_v37, %v14299_v31  ;;  %vm19542_vm0 = vmmov %vm19540_vm8 }
 0x7f6   : > { %v3718_v0 = vsel %vm3158_vm12, %v3717_v48, %v3713_v4 }
 0x7f7   : > { %v3723_v44 = vsel %vm3165_vm13, %v3722_v52, %v3718_v0  ;;  %v19235_v0 = vld [vmem:[#allocation60_spill] sm:$0xff] }
 0x7f8   : > { %v3728_v13 = vsel %vm3172_vm14, %v3727_v41, %v3723_v44 }
 0x7f9   : > { %v3733_v59 = vsel %vm3179_vm15, %v3732_v43, %v3728_v13  ;;  %v19236_v43 = vld [vmem:[#allocation41_spill] sm:$0xff] }
 0x7fa   : > { %v3747_v42 = vsel %vm18634_vm7, %v3733_v59, %v3745_v53  ;;  %v19239_v59 = vld [vmem:[#allocation65_spill] sm:$0xff]  ;;  %vm19539_vm7 = vcmask 523712  }
 0x7fb   : > { %3749 = vmax.xlane.f32.xlu1 %v3747_v42  ;;  %vm19541_vm10 = vmmov %vm19539_vm7 }
 0x888   : > { %v14671_v46 = vpop.xlane.xlu1 %3749 }
 0x889   : > { %v14675_v2 = vrot.slane %v14671_v46, %v19222_v11  ;;  %v14679_v38 = vrot.slane %v14671_v46, %v14669_v1 }
 0x88b   : > { %v3801_v61 = vsub.f32 %v19223_v21, %v14675_v2  ;;  %v3792_v39 = vsub.f32 %v19224_v12, %v14675_v2  ;;  %v3807_v24 = vsub.f32 %v19225_v58, %v14675_v2  ;;  %v3793_v17 = vsub.f32 %v19226_v23, %v14675_v2  ;;  %v19240_v21 = vld [vmem:[#allocation35_spill] sm:$0xff] }
 0x88c   : > { %v3809_v15 = vsub.f32 %v19227_v34, %v14679_v38  ;;  %v3794_v50 = vsub.f32 %v19228_v30, %v14675_v2  ;;  %v3811_v5 = vsub.f32 %v19229_v16, %v14679_v38  ;;  %v3795_v37 = vsub.f32 %v19230_v51, %v14675_v2  ;;  %v19248_v30 = vld [vmem:[#allocation69_spill] sm:$0xff]  ;;  %v19249_v16 = vld [vmem:[#allocation47_spill] sm:$0xff] }
 0x88d   : > { %v3938_v20 = vmul.f32 1.442695, %v3801_v61  ;;  %v3920_v29 = vmul.f32 1.442695, %v3792_v39  ;;  %v3950_v56 = vmul.f32 1.442695, %v3807_v24  ;;  %v3813_v62 = vsub.f32 %v19231_v28, %v14679_v38 }
 0x88e   : > { %v3922_v9 = vmul.f32 1.442695, %v3793_v17  ;;  %v3954_v7 = vmul.f32 1.442695, %v3809_v15  ;;  %v3924_v49 = vmul.f32 1.442695, %v3794_v50  ;;  %v3796_v52 = vsub.f32 %v19232_v60, %v14675_v2 }
 0x88f   : > { %11750 = vpow2.f32 %v3938_v20  ;;  %v3958_v47 = vmul.f32 1.442695, %v3811_v5  ;;  %v3926_v48 = vmul.f32 1.442695, %v3795_v37  ;;  %v3962_v41 = vmul.f32 1.442695, %v3813_v62 }
 0x890   : > { %11752 = vpow2.f32 %v3920_v29  ;;  %v3815_v19 = vsub.f32 %v19235_v0, %v14679_v38  ;;  %v3928_v14 = vmul.f32 1.442695, %v3796_v52  ;;  %v3797_v44 = vsub.f32 %v19236_v43, %v14675_v2  ;;  %v19243_v24 = vld [vmem:[#allocation64_spill] sm:$0xff]  ;;  %v19244_v20 = vld [vmem:[#allocation37_spill] sm:$0xff]  ;;  %v19253_v60 = vld [vmem:[#allocation46_spill] sm:$0xff] }
 0x891   : > { %11754 = vpow2.f32 %v3950_v56  ;;  %v3817_v53 = vsub.f32 %v19239_v59, %v14679_v38  ;;  %v3798_v61 = vsub.f32 %v19240_v21, %v14675_v2  ;;  %v3819_v23 = vsub.f32 %v19243_v24, %v14679_v38  ;;  %v19252_v28 = vld [vmem:[#allocation68_spill] sm:$0xff] }
 0x892   : > { %11756 = vpow2.f32 %v3922_v9  ;;  %v3966_v40 = vmul.f32 1.442695, %v3815_v19  ;;  %v3930_v42 = vmul.f32 1.442695, %v3797_v44  ;;  %v3799_v29 = vsub.f32 %v19244_v20, %v14675_v2 }
 0x893   : > { %11758 = vpow2.f32 %v3954_v7  ;;  %v3970_v58 = vmul.f32 1.442695, %v3817_v53  ;;  %v3932_v17 = vmul.f32 1.442695, %v3798_v61  ;;  %v14737_v15 = vsub.s32 2, %v19124_v26  ;;  %v19260_v61 = vld [vmem:[#allocation72_spill] sm:$0xff] }
 0x894   : > { %11760 = vpow2.f32 %v3924_v49  ;;  %v3974_v9 = vmul.f32 1.442695, %v3819_v23  ;;  %v3821_v50 = vsub.f32 %v19248_v30, %v14679_v38  ;;  %v3934_v7 = vmul.f32 1.442695, %v3799_v29  ;;  %v19261_v23 = vld [vmem:[#allocation51_spill] sm:$0xff]  ;;  %v19264_v30 = vld [vmem:[#allocation77_spill] sm:$0xff] }
 0x895   : > { %11762 = vpow2.f32 %v3958_v47  ;;  %19247 = vst [vmem:[#allocation127_spill] sm:$0xff] %v14737_v15  ;;  %v3800_v5 = vsub.f32 %v19249_v16, %v14675_v2  ;;  %v14751_v37 = vrot.slane %v14671_v46, %v14737_v15  ;;  %v3823_v62 = vsub.f32 %v19252_v28, %v14679_v38  ;;  %v19265_v16 = vld [vmem:[#allocation53_spill] sm:$0xff] }
 0x896   : > { %11764 = vpow2.f32 %v3926_v48  ;;  %v3978_v47 = vmul.f32 1.442695, %v3821_v50  ;;  %v3802_v52 = vsub.f32 %v19253_v60, %v14675_v2 }
 0x897   : > { %11766 = vpow2.f32 %v3962_v41  ;;  %v3936_v48 = vmul.f32 1.442695, %v3800_v5  ;;  %v3982_v19 = vmul.f32 1.442695, %v3823_v62  ;;  %v3829_v50 = vsub.f32 %v19264_v30, %v14751_v37 }
 0x898   : > { %11768 = vpow2.f32 %v3928_v14  ;;  %v19256_v14 = vld [vmem:[#allocation73_spill] sm:$0xff]  ;;  %v3940_v44 = vmul.f32 1.442695, %v3802_v52  ;;  %v3805_v5 = vsub.f32 %v19265_v16, %v14675_v2 }
 0x899   : > { %v14701_v4 = vpop.eup %11750  ;;  %11770 = vpow2.f32 %v3966_v40  ;;  %v3825_v43 = vsub.f32 %v19256_v14, %v14751_v37  ;;  %v19257_v40 = vld [vmem:[#allocation48_spill] sm:$0xff]  ;;  %v3994_v62 = vmul.f32 1.442695, %v3829_v50 }
 0x89a   : > { %19233 = vst [vmem:[#allocation92_spill] sm:$0xff] %v14701_v4  ;;  %v14703_v45 = vpop.eup %11752  ;;  %4332 = vperm.xlu1 %11196, %v14701_v4   ;;  %11772 = vpow2.f32 %v3930_v42  ;;  %v3803_v59 = vsub.f32 %v19257_v40, %v14675_v2  ;;  %v3946_v52 = vmul.f32 1.442695, %v3805_v5 }
 0x89b   : > { %19234 = vst [vmem:[#allocation114_spill] sm:$0xff] %v14703_v45  ;;  %4305 = vperm.xlu0 %11197, %v14703_v45   ;;  %v14711_v32 = vpop.eup %11754  ;;  %11774 = vpow2.f32 %v3970_v58  ;;  %v3986_v21 = vmul.f32 1.442695, %v3825_v43  ;;  %v3827_v58 = vsub.f32 %v19260_v61, %v14751_v37 }
 0x89c   : > { %19237 = vst [vmem:[#allocation118_spill] sm:$0xff] %v14711_v32  ;;  %v14713_v13 = vpop.eup %11756  ;;  %11776 = vpow2.f32 %v3932_v17  ;;  %v3942_v24 = vmul.f32 1.442695, %v3803_v59  ;;  %v3804_v17 = vsub.f32 %v19261_v23, %v14675_v2  ;;  %v19272_v59 = vld [vmem:[#allocation81_spill] sm:$0xff] }
 0x89d   : > { %19238 = vst [vmem:[#allocation99_spill] sm:$0xff] %v14713_v13  ;;  %v14721_v12 = vpop.eup %11758  ;;  %11778 = vpow2.f32 %v3974_v9  ;;  %v3990_v9 = vmul.f32 1.442695, %v3827_v58  ;;  %v19273_v58 = vld [vmem:[#allocation55_spill] sm:$0xff] }
 0x89e   : > { %4350 = vperm.xlu1 %11196, %v14711_v32   ;;  %19241 = vst [vmem:[#allocation40_spill] sm:$0xff] %v14721_v12  ;;  %v14723_v39 = vpop.eup %11760  ;;  %11780 = vpow2.f32 %v3934_v7  ;;  %v3944_v7 = vmul.f32 1.442695, %v3804_v17 }
 0x89f   : > { %4308 = vperm.xlu0 %11197, %v14713_v13   ;;  %19242 = vst [vmem:[#allocation102_spill] sm:$0xff] %v14723_v39  ;;  %v14731_v56 = vpop.eup %11762  ;;  %11782 = vpow2.f32 %v3978_v47 }
 0x8a0   : > { %19245 = vst [vmem:[#allocation115_spill] sm:$0xff] %v14731_v56  ;;  %v14733_v34 = vpop.eup %11764  ;;  %11784 = vpow2.f32 %v3936_v48  ;;  %v19268_v48 = vld [vmem:[#allocation76_spill] sm:$0xff] }
 0x8a1   : > { %19246 = vst [vmem:[#allocation96_spill] sm:$0xff] %v14733_v34  ;;  %v14744_v49 = vpop.eup %11766  ;;  %11786 = vpow2.f32 %v3982_v19  ;;  %v3831_v60 = vsub.f32 %v19268_v48, %v14751_v37  ;;  %v19269_v19 = vld [vmem:[#allocation50_spill] sm:$0xff]  ;;  %v14824_v48 = vsub.s32 3, %v19124_v26 }
 0x8a2   : > { %4356 = vperm.xlu1 %11196, %v14721_v12   ;;  %19250 = vst [vmem:[#allocation116_spill] sm:$0xff] %v14744_v49  ;;  %v14746_v51 = vpop.eup %11768  ;;  %11788 = vpow2.f32 %v3940_v44  ;;  %v3806_v14 = vsub.f32 %v19269_v19, %v14675_v2 }
 0x8a3   : > { %4311 = vperm.xlu0 %11197, %v14723_v39   ;;  %19251 = vst [vmem:[#allocation125_spill] sm:$0xff] %v14746_v51  ;;  %v14758_v41 = vpop.eup %11770  ;;  %11790 = vpow2.f32 %v3986_v21  ;;  %v3998_v40 = vmul.f32 1.442695, %v3831_v60  ;;  %v3833_v21 = vsub.f32 %v19272_v59, %v14751_v37  ;;  %19280 = vst [vmem:[#allocation228_spill] sm:$0xff] %v14824_v48 }
 0x8a4   : > { %19254 = vst [vmem:[#allocation100_spill] sm:$0xff] %v14758_v41  ;;  %v14760_v0 = vpop.eup %11772  ;;  %11792 = vpow2.f32 %v3942_v24  ;;  %v3948_v61 = vmul.f32 1.442695, %v3806_v14  ;;  %v3808_v24 = vsub.f32 %v19273_v58, %v14679_v38  ;;  %v14838_v58 = vrot.slane %v14671_v46, %v14824_v48 }
 0x8a5   : > { %19255 = vst [vmem:[#allocation123_spill] sm:$0xff] %v14760_v0  ;;  %v14768_v53 = vpop.eup %11774  ;;  %11794 = vpow2.f32 %v3990_v9  ;;  %v4002_v17 = vmul.f32 1.442695, %v3833_v21  ;;  %v19276_v9 = vld [vmem:[#allocation80_spill] sm:$0xff] }
 0x8a6   : > { %4362 = vperm.xlu1 %11196, %v14731_v56   ;;  %19258 = vst [vmem:[#allocation122_spill] sm:$0xff] %v14768_v53  ;;  %v14770_v42 = vpop.eup %11776  ;;  %11796 = vpow2.f32 %v3944_v7  ;;  %v3835_v30 = vsub.f32 %v19276_v9, %v14751_v37  ;;  %v3952_v50 = vmul.f32 1.442695, %v3808_v24  ;;  %v19277_v7 = vld [vmem:[#allocation54_spill] sm:$0xff] }
 0x8a7   : > { %4314 = vperm.xlu0 %11197, %v14733_v34   ;;  %19259 = vst [vmem:[#allocation42_spill] sm:$0xff] %v14770_v42  ;;  %v14778_v20 = vpop.eup %11778  ;;  %11798 = vpow2.f32 %v3994_v62  ;;  %v3810_v16 = vsub.f32 %v19277_v7, %v14679_v38 }
 0x8a8   : > { %19262 = vst [vmem:[#allocation185_spill] sm:$0xff] %v14778_v20  ;;  %v14780_v29 = vpop.eup %11780  ;;  %11800 = vpow2.f32 %v3946_v52  ;;  %v4006_v60 = vmul.f32 1.442695, %v3835_v30  ;;  %v19281_v52 = vld [vmem:[#allocation88_spill] sm:$0xff] }
 0x8a9   : > { %19263 = vst [vmem:[#allocation222_spill] sm:$0xff] %v14780_v29  ;;  %v14788_v47 = vpop.eup %11782  ;;  %11802 = vpow2.f32 %v3998_v40  ;;  %v3837_v19 = vsub.f32 %v19281_v52, %v14751_v37  ;;  %v3956_v14 = vmul.f32 1.442695, %v3810_v16  ;;  %v19282_v40 = vld [vmem:[#allocation59_spill] sm:$0xff] }
 0x8aa   : > { %4368 = vperm.xlu1 %11196, %v14744_v49   ;;  %19266 = vst [vmem:[#allocation188_spill] sm:$0xff] %v14788_v47  ;;  %v14790_v28 = vpop.eup %11784  ;;  %11804 = vpow2.f32 %v3948_v61  ;;  %v3812_v59 = vsub.f32 %v19282_v40, %v14679_v38 }
 0x8ab   : > { %4317 = vperm.xlu0 %11197, %v14746_v51   ;;  %19267 = vst [vmem:[#allocation205_spill] sm:$0xff] %v14790_v28  ;;  %v14798_v43 = vpop.eup %11786  ;;  %11806 = vpow2.f32 %v4002_v17  ;;  %v4010_v24 = vmul.f32 1.442695, %v3837_v19  ;;  %v19285_v17 = vld [vmem:[#allocation86_spill] sm:$0xff] }
 0x8ac   : > { %19270 = vst [vmem:[#allocation220_spill] sm:$0xff] %v14798_v43  ;;  %v14800_v44 = vpop.eup %11788  ;;  %11808 = vpow2.f32 %v3952_v50  ;;  %v3839_v9 = vsub.f32 %v19285_v17, %v14751_v37  ;;  %v3960_v30 = vmul.f32 1.442695, %v3812_v59  ;;  %v19286_v50 = vld [vmem:[#allocation58_spill] sm:$0xff] }
 0x8ad   : > { %19271 = vst [vmem:[#allocation191_spill] sm:$0xff] %v14800_v44  ;;  %v14808_v23 = vpop.eup %11790  ;;  %11810 = vpow2.f32 %v4006_v60  ;;  %v3814_v7 = vsub.f32 %v19286_v50, %v14679_v38  ;;  %v19289_v60 = vld [vmem:[#allocation105_spill] sm:$0xff] }
 0x8ae   : > { %4374 = vperm.xlu1 %11196, %v14758_v41   ;;  %19274 = vst [vmem:[#allocation203_spill] sm:$0xff] %v14808_v23  ;;  %v14810_v2 = vpop.eup %11792  ;;  %11812 = vpow2.f32 %v3956_v14  ;;  %v4014_v40 = vmul.f32 1.442695, %v3839_v9  ;;  %v3841_v19 = vsub.f32 %v19289_v60, %v14838_v58  ;;  %v19290_v14 = vld [vmem:[#allocation63_spill] sm:$0xff] }
 0x8af   : > { %4320 = vperm.xlu0 %11197, %v14760_v0   ;;  %19275 = vst [vmem:[#allocation156_spill] sm:$0xff] %v14810_v2  ;;  %v14818_v5 = vpop.eup %11794  ;;  %11814 = vpow2.f32 %v4010_v24  ;;  %v3964_v17 = vmul.f32 1.442695, %v3814_v7  ;;  %v3816_v59 = vsub.f32 %v19290_v14, %v14679_v38  ;;  %v19293_v24 = vld [vmem:[#allocation103_spill] sm:$0xff] }
 0x8b0   : > { %19278 = vst [vmem:[#allocation171_spill] sm:$0xff] %v14818_v5  ;;  %v14820_v62 = vpop.eup %11796  ;;  %11816 = vpow2.f32 %v3960_v30  ;;  %v3843_v9 = vsub.f32 %v19293_v24, %v14838_v58  ;;  %v19294_v30 = vld [vmem:[#allocation62_spill] sm:$0xff] }
 0x8b1   : > { %19279 = vst [vmem:[#allocation210_spill] sm:$0xff] %v14820_v62  ;;  %v14831_v21 = vpop.eup %11798  ;;  %11818 = vpow2.f32 %v4014_v40  ;;  %v3968_v60 = vmul.f32 1.442695, %v3816_v59  ;;  %v3818_v7 = vsub.f32 %v19294_v30, %v14679_v38  ;;  %v19297_v40 = vld [vmem:[#allocation120_spill] sm:$0xff] }
 0x8b2   : > { %4380 = vperm.xlu1 %11196, %v14768_v53   ;;  %19283 = vst [vmem:[#allocation211_spill] sm:$0xff] %v14831_v21  ;;  %v14833_v61 = vpop.eup %11800  ;;  %11820 = vpow2.f32 %v3964_v17  ;;  %v19298_v17 = vld [vmem:[#allocation67_spill] sm:$0xff] }
 0x8b3   : > { %4323 = vperm.xlu0 %11197, %v14770_v42   ;;  %19284 = vst [vmem:[#allocation221_spill] sm:$0xff] %v14833_v61  ;;  %v14845_v16 = vpop.eup %11802  ;;  %v3972_v24 = vmul.f32 1.442695, %v3818_v7  ;;  %v3820_v59 = vsub.f32 %v19298_v17, %v14679_v38 }
 0x8b4   : > { %19287 = vst [vmem:[#allocation215_spill] sm:$0xff] %v14845_v16  ;;  %v14847_v52 = vpop.eup %11804 }
 0x8b5   : > { %19288 = vst [vmem:[#allocation179_spill] sm:$0xff] %v14847_v52  ;;  %v14855_v48 = vpop.eup %11806 }
 0x8b6   : > { %4386 = vperm.xlu1 %11196, %v14778_v20   ;;  %19291 = vst [vmem:[#allocation189_spill] sm:$0xff] %v14855_v48  ;;  %v14857_v50 = vpop.eup %11808 }
 0x8b7   : > { %4326 = vperm.xlu0 %11197, %v14780_v29   ;;  %19292 = vst [vmem:[#allocation82_spill] sm:$0xff] %v14857_v50 }
 0x8ba   : > { %4392 = vperm.xlu1 %11196, %v14788_v47  }
 0x8bb   : > { %4329 = vperm.xlu0 %11197, %v14790_v28  }
 0x8be   : > { %4398 = vperm.xlu1 %11196, %v14798_v43  }
 0x8bf   : > { %4335 = vperm.xlu0 %11197, %v14800_v44  }
 0x8c2   : > { %4404 = vperm.xlu1 %11196, %v14808_v23  }
 0x8c3   : > { %4338 = vperm.xlu0 %11197, %v14810_v2  }
 0x8c6   : > { %4410 = vperm.xlu1 %11196, %v14818_v5  }
 0x8c7   : > { %4341 = vperm.xlu0 %11197, %v14820_v62  }
 0x8ca   : > { %4416 = vperm.xlu1 %11196, %v14831_v21   ;;  %v14865_v21 = vpop.eup %11810 }
 0x8cb   : > { %4344 = vperm.xlu0 %11197, %v14833_v61   ;;  %19295 = vst [vmem:[#allocation209_spill] sm:$0xff] %v14865_v21  ;;  %v14867_v14 = vpop.eup %11812 }
 0x8cc   : > { %19296 = vst [vmem:[#allocation224_spill] sm:$0xff] %v14867_v14  ;;  %v14875_v61 = vpop.eup %11814 }
 0x8cd   : > { %19299 = vst [vmem:[#allocation176_spill] sm:$0xff] %v14875_v61  ;;  %v14877_v30 = vpop.eup %11816 }
 0x8ce   : > { %4422 = vperm.xlu1 %11196, %v14845_v16   ;;  %v4018_v16 = vmul.f32 1.442695, %v3841_v19  ;;  %v3845_v19 = vsub.f32 %v19297_v40, %v14838_v58  ;;  %19300 = vst [vmem:[#allocation200_spill] sm:$0xff] %v14877_v30  ;;  %v3976_v40 = vmul.f32 1.442695, %v3820_v59  ;;  %v14885_v62 = vpop.eup %11818 }
 0x8cf   : > { %4347 = vperm.xlu0 %11197, %v14847_v52   ;;  %19303 = vst [vmem:[#allocation196_spill] sm:$0xff] %v14885_v62  ;;  %v14887_v17 = vpop.eup %11820 }
 0x8d0   : > { %11822 = vpow2.f32 %v4018_v16  ;;  %v19301_v16 = vld [vmem:[#allocation119_spill] sm:$0xff]  ;;  %19304 = vst [vmem:[#allocation214_spill] sm:$0xff] %v14887_v17 }
 0x8d1   : > { %11824 = vpow2.f32 %v3968_v60  ;;  %v19302_v60 = vld [vmem:[#allocation66_spill] sm:$0xff] }
 0x8d2   : > { %4428 = vperm.xlu1 %11196, %v14855_v48   ;;  %v4022_v48 = vmul.f32 1.442695, %v3843_v9  ;;  %v3847_v9 = vsub.f32 %v19301_v16, %v14838_v58  ;;  %v3822_v7 = vsub.f32 %v19302_v60, %v14679_v38 }
 0x8d3   : > { %4353 = vperm.xlu0 %11197, %v14857_v50  }
 0x8d4   : > { %11826 = vpow2.f32 %v4022_v48  ;;  %v19305_v48 = vld [vmem:[#allocation124_spill] sm:$0xff]  ;;  %v3980_v16 = vmul.f32 1.442695, %v3822_v7 }
 0x8d5   : > { %11828 = vpow2.f32 %v3972_v24  ;;  %v19306_v24 = vld [vmem:[#allocation71_spill] sm:$0xff] }
 0x8d6   : > { %4434 = vperm.xlu1 %11196, %v14865_v21   ;;  %v4026_v21 = vmul.f32 1.442695, %v3845_v19  ;;  %v3849_v19 = vsub.f32 %v19305_v48, %v14838_v58  ;;  %v3824_v59 = vsub.f32 %v19306_v24, %v14751_v37 }
 0x8d7   : > { %4359 = vperm.xlu0 %11197, %v14867_v14  }
 0x8d8   : > { %11830 = vpow2.f32 %v4026_v21  ;;  %v4034_v60 = vmul.f32 1.442695, %v3849_v19  ;;  %v19309_v21 = vld [vmem:[#allocation121_spill] sm:$0xff]  ;;  %v3984_v48 = vmul.f32 1.442695, %v3824_v59  ;;  %v19313_v19 = vld [vmem:[#allocation128_spill] sm:$0xff] }
 0x8d9   : > { %11832 = vpow2.f32 %v3976_v40  ;;  %v19310_v40 = vld [vmem:[#allocation70_spill] sm:$0xff]  ;;  %v19314_v59 = vld [vmem:[#allocation75_spill] sm:$0xff] }
 0x8da   : > { %4440 = vperm.xlu1 %11196, %v14875_v61   ;;  %v4030_v61 = vmul.f32 1.442695, %v3847_v9  ;;  %v14895_v5 = vpop.eup %11822  ;;  %v3851_v9 = vsub.f32 %v19309_v21, %v14838_v58  ;;  %v3826_v7 = vsub.f32 %v19310_v40, %v14751_v37  ;;  %v3853_v21 = vsub.f32 %v19313_v19, %v14838_v58  ;;  %v19318_v19 = vld [vmem:[#allocation74_spill] sm:$0xff] }
 0x8db   : > { %4365 = vperm.xlu0 %11197, %v14877_v30   ;;  %19307 = vst [vmem:[#allocation208_spill] sm:$0xff] %v14895_v5  ;;  %v14897_v38 = vpop.eup %11824  ;;  %v3828_v40 = vsub.f32 %v19314_v59, %v14751_v37  ;;  %v3830_v59 = vsub.f32 %v19318_v19, %v14751_v37 }
 0x8dc   : > { %19308 = vst [vmem:[#allocation213_spill] sm:$0xff] %v14897_v38  ;;  %11834 = vpow2.f32 %v4030_v61  ;;  %v4038_v61 = vmul.f32 1.442695, %v3851_v9  ;;  %v19317_v9 = vld [vmem:[#allocation126_spill] sm:$0xff] }
 0x8dd   : > { %11836 = vpow2.f32 %v3980_v16  ;;  %v3988_v16 = vmul.f32 1.442695, %v3826_v7  ;;  %v3992_v7 = vmul.f32 1.442695, %v3828_v40 }
 0x8de   : > { %4446 = vperm.xlu1 %11196, %v14885_v62   ;;  %v14905_v62 = vpop.eup %11826  ;;  %11838 = vpow2.f32 %v4034_v60  ;;  %v4042_v60 = vmul.f32 1.442695, %v3853_v21 }
 0x8df   : > { %4371 = vperm.xlu0 %11197, %v14887_v17   ;;  %19311 = vst [vmem:[#allocation193_spill] sm:$0xff] %v14905_v62  ;;  %v14907_v24 = vpop.eup %11828  ;;  %11840 = vpow2.f32 %v3984_v48  ;;  %v3855_v48 = vsub.f32 %v19317_v9, %v14838_v58  ;;  %v3996_v9 = vmul.f32 1.442695, %v3830_v59 }
 0x8e0   : > { %19312 = vst [vmem:[#allocation226_spill] sm:$0xff] %v14907_v24  ;;  %11842 = vpow2.f32 %v4038_v61  ;;  %v19321_v61 = vld [vmem:[#allocation130_spill] sm:$0xff] }
 0x8e1   : > { %11844 = vpow2.f32 %v3988_v16  ;;  %v19322_v16 = vld [vmem:[#allocation79_spill] sm:$0xff] }
 0x8e2   : > { %4452 = vperm.xlu1 %11196, %v14895_v5   ;;  %v18501_v5 = vsub.s32 4, %v19124_v26  ;;  %v14916_v23 = vpop.eup %11830  ;;  %11846 = vpow2.f32 %v4042_v60  ;;  %v3832_v40 = vsub.f32 %v19322_v16, %v14751_v37  ;;  %v19325_v60 = vld [vmem:[#allocation129_spill] sm:$0xff] }
 0x8e3   : > { %4377 = vperm.xlu0 %11197, %v14897_v38   ;;  %19315 = vst [vmem:[#allocation218_spill] sm:$0xff] %v14916_v23  ;;  %v14918_v2 = vpop.eup %11832  ;;  %11848 = vpow2.f32 %v3992_v7  ;;  %v19326_v7 = vld [vmem:[#allocation78_spill] sm:$0xff] }
 0x8e4   : > { %19316 = vst [vmem:[#allocation109_spill] sm:$0xff] %v14918_v2  ;;  %v3834_v59 = vsub.f32 %v19326_v7, %v14751_v37 }
 0x8e6   : > { %4458 = vperm.xlu1 %11196, %v14905_v62   ;;  %v14924_v62 = vrot.slane %v14671_v46, %v18501_v5  ;;  %v14931_v44 = vpop.eup %11834  ;;  %v4046_v5 = vmul.f32 1.442695, %v3855_v48 }
 0x8e7   : > { %4383 = vperm.xlu0 %11197, %v14907_v24   ;;  %19319 = vst [vmem:[#allocation212_spill] sm:$0xff] %v14931_v44 }
 0x8e8   : > { %v3857_v21 = vsub.f32 %v19321_v61, %v14924_v62  ;;  %11850 = vpow2.f32 %v4046_v5  ;;  %v3859_v48 = vsub.f32 %v19325_v60, %v14924_v62  ;;  %v4000_v61 = vmul.f32 1.442695, %v3832_v40  ;;  %v19329_v5 = vld [vmem:[#allocation45_spill] sm:$0xff] }
 0x8e9   : > { %11852 = vpow2.f32 %v3996_v9  ;;  %v4004_v60 = vmul.f32 1.442695, %v3834_v59  ;;  %v19330_v9 = vld [vmem:[#allocation83_spill] sm:$0xff] }
 0x8ea   : > { %4464 = vperm.xlu1 %11196, %v14916_v23   ;;  %v14933_v23 = vpop.eup %11836  ;;  %v3836_v40 = vsub.f32 %v19330_v9, %v14751_v37 }
 0x8eb   : > { %4389 = vperm.xlu0 %11197, %v14918_v2   ;;  %19320 = vst [vmem:[#allocation183_spill] sm:$0xff] %v14933_v23  ;;  %v14941_v15 = vpop.eup %11838 }
 0x8ec   : > { %19323 = vst [vmem:[#allocation91_spill] sm:$0xff] %v14941_v15  ;;  %v14943_v19 = vpop.eup %11840 }
 0x8ed   : > { %19324 = vst [vmem:[#allocation202_spill] sm:$0xff] %v14943_v19  ;;  %v14951_v43 = vpop.eup %11842 }
 0x8ee   : > { %4470 = vperm.xlu1 %11196, %v14931_v44   ;;  %v4050_v44 = vmul.f32 1.442695, %v3857_v21  ;;  %19327 = vst [vmem:[#allocation219_spill] sm:$0xff] %v14951_v43  ;;  %v14953_v16 = vpop.eup %11844  ;;  %v3861_v21 = vsub.f32 %v19329_v5, %v14924_v62  ;;  %v4008_v5 = vmul.f32 1.442695, %v3836_v40 }
 0x8ef   : > { %4395 = vperm.xlu0 %11197, %v14933_v23   ;;  %19328 = vst [vmem:[#allocation206_spill] sm:$0xff] %v14953_v16 }
 0x8f0   : > { %11854 = vpow2.f32 %v4050_v44  ;;  %v19333_v44 = vld [vmem:[#allocation131_spill] sm:$0xff] }
 0x8f1   : > { %11856 = vpow2.f32 %v4000_v61  ;;  %v19334_v61 = vld [vmem:[#allocation39_spill] sm:$0xff] }
 0x8f2   : > { %4476 = vperm.xlu1 %11196, %v14941_v15   ;;  %v4054_v15 = vmul.f32 1.442695, %v3859_v48  ;;  %v3863_v48 = vsub.f32 %v19333_v44, %v14924_v62  ;;  %v3838_v59 = vsub.f32 %v19334_v61, %v14751_v37 }
 0x8f3   : > { %4401 = vperm.xlu0 %11197, %v14943_v19   ;;  %v14961_v19 = vpop.eup %11846 }
 0x8f4   : > { %19331 = vst [vmem:[#allocation217_spill] sm:$0xff] %v14961_v19  ;;  %v14963_v7 = vpop.eup %11848  ;;  %11858 = vpow2.f32 %v4054_v15  ;;  %v19337_v15 = vld [vmem:[#allocation133_spill] sm:$0xff]  ;;  %v4012_v44 = vmul.f32 1.442695, %v3838_v59 }
 0x8f5   : > { %19332 = vst [vmem:[#allocation38_spill] sm:$0xff] %v14963_v7  ;;  %11860 = vpow2.f32 %v4004_v60  ;;  %v19338_v60 = vld [vmem:[#allocation101_spill] sm:$0xff] }
 0x8f6   : > { %4482 = vperm.xlu1 %11196, %v14951_v43   ;;  %v4058_v43 = vmul.f32 1.442695, %v3861_v21  ;;  %v3865_v21 = vsub.f32 %v19337_v15, %v14924_v62  ;;  %v3840_v40 = vsub.f32 %v19338_v60, %v14838_v58 }
 0x8f7   : > { %4407 = vperm.xlu0 %11197, %v14953_v16   ;;  %v14971_v16 = vpop.eup %11850 }
 0x8f8   : > { %19335 = vst [vmem:[#allocation181_spill] sm:$0xff] %v14971_v16  ;;  %v14973_v9 = vpop.eup %11852  ;;  %11862 = vpow2.f32 %v4058_v43  ;;  %v4066_v61 = vmul.f32 1.442695, %v3865_v21  ;;  %v19341_v43 = vld [vmem:[#allocation132_spill] sm:$0xff]  ;;  %v4016_v15 = vmul.f32 1.442695, %v3840_v40 }
 0x8f9   : > { %19336 = vst [vmem:[#allocation199_spill] sm:$0xff] %v14973_v9  ;;  %11864 = vpow2.f32 %v4008_v5  ;;  %v19342_v5 = vld [vmem:[#allocation98_spill] sm:$0xff]  ;;  %v19345_v21 = vld [vmem:[#allocation136_spill] sm:$0xff]  ;;  %v19346_v40 = vld [vmem:[#allocation117_spill] sm:$0xff] }
 0x8fa   : > { %4488 = vperm.xlu1 %11196, %v14961_v19   ;;  %v4062_v19 = vmul.f32 1.442695, %v3863_v48  ;;  %v3867_v48 = vsub.f32 %v19341_v43, %v14924_v62  ;;  %v3842_v59 = vsub.f32 %v19342_v5, %v14838_v58  ;;  %v3869_v43 = vsub.f32 %v19345_v21, %v14924_v62  ;;  %v19350_v21 = vld [vmem:[#allocation44_spill] sm:$0xff] }
 0x8fb   : > { %4413 = vperm.xlu0 %11197, %v14963_v7   ;;  %v14981_v7 = vpop.eup %11854  ;;  %v3844_v5 = vsub.f32 %v19346_v40, %v14838_v58  ;;  %v3846_v40 = vsub.f32 %v19350_v21, %v14838_v58 }
 0x8fc   : > { %19339 = vst [vmem:[#allocation216_spill] sm:$0xff] %v14981_v7  ;;  %v14983_v37 = vpop.eup %11856  ;;  %11866 = vpow2.f32 %v4062_v19  ;;  %v4070_v19 = vmul.f32 1.442695, %v3867_v48  ;;  %v19349_v48 = vld [vmem:[#allocation134_spill] sm:$0xff] }
 0x8fd   : > { %19340 = vst [vmem:[#allocation49_spill] sm:$0xff] %v14983_v37  ;;  %11868 = vpow2.f32 %v4012_v44  ;;  %v4020_v44 = vmul.f32 1.442695, %v3842_v59  ;;  %v4024_v59 = vmul.f32 1.442695, %v3844_v5 }
 0x8fe   : > { %4494 = vperm.xlu1 %11196, %v14971_v16   ;;  %v14991_v16 = vpop.eup %11858  ;;  %11870 = vpow2.f32 %v4066_v61  ;;  %v4074_v61 = vmul.f32 1.442695, %v3869_v43 }
 0x8ff   : > { %4419 = vperm.xlu0 %11197, %v14973_v9   ;;  %19343 = vst [vmem:[#allocation32_spill] sm:$0xff] %v14991_v16  ;;  %v14993_v60 = vpop.eup %11860  ;;  %11872 = vpow2.f32 %v4016_v15  ;;  %v3871_v15 = vsub.f32 %v19349_v48, %v14924_v62  ;;  %v4028_v48 = vmul.f32 1.442695, %v3846_v40 }
 0x900   : > { %19344 = vst [vmem:[#allocation52_spill] sm:$0xff] %v14993_v60  ;;  %11874 = vpow2.f32 %v4070_v19  ;;  %v19353_v19 = vld [vmem:[#allocation140_spill] sm:$0xff] }
 0x901   : > { %11876 = vpow2.f32 %v4020_v44  ;;  %v19354_v44 = vld [vmem:[#allocation137_spill] sm:$0xff] }
 0x902   : > { %4500 = vperm.xlu1 %11196, %v14981_v7   ;;  %v18519_v7 = vsub.s32 5, %v19124_v26  ;;  %11878 = vpow2.f32 %v4074_v61  ;;  %v3848_v5 = vsub.f32 %v19354_v44, %v14838_v58  ;;  %v19357_v61 = vld [vmem:[#allocation138_spill] sm:$0xff] }
 0x903   : > { %4425 = vperm.xlu0 %11197, %v14983_v37   ;;  %v15002_v37 = vpop.eup %11862  ;;  %11880 = vpow2.f32 %v4024_v59  ;;  %v19358_v59 = vld [vmem:[#allocation135_spill] sm:$0xff] }
 0x904   : > { %19347 = vst [vmem:[#allocation34_spill] sm:$0xff] %v15002_v37  ;;  %v15004_v9 = vpop.eup %11864  ;;  %v3850_v40 = vsub.f32 %v19358_v59, %v14838_v58 }
 0x905   : > { %19348 = vst [vmem:[#allocation57_spill] sm:$0xff] %v15004_v9 }
 0x906   : > { %4506 = vperm.xlu1 %11196, %v14991_v16   ;;  %v15010_v16 = vrot.slane %v14671_v46, %v18519_v7  ;;  %v4078_v7 = vmul.f32 1.442695, %v3871_v15 }
 0x907   : > { %4431 = vperm.xlu0 %11197, %v14993_v60   ;;  %v15017_v60 = vpop.eup %11866 }
 0x908   : > { %19351 = vst [vmem:[#allocation31_spill] sm:$0xff] %v15017_v60  ;;  %v3873_v43 = vsub.f32 %v19353_v19, %v15010_v16  ;;  %11882 = vpow2.f32 %v4078_v7  ;;  %v3875_v15 = vsub.f32 %v19357_v61, %v15010_v16  ;;  %v4032_v19 = vmul.f32 1.442695, %v3848_v5  ;;  %v19361_v7 = vld [vmem:[#allocation144_spill] sm:$0xff] }
 0x909   : > { %11884 = vpow2.f32 %v4028_v48  ;;  %v4036_v61 = vmul.f32 1.442695, %v3850_v40  ;;  %v19362_v48 = vld [vmem:[#allocation141_spill] sm:$0xff] }
 0x90a   : > { %4512 = vperm.xlu1 %11196, %v15002_v37   ;;  %v15019_v37 = vpop.eup %11868  ;;  %v3852_v5 = vsub.f32 %v19362_v48, %v14838_v58 }
 0x90b   : > { %4437 = vperm.xlu0 %11197, %v15004_v9   ;;  %19352 = vst [vmem:[#allocation56_spill] sm:$0xff] %v15019_v37  ;;  %v15027_v9 = vpop.eup %11870 }
 0x90c   : > { %19355 = vst [vmem:[#allocation33_spill] sm:$0xff] %v15027_v9  ;;  %v15029_v21 = vpop.eup %11872  ;;  %v4040_v40 = vmul.f32 1.442695, %v3852_v5 }
 0x90d   : > { %19356 = vst [vmem:[#allocation61_spill] sm:$0xff] %v15029_v21 }
 0x90e   : > { %4518 = vperm.xlu1 %11196, %v15017_v60   ;;  %v4082_v60 = vmul.f32 1.442695, %v3873_v43  ;;  %v3877_v43 = vsub.f32 %v19361_v7, %v15010_v16  ;;  %v19366_v7 = vld [vmem:[#allocation139_spill] sm:$0xff] }
 0x90f   : > { %4443 = vperm.xlu0 %11197, %v15019_v37   ;;  %v15037_v37 = vpop.eup %11874  ;;  %v3854_v48 = vsub.f32 %v19366_v7, %v14838_v58  ;;  %v19371_v58 = vld [vmem:[#allocation145_spill] sm:$0xff] }
 0x910   : > { %19359 = vst [vmem:[#allocation36_spill] sm:$0xff] %v15037_v37  ;;  %v15039_v44 = vpop.eup %11876  ;;  %11886 = vpow2.f32 %v4082_v60  ;;  %v4090_v60 = vmul.f32 1.442695, %v3877_v43  ;;  %v19370_v43 = vld [vmem:[#allocation148_spill] sm:$0xff] }
 0x911   : > { %19360 = vst [vmem:[#allocation60_spill] sm:$0xff] %v15039_v44  ;;  %11888 = vpow2.f32 %v4032_v19  ;;  %v4044_v5 = vmul.f32 1.442695, %v3854_v48 }
 0x912   : > { %4524 = vperm.xlu1 %11196, %v15027_v9   ;;  %v4086_v9 = vmul.f32 1.442695, %v3875_v15  ;;  %v19365_v15 = vld [vmem:[#allocation142_spill] sm:$0xff] }
 0x913   : > { %4449 = vperm.xlu0 %11197, %v15029_v21   ;;  %v15047_v21 = vpop.eup %11878  ;;  %v3879_v19 = vsub.f32 %v19365_v15, %v15010_v16  ;;  %v3856_v15 = vsub.f32 %v19371_v58, %v14924_v62 }
 0x914   : > { %19363 = vst [vmem:[#allocation41_spill] sm:$0xff] %v15047_v21  ;;  %v15051_v23 = vpop.eup %11880  ;;  %11890 = vpow2.f32 %v4086_v9 }
 0x915   : > { %19364 = vst [vmem:[#allocation65_spill] sm:$0xff] %v15051_v23  ;;  %11892 = vpow2.f32 %v4036_v61  ;;  %v4094_v9 = vmul.f32 1.442695, %v3879_v19  ;;  %v3881_v61 = vsub.f32 %v19370_v43, %v15010_v16  ;;  %v19374_v19 = vld [vmem:[#allocation146_spill] sm:$0xff]  ;;  %v4048_v48 = vmul.f32 1.442695, %v3856_v15 }
 0x916   : > { %4530 = vperm.xlu1 %11196, %v15037_v37   ;;  %v15061_v37 = vpop.eup %11882  ;;  %11894 = vpow2.f32 %v4090_v60  ;;  %v19375_v43 = vld [vmem:[#allocation143_spill] sm:$0xff] }
 0x917   : > { %4455 = vperm.xlu0 %11197, %v15039_v44   ;;  %19367 = vst [vmem:[#allocation35_spill] sm:$0xff] %v15061_v37  ;;  %v15065_v2 = vpop.eup %11884  ;;  %11896 = vpow2.f32 %v4040_v40  ;;  %v4098_v60 = vmul.f32 1.442695, %v3881_v61  ;;  %v3883_v40 = vsub.f32 %v19374_v19, %v15010_v16  ;;  %v3858_v58 = vsub.f32 %v19375_v43, %v14924_v62  ;;  %v19379_v43 = vld [vmem:[#allocation149_spill] sm:$0xff] }
 0x918   : > { %19369 = vst [vmem:[#allocation37_spill] sm:$0xff] %v15065_v2  ;;  %11898 = vpow2.f32 %v4094_v9  ;;  %v18547_v9 = vsub.s32 6, %v19124_v26 }
 0x919   : > { %v15049_v59 = vpop.permute.xlu1 %4332  ;;  %11900 = vpow2.f32 %v4044_v5  ;;  %v4102_v61 = vmul.f32 1.442695, %v3883_v40  ;;  %v19378_v5 = vld [vmem:[#allocation152_spill] sm:$0xff]  ;;  %v4052_v19 = vmul.f32 1.442695, %v3858_v58 }
 0x91a   : > { %v15053_v47 = vpop.permute.xlu0 %4305  ;;  %4536 = vperm.xlu1 %11196, %v15047_v21   ;;  %v15075_v7 = vpop.eup %11886  ;;  %11902 = vpow2.f32 %v4098_v60  ;;  %v3885_v15 = vsub.f32 %v19378_v5, %v15010_v16  ;;  %v15116_v60 = vrot.slane %v14671_v46, %v18547_v9 }
 0x91b   : > { %4461 = vperm.xlu0 %11197, %v15051_v23   ;;  %19372 = vst [vmem:[#allocation69_spill] sm:$0xff] %v15075_v7  ;;  %v15079_v23 = vpop.eup %11888  ;;  %11904 = vpow2.f32 %v4048_v48  ;;  %v19382_v48 = vld [vmem:[#allocation150_spill] sm:$0xff] }
 0x91c   : > { %19373 = vst [vmem:[#allocation47_spill] sm:$0xff] %v15079_v23  ;;  %11906 = vpow2.f32 %v4102_v61  ;;  %v4106_v40 = vmul.f32 1.442695, %v3885_v15  ;;  %v3887_v58 = vsub.f32 %v19382_v48, %v15010_v16  ;;  %v19386_v15 = vld [vmem:[#allocation157_spill] sm:$0xff] }
 0x91d   : > { %v15063_v44 = vpop.permute.xlu1 %4350  ;;  %11908 = vpow2.f32 %v4052_v19  ;;  %v19387_v48 = vld [vmem:[#allocation153_spill] sm:$0xff] }
 0x91e   : > { %19368 = vst [vmem:[#allocation64_spill] sm:$0xff] %v15063_v44  ;;  %v15067_v20 = vpop.permute.xlu0 %4308  ;;  %4542 = vperm.xlu1 %11196, %v15061_v37   ;;  %v15089_v37 = vpop.eup %11890  ;;  %11910 = vpow2.f32 %v4106_v40  ;;  %v4110_v61 = vmul.f32 1.442695, %v3887_v58  ;;  %v19390_v58 = vld [vmem:[#allocation154_spill] sm:$0xff] }
 0x91f   : > { %4467 = vperm.xlu0 %11197, %v15065_v2   ;;  %19376 = vst [vmem:[#allocation68_spill] sm:$0xff] %v15089_v37  ;;  %v15093_v29 = vpop.eup %11892 }
 0x920   : > { %19377 = vst [vmem:[#allocation46_spill] sm:$0xff] %v15093_v29 }
 0x921   : > { %v15077_v21 = vpop.permute.xlu1 %4356 }
 0x922   : > { %v15081_v24 = vpop.permute.xlu0 %4311  ;;  %4548 = vperm.xlu1 %11196, %v15075_v7   ;;  %v3860_v7 = vsub.f32 %v19379_v43, %v14924_v62  ;;  %v19383_v43 = vld [vmem:[#allocation147_spill] sm:$0xff] }
 0x923   : > { %4473 = vperm.xlu0 %11197, %v15079_v23   ;;  %v15104_v23 = vpop.eup %11894 }
 0x924   : > { %19380 = vst [vmem:[#allocation73_spill] sm:$0xff] %v15104_v23  ;;  %v15108_v38 = vpop.eup %11896  ;;  %v4056_v5 = vmul.f32 1.442695, %v3860_v7  ;;  %v3889_v7 = vsub.f32 %v19386_v15, %v15116_v60  ;;  %v19391_v15 = vld [vmem:[#allocation151_spill] sm:$0xff] }
 0x925   : > { %v15091_v2 = vpop.permute.xlu1 %4362  ;;  %19381 = vst [vmem:[#allocation48_spill] sm:$0xff] %v15108_v38  ;;  %v15123_v41 = vpop.eup %11898 }
 0x926   : > { %v15095_v42 = vpop.permute.xlu0 %4314  ;;  %4554 = vperm.xlu1 %11196, %v15089_v37   ;;  %19384 = vst [vmem:[#allocation72_spill] sm:$0xff] %v15123_v41  ;;  %v15127_v17 = vpop.eup %11900  ;;  %11912 = vpow2.f32 %v4056_v5  ;;  %v4114_v40 = vmul.f32 1.442695, %v3889_v7  ;;  %v19394_v7 = vld [vmem:[#allocation161_spill] sm:$0xff] }
 0x927   : > { %4479 = vperm.xlu0 %11197, %v15093_v29   ;;  %v3862_v29 = vsub.f32 %v19383_v43, %v14924_v62  ;;  %19385 = vst [vmem:[#allocation51_spill] sm:$0xff] %v15127_v17  ;;  %v3864_v43 = vsub.f32 %v19387_v48, %v14924_v62  ;;  %11914 = vpow2.f32 %v4110_v61  ;;  %v3866_v48 = vsub.f32 %v19391_v15, %v14924_v62 }
 0x929   : > { %v15106_v53 = vpop.permute.xlu1 %4368  ;;  %v4060_v19 = vmul.f32 1.442695, %v3862_v29  ;;  %v3891_v29 = vsub.f32 %v19390_v58, %v15116_v60  ;;  %v4064_v5 = vmul.f32 1.442695, %v3864_v43  ;;  %v4068_v43 = vmul.f32 1.442695, %v3866_v48 }
 0x92a   : > { %v15110_v37 = vpop.permute.xlu0 %4317  ;;  %4560 = vperm.xlu1 %11196, %v15104_v23   ;;  %v19395_v58 = vld [vmem:[#allocation158_spill] sm:$0xff] }
 0x92b   : > { %4485 = vperm.xlu0 %11197, %v15108_v38   ;;  %v15137_v38 = vpop.eup %11902  ;;  %11916 = vpow2.f32 %v4060_v19  ;;  %v4118_v61 = vmul.f32 1.442695, %v3891_v29  ;;  %v3893_v19 = vsub.f32 %v19394_v7, %v15116_v60  ;;  %v3868_v15 = vsub.f32 %v19395_v58, %v14924_v62  ;;  %v19399_v29 = vld [vmem:[#allocation159_spill] sm:$0xff] }
 0x92c   : > { %19388 = vst [vmem:[#allocation77_spill] sm:$0xff] %v15137_v38  ;;  %v15141_v51 = vpop.eup %11904  ;;  %11918 = vpow2.f32 %v4114_v40  ;;  %v19400_v7 = vld [vmem:[#allocation155_spill] sm:$0xff] }
 0x92d   : > { %v15125_v23 = vpop.permute.xlu1 %4374  ;;  %19389 = vst [vmem:[#allocation53_spill] sm:$0xff] %v15141_v51  ;;  %11920 = vpow2.f32 %v4064_v5  ;;  %v4122_v40 = vmul.f32 1.442695, %v3893_v19  ;;  %v3895_v5 = vsub.f32 %v19399_v29, %v15116_v60  ;;  %v4072_v48 = vmul.f32 1.442695, %v3868_v15  ;;  %v19404_v19 = vld [vmem:[#allocation164_spill] sm:$0xff] }
 0x92e   : > { %v15129_v9 = vpop.permute.xlu0 %4320  ;;  %4566 = vperm.xlu1 %11196, %v15123_v41   ;;  %v15151_v41 = vpop.eup %11906  ;;  %11922 = vpow2.f32 %v4118_v61  ;;  %v3870_v58 = vsub.f32 %v19400_v7, %v14924_v62  ;;  %v19405_v62 = vld [vmem:[#allocation162_spill] sm:$0xff] }
 0x92f   : > { %4491 = vperm.xlu0 %11197, %v15127_v17   ;;  %19392 = vst [vmem:[#allocation76_spill] sm:$0xff] %v15151_v41  ;;  %v15155_v30 = vpop.eup %11908  ;;  %11924 = vpow2.f32 %v4068_v43  ;;  %v4126_v61 = vmul.f32 1.442695, %v3895_v5  ;;  %v3897_v43 = vsub.f32 %v19404_v19, %v15116_v60  ;;  %v3872_v29 = vsub.f32 %v19405_v62, %v15010_v16  ;;  %v19408_v5 = vld [vmem:[#allocation163_spill] sm:$0xff]  ;;  %v19409_v19 = vld [vmem:[#allocation160_spill] sm:$0xff] }
 0x930   : > { %19393 = vst [vmem:[#allocation50_spill] sm:$0xff] %v15155_v30  ;;  %11926 = vpow2.f32 %v4122_v40  ;;  %v4076_v15 = vmul.f32 1.442695, %v3870_v58  ;;  %v3874_v62 = vsub.f32 %v19409_v19, %v15010_v16  ;;  %v19413_v19 = vld [vmem:[#allocation97_spill] sm:$0xff] }
 0x931   : > { %v15139_v0 = vpop.permute.xlu1 %4380  ;;  %11928 = vpow2.f32 %v4072_v48  ;;  %v4130_v40 = vmul.f32 1.442695, %v3897_v43  ;;  %v3899_v48 = vsub.f32 %v19408_v5, %v15116_v60  ;;  %v4080_v58 = vmul.f32 1.442695, %v3872_v29 }
 0x932   : > { %v15143_v49 = vpop.permute.xlu0 %4323  ;;  %4572 = vperm.xlu1 %11196, %v15137_v38   ;;  %v15165_v38 = vpop.eup %11910  ;;  %11930 = vpow2.f32 %v4126_v61  ;;  %v18580_v61 = vsub.s32 7, %v19124_v26  ;;  %v4084_v5 = vmul.f32 1.442695, %v3874_v62 }
 0x933   : > { %4497 = vperm.xlu0 %11197, %v15141_v51   ;;  %19396 = vst [vmem:[#allocation81_spill] sm:$0xff] %v15165_v38  ;;  %v15169_v14 = vpop.eup %11912  ;;  %11932 = vpow2.f32 %v4076_v15  ;;  %v4134_v43 = vmul.f32 1.442695, %v3899_v48  ;;  %v19412_v15 = vld [vmem:[#allocation166_spill] sm:$0xff] }
 0x934   : > { %19398 = vst [vmem:[#allocation80_spill] sm:$0xff] %v15169_v14  ;;  %11934 = vpow2.f32 %v4130_v40  ;;  %v3901_v29 = vsub.f32 %v19412_v15, %v15116_v60  ;;  %v15234_v40 = vrot.slane %v14671_v46, %v18580_v61 }
 0x935   : > { %v15153_v17 = vpop.permute.xlu1 %4386  ;;  %11936 = vpow2.f32 %v4080_v58  ;;  %v19416_v58 = vld [vmem:[#allocation165_spill] sm:$0xff] }
 0x936   : > { %v15157_v56 = vpop.permute.xlu0 %4326  ;;  %4578 = vperm.xlu1 %11196, %v15151_v41   ;;  %v15179_v41 = vpop.eup %11914  ;;  %11938 = vpow2.f32 %v4134_v43  ;;  %v4138_v48 = vmul.f32 1.442695, %v3901_v29  ;;  %v3903_v62 = vsub.f32 %v19416_v58, %v15116_v60  ;;  %v19421_v29 = vld [vmem:[#allocation168_spill] sm:$0xff]  ;;  %v19422_v58 = vld [vmem:[#allocation107_spill] sm:$0xff] }
 0x937   : > { %4503 = vperm.xlu0 %11197, %v15155_v30   ;;  %19401 = vst [vmem:[#allocation54_spill] sm:$0xff] %v15179_v41  ;;  %v15183_v39 = vpop.eup %11916  ;;  %11940 = vpow2.f32 %v4084_v5 }
 0x938   : > { %19403 = vst [vmem:[#allocation59_spill] sm:$0xff] %v15183_v39  ;;  %v15193_v7 = vpop.eup %11918  ;;  %11942 = vpow2.f32 %v4138_v48  ;;  %v4142_v43 = vmul.f32 1.442695, %v3903_v62  ;;  %v19426_v62 = vld [vmem:[#allocation167_spill] sm:$0xff] }
 0x939   : > { %v15167_v51 = vpop.permute.xlu1 %4392  ;;  %19406 = vst [vmem:[#allocation86_spill] sm:$0xff] %v15193_v7 }
 0x93a   : > { %19397 = vst [vmem:[#allocation55_spill] sm:$0xff] %v15167_v51  ;;  %v15171_v34 = vpop.permute.xlu0 %4329  ;;  %4584 = vperm.xlu1 %11196, %v15165_v38  }
 0x93b   : > { %4509 = vperm.xlu0 %11197, %v15169_v14   ;;  %v15197_v14 = vpop.eup %11920 }
 0x93c   : > { %19407 = vst [vmem:[#allocation58_spill] sm:$0xff] %v15197_v14 }
 0x93d   : > { %v15181_v30 = vpop.permute.xlu1 %4398 }
 0x93e   : > { %19402 = vst [vmem:[#allocation88_spill] sm:$0xff] %v15181_v30  ;;  %v15185_v12 = vpop.permute.xlu0 %4335  ;;  %4590 = vperm.xlu1 %11196, %v15179_v41   ;;  %v15207_v41 = vpop.eup %11922 }
 0x93f   : > { %4515 = vperm.xlu0 %11197, %v15183_v39   ;;  %19410 = vst [vmem:[#allocation105_spill] sm:$0xff] %v15207_v41  ;;  %v15211_v32 = vpop.eup %11924 }
 0x940   : > { %19411 = vst [vmem:[#allocation63_spill] sm:$0xff] %v15211_v32 }
 0x941   : > { %v15195_v38 = vpop.permute.xlu1 %4404 }
 0x942   : > { %v15199_v50 = vpop.permute.xlu0 %4338  ;;  %4596 = vperm.xlu1 %11196, %v15193_v7   ;;  %v3876_v7 = vsub.f32 %v19413_v19, %v15010_v16  ;;  %v19417_v19 = vld [vmem:[#allocation95_spill] sm:$0xff] }
 0x943   : > { %4521 = vperm.xlu0 %11197, %v15197_v14   ;;  %v15222_v14 = vpop.eup %11926 }
 0x944   : > { %19414 = vst [vmem:[#allocation103_spill] sm:$0xff] %v15222_v14  ;;  %v15226_v45 = vpop.eup %11928  ;;  %v4088_v15 = vmul.f32 1.442695, %v3876_v7  ;;  %v3905_v7 = vsub.f32 %v19421_v29, %v15234_v40  ;;  %v19427_v29 = vld [vmem:[#allocation104_spill] sm:$0xff] }
 0x945   : > { %v15209_v39 = vpop.permute.xlu1 %4410  ;;  %19415 = vst [vmem:[#allocation62_spill] sm:$0xff] %v15226_v45  ;;  %v15241_v4 = vpop.eup %11930 }
 0x946   : > { %v15213_v52 = vpop.permute.xlu0 %4341  ;;  %4602 = vperm.xlu1 %11196, %v15207_v41   ;;  %19418 = vst [vmem:[#allocation120_spill] sm:$0xff] %v15241_v4  ;;  %v15245_v26 = vpop.eup %11932  ;;  %11944 = vpow2.f32 %v4088_v15  ;;  %v4146_v48 = vmul.f32 1.442695, %v3905_v7  ;;  %v19431_v7 = vld [vmem:[#allocation172_spill] sm:$0xff] }
 0x947   : > { %4527 = vperm.xlu0 %11197, %v15211_v32   ;;  %v3878_v32 = vsub.f32 %v19417_v19, %v15010_v16  ;;  %19419 = vst [vmem:[#allocation67_spill] sm:$0xff] %v15245_v26  ;;  %v3880_v19 = vsub.f32 %v19422_v58, %v15010_v16  ;;  %v15255_v61 = vpop.eup %11934  ;;  %11946 = vpow2.f32 %v4142_v43  ;;  %v3882_v58 = vsub.f32 %v19427_v29, %v15010_v16 }
 0x948   : > { %19423 = vst [vmem:[#allocation66_spill] sm:$0xff] %v15255_v61  ;;  %v15259_v28 = vpop.eup %11936 }
 0x949   : > { %v15224_v13 = vpop.permute.xlu1 %4416  ;;  %v4092_v5 = vmul.f32 1.442695, %v3878_v32  ;;  %19425 = vst [vmem:[#allocation71_spill] sm:$0xff] %v15259_v28  ;;  %v3907_v32 = vsub.f32 %v19426_v62, %v15234_v40  ;;  %v4096_v15 = vmul.f32 1.442695, %v3880_v19  ;;  %v19432_v62 = vld [vmem:[#allocation112_spill] sm:$0xff] }
 0x94a   : > { %v15228_v41 = vpop.permute.xlu0 %4344  ;;  %4608 = vperm.xlu1 %11196, %v15222_v14   ;;  %v4100_v19 = vmul.f32 1.442695, %v3882_v58  ;;  %v3884_v29 = vsub.f32 %v19432_v62, %v15010_v16 }
 0x94b   : > { %4533 = vperm.xlu0 %11197, %v15226_v45   ;;  %11948 = vpow2.f32 %v4092_v5  ;;  %v4150_v43 = vmul.f32 1.442695, %v3907_v32  ;;  %v3909_v5 = vsub.f32 %v19431_v7, %v15234_v40  ;;  %v19436_v32 = vld [vmem:[#allocation169_spill] sm:$0xff]  ;;  %v19437_v7 = vld [vmem:[#allocation111_spill] sm:$0xff] }
 0x94c   : > { %11950 = vpow2.f32 %v4146_v48  ;;  %v4104_v58 = vmul.f32 1.442695, %v3884_v29  ;;  %v3886_v62 = vsub.f32 %v19437_v7, %v15010_v16  ;;  %v19442_v16 = vld [vmem:[#allocation173_spill] sm:$0xff] }
 0x94d   : > { %v15243_v14 = vpop.permute.xlu1 %4422  ;;  %11952 = vpow2.f32 %v4096_v15  ;;  %v4154_v48 = vmul.f32 1.442695, %v3909_v5  ;;  %v3911_v15 = vsub.f32 %v19436_v32, %v15234_v40  ;;  %v19441_v5 = vld [vmem:[#allocation177_spill] sm:$0xff]  ;;  %v3888_v32 = vsub.f32 %v19442_v16, %v15116_v60 }
 0x94e   : > { %v15247_v46 = vpop.permute.xlu0 %4347  ;;  %4614 = vperm.xlu1 %11196, %v15241_v4   ;;  %v15269_v4 = vpop.eup %11938  ;;  %11954 = vpow2.f32 %v4150_v43  ;;  %v4108_v29 = vmul.f32 1.442695, %v3886_v62 }
 0x94f   : > { %19420 = vst [vmem:[#allocation119_spill] sm:$0xff] %v15247_v46  ;;  %4539 = vperm.xlu0 %11197, %v15245_v26   ;;  %19428 = vst [vmem:[#allocation121_spill] sm:$0xff] %v15269_v4  ;;  %v15273_v11 = vpop.eup %11940  ;;  %11956 = vpow2.f32 %v4100_v19  ;;  %v4158_v43 = vmul.f32 1.442695, %v3911_v15  ;;  %v3913_v19 = vsub.f32 %v19441_v5, %v15234_v40  ;;  %v19446_v15 = vld [vmem:[#allocation174_spill] sm:$0xff] }
 0x950   : > { %19430 = vst [vmem:[#allocation128_spill] sm:$0xff] %v15273_v11  ;;  %11958 = vpow2.f32 %v4154_v48  ;;  %v4112_v62 = vmul.f32 1.442695, %v3888_v32  ;;  %v19447_v5 = vld [vmem:[#allocation170_spill] sm:$0xff] }
 0x951   : > { %v15257_v45 = vpop.permute.xlu1 %4428  ;;  %11960 = vpow2.f32 %v4104_v58  ;;  %v4162_v48 = vmul.f32 1.442695, %v3913_v19  ;;  %v3915_v58 = vsub.f32 %v19446_v15, %v15234_v40  ;;  %v3890_v16 = vsub.f32 %v19447_v5, %v15116_v60  ;;  %v19451_v19 = vld [vmem:[#allocation197_spill] sm:$0xff]  ;;  %v19452_v15 = vld [vmem:[#allocation178_spill] sm:$0xff] }
 0x952   : > { %19424 = vst [vmem:[#allocation124_spill] sm:$0xff] %v15257_v45  ;;  %v15261_v1 = vpop.permute.xlu0 %4353  ;;  %4620 = vperm.xlu1 %11196, %v15255_v61   ;;  %v15283_v61 = vpop.eup %11942  ;;  %11962 = vpow2.f32 %v4158_v43  ;;  %v3892_v5 = vsub.f32 %v19452_v15, %v15116_v60 }
 0x953   : > { %4545 = vperm.xlu0 %11197, %v15259_v28   ;;  %19433 = vst [vmem:[#allocation75_spill] sm:$0xff] %v15283_v61  ;;  %11964 = vpow2.f32 %v4108_v29  ;;  %v4166_v43 = vmul.f32 1.442695, %v3915_v58  ;;  %v3917_v29 = vsub.f32 %v19451_v19, %v15234_v40  ;;  %v4116_v32 = vmul.f32 1.442695, %v3890_v16  ;;  %v19456_v58 = vld [vmem:[#allocation194_spill] sm:$0xff] }
 0x954   : > { %11966 = vpow2.f32 %v4162_v48  ;;  %v4120_v16 = vmul.f32 1.442695, %v3892_v5  ;;  %v19457_v19 = vld [vmem:[#allocation175_spill] sm:$0xff] }
 0x955   : > { %v15271_v26 = vpop.permute.xlu1 %4434  ;;  %11968 = vpow2.f32 %v4112_v62  ;;  %v4170_v48 = vmul.f32 1.442695, %v3917_v29  ;;  %v3919_v62 = vsub.f32 %v19456_v58, %v15234_v40  ;;  %v3894_v15 = vsub.f32 %v19457_v19, %v15116_v60 }
 0x956   : > { %19429 = vst [vmem:[#allocation70_spill] sm:$0xff] %v15271_v26  ;;  %v15275_v30 = vpop.permute.xlu0 %4359  ;;  %4626 = vperm.xlu1 %11196, %v15269_v4   ;;  %v15287_v26 = vpop.eup %11944  ;;  %11970 = vpow2.f32 %v4166_v43 }
 0x957   : > { %4551 = vperm.xlu0 %11197, %v15273_v11   ;;  %19435 = vst [vmem:[#allocation74_spill] sm:$0xff] %v15287_v26  ;;  %v15297_v4 = vpop.eup %11946  ;;  %11972 = vpow2.f32 %v4116_v32  ;;  %v4174_v43 = vmul.f32 1.442695, %v3919_v62  ;;  %v4124_v29 = vmul.f32 1.442695, %v3894_v15  ;;  %v19462_v32 = vld [vmem:[#allocation182_spill] sm:$0xff] }
 0x958   : > { %19438 = vst [vmem:[#allocation130_spill] sm:$0xff] %v15297_v4  ;;  %11974 = vpow2.f32 %v4170_v48  ;;  %v3896_v5 = vsub.f32 %v19462_v32, %v15116_v60  ;;  %v19466_v62 = vld [vmem:[#allocation180_spill] sm:$0xff] }
 0x959   : > { %v15285_v28 = vpop.permute.xlu1 %4440  ;;  %11976 = vpow2.f32 %v4120_v16  ;;  %v3898_v16 = vsub.f32 %v19466_v62, %v15116_v60 }
 0x95a   : > { %19434 = vst [vmem:[#allocation126_spill] sm:$0xff] %v15285_v28  ;;  %v15289_v44 = vpop.permute.xlu0 %4365  ;;  %4632 = vperm.xlu1 %11196, %v15283_v61   ;;  %v15301_v28 = vpop.eup %11948  ;;  %11978 = vpow2.f32 %v4174_v43  ;;  %v4128_v48 = vmul.f32 1.442695, %v3896_v5  ;;  %v19470_v43 = vld [vmem:[#allocation186_spill] sm:$0xff] }
 0x95b   : > { %4557 = vperm.xlu0 %11197, %v15287_v26   ;;  %19440 = vst [vmem:[#allocation129_spill] sm:$0xff] %v15301_v28  ;;  %v15311_v7 = vpop.eup %11950  ;;  %11980 = vpow2.f32 %v4124_v29  ;;  %v3900_v29 = vsub.f32 %v19470_v43, %v15116_v60 }
 0x95c   : > { %19443 = vst [vmem:[#allocation78_spill] sm:$0xff] %v15311_v7  ;;  %v15315_v26 = vpop.eup %11952  ;;  %11982 = vpow2.f32 %v4128_v48  ;;  %v19474_v48 = vld [vmem:[#allocation184_spill] sm:$0xff] }
 0x95d   : > { %v15299_v11 = vpop.permute.xlu1 %4446  ;;  %19445 = vst [vmem:[#allocation83_spill] sm:$0xff] %v15315_v26 }
 0x95e   : > { %19439 = vst [vmem:[#allocation79_spill] sm:$0xff] %v15299_v11  ;;  %v15303_v36 = vpop.permute.xlu0 %4371  ;;  %4638 = vperm.xlu1 %11196, %v15297_v4   ;;  %v15325_v4 = vpop.eup %11954 }
 0x95f   : > { %4563 = vperm.xlu0 %11197, %v15301_v28   ;;  %19448 = vst [vmem:[#allocation131_spill] sm:$0xff] %v15325_v4  ;;  %v15329_v45 = vpop.eup %11956 }
 0x960   : > { %19450 = vst [vmem:[#allocation133_spill] sm:$0xff] %v15329_v45 }
 0x961   : > { %v15313_v61 = vpop.permute.xlu1 %4452 }
 0x962   : > { %19444 = vst [vmem:[#allocation45_spill] sm:$0xff] %v15313_v61  ;;  %v15317_v11 = vpop.permute.xlu0 %4377  ;;  %4644 = vperm.xlu1 %11196, %v15311_v7   ;;  %v15339_v7 = vpop.eup %11958 }
 0x963   : > { %4569 = vperm.xlu0 %11197, %v15315_v26   ;;  %19453 = vst [vmem:[#allocation101_spill] sm:$0xff] %v15339_v7 }
 0x965   : > { %v15327_v28 = vpop.permute.xlu1 %4458 }
 0x966   : > { %19449 = vst [vmem:[#allocation39_spill] sm:$0xff] %v15327_v28  ;;  %v15331_v51 = vpop.permute.xlu0 %4383  ;;  %4650 = vperm.xlu1 %11196, %v15325_v4   ;;  %v15343_v28 = vpop.eup %11960 }
 0x967   : > { %4575 = vperm.xlu0 %11197, %v15329_v45   ;;  %19455 = vst [vmem:[#allocation98_spill] sm:$0xff] %v15343_v28  ;;  %v15353_v4 = vpop.eup %11962 }
 0x968   : > { %19458 = vst [vmem:[#allocation136_spill] sm:$0xff] %v15353_v4 }
 0x969   : > { %v15341_v26 = vpop.permute.xlu1 %4464 }
 0x96a   : > { %19454 = vst [vmem:[#allocation132_spill] sm:$0xff] %v15341_v26  ;;  %v15345_v61 = vpop.permute.xlu0 %4389  ;;  %4656 = vperm.xlu1 %11196, %v15339_v7   ;;  %v15357_v26 = vpop.eup %11964 }
 0x96b   : > { %4581 = vperm.xlu0 %11197, %v15343_v28   ;;  %19460 = vst [vmem:[#allocation134_spill] sm:$0xff] %v15357_v26  ;;  %v15365_v58 = vpop.eup %11966 }
 0x96c   : > { %19463 = vst [vmem:[#allocation140_spill] sm:$0xff] %v15365_v58  ;;  %v15369_v7 = vpop.eup %11968 }
 0x96d   : > { %v15355_v45 = vpop.permute.xlu1 %4470  ;;  %19465 = vst [vmem:[#allocation138_spill] sm:$0xff] %v15369_v7  ;;  %v15377_v15 = vpop.eup %11970 }
 0x96e   : > { %19459 = vst [vmem:[#allocation117_spill] sm:$0xff] %v15355_v45  ;;  %v15359_v46 = vpop.permute.xlu0 %4395  ;;  %4662 = vperm.xlu1 %11196, %v15353_v4   ;;  %19467 = vst [vmem:[#allocation135_spill] sm:$0xff] %v15377_v15  ;;  %v15381_v4 = vpop.eup %11972  ;;  %v19481_v45 = vld [vmem:[#allocation187_spill] sm:$0xff] }
 0x96f   : > { %19461 = vst [vmem:[#allocation44_spill] sm:$0xff] %v15359_v46  ;;  %4587 = vperm.xlu0 %11197, %v15357_v26   ;;  %19469 = vst [vmem:[#allocation141_spill] sm:$0xff] %v15381_v4  ;;  %v15389_v5 = vpop.eup %11974 }
 0x970   : > { %19471 = vst [vmem:[#allocation142_spill] sm:$0xff] %v15389_v5 }
 0x971   : > { %v15367_v19 = vpop.permute.xlu1 %4476 }
 0x972   : > { %19464 = vst [vmem:[#allocation137_spill] sm:$0xff] %v15367_v19  ;;  %v15371_v28 = vpop.permute.xlu0 %4401  ;;  %4668 = vperm.xlu1 %11196, %v15365_v58   ;;  %v4132_v58 = vmul.f32 1.442695, %v3898_v16  ;;  %v3902_v16 = vsub.f32 %v19474_v48, %v15116_v60 }
 0x973   : > { %4593 = vperm.xlu0 %11197, %v15369_v7   ;;  %v15393_v7 = vpop.eup %11976 }
 0x974   : > { %19473 = vst [vmem:[#allocation148_spill] sm:$0xff] %v15393_v7  ;;  %11984 = vpow2.f32 %v4132_v58  ;;  %v19478_v58 = vld [vmem:[#allocation190_spill] sm:$0xff] }
 0x975   : > { %v15379_v32 = vpop.permute.xlu1 %4482 }
 0x976   : > { %19468 = vst [vmem:[#allocation144_spill] sm:$0xff] %v15379_v32  ;;  %v15383_v26 = vpop.permute.xlu0 %4407  ;;  %4674 = vperm.xlu1 %11196, %v15377_v15   ;;  %v4136_v15 = vmul.f32 1.442695, %v3900_v29  ;;  %v3904_v29 = vsub.f32 %v19478_v58, %v15234_v40 }
 0x977   : > { %4599 = vperm.xlu0 %11197, %v15381_v4   ;;  %v15401_v4 = vpop.eup %11978 }
 0x978   : > { %19475 = vst [vmem:[#allocation145_spill] sm:$0xff] %v15401_v4  ;;  %v15405_v19 = vpop.eup %11980  ;;  %11986 = vpow2.f32 %v4136_v15 }
 0x979   : > { %v15391_v62 = vpop.permute.xlu1 %4488  ;;  %19477 = vst [vmem:[#allocation143_spill] sm:$0xff] %v15405_v19  ;;  %v15415_v60 = vpop.eup %11982 }
 0x97a   : > { %19472 = vst [vmem:[#allocation139_spill] sm:$0xff] %v15391_v62  ;;  %v15395_v32 = vpop.permute.xlu0 %4413  ;;  %4680 = vperm.xlu1 %11196, %v15389_v5   ;;  %v4140_v5 = vmul.f32 1.442695, %v3902_v16  ;;  %19480 = vst [vmem:[#allocation149_spill] sm:$0xff] %v15415_v60 }
 0x97b   : > { %4605 = vperm.xlu0 %11197, %v15393_v7  }
 0x97c   : > { %11988 = vpow2.f32 %v4140_v5 }
 0x97d   : > { %v15403_v43 = vpop.permute.xlu1 %4494 }
 0x97e   : > { %19476 = vst [vmem:[#allocation146_spill] sm:$0xff] %v15403_v43  ;;  %v15407_v62 = vpop.permute.xlu0 %4419  ;;  %4686 = vperm.xlu1 %11196, %v15401_v4   ;;  %v4144_v43 = vmul.f32 1.442695, %v3904_v29  ;;  %v3906_v4 = vsub.f32 %v19481_v45, %v15234_v40  ;;  %v15424_v15 = vpop.eup %11984 }
 0x97f   : > { %4611 = vperm.xlu0 %11197, %v15405_v19   ;;  %19483 = vst [vmem:[#allocation147_spill] sm:$0xff] %v15424_v15  ;;  %v19485_v19 = vld [vmem:[#allocation195_spill] sm:$0xff] }
 0x980   : > { %11990 = vpow2.f32 %v4144_v43  ;;  %v4148_v58 = vmul.f32 1.442695, %v3906_v4 }
 0x981   : > { %v15413_v7 = vpop.permute.xlu1 %4500 }
 0x982   : > { %19479 = vst [vmem:[#allocation152_spill] sm:$0xff] %v15413_v7  ;;  %v15417_v48 = vpop.permute.xlu0 %4425  ;;  %v3908_v7 = vsub.f32 %v19485_v19, %v15234_v40  ;;  %v15433_v5 = vpop.eup %11986  ;;  %11992 = vpow2.f32 %v4148_v58 }
 0x983   : > { %4617 = vperm.xlu0 %11197, %v15415_v60   ;;  %19487 = vst [vmem:[#allocation154_spill] sm:$0xff] %v15433_v5  ;;  %v19489_v60 = vld [vmem:[#allocation192_spill] sm:$0xff] }
 0x984   : > { %v4152_v45 = vmul.f32 1.442695, %v3908_v7 }
 0x985   : > { %v15422_v46 = vpop.permute.xlu1 %4506 }
 0x986   : > { %19482 = vst [vmem:[#allocation150_spill] sm:$0xff] %v15422_v46  ;;  %v15426_v16 = vpop.permute.xlu0 %4431  ;;  %v3910_v46 = vsub.f32 %v19489_v60, %v15234_v40  ;;  %v15442_v43 = vpop.eup %11988  ;;  %11994 = vpow2.f32 %v4152_v45 }
 0x987   : > { %19484 = vst [vmem:[#allocation157_spill] sm:$0xff] %v15426_v16  ;;  %4623 = vperm.xlu0 %11197, %v15424_v15   ;;  %19491 = vst [vmem:[#allocation158_spill] sm:$0xff] %v15442_v43  ;;  %v19493_v15 = vld [vmem:[#allocation201_spill] sm:$0xff] }
 0x988   : > { %v4156_v19 = vmul.f32 1.442695, %v3910_v46 }
 0x989   : > { %v15431_v22 = vpop.permute.xlu1 %4512 }
 0x98a   : > { %19486 = vst [vmem:[#allocation153_spill] sm:$0xff] %v15431_v22  ;;  %v15435_v29 = vpop.permute.xlu0 %4437  ;;  %v3912_v22 = vsub.f32 %v19493_v15, %v15234_v40  ;;  %v15451_v58 = vpop.eup %11990  ;;  %11996 = vpow2.f32 %v4156_v19 }
 0x98b   : > { %19488 = vst [vmem:[#allocation151_spill] sm:$0xff] %v15435_v29  ;;  %4629 = vperm.xlu0 %11197, %v15433_v5   ;;  %19495 = vst [vmem:[#allocation164_spill] sm:$0xff] %v15451_v58  ;;  %v19497_v5 = vld [vmem:[#allocation198_spill] sm:$0xff] }
 0x98c   : > { %v4160_v60 = vmul.f32 1.442695, %v3912_v22  ;;  %v15460_v45 = vpop.eup %11992 }
 0x98d   : > { %v15440_v16 = vpop.permute.xlu1 %4518  ;;  %19499 = vst [vmem:[#allocation160_spill] sm:$0xff] %v15460_v45 }
 0x98e   : > { %19490 = vst [vmem:[#allocation161_spill] sm:$0xff] %v15440_v16  ;;  %v15444_v4 = vpop.permute.xlu0 %4443  ;;  %v3914_v16 = vsub.f32 %v19497_v5, %v15234_v40  ;;  %11998 = vpow2.f32 %v4160_v60 }
 0x98f   : > { %19492 = vst [vmem:[#allocation159_spill] sm:$0xff] %v15444_v4  ;;  %4635 = vperm.xlu0 %11197, %v15442_v43   ;;  %v19501_v43 = vld [vmem:[#allocation207_spill] sm:$0xff] }
 0x990   : > { %v4164_v15 = vmul.f32 1.442695, %v3914_v16  ;;  %v15469_v19 = vpop.eup %11994 }
 0x991   : > { %v15449_v29 = vpop.permute.xlu1 %4524  ;;  %19503 = vst [vmem:[#allocation165_spill] sm:$0xff] %v15469_v19 }
 0x992   : > { %19494 = vst [vmem:[#allocation155_spill] sm:$0xff] %v15449_v29  ;;  %v15453_v7 = vpop.permute.xlu0 %4449  ;;  %v3916_v29 = vsub.f32 %v19501_v43, %v15234_v40  ;;  %12000 = vpow2.f32 %v4164_v15 }
 0x993   : > { %19496 = vst [vmem:[#allocation162_spill] sm:$0xff] %v15453_v7  ;;  %4641 = vperm.xlu0 %11197, %v15451_v58   ;;  %v19504_v58 = vld [vmem:[#allocation204_spill] sm:$0xff] }
 0x994   : > { %v4168_v5 = vmul.f32 1.442695, %v3916_v29  ;;  %v15478_v60 = vpop.eup %11996 }
 0x995   : > { %v15458_v4 = vpop.permute.xlu1 %4530  ;;  %19506 = vst [vmem:[#allocation168_spill] sm:$0xff] %v15478_v60 }
 0x996   : > { %19498 = vst [vmem:[#allocation163_spill] sm:$0xff] %v15458_v4  ;;  %v15462_v46 = vpop.permute.xlu0 %4455  ;;  %v3918_v4 = vsub.f32 %v19504_v58, %v15234_v40  ;;  %12002 = vpow2.f32 %v4168_v5 }
 0x997   : > { %19500 = vst [vmem:[#allocation166_spill] sm:$0xff] %v15462_v46  ;;  %4647 = vperm.xlu0 %11197, %v15460_v45  }
 0x998   : > { %v4172_v43 = vmul.f32 1.442695, %v3918_v4  ;;  %v15483_v45 = vpop.eup %11998 }
 0x999   : > { %v15467_v7 = vpop.permute.xlu1 %4536  ;;  %19507 = vst [vmem:[#allocation107_spill] sm:$0xff] %v15483_v45 }
 0x99a   : > { %19502 = vst [vmem:[#allocation97_spill] sm:$0xff] %v15467_v7  ;;  %v15471_v22 = vpop.permute.xlu0 %4461  ;;  %12004 = vpow2.f32 %v4172_v43 }
 0x99b   : > { %4653 = vperm.xlu0 %11197, %v15469_v19  }
 0x99c   : > { %v15490_v40 = vpop.eup %12000 }
 0x99d   : > { %v15476_v46 = vpop.permute.xlu1 %4542  ;;  %19509 = vst [vmem:[#allocation104_spill] sm:$0xff] %v15490_v40 }
 0x99e   : > { %19505 = vst [vmem:[#allocation95_spill] sm:$0xff] %v15476_v46  ;;  %v15480_v16 = vpop.permute.xlu0 %4467 }
 0x99f   : > { %4659 = vperm.xlu0 %11197, %v15478_v60  }
 0x9a0   : > { %v15497_v15 = vpop.eup %12002 }
 0x9a1   : > { %v15487_v19 = vpop.permute.xlu1 %4548  ;;  %19512 = vst [vmem:[#allocation169_spill] sm:$0xff] %v15497_v15 }
 0x9a2   : > { %v15485_v7 = vpop.permute.xlu0 %4473  ;;  %19508 = vst [vmem:[#allocation167_spill] sm:$0xff] %v15487_v19 }
 0x9a3   : > { %4665 = vperm.xlu0 %11197, %v15483_v45  }
 0x9a4   : > { %v15502_v5 = vpop.eup %12004 }
 0x9a5   : > { %v15495_v58 = vpop.permute.xlu1 %4554  ;;  %19514 = vst [vmem:[#allocation177_spill] sm:$0xff] %v15502_v5 }
 0x9a6   : > { %v15492_v29 = vpop.permute.xlu0 %4479  ;;  %19511 = vst [vmem:[#allocation112_spill] sm:$0xff] %v15495_v58 }
 0x9a7   : > { %19510 = vst [vmem:[#allocation172_spill] sm:$0xff] %v15492_v29  ;;  %4671 = vperm.xlu0 %11197, %v15490_v40  }
 0x9a9   : > { %v15506_v45 = vpop.permute.xlu1 %4560 }
 0x9aa   : > { %v15499_v4 = vpop.permute.xlu0 %4485  ;;  %19516 = vst [vmem:[#allocation174_spill] sm:$0xff] %v15506_v45 }
 0x9ab   : > { %19513 = vst [vmem:[#allocation111_spill] sm:$0xff] %v15499_v4  ;;  %4677 = vperm.xlu0 %11197, %v15497_v15  }
 0x9ad   : > { %v15511_v46 = vpop.permute.xlu1 %4566 }
 0x9ae   : > { %v15504_v60 = vpop.permute.xlu0 %4491  ;;  %19518 = vst [vmem:[#allocation197_spill] sm:$0xff] %v15511_v46 }
 0x9af   : > { %19515 = vst [vmem:[#allocation173_spill] sm:$0xff] %v15504_v60  ;;  %4683 = vperm.xlu0 %11197, %v15502_v5  }
 0x9b1   : > { %v15517_v29 = vpop.permute.xlu1 %4572 }
 0x9b2   : > { %v15509_v43 = vpop.permute.xlu0 %4497  ;;  %19521 = vst [vmem:[#allocation175_spill] sm:$0xff] %v15517_v29 }
 0x9b3   : > { %19517 = vst [vmem:[#allocation170_spill] sm:$0xff] %v15509_v43 }
 0x9b5   : > { %v15521_v15 = vpop.permute.xlu1 %4578 }
 0x9b6   : > { %v15513_v40 = vpop.permute.xlu0 %4503  ;;  %19523 = vst [vmem:[#allocation180_spill] sm:$0xff] %v15521_v15 }
 0x9b7   : > { %19519 = vst [vmem:[#allocation178_spill] sm:$0xff] %v15513_v40 }
 0x9b9   : > { %v15527_v45 = vpop.permute.xlu1 %4584 }
 0x9ba   : > { %v15515_v58 = vpop.permute.xlu0 %4509  ;;  %19526 = vst [vmem:[#allocation190_spill] sm:$0xff] %v15527_v45 }
 0x9bb   : > { %19520 = vst [vmem:[#allocation194_spill] sm:$0xff] %v15515_v58 }
 0x9bd   : > { %v15531_v43 = vpop.permute.xlu1 %4590 }
 0x9be   : > { %v15519_v4 = vpop.permute.xlu0 %4515  ;;  %19528 = vst [vmem:[#allocation195_spill] sm:$0xff] %v15531_v43 }
 0x9bf   : > { %19522 = vst [vmem:[#allocation182_spill] sm:$0xff] %v15519_v4 }
 0x9c1   : > { %v15537_v58 = vpop.permute.xlu1 %4596 }
 0x9c2   : > { %v15523_v19 = vpop.permute.xlu0 %4521  ;;  %19530 = vst [vmem:[#allocation201_spill] sm:$0xff] %v15537_v58 }
 0x9c3   : > { %19524 = vst [vmem:[#allocation186_spill] sm:$0xff] %v15523_v19 }
 0x9c5   : > { %v15541_v4 = vpop.permute.xlu1 %4602 }
 0x9c6   : > { %v15525_v60 = vpop.permute.xlu0 %4527  ;;  %19532 = vst [vmem:[#allocation207_spill] sm:$0xff] %v15541_v4  ;;  %v4779_v4 = vrot.slane %v15275_v30, %v14199_v33  ;;  %v4789_v30 = vrot.slane %v15289_v44, %v14206_v55 }
 0x9c7   : > { %19525 = vst [vmem:[#allocation184_spill] sm:$0xff] %v15525_v60 }
 0x9c9   : > { %v15547_v60 = vpop.permute.xlu1 %4608 }
 0x9ca   : > { %v15529_v5 = vpop.permute.xlu0 %4533  ;;  %19534 = vst [vmem:[#allocation231_spill] sm:$0xff] %v15547_v60 }
 0x9cb   : > { %19527 = vst [vmem:[#allocation187_spill] sm:$0xff] %v15529_v5 }
 0x9cd   : > { %v15551_v5 = vpop.permute.xlu1 %4614 }
 0x9ce   : > { %v15533_v46 = vpop.permute.xlu0 %4539  ;;  %19536 = vst [vmem:[#allocation233_spill] sm:$0xff] %v15551_v5 }
 0x9cf   : > { %19529 = vst [vmem:[#allocation192_spill] sm:$0xff] %v15533_v46  ;;  %v4770_v46 = vrot.slane %v15261_v1, %v14189_v35  ;;  %v4700_v1 = vrot.slane %v15081_v24, %v14199_v33 }
 0x9d2   : > { %v15535_v40 = vpop.permute.xlu0 %4545 }
 0x9d6   : > { %v15539_v29 = vpop.permute.xlu0 %4551 }
 0x9d7   : > { %19531 = vst [vmem:[#allocation198_spill] sm:$0xff] %v15539_v29  ;;  %v15561_v29 = vpop.permute.xlu1 %4620 }
 0x9d8   : > { %19538 = vst [vmem:[#allocation235_spill] sm:$0xff] %v15561_v29  ;;  %v4691_v29 = vrot.slane %v15053_v47, %v14189_v35  ;;  %v4849_v47 = vrot.slane %v15371_v28, %v14189_v35  ;;  %v4720_v28 = vrot.slane %v15143_v49, %v14237_v27 }
 0x9da   : > { %v15543_v15 = vpop.permute.xlu0 %4557 }
 0x9de   : > { %v15545_v19 = vpop.permute.xlu0 %4563 }
 0x9df   : > { %19533 = vst [vmem:[#allocation204_spill] sm:$0xff] %v15545_v19  ;;  %v4774_v19 = vrot.slane %v15077_v21, %v14182_v25  ;;  %v4784_v21 = vrot.slane %v15091_v2, %v14211_v63 }
 0x9e1   : > { %v4775_v5 = vsel %vm3081_vm1, %v4774_v19, %v4770_v46  ;;  %v4710_v46 = vrot.slane %v15110_v37, %v14206_v55  ;;  %v15583_v19 = vpop.permute.xlu1 %4626  ;;  %v4799_v37 = vrot.slane %v15303_v36, %v14237_v27 }
 0x9e2   : > { %v15549_v45 = vpop.permute.xlu0 %4569 }
 0x9e3   : > { %19535 = vst [vmem:[#allocation232_spill] sm:$0xff] %v15549_v45  ;;  %v4695_v45 = vrot.slane %v15067_v20, %v14182_v25  ;;  %v4705_v20 = vrot.slane %v15095_v42, %v14211_v63 }
 0x9e5   : > { %v4696_v24 = vsel %vm3081_vm1, %v4695_v45, %v4691_v29  ;;  %v4858_v45 = vrot.slane %v15383_v26, %v14199_v33  ;;  %v4730_v26 = vrot.slane %v15171_v34, %v14243_v6  ;;  %v4804_v34 = vrot.slane %v15125_v23, %v14240_v54 }
 0x9e6   : > { %v15553_v43 = vpop.permute.xlu0 %4575  ;;  %v4701_v2 = vsel %vm3088_vm2, %v4700_v1, %v4696_v24  ;;  %v15622_v24 = vpop.permute.xlu1 %4632  ;;  %v4819_v23 = vrot.slane %v15331_v51, %v14271_v18  ;;  %v4824_v51 = vrot.slane %v15153_v17, %v14293_v10  ;;  %v4829_v17 = vrot.slane %v15345_v61, %v14299_v31  ;;  %v19550_v61 = vld [vmem:[#allocation119_spill] sm:$0xff] }
 0x9e7   : > { %v4706_v29 = vsel %vm3095_vm3, %v4705_v20, %v4701_v2 }
 0x9e8   : > { %v4711_v1 = vsel %vm3102_vm4, %v4710_v46, %v4706_v29  ;;  %v4735_v29 = vrot.slane %v15049_v59, %v14259_v3  ;;  %v4750_v59 = vrot.slane %v15213_v52, %v14299_v31  ;;  %v4755_v52 = vrot.slane %v15228_v41, %v14302_v8 }
 0x9ea   : > { %v15557_v58 = vpop.permute.xlu0 %4581 }
 0x9eb   : > { %19537 = vst [vmem:[#allocation234_spill] sm:$0xff] %v15557_v58  ;;  %v4780_v58 = vsel %vm3088_vm2, %v4779_v4, %v4775_v5  ;;  %v4715_v4 = vrot.slane %v15129_v9, %v14214_v57  ;;  %v4794_v9 = vrot.slane %v15106_v53, %v14214_v57 }
 0x9ec   : > { %v4785_v44 = vsel %vm3095_vm3, %v4784_v21, %v4780_v58  ;;  %v4853_v58 = vrot.slane %v15195_v38, %v14182_v25  ;;  %v4809_v38 = vrot.slane %v15317_v11, %v14243_v6 }
 0x9ed   : > { %v4790_v42 = vsel %vm3102_vm4, %v4789_v30, %v4785_v44  ;;  %v4725_v30 = vrot.slane %v15157_v56, %v14240_v54  ;;  %v4716_v36 = vsel %vm3109_vm5, %v4715_v4, %v4711_v1  ;;  %v4868_v56 = vrot.slane %v15395_v32, %v14206_v55 }
 0x9ee   : > { %v15568_v60 = vpop.permute.xlu0 %4587  ;;  %v4795_v21 = vsel %vm3109_vm5, %v4794_v9, %v4790_v42  ;;  %v4854_v53 = vsel %vm3081_vm1, %v4853_v58, %v4849_v47  ;;  %v4721_v4 = vsel %vm3116_vm6, %v4720_v28, %v4716_v36  ;;  %v4863_v44 = vrot.slane %v15209_v39, %v14211_v63 }
 0x9ef   : > { %v4800_v49 = vsel %vm3116_vm6, %v4799_v37, %v4795_v21  ;;  %v4859_v46 = vsel %vm3088_vm2, %v4858_v45, %v4854_v53  ;;  %v4726_v47 = vsel %vm19539_vm7, %v4725_v30, %v4721_v4  ;;  %v4878_v39 = vrot.slane %v15407_v62, %v14237_v27  ;;  %v15653_v30 = vpop.permute.xlu1 %4638  ;;  %v19551_v4 = vld [vmem:[#allocation166_spill] sm:$0xff] }
 0x9f0   : > { %v4731_v2 = vsel %vm19540_vm8, %v4730_v26, %v4726_v47  ;;  %v4805_v11 = vsel %vm19541_vm10, %v4804_v34, %v4800_v49  ;;  %v4864_v42 = vsel %vm3095_vm3, %v4863_v44, %v4859_v46  ;;  %v4814_v9 = vrot.slane %v15139_v0, %v14259_v3  ;;  %19543 = vst [vmem:[#allocation236_spill] sm:$0xff] %v15653_v30  ;;  %v19548_v49 = vld [vmem:[#allocation162_spill] sm:$0xff]  ;;  %v19552_v47 = vld [vmem:[#allocation45_spill] sm:$0xff] }
 0x9f1   : > { %v4810_v32 = vsel %vm19542_vm0, %v4809_v38, %v4805_v11  ;;  %v4869_v45 = vsel %vm3102_vm4, %v4868_v56, %v4864_v42  ;;  %v4740_v28 = vrot.slane %v15185_v12, %v14271_v18  ;;  %v4873_v58 = vrot.slane %v15224_v13, %v14214_v57  ;;  %v19549_v56 = vld [vmem:[#allocation90_spill] sm:$0xff] }
 0x9f2   : > { %v15591_v5 = vpop.permute.xlu0 %4593  ;;  %v4745_v1 = vrot.slane %v15199_v50, %v14293_v10  ;;  %vm19544_vm0 = vcmask 654912   ;;  %vm19546_vm8 = vcmask 720512   ;;  %v4888_v26 = vrot.slane %v15417_v48, %v14243_v6 }
 0x9f3   : > { %v4736_v62 = vsel %vm19544_vm0, %v4735_v29, %v4731_v2  ;;  %vm19545_vm7 = vmmov %vm19544_vm0  ;;  %v4874_v12 = vsel %vm3109_vm5, %v4873_v58, %v4869_v45  ;;  %v4883_v53 = vrot.slane %v15243_v14, %v14240_v54  ;;  %v4928_v38 = vrot.slane %v19548_v49, %v14189_v35 }
 0x9f4   : > { %v4815_v0 = vsel %vm19545_vm7, %v4814_v9, %v4810_v32  ;;  %v4879_v50 = vsel %vm3116_vm6, %v4878_v39, %v4874_v12  ;;  %vm19547_vm10 = vmmov %vm19546_vm8  ;;  %v4760_v34 = vrot.slane %v19550_v61, %v19549_v56  ;;  %v4937_v44 = vrot.slane %v19551_v4, %v14199_v33  ;;  %v19554_v32 = vld [vmem:[#allocation44_spill] sm:$0xff]  ;;  %v19556_v39 = vld [vmem:[#allocation157_spill] sm:$0xff]  ;;  %v15693_v9 = vpop.permute.xlu1 %4644 }
 0x9f5   : > { %v4820_v13 = vsel %vm19546_vm8, %v4819_v23, %v4815_v0  ;;  %v4741_v21 = vsel %vm19547_vm10, %v4740_v28, %v4736_v62  ;;  %v4932_v2 = vrot.slane %v19552_v47, %v14182_v25  ;;  %vm19553_vm0 = vcmask 523712   ;;  %v19557_v28 = vld [vmem:[#allocation55_spill] sm:$0xff]  ;;  %v19566_v47 = vld [vmem:[#allocation70_spill] sm:$0xff] }
 0x9f6   : > { %v15614_v20 = vpop.permute.xlu0 %4599  ;;  %v4746_v46 = vsel %vm3151_vm11, %v4745_v1, %v4741_v21  ;;  %v4825_v41 = vsel %vm3151_vm11, %v4824_v51, %v4820_v13  ;;  %v4884_v14 = vsel %vm19553_vm0, %v4883_v53, %v4879_v50  ;;  %v4839_v23 = vrot.slane %v19554_v32, %v19549_v56  ;;  %v19558_v1 = vld [vmem:[#allocation124_spill] sm:$0xff]  ;;  %v19561_v21 = vld [vmem:[#allocation39_spill] sm:$0xff] }
 0x9f7   : > { %v4751_v48 = vsel %vm3158_vm12, %v4750_v59, %v4746_v46  ;;  %v4830_v42 = vsel %vm3158_vm12, %v4829_v17, %v4825_v41  ;;  %vm19555_vm7 = vcmask 589312   ;;  %v4898_v29 = vrot.slane %v19556_v39, %v14271_v18  ;;  %v19559_v17 = vld [vmem:[#allocation94_spill] sm:$0xff]  ;;  %v19560_v50 = vld [vmem:[#allocation64_spill] sm:$0xff]  ;;  %v19568_v32 = vld [vmem:[#allocation79_spill] sm:$0xff] }
 0x9f8   : > { %v4889_v45 = vsel %vm19555_vm7, %v4888_v26, %v4884_v14  ;;  %v4834_v58 = vrot.slane %v19557_v28, %v14302_v8  ;;  %v4756_v51 = vsel %vm3165_vm13, %v4755_v52, %v4751_v48  ;;  %v4893_v62 = vrot.slane %v19558_v1, %v14259_v3  ;;  %v19567_v41 = vld [vmem:[#allocation126_spill] sm:$0xff] }
 0x9f9   : > { %v4933_v59 = vsel %vm3081_vm1, %v4932_v2, %v4928_v38  ;;  %v4761_v0 = vsel %vm3172_vm14, %v4760_v34, %v4756_v51  ;;  %v4947_v13 = vrot.slane %v15471_v22, %v14206_v55  ;;  %v4765_v26 = vrot.slane %v19560_v50, %v19559_v17  ;;  %v19563_v38 = vld [vmem:[#allocation88_spill] sm:$0xff]  ;;  %v19564_v22 = vld [vmem:[#allocation151_spill] sm:$0xff]  ;;  %v19570_v51 = vld [vmem:[#allocation117_spill] sm:$0xff] }
 0x9fa   : > { %v15633_v37 = vpop.permute.xlu0 %4605  ;;  %v4938_v12 = vsel %vm3088_vm2, %v4937_v44, %v4933_v59  ;;  %v4942_v53 = vrot.slane %v19561_v21, %v14211_v63  ;;  %v4835_v52 = vsel %vm3165_vm13, %v4834_v58, %v4830_v42  ;;  %vm19562_vm8 = vcmask 654912   ;;  %v15734_v58 = vpop.permute.xlu1 %4650  ;;  %v19572_v59 = vld [vmem:[#allocation137_spill] sm:$0xff] }
 0x9fb   : > { %v4894_v49 = vsel %vm19562_vm8, %v4893_v62, %v4889_v45  ;;  %v4844_v61 = vrot.slane %v19563_v38, %v19559_v17  ;;  %v4840_v34 = vsel %vm3172_vm14, %v4839_v23, %v4835_v52  ;;  %v4908_v44 = vrot.slane %v19564_v22, %v14299_v31  ;;  %v19569_v23 = vld [vmem:[#allocation132_spill] sm:$0xff]  ;;  %v19575_v52 = vld [vmem:[#allocation159_spill] sm:$0xff]  ;;  %v19576_v38 = vld [vmem:[#allocation146_spill] sm:$0xff] }
 0x9fc   : > { %v4899_v4 = vsel %vm19547_vm10, %v4898_v29, %v4894_v49  ;;  %v15720_v48 = vsel %vm3179_vm15, %v4765_v26, %v4761_v0  ;;  %v4903_v2 = vrot.slane %v19566_v47, %v14293_v10  ;;  %v4913_v14 = vrot.slane %v19567_v41, %v14302_v8  ;;  %v19579_v41 = vld [vmem:[#allocation153_spill] sm:$0xff] }
 0x9fd   : > { %19565 = vst [vmem:[#allocation162_spill] sm:$0xff] %v15720_v48  ;;  %v4943_v42 = vsel %vm3095_vm3, %v4942_v53, %v4938_v12  ;;  %v4952_v39 = vrot.slane %v19569_v23, %v14214_v57  ;;  %v4957_v28 = vrot.slane %v15480_v16, %v14237_v27  ;;  %v4962_v1 = vrot.slane %v19570_v51, %v14240_v54  ;;  %v19574_v16 = vld [vmem:[#allocation139_spill] sm:$0xff]  ;;  %v19580_v51 = vld [vmem:[#allocation170_spill] sm:$0xff] }
 0x9fe   : > { %v15660_v36 = vpop.permute.xlu0 %4611  ;;  %v4948_v29 = vsel %vm3102_vm4, %v4947_v13, %v4943_v42  ;;  %v15739_v62 = vsel %vm3179_vm15, %v4844_v61, %v4840_v34  ;;  %v4972_v0 = vrot.slane %v19572_v59, %v14259_v3  ;;  %v4904_v12 = vsel %vm3151_vm11, %v4903_v2, %v4899_v4  ;;  %v19573_v13 = vld [vmem:[#allocation144_spill] sm:$0xff]  ;;  %v19578_v4 = vld [vmem:[#allocation150_spill] sm:$0xff]  ;;  %v15783_v61 = vpop.permute.xlu1 %4656 }
 0x9ff   : > { %19571 = vst [vmem:[#allocation119_spill] sm:$0xff] %v15739_v62  ;;  %v4982_v26 = vrot.slane %v19573_v13, %v14293_v10  ;;  %v4909_v53 = vsel %vm3158_vm12, %v4908_v44, %v4904_v12  ;;  %v4918_v49 = vrot.slane %v19575_v52, %v19549_v56  ;;  %v19577_v34 = vld [vmem:[#allocation152_spill] sm:$0xff]  ;;  %v5021_v47 = vrot.slane %v19578_v4, %v14211_v63  ;;  %v19581_v12 = vld [vmem:[#allocation161_spill] sm:$0xff] }
 0xa00   : > { %v5011_v22 = vrot.slane %v19577_v34, %v14182_v25  ;;  %v4953_v2 = vsel %vm3109_vm5, %v4952_v39, %v4948_v29  ;;  %v5031_v42 = vrot.slane %v19579_v41, %v14214_v57  ;;  %v4967_v44 = vrot.slane %v15485_v7, %v14243_v6  ;;  %v19582_v34 = vld [vmem:[#allocation178_spill] sm:$0xff]  ;;  %v19583_v7 = vld [vmem:[#allocation155_spill] sm:$0xff] }
 0xa01   : > { %v4958_v23 = vsel %vm3116_vm6, %v4957_v28, %v4953_v2  ;;  %v5007_v59 = vrot.slane %v19580_v51, %v14189_v35  ;;  %v4914_v52 = vsel %vm3165_vm13, %v4913_v14, %v4909_v53  ;;  %v5016_v4 = vrot.slane %v19582_v34, %v14199_v33  ;;  %v19584_v41 = vld [vmem:[#allocation198_spill] sm:$0xff]  ;;  %v19585_v53 = vld [vmem:[#allocation163_spill] sm:$0xff]  ;;  %v19589_v34 = vld [vmem:[#allocation97_spill] sm:$0xff] }
 0xa02   : > { %v15685_v11 = vpop.permute.xlu0 %4617  ;;  %v5086_v39 = vrot.slane %v15535_v40, %v14189_v35  ;;  %v15777_v28 = vsel %vm3172_vm14, %v4918_v49, %v4914_v52  ;;  %v5095_v51 = vrot.slane %v19584_v41, %v14199_v33  ;;  %v5165_v14 = vrot.slane %v15591_v5, %v14189_v35  ;;  %v19586_v40 = vld [vmem:[#allocation167_spill] sm:$0xff]  ;;  %v19587_v41 = vld [vmem:[#allocation172_spill] sm:$0xff]  ;;  %v19588_v5 = vld [vmem:[#allocation201_spill] sm:$0xff] }
 0xa03   : > { %v5090_v45 = vrot.slane %v19586_v40, %v14182_v25  ;;  %v4963_v49 = vsel %vm19553_vm0, %v4962_v1, %v4958_v23  ;;  %v5174_v52 = vrot.slane %v15614_v20, %v14199_v33  ;;  %v4977_v21 = vrot.slane %v19587_v41, %v14271_v18  ;;  %v19590_v1 = vld [vmem:[#allocation194_spill] sm:$0xff] }
 0xa04   : > { %v4968_v2 = vsel %vm19555_vm7, %v4967_v44, %v4963_v49  ;;  %v5012_v13 = vsel %vm3081_vm1, %v5011_v22, %v5007_v59  ;;  %v5169_v30 = vrot.slane %v19588_v5, %v14182_v25  ;;  %v5071_v62 = vrot.slane %v19589_v34, %v14302_v8  ;;  %v19591_v44 = vld [vmem:[#allocation112_spill] sm:$0xff] }
 0xa05   : > { %v5017_v40 = vsel %vm3088_vm2, %v5016_v4, %v5012_v13  ;;  %v5026_v23 = vrot.slane %v19590_v1, %v14206_v55  ;;  %v5091_v20 = vsel %vm3081_vm1, %v5090_v45, %v5086_v39  ;;  %v5100_v49 = vrot.slane %v19591_v44, %v14211_v63  ;;  %v19592_v1 = vld [vmem:[#allocation174_spill] sm:$0xff] }
 0xa06   : > { %v15711_v46 = vpop.permute.xlu0 %4623  ;;  %v5096_v41 = vsel %vm3088_vm2, %v5095_v51, %v5091_v20  ;;  %v5105_v22 = vrot.slane %v15543_v15, %v14206_v55  ;;  %v5170_v59 = vsel %vm3081_vm1, %v5169_v30, %v5165_v14  ;;  %v4973_v5 = vsel %vm19562_vm8, %v4972_v0, %v4968_v2  ;;  %v19593_v15 = vld [vmem:[#allocation207_spill] sm:$0xff]  ;;  %v15823_v30 = vpop.permute.xlu1 %4662  ;;  %v19594_v2 = vld [vmem:[#allocation182_spill] sm:$0xff]  ;;  %vm19604_vm8 = vmmov %vm19553_vm0 }
 0xa07   : > { %v5175_v13 = vsel %vm3088_vm2, %v5174_v52, %v5170_v59  ;;  %v5184_v4 = vrot.slane %v15633_v37, %v14206_v55  ;;  %v4978_v39 = vsel %vm19547_vm10, %v4977_v21, %v4973_v5  ;;  %v5110_v44 = vrot.slane %v19592_v1, %v14214_v57  ;;  %vm19605_vm10 = vmmov %vm19555_vm7 }
 0xa08   : > { %v5022_v51 = vsel %vm3095_vm3, %v5021_v47, %v5017_v40  ;;  %v5179_v20 = vrot.slane %v19593_v15, %v14211_v63  ;;  %v5036_v14 = vrot.slane %v19594_v2, %v14237_v27  ;;  %v5101_v37 = vsel %vm3095_vm3, %v5100_v49, %v5096_v41  ;;  %v19595_v47 = vld [vmem:[#allocation204_spill] sm:$0xff]  ;;  %v19597_v15 = vld [vmem:[#allocation231_spill] sm:$0xff] }
 0xa09   : > { %v5027_v0 = vsel %vm3102_vm4, %v5026_v23, %v5022_v51  ;;  %v5106_v52 = vsel %vm3102_vm4, %v5105_v22, %v5101_v37  ;;  %v5115_v40 = vrot.slane %v19595_v47, %v14237_v27  ;;  %v4983_v23 = vsel %vm3151_vm11, %v4982_v26, %v4978_v39  ;;  %v19598_v26 = vld [vmem:[#allocation186_spill] sm:$0xff] }
 0xa0a   : > { %v15744_v50 = vpop.permute.xlu0 %4629  ;;  %v5180_v59 = vsel %vm3095_vm3, %v5179_v20, %v5175_v13  ;;  %v5194_v49 = vrot.slane %v15660_v36, %v14237_v27  ;;  %v5032_v22 = vsel %vm3109_vm5, %v5031_v42, %v5027_v0  ;;  %v5189_v2 = vrot.slane %v19597_v15, %v14214_v57  ;;  %v19599_v42 = vld [vmem:[#allocation232_spill] sm:$0xff] }
 0xa0b   : > { %v5185_v1 = vsel %vm3102_vm4, %v5184_v4, %v5180_v59  ;;  %v5037_v20 = vsel %vm3116_vm6, %v5036_v14, %v5032_v22  ;;  %v5046_v4 = vrot.slane %v19598_v26, %v14243_v6  ;;  %v5111_v39 = vsel %vm3109_vm5, %v5110_v44, %v5106_v52  ;;  %v19600_v14 = vld [vmem:[#allocation197_spill] sm:$0xff] }
 0xa0c   : > { %v5258_v36 = vrot.slane %v15734_v58, %v14211_v63  ;;  %v5116_v37 = vsel %vm3116_vm6, %v5115_v40, %v5111_v39  ;;  %v5125_v0 = vrot.slane %v19599_v42, %v14243_v6  ;;  %v5120_v59 = vrot.slane %v19600_v14, %v14240_v54 }
 0xa0d   : > { %v5204_v44 = vrot.slane %v15685_v11, %v14243_v6  ;;  %v19601_v40 = vrot.slane %v19581_v12, %v14240_v54 }
 0xa0e   : > { %v15774_v29 = vpop.permute.xlu0 %4635  ;;  %v5121_v11 = vsel %vm19604_vm8, %v5120_v59, %v5116_v37  ;;  %v19607_v37 = vrot.slane %v19574_v16, %v14302_v8  ;;  %vm19609_vm8 = vcmask 654912  }
 0xa0f   : > { %v5126_v12 = vsel %vm19605_vm10, %v5125_v0, %v5121_v11  ;;  %vm19611_vm10 = vcmask 720512   ;;  %v19620_v11 = vld [vmem:[#allocation173_spill] sm:$0xff] }
 0xa12   : > { %v4642_v48 = vpop.permute.xlu0 %4641 }
 0xa13   : > { %v5244_v45 = vrot.slane %v4642_v48, %v14189_v35  ;;  %v5248_v48 = vrot.slane %v15693_v9, %v14182_v25  ;;  %v19596_v9 = vld [vmem:[#allocation111_spill] sm:$0xff] }
 0xa14   : > { %v4987_v51 = vrot.slane %v19596_v9, %v14299_v31 }
 0xa15   : > { %v5249_v41 = vsel %vm3081_vm1, %v5248_v48, %v5244_v45  ;;  %v4669_v48 = vpop.permute.xlu1 %4668 }
 0xa16   : > { %v4648_v21 = vpop.permute.xlu0 %4647  ;;  %v4988_v52 = vsel %vm3158_vm12, %v4987_v51, %v4983_v23  ;;  %v5268_v23 = vrot.slane %v15783_v61, %v14214_v57 }
 0xa17   : > { %v5253_v5 = vrot.slane %v4648_v21, %v14199_v33  ;;  %v5190_v21 = vsel %vm3109_vm5, %v5189_v2, %v5185_v1  ;;  %v19602_v1 = vld [vmem:[#allocation233_spill] sm:$0xff]  ;;  %v4993_v42 = vsel %vm3165_vm13, %v19607_v37, %v4988_v52 }
 0xa18   : > { %v5199_v9 = vrot.slane %v19602_v1, %v14240_v54  ;;  %v19788_v33 = vld [vmem:[#allocation181_spill] sm:$0xff] }
 0xa19   : > { %v5254_v13 = vsel %vm3088_vm2, %v5253_v5, %v5249_v41  ;;  %v5195_v5 = vsel %vm3116_vm6, %v5194_v49, %v5190_v21  ;;  %v5042_v41 = vsel %vm19553_vm0, %v19601_v40, %v5037_v20  ;;  %v19603_v49 = vld [vmem:[#allocation184_spill] sm:$0xff]  ;;  %v19610_v21 = vld [vmem:[#allocation235_spill] sm:$0xff]  ;;  %v4675_v14 = vpop.permute.xlu1 %4674  ;;  %v19615_v40 = vld [vmem:[#allocation234_spill] sm:$0xff] }
 0xa1a   : > { %v4654_v45 = vpop.permute.xlu0 %4653  ;;  %v5259_v58 = vsel %vm3095_vm3, %v5258_v36, %v5254_v13  ;;  %v5047_v15 = vsel %vm19555_vm7, %v5046_v4, %v5042_v41  ;;  %v5056_v2 = vrot.slane %v19603_v49, %v14271_v18  ;;  %v5135_v13 = vrot.slane %v15553_v43, %v14271_v18  ;;  %v19606_v4 = vld [vmem:[#allocation175_spill] sm:$0xff] }
 0xa1b   : > { %v5263_v47 = vrot.slane %v4654_v45, %v14206_v55  ;;  %v5200_v20 = vsel %vm19553_vm0, %v5199_v9, %v5195_v5  ;;  %v5130_v39 = vrot.slane %v19606_v4, %v14259_v3  ;;  %v5214_v45 = vrot.slane %v15711_v46, %v14271_v18  ;;  %v19612_v5 = vld [vmem:[#allocation187_spill] sm:$0xff]  ;;  %vm19613_vm0 = vmmov %vm19609_vm8  ;;  %v19623_v4 = vld [vmem:[#allocation192_spill] sm:$0xff] }
 0xa1c   : > { %v5205_v36 = vsel %vm19555_vm7, %v5204_v44, %v5200_v20  ;;  %v19608_v43 = vrot.slane %v19583_v7, %v14259_v3  ;;  %v5066_v44 = vrot.slane %v19612_v5, %v14299_v31  ;;  %vm19614_vm7 = vmmov %vm19611_vm10  ;;  %v5145_v41 = vrot.slane %v19615_v40, %v14299_v31 }
 0xa1d   : > { %v5264_v22 = vsel %vm3102_vm4, %v5263_v47, %v5259_v58  ;;  %v5209_v47 = vrot.slane %v19610_v21, %v14259_v3  ;;  %v5131_v16 = vsel %vm19613_vm0, %v5130_v39, %v5126_v12  ;;  %v5278_v58 = vrot.slane %v15823_v30, %v14240_v54  ;;  %v4681_v37 = vpop.permute.xlu1 %4680  ;;  %v19778_v54 = vld [vmem:[#allocation48_spill] sm:$0xff] }
 0xa1e   : > { %v4660_v51 = vpop.permute.xlu0 %4659  ;;  %v5269_v61 = vsel %vm3109_vm5, %v5268_v23, %v5264_v22  ;;  %v5052_v0 = vsel %vm19609_vm8, %v19608_v43, %v5047_v15  ;;  %v5136_v7 = vsel %vm19614_vm7, %v5135_v13, %v5131_v16  ;;  %vm19616_vm8 = vmmov %vm19613_vm0  ;;  %v19617_v22 = vld [vmem:[#allocation180_spill] sm:$0xff]  ;;  %vm19619_vm0 = vcmask 523712  }
 0xa1f   : > { %v5273_v26 = vrot.slane %v4660_v51, %v14237_v27  ;;  %v5057_v46 = vsel %vm19611_vm10, %v5056_v2, %v5052_v0  ;;  %v5210_v1 = vsel %vm19616_vm8, %v5209_v47, %v5205_v36  ;;  %v5140_v15 = vrot.slane %v19617_v22, %v14293_v10  ;;  %vm19618_vm10 = vmmov %vm19614_vm7  ;;  %v19624_v0 = vld [vmem:[#allocation190_spill] sm:$0xff]  ;;  %v19780_v27 = vld [vmem:[#allocation217_spill] sm:$0xff] }
 0xa20   : > { %v5215_v49 = vsel %vm19618_vm10, %v5214_v45, %v5210_v1  ;;  %v5224_v2 = vrot.slane %v15744_v50, %v14299_v31  ;;  %v4997_v23 = vrot.slane %v19620_v11, %v19549_v56  ;;  %v19621_v51 = vrot.slane %v19585_v53, %v14293_v10  ;;  %v19628_v1 = vld [vmem:[#allocation195_spill] sm:$0xff]  ;;  %v19632_v11 = vld [vmem:[#allocation236_spill] sm:$0xff] }
 0xa21   : > { %v5274_v59 = vsel %vm3116_vm6, %v5273_v26, %v5269_v61  ;;  %v5219_v13 = vrot.slane %v15583_v19, %v14293_v10  ;;  %vm19622_vm7 = vcmask 589312   ;;  %v5076_v50 = vrot.slane %v19623_v4, %v19549_v56 }
 0xa22   : > { %v4666_v52 = vpop.permute.xlu0 %4665  ;;  %v5279_v30 = vsel %vm19619_vm0, %v5278_v58, %v5274_v59  ;;  %v5062_v12 = vsel %vm3151_vm11, %v19621_v51, %v5057_v46  ;;  %v5141_v39 = vsel %vm3151_vm11, %v5140_v15, %v5136_v7  ;;  %v5288_v36 = vrot.slane %v4669_v48, %v14259_v3  ;;  %v19629_v15 = vld [vmem:[#allocation162_spill] sm:$0xff]  ;;  %v4687_v51 = vpop.permute.xlu1 %4686  ;;  %v19776_v3 = vld [vmem:[#allocation219_spill] sm:$0xff] }
 0xa23   : > { %v5283_v9 = vrot.slane %v4666_v52, %v14243_v6  ;;  %v5067_v26 = vsel %vm3158_vm12, %v5066_v44, %v5062_v12  ;;  %v5146_v61 = vsel %vm3158_vm12, %v5145_v41, %v5141_v39  ;;  %v5155_v53 = vrot.slane %v15568_v60, %v19549_v56 }
 0xa24   : > { %v5220_v19 = vsel %vm3151_vm11, %v5219_v13, %v5215_v49  ;;  %v5150_v21 = vrot.slane %v19624_v0, %v14302_v8  ;;  %v5234_v59 = vrot.slane %v15774_v29, %v19549_v56  ;;  %v4998_v46 = vsel %vm3172_vm14, %v4997_v23, %v4993_v42  ;;  %v19630_v49 = vld [vmem:[#allocation119_spill] sm:$0xff] }
 0xa25   : > { %v5284_v20 = vsel %vm19622_vm7, %v5283_v9, %v5279_v30  ;;  %v5225_v47 = vsel %vm3158_vm12, %v5224_v2, %v5220_v19  ;;  %v5072_v60 = vsel %vm3165_vm13, %v5071_v62, %v5067_v26  ;;  %v5229_v5 = vrot.slane %v15622_v24, %v14302_v8  ;;  %v19626_v62 = vld [vmem:[#allocation95_spill] sm:$0xff] }
 0xa26   : > { %v4672_v45 = vpop.permute.xlu0 %4671  ;;  %v5289_v48 = vsel %vm19616_vm8, %v5288_v36, %v5284_v20  ;;  %v19625_v16 = vrot.slane %v19568_v32, %v19559_v17  ;;  %v5077_v58 = vsel %vm3172_vm14, %v5076_v50, %v5072_v60  ;;  %v5151_v42 = vsel %vm3165_vm13, %v5150_v21, %v5146_v61 }
 0xa27   : > { %v5293_v43 = vrot.slane %v4672_v45, %v14271_v18  ;;  %v5298_v52 = vrot.slane %v4675_v14, %v14293_v10  ;;  %v5081_v7 = vrot.slane %v19626_v62, %v19559_v17  ;;  %v5156_v24 = vsel %vm3172_vm14, %v5155_v53, %v5151_v42  ;;  %v19648_v62 = vld [vmem:[#allocation179_spill] sm:$0xff] }
 0xa28   : > { %v4924_v29 = vsel %vm3179_vm15, %v19625_v16, %v15777_v28  ;;  %v5230_v40 = vsel %vm3165_vm13, %v5229_v5, %v5225_v47  ;;  %v19627_v32 = vrot.slane %v19576_v38, %v19559_v17  ;;  %v5160_v9 = vrot.slane %v19628_v1, %v19559_v17  ;;  %v19640_v5 = vld [vmem:[#allocation205_spill] sm:$0xff]  ;;  %v19642_v16 = vld [vmem:[#allocation92_spill] sm:$0xff] }
 0xa29   : > { %v5294_v44 = vsel %vm19618_vm10, %v5293_v43, %v5289_v48  ;;  %v5235_v14 = vsel %vm3172_vm14, %v5234_v59, %v5230_v40  ;;  %vm19631_vm0 = vcmask 1041409   ;;  %v5082_v30 = vsel %vm3179_vm15, %v5081_v7, %v5077_v58  ;;  %v19638_v59 = vld [vmem:[#allocation30_spill] sm:$0xff] }
 0xa2a   : > { %v4678_v34 = vpop.permute.xlu0 %4677  ;;  %v5003_v28 = vsel %vm3179_vm15, %v19627_v32, %v4998_v46  ;;  %v5299_v22 = vsel %vm3151_vm11, %v5298_v52, %v5294_v44  ;;  %v5320_v2 = vsel %vm19631_vm0, %v19630_v49, %v19629_v15  ;;  %v5239_v23 = vrot.slane %v19632_v11, %v19559_v17  ;;  %v19639_v46 = vld [vmem:[#allocation113_spill] sm:$0xff]  ;;  %v19644_v58 = vld [vmem:[#allocation114_spill] sm:$0xff]  ;;  %v19646_v52 = vld [vmem:[#allocation99_spill] sm:$0xff] }
 0xa2b   : > { %v5303_v41 = vrot.slane %v4678_v34, %v14299_v31  ;;  %vm19633_vm7 = vcmask 1042434   ;;  %v5308_v13 = vrot.slane %v4681_v37, %v14302_v8  ;;  %v5161_v26 = vsel %vm3179_vm15, %v5160_v9, %v5156_v24  ;;  %v19650_v24 = vld [vmem:[#allocation118_spill] sm:$0xff]  ;;  %v19654_v9 = vld [vmem:[#allocation40_spill] sm:$0xff]  ;;  %v19770_v31 = vld [vmem:[#allocation47_spill] sm:$0xff] }
 0xa2c   : > { %v5321_v12 = vsel %vm19633_vm7, %v4924_v29, %v5320_v2  ;;  %v5240_v50 = vsel %vm3179_vm15, %v5239_v23, %v5235_v14  ;;  %v5318_v36 = vrot.slane %v4687_v51, %v19559_v17  ;;  %vm19634_vm8 = vcmask 1044484   ;;  %v19658_v11 = vld [vmem:[#allocation96_spill] sm:$0xff]  ;;  %v11534_v51 = vld [vmem:[#allocation11] sm:$0xff]  }
 0xa2d   : > { %v5304_v38 = vsel %vm3158_vm12, %v5303_v41, %v5299_v22  ;;  %v5322_v39 = vsel %vm3738_vm9, %v5003_v28, %v5321_v12  ;;  %vm19635_vm10 = vcmask 1045509   ;;  %vm19636_vm0 = vcmask 1046534   ;;  %v19652_v28 = vld [vmem:[#allocation82_spill] sm:$0xff]  ;;  %v19660_v12 = vld [vmem:[#allocation224_spill] sm:$0xff]  ;;  %11047 = vmatpush3.bf16.msra.mxu1 %v11534_v51 }
 0xa2e   : > { %v4684_v20 = vpop.permute.xlu0 %4683  ;;  %v5309_v45 = vsel %vm3165_vm13, %v5308_v13, %v5304_v38  ;;  %v5323_v61 = vsel %vm19634_vm8, %v5082_v30, %v5322_v39  ;;  %vm19637_vm7 = vcmask 1047559   ;;  %v19656_v22 = vld [vmem:[#allocation102_spill] sm:$0xff]  ;;  %vm19980_vm8 = vcmask 523712  }
 0xa2f   : > { %v5313_v4 = vrot.slane %v4684_v20, %v19549_v56  ;;  %v5324_v19 = vsel %vm19635_vm10, %v5161_v26, %v5323_v61  ;;  %v19662_v20 = vld [vmem:[#allocation115_spill] sm:$0xff]  ;;  %v19679_v51 = vld [vmem:[#allocation122_spill] sm:$0xff]  ;;  %vm19986_vm10 = vcmask 589312  }
 0xa30   : > { %v5325_v43 = vsel %vm19636_vm0, %v5240_v50, %v5324_v19  ;;  %vm19988_vm0 = vcmask 654912  }
 0xa31   : > { %v5314_v53 = vsel %vm3172_vm14, %v5313_v4, %v5309_v45 }
 0xa32   : > { %v5319_v37 = vsel %vm3179_vm15, %v5318_v36, %v5314_v53  ;;  %v19664_v36 = vmov 0.0   ;;  %v19665_v53 = vld [vmem:[#allocation200_spill] sm:$0xff] }
 0xa33   : > { %v5326_v0 = vsel %vm19637_vm7, %v5319_v37, %v5325_v43  ;;  %11048 = vmatprep.subr.bf16.mxu1 %v19664_v36  ;;  %v19667_v43 = vld [vmem:[#allocation116_spill] sm:$0xff]  ;;  %vm19990_vm7 = vcmask 720512  }
 0xa34   : > { %5328 = vadd.xlane.f32.xlu0 %v5326_v0 }
 0xac1   : > { %v5329_v21 = vpop.xlane.xlu0 %5328 }
 0xac2   : > { %12006 = vrcp.f32 %v5329_v21  ;;  %v19669_v21 = vld [vmem:[#allocation125_spill] sm:$0xff] }
 0xacc   : > { %v15992_v47 = vpop.eup %12006 }
 0xacd   : > { %v15996_v48 = vrot.slane %v15992_v47, %v19638_v59  ;;  %v16000_v60 = vrot.slane %v15992_v47, %v19639_v46  ;;  %v19697_v59 = vld [vmem:[#allocation127_spill] sm:$0xff] }
 0xacf   : > { %v16004_v44 = vmul.f32 %v19640_v5, %v15996_v48  ;;  %v16008_v29 = vmul.f32 %v19642_v16, %v15996_v48  ;;  %v16012_v42 = vmul.f32 %v19644_v58, %v15996_v48  ;;  %v16016_v34 = vmul.f32 %v19646_v52, %v15996_v48  ;;  %v19671_v16 = vld [vmem:[#allocation123_spill] sm:$0xff] }
 0xad0   : > { %v16020_v7 = vmul.f32 %v19648_v62, %v15996_v48  ;;  %v16024_v40 = vmul.f32 %v19650_v24, %v15996_v48  ;;  %v16034_v1 = vmul.f32 %v19652_v28, %v16000_v60  ;;  %v16038_v14 = vmul.f32 %v19654_v9, %v16000_v60  ;;  %v19673_v28 = vld [vmem:[#allocation214_spill] sm:$0xff] }
 0xad1   : > { %19641 = vst [vmem:[#allocation166_spill] sm:$0xff] %v16004_v44  ;;  %19643 = vst [vmem:[#allocation45_spill] sm:$0xff] %v16008_v29  ;;  %v16028_v41 = vpack.c.bf16 %v16008_v29, %v16004_v44  ;;  %v5628_v32 = vpack.c.bf16 %v16016_v34, %v16012_v42  ;;  %v16042_v15 = vmul.f32 %v19656_v22, %v15996_v48  ;;  %v19675_v22 = vld [vmem:[#allocation100_spill] sm:$0xff] }
 0xad2   : > { %19645 = vst [vmem:[#allocation44_spill] sm:$0xff] %v16012_v42  ;;  %19647 = vst [vmem:[#allocation157_spill] sm:$0xff] %v16016_v34  ;;  %v16047_v30 = vpack.c.bf16 %v16024_v40, %v16020_v7  ;;  %v16051_v23 = vmul.f32 %v19658_v11, %v15996_v48  ;;  %v16055_v38 = vpack.c.bf16 %v16038_v14, %v16034_v1  ;;  %v19764_v42 = vld [vmem:[#allocation218_spill] sm:$0xff] }
 0xad3   : > { %19649 = vst [vmem:[#allocation55_spill] sm:$0xff] %v16020_v7  ;;  %19651 = vst [vmem:[#allocation124_spill] sm:$0xff] %v16024_v40  ;;  %v5708_v49 = vunpack.c.l.b16 %v16028_v41  ;;  %v5700_v2 = vunpack.c.l.b16 %v5628_v32  ;;  %v16059_v13 = vmul.f32 %v19660_v12, %v16000_v60  ;;  %v16063_v26 = vmul.f32 %v19662_v20, %v16000_v60  ;;  %v19681_v20 = vld [vmem:[#allocation42_spill] sm:$0xff]  ;;  %v11537_v7 = vld [vmem:[#allocation11 + $0x8] sm:$0xff]  }
 0xad4   : > { %19653 = vst [vmem:[#allocation64_spill] sm:$0xff] %v16034_v1  ;;  %19655 = vst [vmem:[#allocation39_spill] sm:$0xff] %v16038_v14  ;;  %v5715_v4 = vunpack.c.h.b16 %v16047_v30  ;;  %v5701_v50 = vunpack.c.h.b16 %v5628_v32  ;;  %v5629_v39 = vpack.c.bf16 %v16051_v23, %v16042_v15  ;;  %v5942_v45 = vunpack.c.h.b16 %v16055_v38  ;;  %11049 = vmatpush3.bf16.msra.mxu1 %v11537_v7  ;;  %v19721_v7 = vld [vmem:[#allocation199_spill] sm:$0xff]  ;;  %v19749_v1 = vld [vmem:[#allocation29_spill] sm:$0xff] }
 0xad5   : > { %19657 = vst [vmem:[#allocation88_spill] sm:$0xff] %v16042_v15  ;;  %19659 = vst [vmem:[#allocation151_spill] sm:$0xff] %v16051_v23  ;;  %5741 = vperm.xlu0 %11197, %v5708_v49   ;;  %5717 = vperm.xlu1 %11196, %v5700_v2   ;;  %v16072_v61 = vpack.c.bf16 %v16063_v26, %v16059_v13  ;;  %v16076_v19 = vmul.f32 %v19665_v53, %v16000_v60  ;;  %v19677_v2 = vld [vmem:[#allocation213_spill] sm:$0xff]  ;;  %v19683_v53 = vld [vmem:[#allocation222_spill] sm:$0xff]  ;;  %v19750_v29 = vsub.s32 4, %v19749_v1 }
 0xad6   : > { %19661 = vst [vmem:[#allocation70_spill] sm:$0xff] %v16059_v13  ;;  %19663 = vst [vmem:[#allocation126_spill] sm:$0xff] %v16063_v26  ;;  %v5702_v37 = vunpack.c.l.b16 %v5629_v39  ;;  %v16080_v0 = vmul.f32 %v19667_v43, %v16000_v60  ;;  %v16084_v5 = vmul.f32 %v19669_v21, %v15996_v48  ;;  %v16088_v58 = vmul.f32 %v19671_v16, %v15996_v48  ;;  %v19685_v21 = vld [vmem:[#allocation226_spill] sm:$0xff] }
 0xad7   : > { %19666 = vst [vmem:[#allocation79_spill] sm:$0xff] %v16076_v19  ;;  %v5944_v52 = vunpack.c.h.b16 %v16072_v61  ;;  %v5703_v62 = vunpack.c.h.b16 %v5629_v39  ;;  %v16099_v9 = vmul.f32 %v19673_v28, %v16000_v60  ;;  %v16103_v49 = vmul.f32 %v19675_v22, %v16000_v60  ;;  %v19687_v22 = vld [vmem:[#allocation185_spill] sm:$0xff]  ;;  %11050 = vmatprep.subr.bf16.mxu1 %v19664_v36 }
 0xad8   : > { %19668 = vst [vmem:[#allocation132_spill] sm:$0xff] %v16080_v0  ;;  %19670 = vst [vmem:[#allocation117_spill] sm:$0xff] %v16084_v5  ;;  %v16093_v24 = vpack.c.bf16 %v16080_v0, %v16076_v19  ;;  %v5630_v32 = vpack.c.bf16 %v16088_v58, %v16084_v5  ;;  %v16107_v11 = vmul.f32 %v19677_v2, %v16000_v60  ;;  %v5714_v0 = vunpack.c.l.b16 %v16047_v30 }
 0xad9   : > { %5762 = vperm.xlu0 %11197, %v5715_v4   ;;  %5720 = vperm.xlu1 %11196, %v5701_v50   ;;  %19672 = vst [vmem:[#allocation137_spill] sm:$0xff] %v16088_v58  ;;  %19674 = vst [vmem:[#allocation144_spill] sm:$0xff] %v16099_v9  ;;  %v16111_v12 = vmul.f32 %v19679_v51, %v16000_v60  ;;  %v16115_v4 = vmul.f32 %v19681_v20, %v15996_v48  ;;  %v19689_v51 = vld [vmem:[#allocation109_spill] sm:$0xff]  ;;  %v5941_v44 = vunpack.c.l.b16 %v16055_v38 }
 0xada   : > { %19676 = vst [vmem:[#allocation139_spill] sm:$0xff] %v16103_v49  ;;  %19678 = vst [vmem:[#allocation159_spill] sm:$0xff] %v16107_v11  ;;  %v5946_v50 = vunpack.c.h.b16 %v16093_v24  ;;  %v5704_v39 = vunpack.c.l.b16 %v5630_v32  ;;  %v16132_v16 = vmul.f32 %v19685_v21, %v16000_v60  ;;  %v16139_v2 = vmul.f32 %v19687_v22, %v16000_v60 }
 0xadb   : > { %19680 = vst [vmem:[#allocation146_spill] sm:$0xff] %v16111_v12  ;;  %19682 = vst [vmem:[#allocation152_spill] sm:$0xff] %v16115_v4  ;;  %v16128_v43 = vpack.c.bf16 %v16111_v12, %v16107_v11  ;;  %v16143_v20 = vmul.f32 %v19689_v51, %v16000_v60  ;;  %v19695_v51 = vld [vmem:[#allocation220_spill] sm:$0xff]  ;;  %v19754_v58 = vsub.s32 7, %v19749_v1 }
 0xadc   : > { %19686 = vst [vmem:[#allocation153_spill] sm:$0xff] %v16132_v16  ;;  %19688 = vst [vmem:[#allocation170_spill] sm:$0xff] %v16139_v2  ;;  %v16160_v46 = vmul.f32 %v19695_v51, %v16000_v60  ;;  %v5709_v51 = vunpack.c.h.b16 %v16028_v41  ;;  %v11536_v41 = vld [vmem:[#allocation4 + $0x8] sm:$0xff]   ;;  %v19743_v11 = vld [vmem:[#allocation196_spill] sm:$0xff] }
 0xadd   : > { %5961 = vperm.xlu0 %11197, %v5942_v45   ;;  %5723 = vperm.xlu1 %11196, %v5702_v37   ;;  %v16120_v45 = vpack.c.bf16 %v16103_v49, %v16099_v9  ;;  %v16124_v37 = vmul.f32 %v19683_v53, %v15996_v48  ;;  %19690 = vst [vmem:[#allocation161_spill] sm:$0xff] %v16143_v20  ;;  %v19703_v9 = vld [vmem:[#allocation202_spill] sm:$0xff] }
 0xade   : > { %v16148_v53 = vpack.c.bf16 %v16139_v2, %v16132_v16  ;;  %19696 = vst [vmem:[#allocation198_spill] sm:$0xff] %v16160_v46  ;;  %v16164_v49 = vrot.slane %v15992_v47, %v19697_v59 }
 0xadf   : > { %19684 = vst [vmem:[#allocation150_spill] sm:$0xff] %v16124_v37  ;;  %v5631_v28 = vpack.c.bf16 %v16124_v37, %v16115_v4 }
 0xae0   : > { %v5952_v2 = vunpack.c.h.b16 %v16148_v53  ;;  %v16189_v26 = vmul.f32 %v19703_v9, %v16164_v49  ;;  %v19711_v9 = vld [vmem:[#allocation210_spill] sm:$0xff] }
 0xae1   : > { %5967 = vperm.xlu0 %11197, %v5944_v52   ;;  %5726 = vperm.xlu1 %11196, %v5703_v62   ;;  %v5948_v52 = vunpack.c.h.b16 %v16120_v45  ;;  %v5705_v62 = vunpack.c.h.b16 %v5630_v32  ;;  %v19691_v32 = vld [vmem:[#allocation188_spill] sm:$0xff]  ;;  %v5707_v22 = vunpack.c.h.b16 %v5631_v28  ;;  %v16206_v13 = vmul.f32 %v19711_v9, %v15996_v48 }
 0xae2   : > { %v16152_v21 = vmul.f32 %v19691_v32, %v16000_v60  ;;  %19704 = vst [vmem:[#allocation201_spill] sm:$0xff] %v16189_v26 }
 0xae3   : > { %19712 = vst [vmem:[#allocation174_spill] sm:$0xff] %v16206_v13 }
 0xae4   : > { %19692 = vst [vmem:[#allocation178_spill] sm:$0xff] %v16152_v21  ;;  %v16169_v32 = vpack.c.bf16 %v16152_v21, %v16143_v20  ;;  %v19731_v21 = vld [vmem:[#allocation228_spill] sm:$0xff] }
 0xae5   : > { %5973 = vperm.xlu0 %11197, %v5946_v50   ;;  %5729 = vperm.xlu1 %11196, %v5704_v39   ;;  %v5950_v50 = vunpack.c.h.b16 %v16128_v43  ;;  %v5706_v39 = vunpack.c.l.b16 %v5631_v28  ;;  %v19698_v28 = vld [vmem:[#allocation191_spill] sm:$0xff]  ;;  %v19739_v20 = vld [vmem:[#allocation176_spill] sm:$0xff] }
 0xae6   : > { %v5954_v16 = vunpack.c.h.b16 %v16169_v32 }
 0xae9   : > { %5979 = vperm.xlu0 %11197, %v5948_v52   ;;  %5732 = vperm.xlu1 %11196, %v5705_v62   ;;  %v19693_v52 = vld [vmem:[#allocation183_spill] sm:$0xff] }
 0xaea   : > { %v16156_v62 = vmul.f32 %v19693_v52, %v16000_v60  ;;  %v11535_v60 = vld [vmem:[#allocation4] sm:$0xff]  }
 0xaeb   : > { %10887 = vmatpush3.bf16.msra.mxu0 %v11535_v60 }
 0xaec   : > { %19694 = vst [vmem:[#allocation155_spill] sm:$0xff] %v16156_v62  ;;  %v16182_v59 = vpack.c.bf16 %v16160_v46, %v16156_v62  ;;  %10888 = vmatprep.subr.bf16.mxu0 %v19664_v36  ;;  %v19709_v46 = vld [vmem:[#allocation171_spill] sm:$0xff] }
 0xaed   : > { %5985 = vperm.xlu0 %11197, %v5950_v50   ;;  %5735 = vperm.xlu1 %11196, %v5706_v39   ;;  %v16173_v50 = vmul.f32 %v19698_v28, %v15996_v48  ;;  %v19700_v39 = vld [vmem:[#allocation156_spill] sm:$0xff]  ;;  %v16202_v62 = vmul.f32 %v19709_v46, %v16164_v49  ;;  %v11538_v46 = vld [vmem:[#allocation4 + $0x10] sm:$0xff]  }
 0xaee   : > { %v16177_v52 = vmul.f32 %v19700_v39, %v15996_v48  ;;  %19702 = vst [vmem:[#allocation172_spill] sm:$0xff] %v16182_v59  ;;  %v19705_v39 = vld [vmem:[#allocation203_spill] sm:$0xff] }
 0xaef   : > { %19699 = vst [vmem:[#allocation163_spill] sm:$0xff] %v16173_v50  ;;  %19710 = vst [vmem:[#allocation112_spill] sm:$0xff] %v16202_v62  ;;  %10889 = vmatpush3.bf16.msra.mxu0 %v11536_v41  ;;  %v19716_v41 = vld [vmem:[#allocation38_spill] sm:$0xff] }
 0xaf0   : > { %19701 = vst [vmem:[#allocation167_spill] sm:$0xff] %v16177_v52  ;;  %v5633_v28 = vpack.c.bf16 %v16177_v52, %v16173_v50  ;;  %10890 = vmatprep.subr.bf16.mxu0 %v19664_v36  ;;  %v16220_v52 = vmul.f32 %v19716_v41, %v16164_v49 }
 0xaf1   : > { %5991 = vperm.xlu0 %11197, %v5952_v2   ;;  %5738 = vperm.xlu1 %11196, %v5707_v22   ;;  %v16193_v2 = vmul.f32 %v19705_v39, %v16164_v49  ;;  %v19707_v22 = vld [vmem:[#allocation206_spill] sm:$0xff]  ;;  %v5956_v39 = vunpack.c.h.b16 %v16182_v59 }
 0xaf2   : > { %v16198_v60 = vmul.f32 %v19707_v22, %v16164_v49  ;;  %v5710_v40 = vunpack.c.l.b16 %v5633_v28  ;;  %v5711_v9 = vunpack.c.h.b16 %v5633_v28  ;;  %19717 = vst [vmem:[#allocation204_spill] sm:$0xff] %v16220_v52  ;;  %v16237_v28 = vmul.f32 %v19721_v7, %v16164_v49 }
 0xaf3   : > { %19706 = vst [vmem:[#allocation97_spill] sm:$0xff] %v16193_v2  ;;  %10891 = vmatpush3.bf16.msra.mxu0 %v11538_v46 }
 0xaf4   : > { %19708 = vst [vmem:[#allocation194_spill] sm:$0xff] %v16198_v60  ;;  %v16225_v37 = vpack.c.bf16 %v16202_v62, %v16198_v60  ;;  %10892 = vmatprep.subr.bf16.mxu0 %v19664_v36  ;;  %19722 = vst [vmem:[#allocation186_spill] sm:$0xff] %v16237_v28 }
 0xaf5   : > { %5997 = vperm.xlu0 %11197, %v5954_v16   ;;  %5744 = vperm.xlu1 %11196, %v5709_v51   ;;  %v16211_v16 = vpack.c.bf16 %v16193_v2, %v16189_v26  ;;  %v19714_v51 = vld [vmem:[#allocation221_spill] sm:$0xff] }
 0xaf6   : > { %v16215_v22 = vmul.f32 %v19714_v51, %v15996_v48  ;;  %19718 = vst [vmem:[#allocation111_spill] sm:$0xff] %v16225_v37  ;;  %v19719_v51 = vld [vmem:[#allocation211_spill] sm:$0xff]  ;;  %v6185_v46 = vunpack.c.h.b16 %v16225_v37  ;;  %v19808_v37 = vld [vmem:[#allocation33_spill] sm:$0xff] }
 0xaf7   : > { %19713 = vst [vmem:[#allocation207_spill] sm:$0xff] %v16211_v16  ;;  %v6183_v50 = vunpack.c.h.b16 %v16211_v16 }
 0xaf8   : > { %19715 = vst [vmem:[#allocation182_spill] sm:$0xff] %v16215_v22  ;;  %v5634_v48 = vpack.c.bf16 %v16215_v22, %v16206_v13  ;;  %v19889_v13 = vld [vmem:[#allocation78_spill] sm:$0xff]  ;;  %v19891_v22 = vld [vmem:[#allocation160_spill] sm:$0xff] }
 0xaf9   : > { %6003 = vperm.xlu0 %11197, %v5956_v39   ;;  %5747 = vperm.xlu1 %11196, %v5710_v40   ;;  %v16231_v39 = vmul.f32 %v19719_v51, %v16164_v49  ;;  %v11539_v40 = vld [vmem:[#allocation4 + $0x18] sm:$0xff]   ;;  %v19724_v51 = vld [vmem:[#allocation215_spill] sm:$0xff] }
 0xafa   : > { %10893 = vmatpush3.bf16.msra.mxu0 %v11539_v40  ;;  %v5712_v41 = vunpack.c.l.b16 %v5634_v48  ;;  %v16246_v60 = vmul.f32 %v19724_v51, %v16164_v49  ;;  %v19728_v40 = vld [vmem:[#allocation189_spill] sm:$0xff]  ;;  %v5713_v15 = vunpack.c.h.b16 %v5634_v48 }
 0xafb   : > { %19720 = vst [vmem:[#allocation231_spill] sm:$0xff] %v16231_v39  ;;  %v16242_v62 = vpack.c.bf16 %v16231_v39, %v16220_v52  ;;  %10894 = vmatprep.subr.bf16.mxu0 %v19664_v36  ;;  %v16255_v4 = vmul.f32 %v19728_v40, %v16164_v49  ;;  %v19735_v40 = vld [vmem:[#allocation209_spill] sm:$0xff] }
 0xafc   : > { %19725 = vst [vmem:[#allocation197_spill] sm:$0xff] %v16246_v60  ;;  %v16260_v51 = vpack.c.bf16 %v16246_v60, %v16237_v28  ;;  %v16277_v60 = vmul.f32 %v19735_v40, %v16164_v49 }
 0xafd   : > { %6202 = vperm.xlu0 %11197, %v6183_v50   ;;  %5750 = vperm.xlu1 %11196, %v5711_v9   ;;  %19723 = vst [vmem:[#allocation232_spill] sm:$0xff] %v16242_v62  ;;  %v11540_v50 = vld [vmem:[#allocation4 + $0x20] sm:$0xff]   ;;  %19729 = vst [vmem:[#allocation184_spill] sm:$0xff] %v16255_v4  ;;  %v6187_v23 = vunpack.c.h.b16 %v16242_v62  ;;  %v19802_v62 = vld [vmem:[#allocation59_spill] sm:$0xff] }
 0xafe   : > { %v19726_v9 = vld [vmem:[#allocation49_spill] sm:$0xff]  ;;  %10895 = vmatpush3.bf16.msra.mxu0 %v11540_v50  ;;  %19730 = vst [vmem:[#allocation175_spill] sm:$0xff] %v16260_v51  ;;  %v19733_v50 = vld [vmem:[#allocation52_spill] sm:$0xff]  ;;  %19736 = vst [vmem:[#allocation234_spill] sm:$0xff] %v16277_v60  ;;  %v6189_v40 = vunpack.c.h.b16 %v16260_v51 }
 0xaff   : > { %v16251_v7 = vmul.f32 %v19726_v9, %v16164_v49  ;;  %10896 = vmatprep.subr.bf16.mxu0 %v19664_v36  ;;  %v16273_v48 = vmul.f32 %v19733_v50, %v16164_v49  ;;  %v16293_v50 = vmul.f32 %v19743_v11, %v16164_v49  ;;  %v19751_v11 = vsub.s32 5, %v19749_v1  ;;  %v19798_v51 = vld [vmem:[#allocation80_spill] sm:$0xff] }
 0xb01   : > { %6208 = vperm.xlu0 %11197, %v6185_v46   ;;  %5753 = vperm.xlu1 %11196, %v5712_v41   ;;  %19727 = vst [vmem:[#allocation233_spill] sm:$0xff] %v16251_v7  ;;  %v16264_v46 = vrot.slane %v15992_v47, %v19731_v21  ;;  %v11541_v41 = vld [vmem:[#allocation4 + $0x28] sm:$0xff]   ;;  %v16269_v9 = vpack.c.bf16 %v16255_v4, %v16251_v7  ;;  %19734 = vst [vmem:[#allocation187_spill] sm:$0xff] %v16273_v48  ;;  %v19737_v21 = vld [vmem:[#allocation57_spill] sm:$0xff] }
 0xb02   : > { %v16281_v28 = vmul.f32 %v19737_v21, %v16164_v49  ;;  %19744 = vst [vmem:[#allocation190_spill] sm:$0xff] %v16293_v50  ;;  %10897 = vmatpush3.bf16.msra.mxu0 %v11541_v41  ;;  %v19745_v21 = vld [vmem:[#allocation61_spill] sm:$0xff]  ;;  %v16314_v30 = vrot.slane %v15992_v47, %v19751_v11  ;;  %v19752_v41 = vsub.s32 6, %v19749_v1  ;;  %v16330_v11 = vrot.slane %v15992_v47, %v19754_v58 }
 0xb03   : > { %19732 = vst [vmem:[#allocation235_spill] sm:$0xff] %v16269_v9  ;;  %v16299_v19 = vmul.f32 %v19745_v21, %v16264_v46  ;;  %10898 = vmatprep.subr.bf16.mxu0 %v19664_v36  ;;  %v19762_v1 = vld [vmem:[#allocation65_spill] sm:$0xff]  ;;  %v16358_v17 = vmul.f32 %v19764_v42, %v16264_v46  ;;  %v16371_v10 = vmul.f32 %v19770_v31, %v16264_v46  ;;  %v19774_v42 = vld [vmem:[#allocation46_spill] sm:$0xff] }
 0xb04   : > { %19738 = vst [vmem:[#allocation180_spill] sm:$0xff] %v16281_v28  ;;  %v16319_v21 = vrot.slane %v15992_v47, %v19752_v41  ;;  %v19759_v41 = vld [vmem:[#allocation193_spill] sm:$0xff]  ;;  %v16354_v58 = vmul.f32 %v19762_v1, %v16264_v46  ;;  %v19772_v1 = vld [vmem:[#allocation91_spill] sm:$0xff]  ;;  %v16379_v6 = vmul.f32 %v19774_v42, %v16264_v46  ;;  %v16388_v31 = vmul.f32 %v19778_v54, %v16264_v46 }
 0xb05   : > { %6214 = vperm.xlu0 %11197, %v6187_v23   ;;  %5756 = vperm.xlu1 %11196, %v5713_v15   ;;  %v16285_v23 = vmul.f32 %v19739_v20, %v16164_v49  ;;  %v19741_v15 = vld [vmem:[#allocation56_spill] sm:$0xff]  ;;  %19746 = vst [vmem:[#allocation95_spill] sm:$0xff] %v16299_v19  ;;  %v16346_v34 = vmul.f32 %v19759_v41, %v16264_v46  ;;  %19765 = vst [vmem:[#allocation179_spill] sm:$0xff] %v16358_v17  ;;  %v5945_v42 = vunpack.c.l.b16 %v16093_v24 }
 0xb06   : > { %v16289_v12 = vmul.f32 %v19741_v15, %v16164_v49  ;;  %v19747_v20 = vld [vmem:[#allocation208_spill] sm:$0xff]  ;;  %v11542_v15 = vld [vmem:[#allocation4 + $0x30] sm:$0xff]   ;;  %v16309_v49 = vrot.slane %v15992_v47, %v19750_v29  ;;  %v16325_v29 = vpack.c.bf16 %v16277_v60, %v16273_v48  ;;  %19763 = vst [vmem:[#allocation99_spill] sm:$0xff] %v16354_v58  ;;  %19771 = vst [vmem:[#allocation40_spill] sm:$0xff] %v16371_v10 }
 0xb07   : > { %19740 = vst [vmem:[#allocation173_spill] sm:$0xff] %v16285_v23  ;;  %v16303_v14 = vmul.f32 %v19747_v20, %v16264_v46  ;;  %v6191_v20 = vunpack.c.h.b16 %v16269_v9  ;;  %v16334_v5 = vpack.c.bf16 %v16285_v23, %v16281_v28  ;;  %19760 = vst [vmem:[#allocation92_spill] sm:$0xff] %v16346_v34  ;;  %10899 = vmatpush3.bf16.msra.mxu0 %v11542_v15  ;;  %v11543_v41 = vld [vmem:[#allocation4 + $0x38] sm:$0xff]   ;;  %v19942_v60 = vld [vmem:[#allocation207_spill] sm:$0xff] }
 0xb08   : > { %19742 = vst [vmem:[#allocation192_spill] sm:$0xff] %v16289_v12  ;;  %19753 = vst [vmem:[#allocation162_spill] sm:$0xff] %v16325_v29  ;;  %10900 = vmatprep.subr.bf16.mxu0 %v19664_v36  ;;  %v19768_v15 = vld [vmem:[#allocation212_spill] sm:$0xff]  ;;  %v16375_v18 = vmul.f32 %v19772_v1, %v16264_v46  ;;  %v16392_v1 = vmul.f32 %v19780_v27, %v16264_v46  ;;  %v6193_v57 = vunpack.c.h.b16 %v16325_v29 }
 0xb09   : > { %19748 = vst [vmem:[#allocation195_spill] sm:$0xff] %v16303_v14  ;;  %6220 = vperm.xlu0 %11197, %v6189_v40   ;;  %5759 = vperm.xlu1 %11196, %v5714_v0   ;;  %19755 = vst [vmem:[#allocation119_spill] sm:$0xff] %v16334_v5  ;;  %v16338_v0 = vpack.c.bf16 %v16293_v50, %v16289_v12  ;;  %v19757_v40 = vld [vmem:[#allocation60_spill] sm:$0xff]  ;;  %v16350_v47 = vpack.c.bf16 %v16303_v14, %v16299_v19 }
 0xb0a   : > { %v16342_v38 = vmul.f32 %v19757_v40, %v16264_v46  ;;  %v19766_v40 = vld [vmem:[#allocation37_spill] sm:$0xff]  ;;  %v16367_v8 = vmul.f32 %v19768_v15, %v16264_v46  ;;  %19773 = vst [vmem:[#allocation102_spill] sm:$0xff] %v16375_v18  ;;  %19775 = vst [vmem:[#allocation96_spill] sm:$0xff] %v16379_v6  ;;  %v16384_v15 = vmul.f32 %v19776_v3, %v16264_v46  ;;  %v6195_v3 = vunpack.c.h.b16 %v16334_v5  ;;  %v19794_v5 = vld [vmem:[#allocation50_spill] sm:$0xff] }
 0xb0b   : > { %19756 = vst [vmem:[#allocation236_spill] sm:$0xff] %v16338_v0  ;;  %19761 = vst [vmem:[#allocation114_spill] sm:$0xff] %v16350_v47  ;;  %v16362_v56 = vmul.f32 %v19766_v40, %v16264_v46  ;;  %v5943_v40 = vunpack.c.l.b16 %v16072_v61  ;;  %10901 = vmatpush3.bf16.msra.mxu0 %v11543_v41  ;;  %v16408_v24 = vpack.c.bf16 %v16358_v17, %v16354_v58  ;;  %v6424_v27 = vunpack.c.h.b16 %v16350_v47  ;;  %v19792_v47 = vld [vmem:[#allocation216_spill] sm:$0xff]  ;;  %v19944_v17 = vld [vmem:[#allocation111_spill] sm:$0xff] }
 0xb0c   : > { %19758 = vst [vmem:[#allocation205_spill] sm:$0xff] %v16342_v38  ;;  %19769 = vst [vmem:[#allocation82_spill] sm:$0xff] %v16367_v8  ;;  %v16402_v54 = vpack.c.bf16 %v16346_v34, %v16342_v38  ;;  %10906 = vmatprep.subr.bf16.mxu0 %v19664_v36  ;;  %v16417_v61 = vpack.c.bf16 %v16375_v18, %v16371_v10  ;;  %v16422_v55 = vpack.c.bf16 %v16384_v15, %v16379_v6  ;;  %v19796_v9 = vld [vmem:[#allocation32_spill] sm:$0xff]  ;;  %v19915_v18 = vld [vmem:[#allocation142_spill] sm:$0xff] }
 0xb0d   : > { %19767 = vst [vmem:[#allocation118_spill] sm:$0xff] %v16362_v56  ;;  %6226 = vperm.xlu0 %11197, %v6191_v20   ;;  %5958 = vperm.xlu1 %11196, %v5941_v44   ;;  %19777 = vst [vmem:[#allocation224_spill] sm:$0xff] %v16384_v15  ;;  %v5947_v44 = vunpack.c.l.b16 %v16120_v45  ;;  %v6197_v20 = vunpack.c.h.b16 %v16338_v0  ;;  %v16413_v41 = vpack.c.bf16 %v16367_v8, %v16362_v56  ;;  %v19786_v45 = vld [vmem:[#allocation51_spill] sm:$0xff]  ;;  %v19842_v8 = vld [vmem:[#allocation133_spill] sm:$0xff] }
 0xb0e   : > { %19779 = vst [vmem:[#allocation115_spill] sm:$0xff] %v16388_v31  ;;  %19781 = vst [vmem:[#allocation200_spill] sm:$0xff] %v16392_v1  ;;  %v16426_v63 = vpack.c.bf16 %v16392_v1, %v16388_v31  ;;  %v16430_v35 = vmul.f32 %v19786_v45, %v16264_v46  ;;  %v16434_v25 = vmul.f32 %v19788_v33, %v16264_v46  ;;  %v19800_v46 = vld [vmem:[#allocation34_spill] sm:$0xff]  ;;  %v19848_v56 = vld [vmem:[#allocation81_spill] sm:$0xff] }
 0xb0f   : > { %19782 = vst [vmem:[#allocation116_spill] sm:$0xff] %v16402_v54  ;;  %19783 = vst [vmem:[#allocation125_spill] sm:$0xff] %v16417_v61  ;;  %v16442_v0 = vmul.f32 %v19792_v47, %v16309_v49  ;;  %v16446_v29 = vmul.f32 %v19794_v5, %v16309_v49  ;;  %v16450_v45 = vmul.f32 %v19796_v9, %v16309_v49  ;;  %v19906_v19 = vld [vmem:[#allocation140_spill] sm:$0xff]  ;;  %v19911_v31 = vld [vmem:[#allocation135_spill] sm:$0xff] }
 0xb10   : > { %19784 = vst [vmem:[#allocation123_spill] sm:$0xff] %v16422_v55  ;;  %19785 = vst [vmem:[#allocation214_spill] sm:$0xff] %v16426_v63  ;;  %v16454_v33 = vmul.f32 %v19798_v51, %v16309_v49  ;;  %v16462_v47 = vmul.f32 %v19802_v62, %v16309_v49  ;;  %v19804_v63 = vld [vmem:[#allocation31_spill] sm:$0xff]  ;;  %v19806_v55 = vld [vmem:[#allocation58_spill] sm:$0xff]  ;;  %v16474_v51 = vmul.f32 %v19808_v37, %v16309_v49 }
 0xb11   : > { %6232 = vperm.xlu0 %11197, %v6193_v57   ;;  %5964 = vperm.xlu1 %11196, %v5943_v40   ;;  %19787 = vst [vmem:[#allocation100_spill] sm:$0xff] %v16430_v35  ;;  %19789 = vst [vmem:[#allocation213_spill] sm:$0xff] %v16434_v25  ;;  %v19790_v57 = vld [vmem:[#allocation53_spill] sm:$0xff]  ;;  %v16466_v5 = vmul.f32 %v19804_v63, %v16309_v49  ;;  %v16470_v9 = vmul.f32 %v19806_v55, %v16309_v49  ;;  %v19818_v25 = vld [vmem:[#allocation67_spill] sm:$0xff] }
 0xb12   : > { %v16438_v40 = vmul.f32 %v19790_v57, %v16309_v49  ;;  %19793 = vst [vmem:[#allocation42_spill] sm:$0xff] %v16442_v0  ;;  %19795 = vst [vmem:[#allocation222_spill] sm:$0xff] %v16446_v29  ;;  %v16458_v57 = vmul.f32 %v19800_v46, %v16309_v49  ;;  %v19816_v29 = vld [vmem:[#allocation41_spill] sm:$0xff]  ;;  %v19822_v62 = vld [vmem:[#allocation71_spill] sm:$0xff] }
 0xb13   : > { %19797 = vst [vmem:[#allocation226_spill] sm:$0xff] %v16450_v45  ;;  %19799 = vst [vmem:[#allocation185_spill] sm:$0xff] %v16454_v33  ;;  %v19810_v45 = vld [vmem:[#allocation63_spill] sm:$0xff]  ;;  %v16491_v37 = vmul.f32 %v19816_v29, %v16309_v49  ;;  %v19828_v35 = vld [vmem:[#allocation68_spill] sm:$0xff] }
 0xb14   : > { %19791 = vst [vmem:[#allocation122_spill] sm:$0xff] %v16438_v40  ;;  %19801 = vst [vmem:[#allocation109_spill] sm:$0xff] %v16458_v57  ;;  %v16478_v46 = vmul.f32 %v19810_v45, %v16309_v49  ;;  %v16495_v45 = vmul.f32 %v19818_v25, %v16309_v49  ;;  %v16515_v25 = vmul.f32 %v19828_v35, %v16314_v30  ;;  %v19838_v35 = vld [vmem:[#allocation83_spill] sm:$0xff]  ;;  %v19913_v1 = vld [vmem:[#allocation169_spill] sm:$0xff] }
 0xb15   : > { %19803 = vst [vmem:[#allocation188_spill] sm:$0xff] %v16462_v47  ;;  %19805 = vst [vmem:[#allocation183_spill] sm:$0xff] %v16466_v5  ;;  %6238 = vperm.xlu0 %11197, %v6195_v3   ;;  %5970 = vperm.xlu1 %11196, %v5945_v42   ;;  %v19812_v47 = vld [vmem:[#allocation36_spill] sm:$0xff]  ;;  %v19814_v5 = vld [vmem:[#allocation62_spill] sm:$0xff] }
 0xb16   : > { %19807 = vst [vmem:[#allocation220_spill] sm:$0xff] %v16470_v9  ;;  %19809 = vst [vmem:[#allocation191_spill] sm:$0xff] %v16474_v51  ;;  %v16483_v63 = vmul.f32 %v19812_v47, %v16309_v49  ;;  %v16487_v55 = vmul.f32 %v19814_v5, %v16309_v49  ;;  %v19820_v42 = vld [vmem:[#allocation35_spill] sm:$0xff]  ;;  %v16503_v47 = vmul.f32 %v19822_v62, %v16314_v30 }
 0xb17   : > { %19811 = vst [vmem:[#allocation156_spill] sm:$0xff] %v16478_v46  ;;  %19817 = vst [vmem:[#allocation206_spill] sm:$0xff] %v16491_v37  ;;  %v16499_v3 = vmul.f32 %v19820_v42, %v16309_v49  ;;  %v19826_v46 = vld [vmem:[#allocation128_spill] sm:$0xff]  ;;  %v19832_v42 = vld [vmem:[#allocation73_spill] sm:$0xff] }
 0xb18   : > { %19813 = vst [vmem:[#allocation202_spill] sm:$0xff] %v16483_v63  ;;  %19815 = vst [vmem:[#allocation203_spill] sm:$0xff] %v16487_v55  ;;  %v19824_v63 = vld [vmem:[#allocation69_spill] sm:$0xff]  ;;  %v16511_v29 = vmul.f32 %v19826_v46, %v16314_v30  ;;  %v16523_v62 = vmul.f32 %v19832_v42, %v16314_v30  ;;  %v19836_v46 = vld [vmem:[#allocation72_spill] sm:$0xff]  ;;  %v6426_v42 = vunpack.c.h.b16 %v16402_v54 }
 0xb19   : > { %19819 = vst [vmem:[#allocation171_spill] sm:$0xff] %v16495_v45  ;;  %19821 = vst [vmem:[#allocation210_spill] sm:$0xff] %v16499_v3  ;;  %v16507_v5 = vmul.f32 %v19824_v63, %v16314_v30  ;;  %v19830_v45 = vld [vmem:[#allocation74_spill] sm:$0xff]  ;;  %v11546_v3 = vld [vmem:[#allocation11 + $0x10] sm:$0xff]   ;;  %6244 = vperm.xlu0 %11197, %v6197_v20   ;;  %5976 = vperm.xlu1 %11196, %v5947_v44  }
 0xb1a   : > { %19823 = vst [vmem:[#allocation221_spill] sm:$0xff] %v16503_v47  ;;  %19827 = vst [vmem:[#allocation211_spill] sm:$0xff] %v16511_v29  ;;  %v16519_v49 = vmul.f32 %v19830_v45, %v16314_v30  ;;  %v19834_v63 = vld [vmem:[#allocation129_spill] sm:$0xff]  ;;  %v16531_v29 = vmul.f32 %v19836_v46, %v16314_v30  ;;  %v19850_v44 = vld [vmem:[#allocation134_spill] sm:$0xff]  ;;  %11051 = vmatpush3.bf16.msra.mxu1 %v11546_v3 }
 0xb1b   : > { %19825 = vst [vmem:[#allocation38_spill] sm:$0xff] %v16507_v5  ;;  %19829 = vst [vmem:[#allocation199_spill] sm:$0xff] %v16515_v25  ;;  %v16527_v15 = vmul.f32 %v19834_v63, %v16314_v30  ;;  %v16535_v25 = vmul.f32 %v19838_v35, %v16314_v30  ;;  %v19840_v45 = vld [vmem:[#allocation77_spill] sm:$0xff]  ;;  %v16544_v63 = vmul.f32 %v19842_v8, %v16314_v30  ;;  %v19852_v54 = vld [vmem:[#allocation54_spill] sm:$0xff]  ;;  %11052 = vmatprep.subr.bf16.mxu1 %v19664_v36 }
 0xb1c   : > { %19831 = vst [vmem:[#allocation215_spill] sm:$0xff] %v16519_v49  ;;  %19833 = vst [vmem:[#allocation49_spill] sm:$0xff] %v16523_v62  ;;  %v16539_v6 = vmul.f32 %v19840_v45, %v16314_v30  ;;  %v16556_v45 = vmul.f32 %v19848_v56, %v16314_v30  ;;  %v16560_v20 = vmul.f32 %v19850_v44, %v16314_v30  ;;  %v19858_v56 = vld [vmem:[#allocation141_spill] sm:$0xff]  ;;  %v19864_v3 = vld [vmem:[#allocation103_spill] sm:$0xff] }
 0xb1d   : > { %19835 = vst [vmem:[#allocation189_spill] sm:$0xff] %v16527_v15  ;;  %19837 = vst [vmem:[#allocation52_spill] sm:$0xff] %v16531_v29  ;;  %v19844_v15 = vld [vmem:[#allocation76_spill] sm:$0xff]  ;;  %v19846_v29 = vld [vmem:[#allocation98_spill] sm:$0xff]  ;;  %v16564_v8 = vmul.f32 %v19852_v54, %v16314_v30  ;;  %v16576_v61 = vmul.f32 %v19858_v56, %v16319_v21  ;;  %6443 = vperm.xlu0 %11197, %v6424_v27  }
 0xb1e   : > { %19839 = vst [vmem:[#allocation209_spill] sm:$0xff] %v16535_v25  ;;  %19841 = vst [vmem:[#allocation57_spill] sm:$0xff] %v16539_v6  ;;  %v16548_v46 = vmul.f32 %v19844_v15, %v16314_v30  ;;  %v16552_v35 = vmul.f32 %v19846_v29, %v16314_v30  ;;  %v19856_v29 = vld [vmem:[#allocation86_spill] sm:$0xff]  ;;  %v19860_v44 = vld [vmem:[#allocation105_spill] sm:$0xff] }
 0xb1f   : > { %19843 = vst [vmem:[#allocation176_spill] sm:$0xff] %v16544_v63  ;;  %19849 = vst [vmem:[#allocation61_spill] sm:$0xff] %v16556_v45  ;;  %v19854_v63 = vld [vmem:[#allocation138_spill] sm:$0xff]  ;;  %v19862_v30 = vld [vmem:[#allocation148_spill] sm:$0xff] }
 0xb20   : > { %19845 = vst [vmem:[#allocation56_spill] sm:$0xff] %v16548_v46  ;;  %19847 = vst [vmem:[#allocation196_spill] sm:$0xff] %v16552_v35  ;;  %v16568_v15 = vmul.f32 %v19854_v63, %v16319_v21  ;;  %v16572_v46 = vmul.f32 %v19856_v29, %v16319_v21  ;;  %v16584_v54 = vmul.f32 %v19862_v30, %v16319_v21  ;;  %v19866_v29 = vld [vmem:[#allocation143_spill] sm:$0xff]  ;;  %v19868_v56 = vld [vmem:[#allocation120_spill] sm:$0xff]  ;;  %v19872_v30 = vunpack.c.l.b16 %v16128_v43 }
 0xb21   : > { %19851 = vst [vmem:[#allocation208_spill] sm:$0xff] %v16560_v20  ;;  %19853 = vst [vmem:[#allocation29_spill] sm:$0xff] %v16564_v8  ;;  %v16580_v20 = vmul.f32 %v19860_v44, %v16319_v21  ;;  %v16589_v63 = vmul.f32 %v19864_v3, %v16319_v21  ;;  %v16593_v8 = vmul.f32 %v19866_v29, %v16319_v21  ;;  %v19870_v44 = vld [vmem:[#allocation149_spill] sm:$0xff]  ;;  %v19873_v3 = vld [vmem:[#allocation66_spill] sm:$0xff]  ;;  %6449 = vperm.xlu0 %11197, %v6426_v42  }
 0xb22   : > { %19855 = vst [vmem:[#allocation60_spill] sm:$0xff] %v16568_v15  ;;  %19857 = vst [vmem:[#allocation193_spill] sm:$0xff] %v16572_v46  ;;  %5982 = vperm.xlu1 %11196, %v19872_v30   ;;  %v16608_v59 = vmul.f32 %v19873_v3, %v16319_v21  ;;  %v19875_v29 = vld [vmem:[#allocation147_spill] sm:$0xff]  ;;  %v19879_v43 = vld [vmem:[#allocation154_spill] sm:$0xff]  ;;  %v16695_v42 = vmul.f32 %v19906_v19, %v16330_v11  ;;  %v16710_v19 = vmul.f32 %v19911_v31, %v16330_v11 }
 0xb23   : > { %19859 = vst [vmem:[#allocation65_spill] sm:$0xff] %v16576_v61  ;;  %19861 = vst [vmem:[#allocation218_spill] sm:$0xff] %v16580_v20  ;;  %v16597_v61 = vmul.f32 %v19868_v56, %v16319_v21  ;;  %v16601_v20 = vmul.f32 %v19870_v44, %v16319_v21  ;;  %v19877_v44 = vld [vmem:[#allocation121_spill] sm:$0xff]  ;;  %v16622_v27 = vmul.f32 %v19879_v43, %v16319_v21  ;;  %v19881_v30 = vld [vmem:[#allocation75_spill] sm:$0xff] }
 0xb24   : > { %19863 = vst [vmem:[#allocation37_spill] sm:$0xff] %v16584_v54  ;;  %19865 = vst [vmem:[#allocation212_spill] sm:$0xff] %v16589_v63  ;;  %v16626_v36 = vmul.f32 %v19881_v30, %v16319_v21  ;;  %v19883_v3 = vld [vmem:[#allocation158_spill] sm:$0xff]  ;;  %v19887_v56 = vld [vmem:[#allocation164_spill] sm:$0xff]  ;;  %v16642_v43 = vmul.f32 %v19889_v13, %v16330_v11  ;;  %v16646_v30 = vmul.f32 %v19891_v22, %v16330_v11  ;;  %v19897_v13 = vunpack.c.l.b16 %v16148_v53 }
 0xb25   : > { %19867 = vst [vmem:[#allocation47_spill] sm:$0xff] %v16593_v8  ;;  %19869 = vst [vmem:[#allocation91_spill] sm:$0xff] %v16597_v61  ;;  %v16612_v8 = vmul.f32 %v19875_v29, %v16319_v21  ;;  %v16618_v61 = vmul.f32 %v19877_v44, %v16319_v21  ;;  %v16630_v16 = vmul.f32 %v19883_v3, %v16319_v21  ;;  %v19885_v29 = vld [vmem:[#allocation130_spill] sm:$0xff]  ;;  %v6428_v22 = vunpack.c.h.b16 %v16408_v24  ;;  %v19932_v48 = vld [vmem:[#allocation188_spill] sm:$0xff] }
 0xb26   : > { %19871 = vst [vmem:[#allocation46_spill] sm:$0xff] %v16601_v20  ;;  %19874 = vst [vmem:[#allocation219_spill] sm:$0xff] %v16608_v59  ;;  %v16638_v44 = vmul.f32 %v19887_v56, %v16330_v11  ;;  %5988 = vperm.xlu1 %11196, %v19897_v13   ;;  %v19900_v56 = vld [vmem:[#allocation168_spill] sm:$0xff]  ;;  %v6430_v53 = vunpack.c.h.b16 %v16413_v41  ;;  %v19930_v34 = vld [vmem:[#allocation222_spill] sm:$0xff] }
 0xb27   : > { %19876 = vst [vmem:[#allocation48_spill] sm:$0xff] %v16612_v8  ;;  %19878 = vst [vmem:[#allocation217_spill] sm:$0xff] %v16618_v61  ;;  %v16634_v8 = vmul.f32 %v19885_v29, %v16319_v21  ;;  %v16673_v26 = vmul.f32 %v19900_v56, %v16330_v11  ;;  %v19902_v13 = vld [vmem:[#allocation136_spill] sm:$0xff]  ;;  %6455 = vperm.xlu0 %11197, %v6428_v22   ;;  %v19910_v56 = vunpack.c.l.b16 %v16169_v32  ;;  %v19917_v32 = vld [vmem:[#allocation177_spill] sm:$0xff] }
 0xb28   : > { %19880 = vst [vmem:[#allocation51_spill] sm:$0xff] %v16622_v27  ;;  %19882 = vst [vmem:[#allocation181_spill] sm:$0xff] %v16626_v36  ;;  %v19893_v27 = vld [vmem:[#allocation131_spill] sm:$0xff]  ;;  %v16683_v29 = vmul.f32 %v19902_v13, %v16330_v11  ;;  %v16724_v22 = vmul.f32 %v19917_v32, %v16330_v11  ;;  %v19931_v32 = vld [vmem:[#allocation226_spill] sm:$0xff] }
 0xb29   : > { %19884 = vst [vmem:[#allocation53_spill] sm:$0xff] %v16630_v16  ;;  %19886 = vst [vmem:[#allocation216_spill] sm:$0xff] %v16634_v8  ;;  %v16650_v3 = vmul.f32 %v19893_v27, %v16330_v11  ;;  %v19895_v16 = vld [vmem:[#allocation165_spill] sm:$0xff]  ;;  %v19934_v12 = vld [vmem:[#allocation156_spill] sm:$0xff]  ;;  %v16815_v8 = vpack.c.bf16 %v16442_v0, %v16438_v40 }
 0xb2a   : > { %19888 = vst [vmem:[#allocation50_spill] sm:$0xff] %v16638_v44  ;;  %19890 = vst [vmem:[#allocation32_spill] sm:$0xff] %v16642_v43  ;;  %v16654_v21 = vmul.f32 %v19895_v16, %v16330_v11  ;;  %v19898_v44 = vld [vmem:[#allocation101_spill] sm:$0xff]  ;;  %v19904_v16 = vld [vmem:[#allocation107_spill] sm:$0xff]  ;;  %5994 = vperm.xlu1 %11196, %v19910_v56  }
 0xb2b   : > { %19892 = vst [vmem:[#allocation80_spill] sm:$0xff] %v16646_v30  ;;  %19894 = vst [vmem:[#allocation34_spill] sm:$0xff] %v16650_v3  ;;  %v16665_v27 = vmul.f32 %v19898_v44, %v16330_v11  ;;  %v19908_v44 = vld [vmem:[#allocation104_spill] sm:$0xff]  ;;  %6461 = vperm.xlu0 %11197, %v6430_v53   ;;  %v19933_v56 = vld [vmem:[#allocation183_spill] sm:$0xff] }
 0xb2c   : > { %19896 = vst [vmem:[#allocation59_spill] sm:$0xff] %v16654_v21  ;;  %19901 = vst [vmem:[#allocation58_spill] sm:$0xff] %v16673_v26  ;;  %v16687_v21 = vmul.f32 %v19904_v16, %v16330_v11  ;;  %v16699_v10 = vmul.f32 %v19908_v44, %v16330_v11  ;;  %v16714_v44 = vmul.f32 %v19913_v1, %v16330_v11  ;;  %v19919_v1 = vld [vmem:[#allocation145_spill] sm:$0xff]  ;;  %v19935_v53 = vld [vmem:[#allocation202_spill] sm:$0xff] }
 0xb2d   : > { %19899 = vst [vmem:[#allocation31_spill] sm:$0xff] %v16665_v27  ;;  %19903 = vst [vmem:[#allocation33_spill] sm:$0xff] %v16683_v29  ;;  %v16720_v16 = vmul.f32 %v19915_v18, %v16330_v11  ;;  %v16732_v58 = vmul.f32 %v19919_v1, %v16330_v11  ;;  %v19921_v1 = vld [vmem:[#allocation172_spill] sm:$0xff]  ;;  %v19923_v18 = vld [vmem:[#allocation125_spill] sm:$0xff] }
 0xb2e   : > { %19905 = vst [vmem:[#allocation63_spill] sm:$0xff] %v16687_v21  ;;  %19907 = vst [vmem:[#allocation36_spill] sm:$0xff] %v16695_v42  ;;  %v19922_v13 = vunpack.c.l.b16 %v19921_v1  ;;  %v6432_v14 = vunpack.c.h.b16 %v19923_v18  ;;  %v19928_v11 = vld [vmem:[#allocation100_spill] sm:$0xff]  ;;  %v19929_v1 = vld [vmem:[#allocation213_spill] sm:$0xff]  ;;  %v6184_v42 = vunpack.c.l.b16 %v19944_v17 }
 0xb2f   : > { %19909 = vst [vmem:[#allocation62_spill] sm:$0xff] %v16699_v10  ;;  %19912 = vst [vmem:[#allocation41_spill] sm:$0xff] %v16710_v19  ;;  %v19936_v23 = vld [vmem:[#allocation171_spill] sm:$0xff]  ;;  %v19940_v39 = vld [vmem:[#allocation189_spill] sm:$0xff]  ;;  %v19943_v19 = vunpack.c.l.b16 %v19942_v60  ;;  %v16809_v17 = vpack.c.bf16 %v19929_v1, %v19928_v11 }
 0xb30   : > { %19914 = vst [vmem:[#allocation67_spill] sm:$0xff] %v16714_v44  ;;  %19916 = vst [vmem:[#allocation35_spill] sm:$0xff] %v16720_v16  ;;  %6000 = vperm.xlu1 %11196, %v19922_v13   ;;  %v19937_v13 = vld [vmem:[#allocation210_spill] sm:$0xff]  ;;  %v19938_v4 = vld [vmem:[#allocation211_spill] sm:$0xff]  ;;  %6467 = vperm.xlu0 %11197, %v6432_v14  }
 0xb31   : > { %19918 = vst [vmem:[#allocation71_spill] sm:$0xff] %v16724_v22  ;;  %19920 = vst [vmem:[#allocation69_spill] sm:$0xff] %v16732_v58  ;;  %v19939_v38 = vld [vmem:[#allocation199_spill] sm:$0xff]  ;;  %v19941_v28 = vld [vmem:[#allocation52_spill] sm:$0xff]  ;;  %v6438_v30 = vunpack.c.h.b16 %v16809_v17 }
 0xb32   : > { %v19945_v26 = vld [vmem:[#allocation176_spill] sm:$0xff]  ;;  %v19948_v31 = vld [vmem:[#allocation29_spill] sm:$0xff]  ;;  %v19950_v7 = vld [vmem:[#allocation218_spill] sm:$0xff] }
 0xb33   : > { %v19946_v50 = vld [vmem:[#allocation56_spill] sm:$0xff]  ;;  %v19949_v43 = vld [vmem:[#allocation65_spill] sm:$0xff]  ;;  %v19951_v36 = vld [vmem:[#allocation47_spill] sm:$0xff] }
 0xb34   : > { %6199 = vperm.xlu1 %11196, %v19943_v19   ;;  %v19947_v27 = vld [vmem:[#allocation208_spill] sm:$0xff]  ;;  %v19952_v52 = vld [vmem:[#allocation91_spill] sm:$0xff]  ;;  %v19958_v54 = vld [vmem:[#allocation53_spill] sm:$0xff] }
 0xb35   : > { %v19955_v60 = vld [vmem:[#allocation59_spill] sm:$0xff]  ;;  %v19959_v14 = vld [vmem:[#allocation214_spill] sm:$0xff]  ;;  %v19960_v59 = vld [vmem:[#allocation232_spill] sm:$0xff] }
 0xb36   : > { %v19956_v20 = vld [vmem:[#allocation123_spill] sm:$0xff]  ;;  %v6436_v2 = vunpack.c.h.b16 %v19959_v14  ;;  %v6186_v19 = vunpack.c.l.b16 %v19960_v59  ;;  %v6665_v59 = vunpack.c.h.b16 %v16815_v8  ;;  %v19964_v11 = vld [vmem:[#allocation162_spill] sm:$0xff]  ;;  %v19976_v40 = vld [vmem:[#allocation89_spill] sm:$0xff] }
 0xb37   : > { %v6434_v16 = vunpack.c.h.b16 %v19956_v20  ;;  %v19957_v63 = vld [vmem:[#allocation51_spill] sm:$0xff]  ;;  %v6192_v1 = vunpack.c.l.b16 %v19964_v11 }
 0xb38   : > { %6205 = vperm.xlu1 %11196, %v6184_v42   ;;  %v19961_v10 = vld [vmem:[#allocation175_spill] sm:$0xff] }
 0xb39   : > { %6473 = vperm.xlu0 %11197, %v6434_v16   ;;  %v6188_v21 = vunpack.c.l.b16 %v19961_v10  ;;  %v11555_v16 = vld [vmem:[#allocation11 + $0x18] sm:$0xff]   ;;  %v19962_v42 = vld [vmem:[#allocation235_spill] sm:$0xff] }
 0xb3a   : > { %11053 = vmatpush3.bf16.msra.mxu1 %v11555_v16  ;;  %v6190_v61 = vunpack.c.l.b16 %v19962_v42  ;;  %v19965_v16 = vld [vmem:[#allocation119_spill] sm:$0xff] }
 0xb3b   : > { %v6194_v42 = vunpack.c.l.b16 %v19965_v16 }
 0xb3c   : > { %6211 = vperm.xlu1 %11196, %v6186_v19   ;;  %v19963_v19 = vmov 0.0  }
 0xb3d   : > { %6479 = vperm.xlu0 %11197, %v6436_v2   ;;  %v16821_v2 = vpack.c.bf16 %v19931_v32, %v19930_v34  ;;  %11054 = vmatprep.subr.bf16.mxu1 %v19963_v19  ;;  %v16834_v34 = vpack.c.bf16 %v19933_v56, %v19932_v48  ;;  %v16840_v32 = vpack.c.bf16 %v16474_v51, %v16470_v9 }
 0xb3e   : > { %v16846_v48 = vpack.c.bf16 %v19935_v53, %v19934_v12  ;;  %v16852_v56 = vpack.c.bf16 %v16491_v37, %v16487_v55  ;;  %v6429_v12 = vunpack.c.l.b16 %v16413_v41 }
 0xb3f   : > { %v6667_v10 = vunpack.c.h.b16 %v16821_v2 }
 0xb40   : > { %6217 = vperm.xlu1 %11196, %v6188_v21  }
 0xb41   : > { %6485 = vperm.xlu0 %11197, %v6438_v30   ;;  %v16828_v30 = vpack.c.bf16 %v16458_v57, %v16454_v33  ;;  %v16956_v33 = vpack.c.bf16 %v19950_v7, %v19949_v43 }
 0xb43   : > { %v6669_v21 = vunpack.c.h.b16 %v16828_v30  ;;  %v7149_v0 = vunpack.c.h.b16 %v16956_v33 }
 0xb44   : > { %6223 = vperm.xlu1 %11196, %v6190_v61   ;;  %v6671_v61 = vunpack.c.h.b16 %v16834_v34 }
 0xb45   : > { %6684 = vperm.xlu0 %11197, %v6665_v59   ;;  %v19966_v59 = vld [vmem:[#allocation236_spill] sm:$0xff] }
 0xb46   : > { %v6196_v11 = vunpack.c.l.b16 %v19966_v59 }
 0xb48   : > { %6229 = vperm.xlu1 %11196, %v6192_v1   ;;  %v6673_v1 = vunpack.c.h.b16 %v16840_v32 }
 0xb49   : > { %6690 = vperm.xlu0 %11197, %v6667_v10   ;;  %v19967_v10 = vld [vmem:[#allocation114_spill] sm:$0xff] }
 0xb4a   : > { %v6423_v16 = vunpack.c.l.b16 %v19967_v10  ;;  %v16858_v10 = vpack.c.bf16 %v19937_v13, %v19936_v23 }
 0xb4c   : > { %6235 = vperm.xlu1 %11196, %v6194_v42   ;;  %v19968_v42 = vld [vmem:[#allocation116_spill] sm:$0xff] }
 0xb4d   : > { %6696 = vperm.xlu0 %11197, %v6669_v21   ;;  %v6675_v21 = vunpack.c.h.b16 %v16846_v48  ;;  %v6425_v59 = vunpack.c.l.b16 %v19968_v42  ;;  %v6679_v42 = vunpack.c.h.b16 %v16858_v10 }
 0xb50   : > { %6241 = vperm.xlu1 %11196, %v6196_v11   ;;  %v6427_v11 = vunpack.c.l.b16 %v16408_v24 }
 0xb51   : > { %6702 = vperm.xlu0 %11197, %v6671_v61   ;;  %v6677_v61 = vunpack.c.h.b16 %v16852_v56 }
 0xb54   : > { %6440 = vperm.xlu1 %11196, %v6423_v16   ;;  %v16862_v16 = vpop.permute.xlu1 %5717 }
 0xb55   : > { %6708 = vperm.xlu0 %11197, %v6673_v1   ;;  %v16860_v1 = vpop.permute.xlu0 %5741 }
 0xb58   : > { %6446 = vperm.xlu1 %11196, %v6425_v59   ;;  %v11564_v59 = vld [vmem:[#allocation11 + $0x20] sm:$0xff]   ;;  %v16872_v53 = vpop.permute.xlu1 %5720 }
 0xb59   : > { %6714 = vperm.xlu0 %11197, %v6675_v21   ;;  %v16868_v21 = vpack.c.bf16 %v16507_v5, %v16503_v47  ;;  %v16870_v24 = vpop.permute.xlu0 %5762  ;;  %11055 = vmatpush3.bf16.msra.mxu1 %v11564_v59  ;;  %v16889_v59 = vpack.c.bf16 %v16523_v62, %v16519_v49  ;;  %v6435_v47 = vunpack.c.l.b16 %v19959_v14  ;;  %v6437_v62 = vunpack.c.l.b16 %v16809_v17  ;;  %v19969_v5 = vld [vmem:[#allocation223_spill] sm:$0xff] }
 0xb5a   : > { %11056 = vmatprep.subr.bf16.mxu1 %v19963_v19 }
 0xb5b   : > { %v6906_v23 = vunpack.c.h.b16 %v16868_v21 }
 0xb5c   : > { %6452 = vperm.xlu1 %11196, %v6427_v11   ;;  %v16878_v11 = vpack.c.bf16 %v19939_v38, %v19938_v4  ;;  %v16883_v13 = vpop.permute.xlu1 %5723  ;;  %v6910_v38 = vunpack.c.h.b16 %v16889_v59 }
 0xb5d   : > { %6720 = vperm.xlu0 %11197, %v6677_v61   ;;  %v6431_v61 = vunpack.c.l.b16 %v19923_v18  ;;  %v16881_v41 = vpop.permute.xlu0 %5961 }
 0xb60   : > { %6458 = vperm.xlu1 %11196, %v6429_v12   ;;  %v6433_v12 = vunpack.c.l.b16 %v19956_v20  ;;  %v16893_v4 = vpop.permute.xlu1 %5726 }
 0xb61   : > { %6726 = vperm.xlu0 %11197, %v6679_v42   ;;  %v6908_v42 = vunpack.c.h.b16 %v16878_v11  ;;  %v16891_v18 = vpop.permute.xlu0 %5967 }
 0xb64   : > { %6464 = vperm.xlu1 %11196, %v6431_v61   ;;  %v5730_v20 = vpop.permute.xlu1 %5729 }
 0xb65   : > { %6925 = vperm.xlu0 %11197, %v6906_v23   ;;  %v16899_v23 = vpack.c.bf16 %v19941_v28, %v19940_v39  ;;  %v16901_v61 = vpop.permute.xlu0 %5973  ;;  %v6664_v28 = vunpack.c.l.b16 %v16815_v8 }
 0xb67   : > { %v6912_v49 = vunpack.c.h.b16 %v16899_v23 }
 0xb68   : > { %6470 = vperm.xlu1 %11196, %v6433_v12   ;;  %v5733_v14 = vpop.permute.xlu1 %5732 }
 0xb69   : > { %6931 = vperm.xlu0 %11197, %v6908_v42   ;;  %v16907_v42 = vpack.c.bf16 %v16539_v6, %v16535_v25  ;;  %v16909_v12 = vpop.permute.xlu0 %5979  ;;  %v6666_v6 = vunpack.c.l.b16 %v16821_v2 }
 0xb6b   : > { %v6914_v39 = vunpack.c.h.b16 %v16907_v42 }
 0xb6c   : > { %6476 = vperm.xlu1 %11196, %v6435_v47   ;;  %v5736_v17 = vpop.permute.xlu1 %5735 }
 0xb6d   : > { %6937 = vperm.xlu0 %11197, %v6910_v38   ;;  %v16915_v38 = vpack.c.bf16 %v19946_v50, %v19945_v26  ;;  %v16917_v47 = vpop.permute.xlu0 %5985  ;;  %v6668_v50 = vunpack.c.l.b16 %v16828_v30  ;;  %v5771_v30 = vrot.slane %v16872_v53, %v19969_v5  ;;  %v6672_v53 = vunpack.c.l.b16 %v16840_v32 }
 0xb6f   : > { %v6916_v25 = vunpack.c.h.b16 %v16915_v38 }
 0xb70   : > { %6482 = vperm.xlu1 %11196, %v6437_v62   ;;  %v5739_v8 = vpop.permute.xlu1 %5738 }
 0xb71   : > { %6943 = vperm.xlu0 %11197, %v6912_v49   ;;  %v16923_v49 = vpack.c.bf16 %v16556_v45, %v16552_v35  ;;  %v16925_v62 = vpop.permute.xlu0 %5991  ;;  %v6670_v45 = vunpack.c.l.b16 %v16834_v34  ;;  %v19972_v34 = vld [vmem:[#allocation229_spill] sm:$0xff]  ;;  %v5801_v43 = vrot.slane %v5739_v8, %v19976_v40 }
 0xb72   : > { %v5781_v9 = vrot.slane %v16893_v4, %v19972_v34 }
 0xb73   : > { %v6918_v26 = vunpack.c.h.b16 %v16923_v49 }
 0xb74   : > { %6681 = vperm.xlu1 %11196, %v6664_v28   ;;  %v5745_v2 = vpop.permute.xlu1 %5744 }
 0xb75   : > { %6949 = vperm.xlu0 %11197, %v6914_v39   ;;  %v16931_v39 = vpack.c.bf16 %v19948_v31, %v19947_v27  ;;  %v16933_v28 = vpop.permute.xlu0 %5997  ;;  %v19970_v31 = vld [vmem:[#allocation84_spill] sm:$0xff] }
 0xb76   : > { %v5776_v37 = vrot.slane %v16883_v13, %v19970_v31 }
 0xb77   : > { %v6920_v35 = vunpack.c.h.b16 %v16931_v39 }
 0xb78   : > { %6687 = vperm.xlu1 %11196, %v6666_v6   ;;  %v16939_v6 = vpack.c.bf16 %v16572_v46, %v16568_v15  ;;  %v5748_v27 = vpop.permute.xlu1 %5747  ;;  %v19973_v15 = vld [vmem:[#allocation227_spill] sm:$0xff] }
 0xb79   : > { %6955 = vperm.xlu0 %11197, %v6916_v25   ;;  %v11573_v25 = vld [vmem:[#allocation11 + $0x28] sm:$0xff]   ;;  %v16943_v55 = vpop.permute.xlu0 %6003  ;;  %v5786_v46 = vrot.slane %v5730_v20, %v19973_v15  ;;  %v19975_v20 = vld [vmem:[#allocation110_spill] sm:$0xff] }
 0xb7a   : > { %11057 = vmatpush3.bf16.msra.mxu1 %v11573_v25  ;;  %v7147_v51 = vunpack.c.h.b16 %v16939_v6  ;;  %v5796_v57 = vrot.slane %v5736_v17, %v19975_v20 }
 0xb7b   : > { %11058 = vmatprep.subr.bf16.mxu1 %v19963_v19 }
 0xb7c   : > { %6693 = vperm.xlu1 %11196, %v6668_v50   ;;  %v5751_v4 = vpop.permute.xlu1 %5750 }
 0xb7d   : > { %6961 = vperm.xlu0 %11197, %v6918_v26   ;;  %v19971_v26 = vld [vmem:[#allocation225_spill] sm:$0xff] }
 0xb7e   : > { %v5767_v50 = vrot.slane %v16862_v16, %v19971_v26  ;;  %v16961_v16 = vpop.permute.xlu0 %6202 }
 0xb80   : > { %6699 = vperm.xlu1 %11196, %v6670_v45   ;;  %v19974_v45 = vld [vmem:[#allocation230_spill] sm:$0xff] }
 0xb81   : > { %6967 = vperm.xlu0 %11197, %v6920_v35   ;;  %v5772_v35 = vsel %vm3081_vm1, %v5771_v30, %v5767_v50  ;;  %v5791_v13 = vrot.slane %v5733_v14, %v19974_v45  ;;  %v6674_v30 = vunpack.c.l.b16 %v16846_v48  ;;  %v19977_v14 = vld [vmem:[#allocation37_spill] sm:$0xff]  ;;  %v19978_v50 = vld [vmem:[#allocation212_spill] sm:$0xff] }
 0xb82   : > { %v5777_v25 = vsel %vm3088_vm2, %v5776_v37, %v5772_v35  ;;  %v16972_v58 = vpack.c.bf16 %v19978_v50, %v19977_v14  ;;  %v16975_v35 = vpop.permute.xlu0 %6208  ;;  %v19982_v48 = vld [vmem:[#allocation85_spill] sm:$0xff] }
 0xb83   : > { %v5782_v32 = vsel %vm3095_vm3, %v5781_v9, %v5777_v25  ;;  %19979 = vst [vmem:[#allocation128_spill] sm:$0xff] %v16975_v35  ;;  %v5806_v25 = vrot.slane %v16860_v1, %v19982_v48  ;;  %v19992_v35 = vld [vmem:[#allocation219_spill] sm:$0xff] }
 0xb84   : > { %6705 = vperm.xlu1 %11196, %v6672_v53   ;;  %v5787_v7 = vsel %vm3102_vm4, %v5786_v46, %v5782_v32  ;;  %v19981_v46 = vld [vmem:[#allocation106_spill] sm:$0xff]  ;;  %v6676_v53 = vunpack.c.l.b16 %v16852_v56  ;;  %v19983_v32 = vld [vmem:[#allocation87_spill] sm:$0xff] }
 0xb85   : > { %7166 = vperm.xlu0 %11197, %v7147_v51   ;;  %v5792_v37 = vsel %vm3109_vm5, %v5791_v13, %v5787_v7  ;;  %v5754_v51 = vpop.permute.xlu1 %5753  ;;  %v5811_v8 = vrot.slane %v5745_v2, %v19981_v46  ;;  %v5816_v14 = vrot.slane %v5748_v27, %v19983_v32  ;;  %v7151_v7 = vunpack.c.h.b16 %v16972_v58  ;;  %v19989_v27 = vld [vmem:[#allocation93_spill] sm:$0xff] }
 0xb86   : > { %v5797_v17 = vsel %vm3116_vm6, %v5796_v57, %v5792_v37  ;;  %v16987_v13 = vpack.c.bf16 %v19952_v52, %v19951_v36  ;;  %v19984_v57 = vld [vmem:[#allocation108_spill] sm:$0xff]  ;;  %v19987_v37 = vld [vmem:[#allocation43_spill] sm:$0xff]  ;;  %v6678_v52 = vunpack.c.l.b16 %v16858_v10 }
 0xb87   : > { %v5802_v9 = vsel %vm19980_vm8, %v5801_v43, %v5797_v17  ;;  %v5826_v56 = vrot.slane %v5754_v51, %v19987_v37  ;;  %vm19998_vm8 = vmmov 0  }
 0xb88   : > { %6711 = vperm.xlu1 %11196, %v6674_v30   ;;  %v16990_v30 = vpop.permute.xlu0 %6214  ;;  %v5807_v2 = vsel %vm19986_vm10, %v5806_v25, %v5802_v9  ;;  %v7153_v36 = vunpack.c.h.b16 %v16987_v13  ;;  %vm20003_vm10 = vcmask 523712  }
 0xb89   : > { %7172 = vperm.xlu0 %11197, %v7149_v0   ;;  %v5821_v0 = vrot.slane %v5751_v4, %v19984_v57  ;;  %19985 = vst [vmem:[#allocation68_spill] sm:$0xff] %v16990_v30  ;;  %v5757_v43 = vpop.permute.xlu1 %5756  ;;  %v5812_v1 = vsel %vm19988_vm0, %v5811_v8, %v5807_v2  ;;  %v19991_v4 = vld [vmem:[#allocation46_spill] sm:$0xff]  ;;  %vm20004_vm0 = vcmask 589312  }
 0xb8a   : > { %v5831_v17 = vrot.slane %v5757_v43, %v19989_v27  ;;  %v5817_v50 = vsel %vm19990_vm7, %v5816_v14, %v5812_v1  ;;  %v17001_v30 = vpack.c.bf16 %v19992_v35, %v19991_v4  ;;  %v19993_v8 = vld [vmem:[#allocation90_spill] sm:$0xff]  ;;  %v19996_v4 = vld [vmem:[#allocation217_spill] sm:$0xff]  ;;  %vm20006_vm7 = vcmask 654912  }
 0xb8b   : > { %v5822_v9 = vsel %vm3151_vm11, %v5821_v0, %v5817_v50  ;;  %v19994_v14 = vld [vmem:[#allocation94_spill] sm:$0xff]  ;;  %v6905_v50 = vunpack.c.l.b16 %v16868_v21  ;;  %v19995_v0 = vld [vmem:[#allocation48_spill] sm:$0xff]  ;;  %v6907_v21 = vunpack.c.l.b16 %v16878_v11 }
 0xb8c   : > { %6717 = vperm.xlu1 %11196, %v6676_v53   ;;  %v17004_v25 = vpop.permute.xlu0 %6220  ;;  %v5827_v53 = vsel %vm3158_vm12, %v5826_v56, %v5822_v9  ;;  %v5841_v43 = vrot.slane %v16870_v24, %v19994_v14  ;;  %v7155_v1 = vunpack.c.h.b16 %v17001_v30  ;;  %v17016_v35 = vpack.c.bf16 %v19996_v4, %v19995_v0 }
 0xb8d   : > { %7178 = vperm.xlu0 %11197, %v7151_v7   ;;  %v5760_v51 = vpop.permute.xlu1 %5759  ;;  %v5832_v10 = vsel %vm3165_vm13, %v5831_v17, %v5827_v53  ;;  %v19997_v53 = vld [vmem:[#allocation181_spill] sm:$0xff] }
 0xb8e   : > { %v5836_v7 = vrot.slane %v5760_v51, %v19993_v8  ;;  %v7157_v51 = vunpack.c.h.b16 %v17016_v35 }
 0xb90   : > { %6723 = vperm.xlu1 %11196, %v6678_v52   ;;  %v5837_v2 = vsel %vm3172_vm14, %v5836_v7, %v5832_v10  ;;  %v17018_v56 = vpop.permute.xlu0 %6226  ;;  %v11544_v52 = vld [vmem:[#allocation4 + $0x40] sm:$0xff]   ;;  %v17026_v7 = vpack.c.bf16 %v19997_v53, %v19957_v63  ;;  %v6012_v10 = vrot.slane %v16881_v41, %v19969_v5 }
 0xb91   : > { %7184 = vperm.xlu0 %11197, %v7153_v36   ;;  %v5959_v9 = vpop.permute.xlu1 %5958  ;;  %v5842_v36 = vsel %vm3179_vm15, %v5841_v43, %v5837_v2  ;;  %v11545_v2 = vld [vmem:[#allocation4 + $0x48] sm:$0xff]  }
 0xb92   : > { %v5843_v24 = vpack.c.b16 %v5842_v36, %v5842_v36  ;;  %v6008_v17 = vrot.slane %v5959_v9, %v19971_v26  ;;  %v7159_v41 = vunpack.c.h.b16 %v17026_v7  ;;  %v6909_v9 = vunpack.c.l.b16 %v16889_v59  ;;  %v19999_v36 = vld [vmem:[#allocation216_spill] sm:$0xff] }
 0xb94   : > { %6922 = vperm.xlu1 %11196, %v6905_v50   ;;  %10903 = vmatmul.mubr.bf16.vlgmr.msra.gmra.mrb[4].mxu0 %v5843_v24  ;;  %v17030_v0 = vpop.permute.xlu0 %6232  ;;  %v6013_v11 = vsel %vm3081_vm1, %v6012_v10, %v6008_v17  ;;  %v6022_v24 = vrot.slane %v16891_v18, %v19972_v34  ;;  %v11547_v17 = vld [vmem:[#allocation4 + $0x50] sm:$0xff]   ;;  %v20000_v18 = vld [vmem:[#allocation50_spill] sm:$0xff] }
 0xb95   : > { %7190 = vperm.xlu0 %11197, %v7155_v1   ;;  %10907 = vmatpush3.bf16.msra.mxu0 %v11544_v52  ;;  %v5965_v43 = vpop.permute.xlu1 %5964  ;;  %v17042_v52 = vpack.c.bf16 %v19999_v36, %v19958_v54  ;;  %v20001_v54 = vld [vmem:[#allocation32_spill] sm:$0xff] }
 0xb96   : > { %10922 = vmatprep.mubr.msk.bf16.mxu0 %vm19998_vm8, %v19963_v19  ;;  %v6017_v1 = vrot.slane %v5965_v43, %v19970_v31  ;;  %10908 = vmatprep.subr.bf16.mxu0 %v19963_v19  ;;  %v17056_v63 = vpack.c.bf16 %v20001_v54, %v20000_v18  ;;  %v20002_v18 = vld [vmem:[#allocation80_spill] sm:$0xff] }
 0xb98   : > { %6928 = vperm.xlu1 %11196, %v6907_v21   ;;  %v6018_v50 = vsel %vm3088_vm2, %v6017_v1, %v6013_v11  ;;  %v17046_v43 = vpop.permute.xlu0 %6238  ;;  %v7161_v1 = vunpack.c.h.b16 %v17042_v52  ;;  %v6911_v11 = vunpack.c.l.b16 %v16899_v23 }
 0xb99   : > { %7196 = vperm.xlu0 %11197, %v7157_v51   ;;  %10909 = vmatpush3.bf16.msra.mxu0 %v11545_v2  ;;  %v5971_v51 = vpop.permute.xlu1 %5970  ;;  %v6023_v10 = vsel %vm3095_vm3, %v6022_v24, %v6018_v50  ;;  %v11582_v2 = vld [vmem:[#allocation11 + $0x30] sm:$0xff]  }
 0xb9a   : > { %v6027_v21 = vrot.slane %v5971_v51, %v19973_v15  ;;  %10910 = vmatprep.subr.bf16.mxu0 %v19963_v19  ;;  %v6032_v51 = vrot.slane %v16901_v61, %v19974_v45  ;;  %11059 = vmatpush3.bf16.msra.mxu1 %v11582_v2  ;;  %v6913_v61 = vunpack.c.l.b16 %v16907_v42  ;;  %v11549_v2 = vld [vmem:[#allocation4 + $0x60] sm:$0xff]  }
 0xb9b   : > { %11060 = vmatprep.subr.bf16.mxu1 %v19963_v19 }
 0xb9c   : > { %6934 = vperm.xlu1 %11196, %v6909_v9   ;;  %v6028_v59 = vsel %vm3102_vm4, %v6027_v21, %v6023_v10  ;;  %v11548_v9 = vld [vmem:[#allocation4 + $0x58] sm:$0xff]   ;;  %v7388_v10 = vunpack.c.h.b16 %v17056_v63 }
 0xb9d   : > { %7202 = vperm.xlu0 %11197, %v7159_v41   ;;  %v17060_v41 = vpop.permute.xlu0 %6244  ;;  %10911 = vmatpush3.bf16.msra.mxu0 %v11547_v17  ;;  %v5977_v50 = vpop.permute.xlu1 %5976  ;;  %v6033_v21 = vsel %vm3109_vm5, %v6032_v51, %v6028_v59  ;;  %v17070_v17 = vpack.c.bf16 %v16650_v3, %v20002_v18 }
 0xb9e   : > { %v6037_v24 = vrot.slane %v5977_v50, %v19975_v20  ;;  %10912 = vmatprep.subr.bf16.mxu0 %v19963_v19 }
 0xba0   : > { %6940 = vperm.xlu1 %11196, %v6911_v11   ;;  %v6038_v23 = vsel %vm3116_vm6, %v6037_v24, %v6033_v21  ;;  %v7390_v24 = vunpack.c.h.b16 %v17070_v17  ;;  %v6915_v21 = vunpack.c.l.b16 %v16915_v38 }
 0xba1   : > { %7208 = vperm.xlu0 %11197, %v7161_v1   ;;  %v6042_v1 = vrot.slane %v16909_v12, %v19976_v40  ;;  %v17075_v11 = vpop.permute.xlu0 %6443  ;;  %10913 = vmatpush3.bf16.msra.mxu0 %v11548_v9  ;;  %v5983_v59 = vpop.permute.xlu1 %5982  ;;  %v20005_v12 = vld [vmem:[#allocation31_spill] sm:$0xff]  ;;  %v6052_v9 = vrot.slane %v16917_v47, %v19981_v46  ;;  %v20008_v47 = vld [vmem:[#allocation58_spill] sm:$0xff] }
 0xba2   : > { %v6047_v51 = vrot.slane %v5983_v59, %v19982_v48  ;;  %10914 = vmatprep.subr.bf16.mxu0 %v19963_v19  ;;  %v17085_v3 = vpack.c.bf16 %v20005_v12, %v19955_v60  ;;  %v17099_v60 = vpack.c.bf16 %v16683_v29, %v20008_v47  ;;  %v20010_v29 = vld [vmem:[#allocation36_spill] sm:$0xff] }
 0xba3   : > { %v6043_v42 = vsel %vm20003_vm10, %v6042_v1, %v6038_v23  ;;  %v11550_v23 = vld [vmem:[#allocation4 + $0x68] sm:$0xff]   ;;  %vm20007_vm10 = vcmask 720512  }
 0xba4   : > { %6946 = vperm.xlu1 %11196, %v6913_v61   ;;  %v6048_v50 = vsel %vm20004_vm0, %v6047_v51, %v6043_v42  ;;  %v7392_v51 = vunpack.c.h.b16 %v17085_v3  ;;  %v6917_v42 = vunpack.c.l.b16 %v16923_v49  ;;  %vm20019_vm0 = vcmask 523712  }
 0xba5   : > { %7407 = vperm.xlu0 %11197, %v7388_v10   ;;  %v17089_v59 = vpop.permute.xlu0 %6449  ;;  %10915 = vmatpush3.bf16.msra.mxu0 %v11549_v2  ;;  %v5989_v10 = vpop.permute.xlu1 %5988  ;;  %v6053_v1 = vsel %vm20006_vm7, %v6052_v9, %v6048_v50  ;;  %v6062_v2 = vrot.slane %v16925_v62, %v19984_v57  ;;  %v11551_v50 = vld [vmem:[#allocation4 + $0x70] sm:$0xff]   ;;  %vm20021_vm7 = vcmask 589312  }
 0xba6   : > { %v6057_v61 = vrot.slane %v5989_v10, %v19983_v32  ;;  %10916 = vmatprep.subr.bf16.mxu0 %v19963_v19  ;;  %v20009_v62 = vld [vmem:[#allocation63_spill] sm:$0xff] }
 0xba7   : > { %v17113_v36 = vpack.c.bf16 %v20010_v29, %v20009_v62  ;;  %v20012_v62 = vld [vmem:[#allocation41_spill] sm:$0xff] }
 0xba8   : > { %6952 = vperm.xlu1 %11196, %v6915_v21   ;;  %v6058_v38 = vsel %vm20007_vm10, %v6057_v61, %v6053_v1  ;;  %v7394_v61 = vunpack.c.h.b16 %v17099_v60  ;;  %v6919_v1 = vunpack.c.l.b16 %v16931_v39  ;;  %vm20025_vm10 = vcmask 654912  }
 0xba9   : > { %7413 = vperm.xlu0 %11197, %v7390_v24   ;;  %v17103_v10 = vpop.permute.xlu0 %6455  ;;  %10917 = vmatpush3.bf16.msra.mxu0 %v11550_v23  ;;  %v5995_v24 = vpop.permute.xlu1 %5994  ;;  %v6063_v9 = vsel %vm3151_vm11, %v6062_v2, %v6058_v38  ;;  %v6072_v23 = vrot.slane %v16933_v28, %v19989_v27  ;;  %v11552_v38 = vld [vmem:[#allocation4 + $0x78] sm:$0xff]   ;;  %v6082_v2 = vrot.slane %v16943_v55, %v19994_v14  ;;  %v7396_v28 = vunpack.c.h.b16 %v17113_v36 }
 0xbaa   : > { %v6067_v21 = vrot.slane %v5995_v24, %v19987_v37  ;;  %10918 = vmatprep.subr.bf16.mxu0 %v19963_v19 }
 0xbac   : > { %6958 = vperm.xlu1 %11196, %v6917_v42   ;;  %v6068_v49 = vsel %vm3158_vm12, %v6067_v21, %v6063_v9  ;;  %v7146_v9 = vunpack.c.l.b16 %v16939_v6 }
 0xbad   : > { %7419 = vperm.xlu0 %11197, %v7392_v51   ;;  %v17117_v24 = vpop.permute.xlu0 %6461  ;;  %10919 = vmatpush3.bf16.msra.mxu0 %v11551_v50  ;;  %v6073_v39 = vsel %vm3165_vm13, %v6072_v23, %v6068_v49  ;;  %v20011_v50 = vld [vmem:[#allocation62_spill] sm:$0xff] }
 0xbae   : > { %10920 = vmatprep.subr.bf16.mxu0 %v19963_v19  ;;  %v17129_v53 = vpack.c.bf16 %v20012_v62, %v20011_v50 }
 0xbaf   : > { %v6001_v51 = vpop.permute.xlu1 %6000 }
 0xbb0   : > { %v6077_v42 = vrot.slane %v6001_v51, %v19993_v8  ;;  %6964 = vperm.xlu1 %11196, %v6919_v1   ;;  %v11553_v1 = vld [vmem:[#allocation4 + $0x80] sm:$0xff]   ;;  %v7398_v6 = vunpack.c.h.b16 %v17129_v53 }
 0xbb1   : > { %7425 = vperm.xlu0 %11197, %v7394_v61   ;;  %v17131_v51 = vpop.permute.xlu0 %6467  ;;  %10921 = vmatpush3.bf16.msra.mxu0 %v11552_v38  ;;  %v6253_v38 = vrot.slane %v16961_v16, %v19969_v5 }
 0xbb2   : > { %v6078_v21 = vsel %vm3172_vm14, %v6077_v42, %v6073_v39  ;;  %10926 = vmatprep.subr.bf16.mxu0 %v19963_v19  ;;  %v7148_v42 = vunpack.c.l.b16 %v16956_v33  ;;  %v20013_v39 = vld [vmem:[#allocation35_spill] sm:$0xff] }
 0xbb3   : > { %v6200_v61 = vpop.permute.xlu1 %6199  ;;  %v6083_v55 = vsel %vm3179_vm15, %v6082_v2, %v6078_v21  ;;  %v17140_v50 = vpack.c.bf16 %v20013_v39, %v16714_v44  ;;  %v20015_v44 = vld [vmem:[#allocation128_spill] sm:$0xff] }
 0xbb4   : > { %7163 = vperm.xlu1 %11196, %v7146_v9   ;;  %v6084_v49 = vpack.c.b16 %v6083_v55, %v6083_v55  ;;  %v6249_v23 = vrot.slane %v6200_v61, %v19971_v26  ;;  %v7150_v55 = vunpack.c.l.b16 %v16972_v58  ;;  %v6263_v39 = vrot.slane %v20015_v44, %v19972_v34  ;;  %v11591_v44 = vld [vmem:[#allocation11 + $0x38] sm:$0xff]  }
 0xbb5   : > { %7431 = vperm.xlu0 %11197, %v7396_v28   ;;  %v11554_v28 = vld [vmem:[#allocation4 + $0x88] sm:$0xff]   ;;  %v7400_v16 = vunpack.c.h.b16 %v17140_v50  ;;  %11061 = vmatpush3.bf16.msra.mxu1 %v11591_v44 }
 0xbb6   : > { %10923 = vmatmul.mubr.bf16.vlgmr.msra.gmra.mrb[8].mxu0 %v6084_v49  ;;  %v6254_v33 = vsel %vm3081_vm1, %v6253_v38, %v6249_v23  ;;  %v11556_v23 = vld [vmem:[#allocation4 + $0x90] sm:$0xff]  }
 0xbb7   : > { %10927 = vmatpush3.bf16.msra.mxu0 %v11553_v1  ;;  %v6206_v21 = vpop.permute.xlu1 %6205  ;;  %10942 = vmatprep.mubr.msk.bf16.mxu0 %vm19998_vm8, %v19963_v19  ;;  %v20014_v1 = vld [vmem:[#allocation69_spill] sm:$0xff] }
 0xbb8   : > { %v17144_v2 = vpop.permute.xlu0 %6473  ;;  %v6258_v9 = vrot.slane %v6206_v21, %v19970_v31  ;;  %7169 = vperm.xlu1 %11196, %v7148_v42   ;;  %10928 = vmatprep.subr.bf16.mxu0 %v19963_v19  ;;  %v17156_v49 = vpack.c.bf16 %v20014_v1, %v16724_v22  ;;  %v20016_v22 = vld [vmem:[#allocation68_spill] sm:$0xff] }
 0xbb9   : > { %7437 = vperm.xlu0 %11197, %v7398_v6  }
 0xbba   : > { %v6259_v61 = vsel %vm3088_vm2, %v6258_v9, %v6254_v33  ;;  %v7402_v9 = vunpack.c.h.b16 %v17156_v49  ;;  %v7152_v33 = vunpack.c.l.b16 %v16987_v13 }
 0xbbb   : > { %10929 = vmatpush3.bf16.msra.mxu0 %v11554_v28  ;;  %v6212_v6 = vpop.permute.xlu1 %6211  ;;  %v6264_v38 = vsel %vm3095_vm3, %v6263_v39, %v6259_v61  ;;  %v6273_v28 = vrot.slane %v20016_v22, %v19974_v45  ;;  %v20017_v61 = vld [vmem:[#allocation44_spill] sm:$0xff]  ;;  %v7154_v22 = vunpack.c.l.b16 %v17001_v30 }
 0xbbc   : > { %v17160_v21 = vpop.permute.xlu0 %6479  ;;  %v6268_v42 = vrot.slane %v6212_v6, %v19973_v15  ;;  %7175 = vperm.xlu1 %11196, %v7150_v55   ;;  %10930 = vmatprep.subr.bf16.mxu0 %v19963_v19 }
 0xbbd   : > { %7443 = vperm.xlu0 %11197, %v7400_v16   ;;  %v11557_v16 = vld [vmem:[#allocation4 + $0x98] sm:$0xff]  }
 0xbbe   : > { %v6269_v58 = vsel %vm3102_vm4, %v6268_v42, %v6264_v38  ;;  %v20018_v42 = vld [vmem:[#allocation157_spill] sm:$0xff] }
 0xbbf   : > { %10931 = vmatpush3.bf16.msra.mxu0 %v11556_v23  ;;  %v6218_v6 = vpop.permute.xlu1 %6217  ;;  %v6274_v39 = vsel %vm3109_vm5, %v6273_v28, %v6269_v58  ;;  %v11198_v38 = vpack.i.bf16 %v20018_v42, %v20017_v61  ;;  %v6283_v23 = vrot.slane %v17004_v25, %v19976_v40  ;;  %v20020_v28 = vld [vmem:[#allocation28_spill] sm:$0xff]  ;;  %v6293_v61 = vrot.slane %v17018_v56, %v19981_v46 }
 0xbc0   : > { %v17170_v1 = vpop.permute.xlu0 %6485  ;;  %v6278_v55 = vrot.slane %v6218_v6, %v19975_v20  ;;  %7181 = vperm.xlu1 %11196, %v7152_v33   ;;  %10932 = vmatprep.subr.bf16.mxu0 %v19963_v19  ;;  %v11558_v33 = vld [vmem:[#allocation4 + $0xa0] sm:$0xff]   ;;  %v7158_v56 = vunpack.c.l.b16 %v17026_v7  ;;  %v7160_v7 = vunpack.c.l.b16 %v17042_v52 }
 0xbc1   : > { %7449 = vperm.xlu0 %11197, %v7402_v9   ;;  %11063 = vmatmul.mubr.bf16.vlgmr.msra.gmra.mrb[128].mxu1 %v20020_v28  ;;  %v20022_v6 = vld [vmem:[#allocation117_spill] sm:$0xff] }
 0xbc2   : > { %v6279_v13 = vsel %vm3116_vm6, %v6278_v55, %v6274_v39  ;;  %v20023_v55 = vld [vmem:[#allocation137_spill] sm:$0xff]  ;;  %v7156_v39 = vunpack.c.l.b16 %v17016_v35 }
 0xbc3   : > { %10933 = vmatpush3.bf16.msra.mxu0 %v11557_v16  ;;  %v6224_v9 = vpop.permute.xlu1 %6223  ;;  %v6284_v44 = vsel %vm20019_vm0, %v6283_v23, %v6279_v13  ;;  %v11208_v25 = vpack.i.bf16 %v20023_v55, %v20022_v6  ;;  %v20024_v16 = vmov 0   ;;  %vm20026_vm0 = vcmask 720512  }
 0xbc4   : > { %v17181_v62 = vpop.permute.xlu0 %6684  ;;  %v6288_v58 = vrot.slane %v6224_v9, %v19982_v48  ;;  %7187 = vperm.xlu1 %11196, %v7154_v22   ;;  %10934 = vmatprep.subr.bf16.mxu0 %v19963_v19  ;;  %v20027_v9 = vld [vmem:[#allocation166_spill] sm:$0xff] }
 0xbc5   : > { %11199 = vperm.xlu0 %11197, %v11198_v38   ;;  %8060 = vmatprep.mubr.bf16.mxu1 %v20024_v16  ;;  %v11559_v38 = vld [vmem:[#allocation4 + $0xa8] sm:$0xff]  }
 0xbc6   : > { %v6289_v30 = vsel %vm20021_vm7, %v6288_v58, %v6284_v44  ;;  %v20028_v58 = vld [vmem:[#allocation45_spill] sm:$0xff]  ;;  %vm20043_vm7 = vcmask 523712  }
 0xbc7   : > { %10935 = vmatpush3.bf16.msra.mxu0 %v11558_v33  ;;  %v6230_v13 = vpop.permute.xlu1 %6229  ;;  %v6294_v23 = vsel %vm20025_vm10, %v6293_v61, %v6289_v30  ;;  %v11218_v44 = vpack.i.bf16 %v20028_v58, %v20027_v9  ;;  %v6303_v33 = vrot.slane %v17030_v0, %v19984_v57  ;;  %v6313_v0 = vrot.slane %v17046_v43, %v19989_v27  ;;  %v20029_v9 = vld [vmem:[#allocation182_spill] sm:$0xff] }
 0xbc8   : > { %v17194_v42 = vpop.permute.xlu0 %6690  ;;  %v6298_v22 = vrot.slane %v6230_v13, %v19983_v32  ;;  %7193 = vperm.xlu1 %11196, %v7156_v39   ;;  %10936 = vmatprep.subr.bf16.mxu0 %v19963_v19  ;;  %v20030_v58 = vld [vmem:[#allocation174_spill] sm:$0xff]  ;;  %vm20044_vm10 = vcmask 589312  }
 0xbc9   : > { %11209 = vperm.xlu0 %11197, %v11208_v25   ;;  %v11560_v25 = vld [vmem:[#allocation4 + $0xb0] sm:$0xff]  }
 0xbca   : > { %v6299_v35 = vsel %vm20026_vm0, %v6298_v22, %v6294_v23  ;;  %v11561_v22 = vld [vmem:[#allocation4 + $0xb8] sm:$0xff]   ;;  %vm20048_vm0 = vcmask 654912  }
 0xbcb   : > { %10937 = vmatpush3.bf16.msra.mxu0 %v11559_v38  ;;  %v6236_v55 = vpop.permute.xlu1 %6235  ;;  %v6304_v30 = vsel %vm3151_vm11, %v6303_v33, %v6299_v35  ;;  %v6323_v35 = vrot.slane %v17060_v41, %v19994_v14  ;;  %v20033_v33 = vld [vmem:[#allocation39_spill] sm:$0xff] }
 0xbcc   : > { %v17205_v6 = vpop.permute.xlu0 %6696  ;;  %v6308_v39 = vrot.slane %v6236_v55, %v19987_v37  ;;  %7199 = vperm.xlu1 %11196, %v7158_v56   ;;  %10938 = vmatprep.subr.bf16.mxu0 %v19963_v19  ;;  %v20032_v56 = vld [vmem:[#allocation64_spill] sm:$0xff] }
 0xbcd   : > { %11219 = vperm.xlu0 %11197, %v11218_v44   ;;  %v20031_v44 = vpack.i.bf16 %v20029_v9, %v20030_v58  ;;  %v11238_v55 = vpack.i.bf16 %v20033_v33, %v20032_v56  ;;  %v20036_v56 = vld [vmem:[#allocation159_spill] sm:$0xff] }
 0xbce   : > { %v6309_v61 = vsel %vm3158_vm12, %v6308_v39, %v6304_v30 }
 0xbcf   : > { %10939 = vmatpush3.bf16.msra.mxu0 %v11560_v25  ;;  %v6242_v38 = vpop.permute.xlu1 %6241  ;;  %v6314_v52 = vsel %vm3165_vm13, %v6313_v0, %v6309_v61  ;;  %v7387_v25 = vunpack.c.l.b16 %v17056_v63  ;;  %v20034_v0 = vld [vmem:[#allocation79_spill] sm:$0xff]  ;;  %v7389_v63 = vunpack.c.l.b16 %v17070_v17 }
 0xbd0   : > { %v17214_v13 = vpop.permute.xlu0 %6702  ;;  %v6318_v23 = vrot.slane %v6242_v38, %v19993_v8  ;;  %7205 = vperm.xlu1 %11196, %v7160_v7   ;;  %10940 = vmatprep.subr.bf16.mxu0 %v19963_v19  ;;  %v11562_v38 = vld [vmem:[#allocation4 + $0xc0] sm:$0xff]  }
 0xbd1   : > { %11229 = vperm.xlu0 %11197, %v20031_v44  }
 0xbd2   : > { %v6319_v43 = vsel %vm3172_vm14, %v6318_v23, %v6314_v52  ;;  %v20035_v23 = vld [vmem:[#allocation132_spill] sm:$0xff] }
 0xbd3   : > { %10941 = vmatpush3.bf16.msra.mxu0 %v11561_v22  ;;  %v6441_v30 = vpop.permute.xlu1 %6440  ;;  %v6324_v7 = vsel %vm3179_vm15, %v6323_v35, %v6319_v43  ;;  %v11248_v9 = vpack.i.bf16 %v20035_v23, %v20034_v0  ;;  %v6494_v22 = vrot.slane %v17075_v11, %v19969_v5  ;;  %v11563_v35 = vld [vmem:[#allocation4 + $0xc8] sm:$0xff]   ;;  %v20038_v23 = vld [vmem:[#allocation161_spill] sm:$0xff] }
 0xbd4   : > { %v17228_v39 = vpop.permute.xlu0 %6708  ;;  %7404 = vperm.xlu1 %11196, %v7387_v25   ;;  %v6325_v41 = vpack.c.b16 %v6324_v7, %v6324_v7  ;;  %v6490_v61 = vrot.slane %v6441_v30, %v19971_v26  ;;  %10946 = vmatprep.subr.bf16.mxu0 %v19963_v19  ;;  %v20037_v11 = vld [vmem:[#allocation146_spill] sm:$0xff]  ;;  %v6504_v25 = vrot.slane %v17089_v59, %v19972_v34  ;;  %v7393_v59 = vunpack.c.l.b16 %v17099_v60 }
 0xbd5   : > { %11239 = vperm.xlu0 %11197, %v11238_v55   ;;  %v11258_v33 = vpack.i.bf16 %v20037_v11, %v20036_v56  ;;  %v7391_v55 = vunpack.c.l.b16 %v17085_v3  ;;  %v20039_v3 = vld [vmem:[#allocation178_spill] sm:$0xff]  ;;  %v7395_v60 = vunpack.c.l.b16 %v17113_v36 }
 0xbd6   : > { %10943 = vmatmul.mubr.bf16.vlgmr.msra.gmra.mrb[12].mxu0 %v6325_v41  ;;  %v6495_v43 = vsel %vm3081_vm1, %v6494_v22, %v6490_v61 }
 0xbd7   : > { %10947 = vmatpush3.bf16.msra.mxu0 %v11562_v38  ;;  %v6447_v44 = vpop.permute.xlu1 %6446  ;;  %10962 = vmatprep.mubr.msk.bf16.mxu0 %vm19998_vm8, %v19963_v19  ;;  %v11565_v38 = vld [vmem:[#allocation4 + $0xd0] sm:$0xff]  }
 0xbd8   : > { %v17238_v58 = vpop.permute.xlu0 %6714  ;;  %v6499_v52 = vrot.slane %v6447_v44, %v19970_v31  ;;  %7410 = vperm.xlu1 %11196, %v7389_v63   ;;  %10948 = vmatprep.subr.bf16.mxu0 %v19963_v19  ;;  %v6514_v63 = vrot.slane %v17103_v10, %v19974_v45  ;;  %v6524_v10 = vrot.slane %v17117_v24, %v19976_v40  ;;  %v7397_v24 = vunpack.c.l.b16 %v17129_v53 }
 0xbd9   : > { %11249 = vperm.xlu0 %11197, %v11248_v9   ;;  %v11268_v9 = vpack.i.bf16 %v20039_v3, %v20038_v23  ;;  %v11568_v3 = vld [vmem:[#allocation4 + $0xe8] sm:$0xff]  }
 0xbda   : > { %v6500_v17 = vsel %vm3088_vm2, %v6499_v52, %v6495_v43 }
 0xbdb   : > { %10949 = vmatpush3.bf16.msra.mxu0 %v11563_v35  ;;  %v6453_v7 = vpop.permute.xlu1 %6452  ;;  %v6505_v61 = vsel %vm3095_vm3, %v6504_v25, %v6500_v17  ;;  %v11566_v35 = vld [vmem:[#allocation4 + $0xd8] sm:$0xff]   ;;  %v20040_v25 = vld [vmem:[#allocation97_spill] sm:$0xff] }
 0xbdc   : > { %v17251_v30 = vpop.permute.xlu0 %6720  ;;  %v6509_v41 = vrot.slane %v6453_v7, %v19973_v15  ;;  %7416 = vperm.xlu1 %11196, %v7391_v55   ;;  %10950 = vmatprep.subr.bf16.mxu0 %v19963_v19  ;;  %v20041_v7 = vld [vmem:[#allocation201_spill] sm:$0xff] }
 0xbdd   : > { %11259 = vperm.xlu0 %11197, %v11258_v33   ;;  %v11567_v33 = vld [vmem:[#allocation4 + $0xe0] sm:$0xff]  }
 0xbde   : > { %v6510_v0 = vsel %vm3102_vm4, %v6509_v41, %v6505_v61  ;;  %v6534_v61 = vrot.slane %v17131_v51, %v19981_v46  ;;  %v7399_v51 = vunpack.c.l.b16 %v17140_v50 }
 0xbdf   : > { %10951 = vmatpush3.bf16.msra.mxu0 %v11565_v38  ;;  %v6459_v44 = vpop.permute.xlu1 %6458  ;;  %v6515_v43 = vsel %vm3109_vm5, %v6514_v63, %v6510_v0  ;;  %v20042_v38 = vpack.i.bf16 %v20040_v25, %v20041_v7  ;;  %v20046_v63 = vld [vmem:[#allocation204_spill] sm:$0xff] }
 0xbe0   : > { %v17262_v22 = vpop.permute.xlu0 %6726  ;;  %v6519_v52 = vrot.slane %v6459_v44, %v19975_v20  ;;  %7422 = vperm.xlu1 %11196, %v7393_v59   ;;  %10952 = vmatprep.subr.bf16.mxu0 %v19963_v19  ;;  %v20045_v59 = vld [vmem:[#allocation231_spill] sm:$0xff] }
 0xbe1   : > { %11269 = vperm.xlu0 %11197, %v11268_v9   ;;  %v20047_v44 = vpack.i.bf16 %v20045_v59, %v20046_v63  ;;  %v6564_v59 = vrot.slane %v17170_v1, %v19994_v14 }
 0xbe2   : > { %v6520_v17 = vsel %vm3116_vm6, %v6519_v52, %v6515_v43  ;;  %v6544_v52 = vrot.slane %v17144_v2, %v19984_v57  ;;  %v7401_v2 = vunpack.c.l.b16 %v17156_v49 }
 0xbe3   : > { %10953 = vmatpush3.bf16.msra.mxu0 %v11566_v35  ;;  %v6465_v11 = vpop.permute.xlu1 %6464  ;;  %v6525_v41 = vsel %vm20043_vm7, %v6524_v10, %v6520_v17  ;;  %vm20049_vm7 = vcmask 720512   ;;  %v8639_v10 = vld [vmem:[%s12805_s21] sm:$0xff]  ;;  %s12255_s21 = scalar_lea.vmem %s9840_s1, 64 }
 0xbe4   : > { %v17271_v56 = vpop.permute.xlu0 %6925  ;;  %v6529_v55 = vrot.slane %v6465_v11, %v19982_v48  ;;  %7428 = vperm.xlu1 %11196, %v7395_v60   ;;  %10954 = vmatprep.subr.bf16.mxu0 %v19963_v19  ;;  %v11569_v60 = vld [vmem:[#allocation4 + $0xf0] sm:$0xff]   ;;  %p12256_p2 = scmp.ne.s32.totalorder %s9840_s1, %s12255_s21 }
 0xbe5   : > { %11279 = vperm.xlu0 %11197, %v20042_v38   ;;  %v6554_v38 = vrot.slane %v17160_v21, %v19989_v27 }
 0xbe6   : > { %v6530_v36 = vsel %vm20044_vm10, %v6529_v55, %v6525_v41  ;;  %v20051_v55 = vld [vmem:[#allocation233_spill] sm:$0xff]  ;;  %vm8640_vm10 = vcmp.gt.f32.partialorder %v8639_v10, 0.5  ;;  %p12257_p8 = pnand %p12256_p2, %p20259_p4 }
 0xbe7   : > { %10955 = vmatpush3.bf16.msra.mxu0 %v11567_v33  ;;  %v6471_v23 = vpop.permute.xlu1 %6470  ;;  %v6535_v35 = vsel %vm20048_vm0, %v6534_v61, %v6530_v36  ;;  %v20050_v33 = vld [vmem:[#allocation184_spill] sm:$0xff]  ;;  %v8641_v21 = vsel %vm8640_vm10, 1, %v20024_v16  ;;  %vm20079_vm0 = vcmask 523712   ;;  %vm20086_vm10 = vcmask 654912  }
 0xbe8   : > { %v17283_v0 = vpop.permute.xlu0 %6931  ;;  %v6539_v9 = vrot.slane %v6471_v23, %v19983_v32  ;;  %7434 = vperm.xlu1 %11196, %v7397_v24   ;;  %10956 = vmatprep.subr.bf16.mxu0 %v19963_v19  ;;  %v20052_v25 = vpack.i.bf16 %v20050_v33, %v20051_v55  ;;  %v11570_v24 = vld [vmem:[#allocation4 + $0xf8] sm:$0xff]   ;;  %v20053_v23 = vld [vmem:[#allocation173_spill] sm:$0xff]  ;;  %v20060_v33 = vld [vmem:[#allocation151_spill] sm:$0xff]  ;;  %p12258_p5 = pneg %p12257_p8 }
 0xbe9   : > { %11289 = vperm.xlu0 %11197, %v20047_v44  }
 0xbea   : > { %v6540_v53 = vsel %vm20049_vm7, %v6539_v9, %v6535_v35  ;;  %vm20080_vm7 = vcmask 589312  }
 0xbeb   : > { %10957 = vmatpush3.bf16.msra.mxu0 %v11568_v3  ;;  %v6477_v17 = vpop.permute.xlu1 %6476  ;;  %v6545_v7 = vsel %vm3151_vm11, %v6544_v52, %v6540_v53  ;;  %v20054_v3 = vld [vmem:[#allocation180_spill] sm:$0xff]  ;;  %v20056_v52 = vld [vmem:[#allocation195_spill] sm:$0xff] }
 0xbec   : > { %v17295_v43 = vpop.permute.xlu0 %6937  ;;  %v6549_v11 = vrot.slane %v6477_v17, %v19987_v37  ;;  %7440 = vperm.xlu1 %11196, %v7399_v51   ;;  %10958 = vmatprep.subr.bf16.mxu0 %v19963_v19  ;;  %v20055_v9 = vpack.i.bf16 %v20053_v23, %v20054_v3  ;;  %v11571_v51 = vld [vmem:[#allocation4 + $0x100] sm:$0xff]   ;;  %v20057_v17 = vld [vmem:[#allocation95_spill] sm:$0xff]  ;;  %v20064_v3 = vld [vmem:[#allocation152_spill] sm:$0xff] }
 0xbed   : > { %11299 = vperm.xlu0 %11197, %v20052_v25   ;;  %v6735_v25 = vrot.slane %v17181_v62, %v19969_v5 }
 0xbee   : > { %v6550_v50 = vsel %vm3158_vm12, %v6549_v11, %v6545_v7  ;;  %v20059_v11 = vld [vmem:[#allocation88_spill] sm:$0xff] }
 0xbef   : > { %10959 = vmatpush3.bf16.msra.mxu0 %v11569_v60  ;;  %v6483_v36 = vpop.permute.xlu1 %6482  ;;  %v6555_v49 = vsel %vm3165_vm13, %v6554_v38, %v6550_v50  ;;  %v20058_v60 = vpack.i.bf16 %v20056_v52, %v20057_v17  ;;  %v11203_v55 = vpack.i.bf16 %v20060_v33, %v20059_v11  ;;  %v20067_v52 = vld [vmem:[#allocation40_spill] sm:$0xff]  ;;  %v6755_v33 = vrot.slane %v17205_v6, %v19974_v45 }
 0xbf0   : > { %v17308_v41 = vpop.permute.xlu0 %6943  ;;  %v6559_v61 = vrot.slane %v6483_v36, %v19993_v8  ;;  %7446 = vperm.xlu1 %11196, %v7401_v2   ;;  %10960 = vmatprep.subr.bf16.mxu0 %v19963_v19  ;;  %v11572_v2 = vld [vmem:[#allocation4 + $0x108] sm:$0xff]   ;;  %v20061_v36 = vld [vmem:[#allocation179_spill] sm:$0xff]  ;;  %v20075_v6 = vld [vmem:[#allocation124_spill] sm:$0xff] }
 0xbf1   : > { %11309 = vperm.xlu0 %11197, %v20055_v9   ;;  %v20065_v9 = vld [vmem:[#allocation150_spill] sm:$0xff] }
 0xbf2   : > { %v6560_v63 = vsel %vm3172_vm14, %v6559_v61, %v6555_v49  ;;  %v6745_v49 = vrot.slane %v17194_v42, %v19972_v34  ;;  %v20070_v42 = vld [vmem:[#allocation167_spill] sm:$0xff] }
 0xbf3   : > { %10961 = vmatpush3.bf16.msra.mxu0 %v11570_v24  ;;  %v6682_v35 = vpop.permute.xlu1 %6681  ;;  %v6565_v53 = vsel %vm3179_vm15, %v6564_v59, %v6560_v63  ;;  %v20062_v24 = vld [vmem:[#allocation99_spill] sm:$0xff]  ;;  %v11213_v59 = vpack.i.bf16 %v20065_v9, %v20064_v3  ;;  %v6765_v9 = vrot.slane %v17214_v13, %v19976_v40  ;;  %v20082_v13 = vld [vmem:[#allocation126_spill] sm:$0xff] }
 0xbf4   : > { %v17320_v44 = vpop.permute.xlu0 %6949  ;;  %8643 = vperm.xlu1 %11196, %v8641_v21   ;;  %v6566_v1 = vpack.c.b16 %v6565_v53, %v6565_v53  ;;  %v6731_v10 = vrot.slane %v6682_v35, %v19971_v26  ;;  %10966 = vmatprep.subr.bf16.mxu0 %v19963_v19  ;;  %v20063_v61 = vpack.i.bf16 %v20061_v36, %v20062_v24  ;;  %v11574_v35 = vld [vmem:[#allocation4 + $0x110] sm:$0xff]  }
 0xbf5   : > { %11319 = vperm.xlu0 %11197, %v20058_v60   ;;  %v20072_v36 = vld [vmem:[#allocation115_spill] sm:$0xff] }
 0xbf6   : > { %10963 = vmatmul.mubr.bf16.vlgmr.msra.gmra.mrb[16].mxu0 %v6566_v1  ;;  %v6736_v23 = vsel %vm3081_vm1, %v6735_v25, %v6731_v10  ;;  %v20069_v10 = vld [vmem:[#allocation163_spill] sm:$0xff] }
 0xbf7   : > { %10967 = vmatpush3.bf16.msra.mxu0 %v11571_v51  ;;  %v6688_v50 = vpop.permute.xlu1 %6687  ;;  %10982 = vmatprep.mubr.msk.bf16.mxu0 %vm19998_vm8, %v19963_v19  ;;  %v20066_v51 = vld [vmem:[#allocation102_spill] sm:$0xff]  ;;  %v11223_v11 = vpack.i.bf16 %v20070_v42, %v20069_v10  ;;  %v6775_v42 = vrot.slane %v17228_v39, %v19981_v46  ;;  %v20089_v39 = vld [vmem:[#allocation139_spill] sm:$0xff] }
 0xbf8   : > { %v17332_v7 = vpop.permute.xlu0 %6955  ;;  %v6740_v38 = vrot.slane %v6688_v50, %v19970_v31  ;;  %11204 = vperm.xlu1 %11196, %v11203_v55   ;;  %10968 = vmatprep.subr.bf16.mxu0 %v19963_v19  ;;  %v20068_v17 = vpack.i.bf16 %v20066_v51, %v20067_v52  ;;  %v11575_v50 = vld [vmem:[#allocation4 + $0x118] sm:$0xff]   ;;  %v20077_v51 = vld [vmem:[#allocation122_spill] sm:$0xff] }
 0xbf9   : > { %11329 = vperm.xlu0 %11197, %v20063_v61  }
 0xbfa   : > { %v6741_v62 = vsel %vm3088_vm2, %v6740_v38, %v6736_v23  ;;  %v20071_v38 = vld [vmem:[#allocation200_spill] sm:$0xff] }
 0xbfb   : > { %10969 = vmatpush3.bf16.msra.mxu0 %v11572_v2  ;;  %v6694_v63 = vpop.permute.xlu1 %6693  ;;  %v6746_v60 = vsel %vm3095_vm3, %v6745_v49, %v6741_v62  ;;  %v20073_v24 = vpack.i.bf16 %v20071_v38, %v20072_v36  ;;  %v20074_v62 = vld [vmem:[#allocation55_spill] sm:$0xff]  ;;  %v20084_v38 = vld [vmem:[#allocation185_spill] sm:$0xff] }
 0xbfc   : > { %v17347_v21 = vpop.permute.xlu0 %6961  ;;  %v6750_v53 = vrot.slane %v6694_v63, %v19973_v15  ;;  %11214 = vperm.xlu1 %11196, %v11213_v59   ;;  %10970 = vmatprep.subr.bf16.mxu0 %v19963_v19  ;;  %v11233_v3 = vpack.i.bf16 %v20075_v6, %v20074_v62  ;;  %v11576_v63 = vld [vmem:[#allocation4 + $0x120] sm:$0xff]   ;;  %v6785_v6 = vrot.slane %v17238_v58, %v19984_v57  ;;  %v20094_v58 = vld [vmem:[#allocation170_spill] sm:$0xff] }
 0xbfd   : > { %11339 = vperm.xlu0 %11197, %v20068_v17  }
 0xbfe   : > { %v6751_v1 = vsel %vm3102_vm4, %v6750_v53, %v6746_v60  ;;  %v20076_v53 = vld [vmem:[#allocation42_spill] sm:$0xff] }
 0xbff   : > { %10971 = vmatpush3.bf16.msra.mxu0 %v11574_v35  ;;  %v6700_v25 = vpop.permute.xlu1 %6699  ;;  %v6756_v61 = vsel %vm3109_vm5, %v6755_v33, %v6751_v1  ;;  %v20078_v52 = vpack.i.bf16 %v20076_v53, %v20077_v51  ;;  %v20081_v1 = vld [vmem:[#allocation70_spill] sm:$0xff]  ;;  %v20091_v53 = vld [vmem:[#allocation220_spill] sm:$0xff] }
 0xc00   : > { %v17360_v55 = vpop.permute.xlu0 %6967  ;;  %v6760_v2 = vrot.slane %v6700_v25, %v19975_v20  ;;  %11224 = vperm.xlu1 %11196, %v11223_v11   ;;  %10972 = vmatprep.subr.bf16.mxu0 %v19963_v19  ;;  %v11243_v10 = vpack.i.bf16 %v20082_v13, %v20081_v1  ;;  %v11577_v25 = vld [vmem:[#allocation4 + $0x128] sm:$0xff]   ;;  %v6795_v13 = vrot.slane %v17251_v30, %v19989_v27 }
 0xc01   : > { %11349 = vperm.xlu0 %11197, %v20073_v24  }
 0xc02   : > { %v6761_v23 = vsel %vm3116_vm6, %v6760_v2, %v6756_v61  ;;  %v20083_v2 = vld [vmem:[#allocation109_spill] sm:$0xff] }
 0xc03   : > { %10973 = vmatpush3.bf16.msra.mxu0 %v11575_v50  ;;  %v6706_v49 = vpop.permute.xlu1 %6705  ;;  %v6766_v17 = vsel %vm20079_vm0, %v6765_v9, %v6761_v23  ;;  %v20085_v36 = vpack.i.bf16 %v20083_v2, %v20084_v38  ;;  %vm20087_vm0 = vcmask 720512   ;;  %v20088_v23 = vld [vmem:[#allocation144_spill] sm:$0xff]  ;;  %v20096_v2 = vld [vmem:[#allocation203_spill] sm:$0xff] }
 0xc04   : > { %v17373_v59 = vpop.permute.xlu0 %7166  ;;  %v6770_v35 = vrot.slane %v6706_v49, %v19982_v48  ;;  %11234 = vperm.xlu1 %11196, %v11233_v3   ;;  %10974 = vmatprep.subr.bf16.mxu0 %v19963_v19  ;;  %v11253_v62 = vpack.i.bf16 %v20089_v39, %v20088_v23  ;;  %v11578_v49 = vld [vmem:[#allocation4 + $0x130] sm:$0xff]   ;;  %v20099_v23 = vld [vmem:[#allocation198_spill] sm:$0xff] }
 0xc05   : > { %11359 = vperm.xlu0 %11197, %v20078_v52  }
 0xc06   : > { %v6771_v60 = vsel %vm20080_vm7, %v6770_v35, %v6766_v17  ;;  %v20090_v35 = vld [vmem:[#allocation191_spill] sm:$0xff]  ;;  %vm20125_vm7 = vcmask 523712  }
 0xc07   : > { %10975 = vmatpush3.bf16.msra.mxu0 %v11576_v63  ;;  %v6712_v33 = vpop.permute.xlu1 %6711  ;;  %v6776_v24 = vsel %vm20086_vm10, %v6775_v42, %v6771_v60  ;;  %v20092_v51 = vpack.i.bf16 %v20090_v35, %v20091_v53  ;;  %v20093_v60 = vld [vmem:[#allocation153_spill] sm:$0xff]  ;;  %vm20126_vm10 = vcmask 589312  }
 0xc08   : > { %v17386_v11 = vpop.permute.xlu0 %7172  ;;  %v6780_v50 = vrot.slane %v6712_v33, %v19983_v32  ;;  %11244 = vperm.xlu1 %11196, %v11243_v10   ;;  %10976 = vmatprep.subr.bf16.mxu0 %v19963_v19  ;;  %v11263_v1 = vpack.i.bf16 %v20094_v58, %v20093_v60  ;;  %v11579_v33 = vld [vmem:[#allocation4 + $0x138] sm:$0xff]   ;;  %v20101_v35 = vld [vmem:[#allocation221_spill] sm:$0xff]  ;;  %v6976_v58 = vrot.slane %v17271_v56, %v19969_v5 }
 0xc09   : > { %11369 = vperm.xlu0 %11197, %v20085_v36   ;;  %v6805_v36 = vrot.slane %v17262_v22, %v19994_v14 }
 0xc0a   : > { %v6781_v61 = vsel %vm20087_vm0, %v6780_v50, %v6776_v24  ;;  %v20095_v50 = vld [vmem:[#allocation206_spill] sm:$0xff]  ;;  %vm20133_vm0 = vcmask 654912  }
 0xc0b   : > { %10977 = vmatpush3.bf16.msra.mxu0 %v11577_v25  ;;  %v6718_v9 = vpop.permute.xlu1 %6717  ;;  %v6786_v52 = vsel %vm3151_vm11, %v6785_v6, %v6781_v61  ;;  %v20097_v38 = vpack.i.bf16 %v20095_v50, %v20096_v2  ;;  %v20098_v61 = vld [vmem:[#allocation155_spill] sm:$0xff] }
 0xc0c   : > { %v17399_v3 = vpop.permute.xlu0 %7178  ;;  %v6790_v63 = vrot.slane %v6718_v9, %v19987_v37  ;;  %11254 = vperm.xlu1 %11196, %v11253_v62   ;;  %10978 = vmatprep.subr.bf16.mxu0 %v19963_v19  ;;  %v11273_v39 = vpack.i.bf16 %v20099_v23, %v20098_v61  ;;  %v20106_v50 = vld [vmem:[#allocation215_spill] sm:$0xff]  ;;  %v6986_v61 = vrot.slane %v17283_v0, %v19972_v34 }
 0xc0d   : > { %11379 = vperm.xlu0 %11197, %v20092_v51   ;;  %v6996_v0 = vrot.slane %v17295_v43, %v19974_v45 }
 0xc0e   : > { %v6791_v17 = vsel %vm3158_vm12, %v6790_v63, %v6786_v52  ;;  %v20100_v63 = vld [vmem:[#allocation38_spill] sm:$0xff] }
 0xc0f   : > { %10979 = vmatpush3.bf16.msra.mxu0 %v11578_v49  ;;  %v6724_v42 = vpop.permute.xlu1 %6723  ;;  %v6796_v24 = vsel %vm3165_vm13, %v6795_v13, %v6791_v17  ;;  %v11580_v49 = vld [vmem:[#allocation4 + $0x140] sm:$0xff]   ;;  %v20102_v53 = vpack.i.bf16 %v20100_v63, %v20101_v35  ;;  %v20103_v52 = vld [vmem:[#allocation194_spill] sm:$0xff]  ;;  %v20104_v17 = vld [vmem:[#allocation112_spill] sm:$0xff] }
 0xc10   : > { %v17412_v10 = vpop.permute.xlu0 %7184  ;;  %v6800_v25 = vrot.slane %v6724_v42, %v19993_v8  ;;  %11264 = vperm.xlu1 %11196, %v11263_v1   ;;  %10980 = vmatprep.subr.bf16.mxu0 %v19963_v19  ;;  %v11283_v60 = vpack.i.bf16 %v20104_v17, %v20103_v52  ;;  %v11581_v42 = vld [vmem:[#allocation4 + $0x148] sm:$0xff]   ;;  %v20111_v63 = vld [vmem:[#allocation209_spill] sm:$0xff]  ;;  %v11584_v17 = vld [vmem:[#allocation4 + $0x158] sm:$0xff]  }
 0xc11   : > { %11389 = vperm.xlu0 %11197, %v20097_v38  }
 0xc12   : > { %v6801_v30 = vsel %vm3172_vm14, %v6800_v25, %v6796_v24  ;;  %v20105_v25 = vld [vmem:[#allocation49_spill] sm:$0xff] }
 0xc13   : > { %10981 = vmatpush3.bf16.msra.mxu0 %v11579_v33  ;;  %v6923_v6 = vpop.permute.xlu1 %6922  ;;  %v6806_v9 = vsel %vm3179_vm15, %v6805_v36, %v6801_v30  ;;  %v20107_v2 = vpack.i.bf16 %v20105_v25, %v20106_v50  ;;  %v20108_v36 = vld [vmem:[#allocation186_spill] sm:$0xff]  ;;  %v20109_v24 = vld [vmem:[#allocation197_spill] sm:$0xff]  ;;  %v20117_v25 = vld [vmem:[#allocation187_spill] sm:$0xff] }
 0xc14   : > { %v17425_v62 = vpop.permute.xlu0 %7190  ;;  %11274 = vperm.xlu1 %11196, %v11273_v39   ;;  %v6807_v22 = vpack.c.b16 %v6806_v9, %v6806_v9  ;;  %v6972_v51 = vrot.slane %v6923_v6, %v19971_v26  ;;  %10986 = vmatprep.subr.bf16.mxu0 %v19963_v19  ;;  %v11293_v30 = vpack.i.bf16 %v20109_v24, %v20108_v36  ;;  %v11583_v6 = vld [vmem:[#allocation4 + $0x150] sm:$0xff]   ;;  %v11585_v24 = vld [vmem:[#allocation4 + $0x160] sm:$0xff]  }
 0xc15   : > { %11399 = vperm.xlu0 %11197, %v20102_v53  }
 0xc16   : > { %10983 = vmatmul.mubr.bf16.vlgmr.msra.gmra.mrb[20].mxu0 %v6807_v22  ;;  %v6977_v38 = vsel %vm3081_vm1, %v6976_v58, %v6972_v51  ;;  %v20113_v58 = vld [vmem:[#allocation61_spill] sm:$0xff] }
 0xc17   : > { %10987 = vmatpush3.bf16.msra.mxu0 %v11580_v49  ;;  %v6929_v13 = vpop.permute.xlu1 %6928  ;;  %11002 = vmatprep.mubr.msk.bf16.mxu0 %vm19998_vm8, %v19963_v19  ;;  %v20110_v49 = vld [vmem:[#allocation57_spill] sm:$0xff] }
 0xc18   : > { %v17437_v1 = vpop.permute.xlu0 %7196  ;;  %v6981_v33 = vrot.slane %v6929_v13, %v19970_v31  ;;  %11284 = vperm.xlu1 %11196, %v11283_v60   ;;  %10988 = vmatprep.subr.bf16.mxu0 %v19963_v19  ;;  %v20112_v35 = vpack.i.bf16 %v20110_v49, %v20111_v63  ;;  %v20114_v13 = vld [vmem:[#allocation196_spill] sm:$0xff] }
 0xc19   : > { %11409 = vperm.xlu0 %11197, %v20107_v2   ;;  %v20123_v49 = vld [vmem:[#allocation192_spill] sm:$0xff] }
 0xc1a   : > { %v6982_v56 = vsel %vm3088_vm2, %v6981_v33, %v6977_v38  ;;  %v20116_v33 = vld [vmem:[#allocation234_spill] sm:$0xff]  ;;  %v7006_v38 = vrot.slane %v17308_v41, %v19976_v40 }
 0xc1b   : > { %10989 = vmatpush3.bf16.msra.mxu0 %v11581_v42  ;;  %v6935_v39 = vpop.permute.xlu1 %6934  ;;  %v6987_v53 = vsel %vm3095_vm3, %v6986_v61, %v6982_v56  ;;  %v20115_v42 = vpack.i.bf16 %v20113_v58, %v20114_v13  ;;  %v20118_v50 = vpack.i.bf16 %v20116_v33, %v20117_v25  ;;  %v20119_v61 = vld [vmem:[#allocation193_spill] sm:$0xff] }
 0xc1c   : > { %v17452_v23 = vpop.permute.xlu0 %7202  ;;  %v6991_v9 = vrot.slane %v6935_v39, %v19973_v15  ;;  %11294 = vperm.xlu1 %11196, %v11293_v30   ;;  %10990 = vmatprep.subr.bf16.mxu0 %v19963_v19  ;;  %v20120_v39 = vld [vmem:[#allocation60_spill] sm:$0xff]  ;;  %v20128_v58 = vld [vmem:[#allocation37_spill] sm:$0xff] }
 0xc1d   : > { %11419 = vperm.xlu0 %11197, %v20112_v35   ;;  %v20131_v33 = vld [vmem:[#allocation205_spill] sm:$0xff] }
 0xc1e   : > { %v6992_v22 = vsel %vm3102_vm4, %v6991_v9, %v6987_v53  ;;  %v20122_v9 = vld [vmem:[#allocation190_spill] sm:$0xff]  ;;  %v7016_v53 = vrot.slane %v17320_v44, %v19981_v46 }
 0xc1f   : > { %10991 = vmatpush3.bf16.msra.mxu0 %v11583_v6  ;;  %v6941_v52 = vpop.permute.xlu1 %6940  ;;  %v6997_v2 = vsel %vm3109_vm5, %v6996_v0, %v6992_v22  ;;  %v20121_v6 = vpack.i.bf16 %v20119_v61, %v20120_v39  ;;  %v20124_v63 = vpack.i.bf16 %v20122_v9, %v20123_v49  ;;  %v20136_v61 = vld [vmem:[#allocation46_spill] sm:$0xff] }
 0xc20   : > { %v17463_v51 = vpop.permute.xlu0 %7208  ;;  %v7001_v60 = vrot.slane %v6941_v52, %v19975_v20  ;;  %11304 = vperm.xlu1 %11196, %v20118_v50   ;;  %10992 = vmatprep.subr.bf16.mxu0 %v19963_v19  ;;  %v11586_v52 = vld [vmem:[#allocation4 + $0x168] sm:$0xff]  }
 0xc21   : > { %11429 = vperm.xlu0 %11197, %v20115_v42   ;;  %v20130_v42 = vld [vmem:[#allocation92_spill] sm:$0xff]  ;;  %v20139_v9 = vld [vmem:[#allocation118_spill] sm:$0xff] }
 0xc22   : > { %v7002_v43 = vsel %vm3116_vm6, %v7001_v60, %v6997_v2  ;;  %v20127_v60 = vld [vmem:[#allocation212_spill] sm:$0xff]  ;;  %v20132_v25 = vpack.i.bf16 %v20130_v42, %v20131_v33  ;;  %v7026_v2 = vrot.slane %v17332_v7, %v19984_v57  ;;  %v7046_v42 = vrot.slane %v17360_v55, %v19994_v14 }
 0xc23   : > { %10993 = vmatpush3.bf16.msra.mxu0 %v11584_v17  ;;  %v6947_v36 = vpop.permute.xlu1 %6946  ;;  %v7007_v35 = vsel %vm20125_vm7, %v7006_v38, %v7002_v43  ;;  %v20129_v13 = vpack.i.bf16 %v20127_v60, %v20128_v58  ;;  %vm20134_vm7 = vcmask 720512   ;;  %v20142_v60 = vld [vmem:[#allocation224_spill] sm:$0xff] }
 0xc24   : > { %v17477_v56 = vpop.permute.xlu0 %7407  ;;  %v7011_v30 = vrot.slane %v6947_v36, %v19982_v48  ;;  %11314 = vperm.xlu1 %11196, %v20124_v63   ;;  %10994 = vmatprep.subr.bf16.mxu0 %v19963_v19  ;;  %v11587_v36 = vld [vmem:[#allocation4 + $0x170] sm:$0xff]   ;;  %v20143_v58 = vld [vmem:[#allocation96_spill] sm:$0xff] }
 0xc25   : > { %11439 = vperm.xlu0 %11197, %v20121_v6   ;;  %v20138_v6 = vld [vmem:[#allocation82_spill] sm:$0xff] }
 0xc26   : > { %v7012_v41 = vsel %vm20126_vm10, %v7011_v30, %v7007_v35  ;;  %v20135_v30 = vld [vmem:[#allocation219_spill] sm:$0xff]  ;;  %v20140_v49 = vpack.i.bf16 %v20138_v6, %v20139_v9  ;;  %v7036_v35 = vrot.slane %v17347_v21, %v19989_v27  ;;  %v11590_v6 = vld [vmem:[#allocation4 + $0x188] sm:$0xff]   ;;  %vm20168_vm10 = vcmask 523712  }
 0xc27   : > { %10995 = vmatpush3.bf16.msra.mxu0 %v11585_v24  ;;  %v6953_v0 = vpop.permute.xlu1 %6952  ;;  %v7017_v50 = vsel %vm20133_vm0, %v7016_v53, %v7012_v41  ;;  %v20137_v39 = vpack.i.bf16 %v20135_v30, %v20136_v61  ;;  %v7217_v30 = vrot.slane %v17373_v59, %v19969_v5  ;;  %v20150_v9 = vld [vmem:[#allocation226_spill] sm:$0xff]  ;;  %vm20169_vm0 = vcmask 589312  }
 0xc28   : > { %v17491_v22 = vpop.permute.xlu0 %7413  ;;  %v7021_v17 = vrot.slane %v6953_v0, %v19983_v32  ;;  %11324 = vperm.xlu1 %11196, %v20132_v25   ;;  %10996 = vmatprep.subr.bf16.mxu0 %v19963_v19  ;;  %v11588_v0 = vld [vmem:[#allocation4 + $0x178] sm:$0xff]  }
 0xc29   : > { %11449 = vperm.xlu0 %11197, %v20129_v13   ;;  %v20144_v13 = vpack.i.bf16 %v20142_v60, %v20143_v58  ;;  %v20156_v58 = vld [vmem:[#allocation183_spill] sm:$0xff] }
 0xc2a   : > { %v7022_v44 = vsel %vm20134_vm7, %v7021_v17, %v7017_v50  ;;  %v20141_v17 = vpack.i.bf16 %v20002_v18, %v20001_v54  ;;  %v11589_v18 = vld [vmem:[#allocation4 + $0x180] sm:$0xff]   ;;  %vm20173_vm7 = vcmask 654912  }
 0xc2b   : > { %10997 = vmatpush3.bf16.msra.mxu0 %v11586_v52  ;;  %v6959_v38 = vpop.permute.xlu1 %6958  ;;  %v7027_v63 = vsel %vm3151_vm11, %v7026_v2, %v7022_v44  ;;  %v20145_v44 = vpack.i.bf16 %v20008_v47, %v20005_v12  ;;  %v20146_v2 = vld [vmem:[#allocation213_spill] sm:$0xff]  ;;  %v20149_v47 = vpack.i.bf16 %v19996_v4, %v20010_v29 }
 0xc2c   : > { %v17505_v43 = vpop.permute.xlu0 %7419  ;;  %v7031_v24 = vrot.slane %v6959_v38, %v19987_v37  ;;  %11334 = vperm.xlu1 %11196, %v20140_v49   ;;  %10998 = vmatprep.subr.bf16.mxu0 %v19963_v19  ;;  %v20147_v38 = vld [vmem:[#allocation100_spill] sm:$0xff]  ;;  %v20151_v49 = vld [vmem:[#allocation222_spill] sm:$0xff]  ;;  %v20153_v4 = vld [vmem:[#allocation181_spill] sm:$0xff] }
 0xc2d   : > { %11459 = vperm.xlu0 %11197, %v20137_v39   ;;  %v20148_v55 = vpack.i.bf16 %v20146_v2, %v20147_v38  ;;  %v20159_v2 = vld [vmem:[#allocation216_spill] sm:$0xff]  ;;  %v20160_v38 = vld [vmem:[#allocation35_spill] sm:$0xff] }
 0xc2e   : > { %v7032_v7 = vsel %vm3158_vm12, %v7031_v24, %v7027_v63  ;;  %v20152_v63 = vpack.i.bf16 %v20150_v9, %v20151_v49  ;;  %v11594_v9 = vld [vmem:[#allocation4 + $0x1a0] sm:$0xff]  }
 0xc2f   : > { %10999 = vmatpush3.bf16.msra.mxu0 %v11587_v36  ;;  %v6965_v53 = vpop.permute.xlu1 %6964  ;;  %v7037_v21 = vsel %vm3165_vm13, %v7036_v35, %v7032_v7  ;;  %v7227_v35 = vrot.slane %v17386_v11, %v19972_v34 }
 0xc30   : > { %v17519_v41 = vpop.permute.xlu0 %7425  ;;  %v7041_v52 = vrot.slane %v6965_v53, %v19993_v8  ;;  %11344 = vperm.xlu1 %11196, %v20144_v13   ;;  %11000 = vmatprep.subr.bf16.mxu0 %v19963_v19  ;;  %v20157_v13 = vld [vmem:[#allocation188_spill] sm:$0xff] }
 0xc31   : > { %11469 = vperm.xlu0 %11197, %v20141_v17   ;;  %v20154_v17 = vld [vmem:[#allocation41_spill] sm:$0xff] }
 0xc32   : > { %v7042_v33 = vsel %vm3172_vm14, %v7041_v52, %v7037_v21  ;;  %v11592_v52 = vld [vmem:[#allocation4 + $0x190] sm:$0xff]   ;;  %v20155_v60 = vpack.i.bf16 %v20153_v4, %v20154_v17  ;;  %v11595_v4 = vld [vmem:[#allocation4 + $0x1a8] sm:$0xff]  }
 0xc33   : > { %11001 = vmatpush3.bf16.msra.mxu0 %v11588_v0  ;;  %v7164_v50 = vpop.permute.xlu1 %7163  ;;  %v7047_v54 = vsel %vm3179_vm15, %v7046_v42, %v7042_v33  ;;  %v20158_v42 = vpack.i.bf16 %v20156_v58, %v20157_v13  ;;  %v7237_v33 = vrot.slane %v17399_v3, %v19974_v45  ;;  %v20171_v58 = vld [vmem:[#allocation211_spill] sm:$0xff] }
 0xc34   : > { %v17533_v25 = vpop.permute.xlu0 %7431  ;;  %11354 = vperm.xlu1 %11196, %v20148_v55   ;;  %v7048_v36 = vpack.c.b16 %v7047_v54, %v7047_v54  ;;  %v7213_v24 = vrot.slane %v7164_v50, %v19971_v26  ;;  %11006 = vmatprep.subr.bf16.mxu0 %v19963_v19  ;;  %v20161_v55 = vpack.i.bf16 %v20159_v2, %v20160_v38  ;;  %v20176_v2 = vld [vmem:[#allocation189_spill] sm:$0xff] }
 0xc35   : > { %11479 = vperm.xlu0 %11197, %v20145_v44  }
 0xc36   : > { %11003 = vmatmul.mubr.bf16.vlgmr.msra.gmra.mrb[24].mxu0 %v7048_v36  ;;  %v7218_v59 = vsel %vm3081_vm1, %v7217_v30, %v7213_v24  ;;  %v20162_v36 = vld [vmem:[#allocation202_spill] sm:$0xff]  ;;  %v20163_v24 = vld [vmem:[#allocation156_spill] sm:$0xff] }
 0xc37   : > { %11007 = vmatpush3.bf16.msra.mxu0 %v11589_v18  ;;  %v7170_v39 = vpop.permute.xlu1 %7169  ;;  %11022 = vmatprep.mubr.msk.bf16.mxu0 %vm19998_vm8, %v19963_v19  ;;  %v11593_v18 = vld [vmem:[#allocation4 + $0x198] sm:$0xff]   ;;  %v20164_v30 = vpack.i.bf16 %v20162_v36, %v20163_v24 }
 0xc38   : > { %v17546_v61 = vpop.permute.xlu0 %7437  ;;  %v7222_v12 = vrot.slane %v7170_v39, %v19970_v31  ;;  %11364 = vperm.xlu1 %11196, %v20152_v63   ;;  %11008 = vmatprep.subr.bf16.mxu0 %v19963_v19  ;;  %v20165_v63 = vld [vmem:[#allocation210_spill] sm:$0xff] }
 0xc39   : > { %11489 = vperm.xlu0 %11197, %v20149_v47  }
 0xc3a   : > { %v7223_v7 = vsel %vm3088_vm2, %v7222_v12, %v7218_v59  ;;  %v20166_v59 = vld [vmem:[#allocation171_spill] sm:$0xff] }
 0xc3b   : > { %11009 = vmatpush3.bf16.msra.mxu0 %v11590_v6  ;;  %v7176_v0 = vpop.permute.xlu1 %7175  ;;  %v7228_v21 = vsel %vm3095_vm3, %v7227_v35, %v7223_v7  ;;  %v7247_v6 = vrot.slane %v17412_v10, %v19976_v40  ;;  %v20167_v7 = vpack.i.bf16 %v20165_v63, %v20166_v59  ;;  %v7257_v10 = vrot.slane %v17425_v62, %v19981_v46 }
 0xc3c   : > { %v17562_v53 = vpop.permute.xlu0 %7443  ;;  %v7232_v29 = vrot.slane %v7176_v0, %v19973_v15  ;;  %11374 = vperm.xlu1 %11196, %v20158_v42   ;;  %11010 = vmatprep.subr.bf16.mxu0 %v19963_v19  ;;  %v7267_v62 = vrot.slane %v17437_v1, %v19984_v57  ;;  %v7277_v1 = vrot.slane %v17452_v23, %v19989_v27 }
 0xc3d   : > { %11499 = vperm.xlu0 %11197, %v20155_v60   ;;  %v20170_v60 = vld [vmem:[#allocation199_spill] sm:$0xff] }
 0xc3e   : > { %v7233_v11 = vsel %vm3102_vm4, %v7232_v29, %v7228_v21  ;;  %v20172_v13 = vpack.i.bf16 %v20170_v60, %v20171_v58  ;;  %v7458_v60 = vrot.slane %v17477_v56, %v19969_v5 }
 0xc3f   : > { %11011 = vmatpush3.bf16.msra.mxu0 %v11592_v52  ;;  %v7182_v54 = vpop.permute.xlu1 %7181  ;;  %v7238_v39 = vsel %vm3109_vm5, %v7237_v33, %v7233_v11 }
 0xc40   : > { %v17576_v50 = vpop.permute.xlu0 %7449  ;;  %v7242_v44 = vrot.slane %v7182_v54, %v19975_v20  ;;  %11384 = vperm.xlu1 %11196, %v20164_v30   ;;  %11012 = vmatprep.subr.bf16.mxu0 %v19963_v19  ;;  %v11596_v54 = vld [vmem:[#allocation4 + $0x1b0] sm:$0xff]  }
 0xc41   : > { %11509 = vperm.xlu0 %11197, %v20161_v55  }
 0xc42   : > { %v7243_v3 = vsel %vm3116_vm6, %v7242_v44, %v7238_v39  ;;  %v20175_v44 = vld [vmem:[#allocation52_spill] sm:$0xff] }
 0xc43   : > { %11013 = vmatpush3.bf16.msra.mxu0 %v11593_v18  ;;  %v7188_v47 = vpop.permute.xlu1 %7187  ;;  %v7248_v35 = vsel %vm20168_vm10, %v7247_v6, %v7243_v3  ;;  %vm20174_vm10 = vcmask 720512   ;;  %v20177_v38 = vpack.i.bf16 %v20175_v44, %v20176_v2  ;;  %v11597_v39 = vld [vmem:[#allocation4 + $0x1b8] sm:$0xff]   ;;  %v7468_v44 = vrot.slane %v17491_v22, %v19972_v34 }
 0xc44   : > { %v17590_v12 = vpop.permute.xlu0 %11199  ;;  %v7252_v49 = vrot.slane %v7188_v47, %v19982_v48  ;;  %11394 = vperm.xlu1 %11196, %v20167_v7   ;;  %11014 = vmatprep.subr.bf16.mxu0 %v19963_v19  ;;  %v20178_v6 = vld [vmem:[#allocation56_spill] sm:$0xff]  ;;  %v7478_v22 = vrot.slane %v17505_v43, %v19974_v45  ;;  %v7488_v43 = vrot.slane %v17519_v41, %v19976_v40 }
 0xc45   : > { %v20179_v47 = vld [vmem:[#allocation176_spill] sm:$0xff]  ;;  %v7498_v41 = vrot.slane %v17533_v25, %v19981_v46 }
 0xc46   : > { %v7253_v0 = vsel %vm20169_vm0, %v7252_v49, %v7248_v35  ;;  %v7287_v49 = vrot.slane %v17463_v51, %v19994_v14 }
 0xc47   : > { %11015 = vmatpush3.bf16.msra.mxu0 %v11594_v9  ;;  %v7194_v29 = vpop.permute.xlu1 %7193  ;;  %v7258_v42 = vsel %vm20173_vm7, %v7257_v10, %v7253_v0  ;;  %v20180_v9 = vpack.i.bf16 %v20178_v6, %v20179_v47  ;;  %v11598_v0 = vld [vmem:[#allocation4 + $0x1c0] sm:$0xff]  }
 0xc48   : > { %v17601_v52 = vpop.permute.xlu0 %11209  ;;  %v7262_v17 = vrot.slane %v7194_v29, %v19983_v32  ;;  %11404 = vperm.xlu1 %11196, %v20172_v13   ;;  %11016 = vmatprep.subr.bf16.mxu0 %v19963_v19  ;;  %v20181_v10 = vld [vmem:[#allocation29_spill] sm:$0xff]  ;;  %v20182_v29 = vld [vmem:[#allocation208_spill] sm:$0xff] }
 0xc4a   : > { %v7263_v21 = vsel %vm20174_vm10, %v7262_v17, %v7258_v42  ;;  %v11599_v42 = vld [vmem:[#allocation4 + $0x1c8] sm:$0xff]  }
 0xc4b   : > { %11017 = vmatpush3.bf16.msra.mxu0 %v11595_v4  ;;  %v7200_v33 = vpop.permute.xlu1 %7199  ;;  %v7268_v55 = vsel %vm3151_vm11, %v7267_v62, %v7263_v21  ;;  %v20183_v4 = vpack.i.bf16 %v20181_v10, %v20182_v29  ;;  %v20184_v62 = vld [vmem:[#allocation218_spill] sm:$0xff] }
 0xc4c   : > { %v17612_v11 = vpop.permute.xlu0 %11219  ;;  %v7272_v18 = vrot.slane %v7200_v33, %v19987_v37  ;;  %11414 = vperm.xlu1 %11196, %v20177_v38   ;;  %11018 = vmatprep.subr.bf16.mxu0 %v19963_v19  ;;  %v20185_v33 = vld [vmem:[#allocation65_spill] sm:$0xff] }
 0xc4e   : > { %v7273_v36 = vsel %vm3158_vm12, %v7272_v18, %v7268_v55  ;;  %v11600_v55 = vld [vmem:[#allocation4 + $0x1d0] sm:$0xff]  }
 0xc4f   : > { %11019 = vmatpush3.bf16.msra.mxu0 %v11596_v54  ;;  %v7206_v30 = vpop.permute.xlu1 %7205  ;;  %v7278_v63 = vsel %vm3165_vm13, %v7277_v1, %v7273_v36  ;;  %v20186_v54 = vpack.i.bf16 %v20184_v62, %v20185_v33  ;;  %v20187_v1 = vld [vmem:[#allocation91_spill] sm:$0xff] }
 0xc50   : > { %v17623_v24 = vpop.permute.xlu0 %11229  ;;  %v7282_v3 = vrot.slane %v7206_v30, %v19993_v8  ;;  %11424 = vperm.xlu1 %11196, %v20180_v9   ;;  %11020 = vmatprep.subr.bf16.mxu0 %v19963_v19  ;;  %v20188_v30 = vld [vmem:[#allocation47_spill] sm:$0xff] }
 0xc52   : > { %v7283_v23 = vsel %vm3172_vm14, %v7282_v3, %v7278_v63 }
 0xc53   : > { %v7288_v59 = vsel %vm3179_vm15, %v7287_v49, %v7283_v23  ;;  %11021 = vmatpush3.bf16.msra.mxu0 %v11597_v39  ;;  %v7405_v35 = vpop.permute.xlu1 %7404  ;;  %v20189_v39 = vpack.i.bf16 %v20187_v1, %v20188_v30  ;;  %v11601_v49 = vld [vmem:[#allocation4 + $0x1d8] sm:$0xff]   ;;  %v20190_v23 = vld [vmem:[#allocation50_spill] sm:$0xff] }
 0xc54   : > { %v17635_v7 = vpop.permute.xlu0 %11239  ;;  %11434 = vperm.xlu1 %11196, %v20183_v4   ;;  %v7289_v17 = vpack.c.b16 %v7288_v59, %v7288_v59  ;;  %11026 = vmatprep.subr.bf16.mxu0 %v19963_v19  ;;  %v7454_v51 = vrot.slane %v7405_v35, %v19971_v26  ;;  %v20191_v59 = vld [vmem:[#allocation48_spill] sm:$0xff] }
 0xc55   : > { %v20192_v35 = vpack.i.bf16 %v20190_v23, %v20191_v59  ;;  %v20201_v23 = vld [vmem:[#allocation62_spill] sm:$0xff] }
 0xc56   : > { %11023 = vmatmul.mubr.bf16.vlgmr.msra.gmra.mrb[28].mxu0 %v7289_v17  ;;  %v7459_v18 = vsel %vm3081_vm1, %v7458_v60, %v7454_v51  ;;  %v11602_v17 = vld [vmem:[#allocation4 + $0x1e0] sm:$0xff]   ;;  %v20193_v60 = vld [vmem:[#allocation59_spill] sm:$0xff] }
 0xc57   : > { %11027 = vmatpush3.bf16.msra.mxu0 %v11598_v0  ;;  %v7411_v13 = vpop.permute.xlu1 %7410  ;;  %11042 = vmatprep.mubr.msk.bf16.mxu0 %vm19998_vm8, %v19963_v19  ;;  %vm20196_vm8 = vcmask 523712  }
 0xc58   : > { %v17644_v58 = vpop.permute.xlu0 %11249  ;;  %v7463_v21 = vrot.slane %v7411_v13, %v19970_v31  ;;  %11444 = vperm.xlu1 %11196, %v20186_v54   ;;  %11028 = vmatprep.subr.bf16.mxu0 %v19963_v19  ;;  %v20194_v13 = vld [vmem:[#allocation34_spill] sm:$0xff] }
 0xc5a   : > { %v7464_v56 = vsel %vm3088_vm2, %v7463_v21, %v7459_v18  ;;  %v11603_v18 = vld [vmem:[#allocation4 + $0x1e8] sm:$0xff]  }
 0xc5b   : > { %11029 = vmatpush3.bf16.msra.mxu0 %v11599_v42  ;;  %v7417_v38 = vpop.permute.xlu1 %7416  ;;  %v7469_v3 = vsel %vm3095_vm3, %v7468_v44, %v7464_v56  ;;  %v20195_v42 = vpack.i.bf16 %v20193_v60, %v20194_v13  ;;  %v20197_v44 = vld [vmem:[#allocation63_spill] sm:$0xff]  ;;  %v20203_v60 = vld [vmem:[#allocation53_spill] sm:$0xff] }
 0xc5c   : > { %v17657_v2 = vpop.permute.xlu0 %11259  ;;  %v7473_v36 = vrot.slane %v7417_v38, %v19973_v15  ;;  %11454 = vperm.xlu1 %11196, %v20189_v39   ;;  %11030 = vmatprep.subr.bf16.mxu0 %v19963_v19  ;;  %v20198_v38 = vld [vmem:[#allocation33_spill] sm:$0xff]  ;;  %v7508_v39 = vrot.slane %v17546_v61, %v19984_v57  ;;  %v7518_v61 = vrot.slane %v17562_v53, %v19989_v27  ;;  %v20204_v13 = vld [vmem:[#allocation67_spill] sm:$0xff] }
 0xc5e   : > { %v7474_v6 = vsel %vm3102_vm4, %v7473_v36, %v7469_v3 }
 0xc5f   : > { %11031 = vmatpush3.bf16.msra.mxu0 %v11600_v55  ;;  %v7423_v9 = vpop.permute.xlu1 %7422  ;;  %v7479_v0 = vsel %vm3109_vm5, %v7478_v22, %v7474_v6  ;;  %v20199_v55 = vpack.i.bf16 %v20197_v44, %v20198_v38  ;;  %v11604_v22 = vld [vmem:[#allocation4 + $0x1f0] sm:$0xff]   ;;  %v20207_v44 = vld [vmem:[#allocation69_spill] sm:$0xff] }
 0xc60   : > { %v17668_v47 = vpop.permute.xlu0 %11269  ;;  %v7483_v63 = vrot.slane %v7423_v9, %v19975_v20  ;;  %11464 = vperm.xlu1 %11196, %v20192_v35   ;;  %11032 = vmatprep.subr.bf16.mxu0 %v19963_v19  ;;  %v20208_v38 = vld [vmem:[#allocation71_spill] sm:$0xff] }
 0xc62   : > { %v7484_v10 = vsel %vm3116_vm6, %v7483_v63, %v7479_v0  ;;  %v20200_v63 = vld [vmem:[#allocation51_spill] sm:$0xff] }
 0xc63   : > { %11033 = vmatpush3.bf16.msra.mxu0 %v11601_v49  ;;  %v7429_v4 = vpop.permute.xlu1 %7428  ;;  %v7489_v21 = vsel %vm20196_vm8, %v7488_v43, %v7484_v10  ;;  %v20202_v59 = vpack.i.bf16 %v20200_v63, %v20201_v23 }
 0xc64   : > { %v17679_v29 = vpop.permute.xlu0 %11279  ;;  %v7493_v51 = vrot.slane %v7429_v4, %v19982_v48  ;;  %11474 = vperm.xlu1 %11196, %v20195_v42   ;;  %11034 = vmatprep.subr.bf16.mxu0 %v19963_v19  ;;  %v20205_v42 = vpack.i.bf16 %v20203_v60, %v20204_v13 }
 0xc66   : > { %v7494_v62 = vsel %vm20169_vm0, %v7493_v51, %v7489_v21  ;;  %v7528_v21 = vrot.slane %v17576_v50, %v19994_v14 }
 0xc67   : > { %11035 = vmatpush3.bf16.msra.mxu0 %v11602_v17  ;;  %v7435_v54 = vpop.permute.xlu1 %7434  ;;  %v7499_v36 = vsel %vm20173_vm7, %v7498_v41, %v7494_v62  ;;  %v17698_v1 = vpop.f32.mrb[4].mxu0  ;;  %v11605_v17 = vld [vmem:[#allocation4 + $0x1f8] sm:$0xff]  }
 0xc68   : > { %v17690_v33 = vpop.permute.xlu0 %11289  ;;  %v7503_v56 = vrot.slane %v7435_v54, %v19983_v32  ;;  %11484 = vperm.xlu1 %11196, %v20199_v55   ;;  %11036 = vmatprep.subr.bf16.mxu0 %v19963_v19  ;;  %v10904_v25 = vpop.f32.mrb[5].mxu0  ;;  %v20209_v55 = vpack.i.bf16 %v20207_v44, %v20208_v38 }
 0xc69   : > { %v5930_v49 = vpop.f32.mrb[6].mxu0 }
 0xc6a   : > { %v7504_v30 = vsel %vm20174_vm10, %v7503_v56, %v7499_v36  ;;  %v10905_v0 = vpop.f32.mrb[7].mxu0  ;;  %v11201_v56 = vunpack.i.l.bf16 %v17590_v12 }
 0xc6b   : > { %11037 = vmatpush3.bf16.msra.mxu0 %v11603_v18  ;;  %v7441_v6 = vpop.permute.xlu1 %7440  ;;  %v7509_v35 = vsel %vm3151_vm11, %v7508_v39, %v7504_v30  ;;  %v11202_v18 = vunpack.i.h.bf16 %v17590_v12  ;;  %v11212_v12 = vunpack.i.h.bf16 %v17601_v52 }
 0xc6c   : > { %v17703_v3 = vpop.permute.xlu0 %11299  ;;  %v7513_v9 = vrot.slane %v7441_v6, %v19987_v37  ;;  %11494 = vperm.xlu1 %11196, %v20202_v59   ;;  %11038 = vmatprep.subr.bf16.mxu0 %v19963_v19  ;;  %v9167_v25 = vrot.slane %v11201_v56, %v19971_v26  ;;  %v11211_v6 = vunpack.i.l.bf16 %v17601_v52  ;;  %v11222_v52 = vunpack.i.h.bf16 %v17612_v11 }
 0xc6d   : > { %v9171_v30 = vrot.slane %v11202_v18, %v19969_v5  ;;  %v11231_v18 = vunpack.i.l.bf16 %v17623_v24 }
 0xc6e   : > { %v7514_v10 = vsel %vm3158_vm12, %v7513_v9, %v7509_v35  ;;  %v9211_v38 = vrot.slane %v11222_v52, %v19981_v46 }
 0xc6f   : > { %11039 = vmatpush3.bf16.msra.mxu0 %v11604_v22  ;;  %v7447_v4 = vpop.permute.xlu1 %7446  ;;  %v7519_v62 = vsel %vm3165_vm13, %v7518_v61, %v7514_v10  ;;  %v9172_v59 = vsel %vm3081_vm1, %v9171_v30, %v9167_v25  ;;  %v9186_v10 = vrot.slane %v11211_v6, %v19973_v15  ;;  %v11221_v61 = vunpack.i.l.bf16 %v17612_v11 }
 0xc70   : > { %v17714_v43 = vpop.permute.xlu0 %11309  ;;  %v7523_v51 = vrot.slane %v7447_v4, %v19993_v8  ;;  %11504 = vperm.xlu1 %11196, %v20205_v42   ;;  %11040 = vmatprep.subr.bf16.mxu0 %v19963_v19  ;;  %v11242_v6 = vunpack.i.h.bf16 %v17635_v7 }
 0xc72   : > { %v7524_v53 = vsel %vm3172_vm14, %v7523_v51, %v7519_v62 }
 0xc73   : > { %v7529_v41 = vsel %vm3179_vm15, %v7528_v21, %v7524_v53  ;;  %11041 = vmatpush3.bf16.msra.mxu0 %v11605_v17  ;;  %v17726_v54 = vpop.permute.xlu1 %8643  ;;  %v9191_v17 = vrot.slane %v11212_v12, %v19974_v45 }
 0xc74   : > { %20206 = vst [vmem:[#allocation74_spill] sm:$0xff] %v17726_v54  ;;  %11514 = vperm.xlu1 %11196, %v20209_v55   ;;  %v7530_v19 = vpack.c.b16 %v7529_v41, %v7529_v41  ;;  %v17733_v36 = vpop.permute.xlu0 %11319  ;;  %v9206_v41 = vrot.slane %v11221_v61, %v19982_v48  ;;  %v11232_v55 = vunpack.i.h.bf16 %v17623_v24 }
 0xc76   : > { %11043 = vmatmul.mubr.bf16.vlgmr.msra.gmra.mrb[32].mxu0 %v7530_v19 }
 0xc77   : > { %v11205_v50 = vpop.permute.xlu1 %11204  ;;  %8019 = vmatprep.mubr.bf16.mxu0 %v20024_v16 }
 0xc78   : > { %v11207_v39 = vunpack.i.h.bf16 %v11205_v50  ;;  %v11206_v22 = vunpack.i.l.bf16 %v11205_v50  ;;  %v17741_v49 = vpop.permute.xlu0 %11329 }
 0xc7a   : > { %v9181_v9 = vrot.slane %v11207_v39, %v19972_v34  ;;  %v9176_v63 = vrot.slane %v11206_v22, %v19970_v31  ;;  %v11241_v22 = vunpack.i.l.bf16 %v17635_v7 }
 0xc7b   : > { %v11215_v23 = vpop.permute.xlu1 %11214 }
 0xc7c   : > { %v11217_v35 = vunpack.i.h.bf16 %v11215_v23  ;;  %v11216_v0 = vunpack.i.l.bf16 %v11215_v23  ;;  %v9177_v4 = vsel %vm3088_vm2, %v9176_v63, %v9172_v59  ;;  %v17757_v56 = vpop.permute.xlu0 %11339  ;;  %v9226_v63 = vrot.slane %v11231_v18, %v19987_v37 }
 0xc7d   : > { %v9182_v51 = vsel %vm3095_vm3, %v9181_v9, %v9177_v4  ;;  %v9231_v59 = vrot.slane %v11232_v55, %v19989_v27  ;;  %v9246_v52 = vrot.slane %v11241_v22, %v19971_v26 }
 0xc7e   : > { %v9201_v60 = vrot.slane %v11217_v35, %v19976_v40  ;;  %v9187_v13 = vsel %vm3102_vm4, %v9186_v10, %v9182_v51  ;;  %v9196_v42 = vrot.slane %v11216_v0, %v19975_v20 }
 0xc7f   : > { %v11225_v21 = vpop.permute.xlu1 %11224  ;;  %v9192_v62 = vsel %vm3109_vm5, %v9191_v17, %v9187_v13  ;;  %v9250_v17 = vrot.slane %v11242_v6, %v19969_v5 }
 0xc80   : > { %v11227_v53 = vunpack.i.h.bf16 %v11225_v21  ;;  %v9197_v11 = vsel %vm3116_vm6, %v9196_v42, %v9192_v62  ;;  %v11226_v44 = vunpack.i.l.bf16 %v11225_v21  ;;  %v17774_v10 = vpop.permute.xlu0 %11349 }
 0xc81   : > { %v9202_v19 = vsel %vm20196_vm8, %v9201_v60, %v9197_v11  ;;  %v11251_v60 = vunpack.i.l.bf16 %v17644_v58  ;;  %vm20210_vm8 = vcmask 1041409  }
 0xc82   : > { %v9221_v50 = vrot.slane %v11227_v53, %v19984_v57  ;;  %v9207_v30 = vsel %vm20169_vm0, %v9206_v41, %v9202_v19  ;;  %v9216_v25 = vrot.slane %v11226_v44, %v19983_v32  ;;  %v11252_v53 = vunpack.i.h.bf16 %v17644_v58 }
 0xc83   : > { %v11235_v39 = vpop.permute.xlu1 %11234  ;;  %v9212_v12 = vsel %vm20173_vm7, %v9211_v38, %v9207_v30  ;;  %v9251_v19 = vsel %vm3081_vm1, %v9250_v17, %v9246_v52  ;;  %v11261_v58 = vunpack.i.l.bf16 %v17657_v2  ;;  %v11271_v17 = vunpack.i.l.bf16 %v17668_v47 }
 0xc84   : > { %v11237_v9 = vunpack.i.h.bf16 %v11235_v39  ;;  %v9217_v24 = vsel %vm20174_vm10, %v9216_v25, %v9212_v12  ;;  %v11236_v23 = vunpack.i.l.bf16 %v11235_v39  ;;  %v9265_v39 = vrot.slane %v11251_v60, %v19973_v15  ;;  %v17794_v6 = vpop.permute.xlu0 %11359 }
 0xc85   : > { %v9222_v35 = vsel %vm3151_vm11, %v9221_v50, %v9217_v24  ;;  %v11262_v24 = vunpack.i.h.bf16 %v17657_v2  ;;  %v11272_v60 = vunpack.i.h.bf16 %v17668_v47  ;;  %vm20211_vm0 = vcmask 523712  }
 0xc86   : > { %v9241_v0 = vrot.slane %v11237_v9, %v19994_v14  ;;  %v9227_v61 = vsel %vm3158_vm12, %v9226_v63, %v9222_v35  ;;  %v9236_v7 = vrot.slane %v11236_v23, %v19993_v8  ;;  %v9270_v63 = vrot.slane %v11252_v53, %v19974_v45 }
 0xc87   : > { %v11245_v4 = vpop.permute.xlu1 %11244  ;;  %v9232_v51 = vsel %vm3165_vm13, %v9231_v59, %v9227_v61  ;;  %v9290_v2 = vrot.slane %v11262_v24, %v19981_v46  ;;  %vm20212_vm7 = vcmask 589312   ;;  %vm20213_vm10 = vcmask 654912  }
 0xc88   : > { %v9237_v13 = vsel %vm3172_vm14, %v9236_v7, %v9232_v51  ;;  %v11247_v42 = vunpack.i.h.bf16 %v11245_v4  ;;  %v11246_v21 = vunpack.i.l.bf16 %v11245_v4  ;;  %v9285_v4 = vrot.slane %v11261_v58, %v19982_v48 }
 0xc89   : > { %v6168_v62 = vpop.f32.mrb[8].mxu0  ;;  %v9242_v41 = vsel %vm3179_vm15, %v9241_v0, %v9237_v13  ;;  %v9305_v47 = vrot.slane %v11271_v17, %v19987_v37 }
 0xc8a   : > { %v7745_v18 = vrot.slane %v6168_v62, 7  ;;  %v10924_v11 = vpop.f32.mrb[9].mxu0  ;;  %v9260_v44 = vrot.slane %v11247_v42, %v19972_v34  ;;  %v9255_v38 = vrot.slane %v11246_v21, %v19970_v31  ;;  %v17811_v21 = vpop.permute.xlu0 %11369 }
 0xc8b   : > { %v11255_v55 = vpop.permute.xlu1 %11254  ;;  %v6171_v25 = vpop.f32.mrb[10].mxu0  ;;  %v11282_v11 = vunpack.i.h.bf16 %v17679_v29 }
 0xc8c   : > { %v17790_v50 = vsel %vm20210_vm8, %v7745_v18, %v17698_v1  ;;  %v11257_v30 = vunpack.i.h.bf16 %v11255_v55  ;;  %v9256_v22 = vsel %vm3088_vm2, %v9255_v38, %v9251_v19  ;;  %v11256_v12 = vunpack.i.l.bf16 %v11255_v55  ;;  %v10925_v9 = vpop.f32.mrb[11].mxu0 }
 0xc8d   : > { %v9261_v23 = vsel %vm3095_vm3, %v9260_v44, %v9256_v22  ;;  %v11281_v44 = vunpack.i.l.bf16 %v17679_v29  ;;  %vm20214_vm8 = vcmask 720512   ;;  %v9310_v25 = vrot.slane %v11272_v60, %v19989_v27 }
 0xc8e   : > { %v9280_v1 = vrot.slane %v11257_v30, %v19976_v40  ;;  %v9266_v59 = vsel %vm3102_vm4, %v9265_v39, %v9261_v23  ;;  %v9275_v35 = vrot.slane %v11256_v12, %v19975_v20  ;;  %v9329_v29 = vrot.slane %v11282_v11, %v19969_v5 }
 0xc8f   : > { %v11265_v0 = vpop.permute.xlu1 %11264  ;;  %v9271_v61 = vsel %vm3109_vm5, %v9270_v63, %v9266_v59  ;;  %v9325_v63 = vrot.slane %v11281_v44, %v19971_v26  ;;  %v11291_v23 = vunpack.i.l.bf16 %v17690_v33 }
 0xc90   : > { %v11267_v7 = vunpack.i.h.bf16 %v11265_v0  ;;  %v9276_v52 = vsel %vm3116_vm6, %v9275_v35, %v9271_v61  ;;  %v11266_v51 = vunpack.i.l.bf16 %v11265_v0  ;;  %v11292_v61 = vunpack.i.h.bf16 %v17690_v33 }
 0xc91   : > { %v9281_v13 = vsel %vm20211_vm0, %v9280_v1, %v9276_v52  ;;  %v17829_v1 = vpop.permute.xlu0 %11379  ;;  %vm20215_vm0 = vcmask 1041409  }
 0xc92   : > { %v9300_v42 = vrot.slane %v11267_v7, %v19984_v57  ;;  %v9286_v62 = vsel %vm20212_vm7, %v9285_v4, %v9281_v13  ;;  %v9295_v53 = vrot.slane %v11266_v51, %v19983_v32  ;;  %v9349_v33 = vrot.slane %v11292_v61, %v19974_v45 }
 0xc93   : > { %v11275_v18 = vpop.permute.xlu1 %11274  ;;  %v9291_v38 = vsel %vm20213_vm10, %v9290_v2, %v9286_v62  ;;  %v9330_v2 = vsel %vm3081_vm1, %v9329_v29, %v9325_v63  ;;  %v11301_v62 = vunpack.i.l.bf16 %v17703_v3  ;;  %vm20216_vm7 = vcmask 523712  }
 0xc94   : > { %v11277_v55 = vunpack.i.h.bf16 %v11275_v18  ;;  %v9296_v19 = vsel %vm20214_vm8, %v9295_v53, %v9291_v38  ;;  %v11276_v30 = vunpack.i.l.bf16 %v11275_v18  ;;  %v11302_v18 = vunpack.i.h.bf16 %v17703_v3 }
 0xc95   : > { %v9301_v39 = vsel %vm3151_vm11, %v9300_v42, %v9296_v19  ;;  %v9344_v42 = vrot.slane %v11291_v23, %v19973_v15  ;;  %v17845_v44 = vpop.permute.xlu0 %11389  ;;  %vm20217_vm10 = vcmask 589312   ;;  %vm20218_vm8 = vcmask 654912  }
 0xc96   : > { %v9320_v58 = vrot.slane %v11277_v55, %v19994_v14  ;;  %v9306_v22 = vsel %vm3158_vm12, %v9305_v47, %v9301_v39  ;;  %v9315_v12 = vrot.slane %v11276_v30, %v19993_v8  ;;  %v11311_v39 = vunpack.i.l.bf16 %v17714_v43 }
 0xc97   : > { %v11285_v9 = vpop.permute.xlu1 %11284  ;;  %v9311_v24 = vsel %vm3165_vm13, %v9310_v25, %v9306_v22  ;;  %v9364_v25 = vrot.slane %v11301_v62, %v19982_v48  ;;  %v9369_v22 = vrot.slane %v11302_v18, %v19981_v46 }
 0xc98   : > { %v9316_v59 = vsel %vm3172_vm14, %v9315_v12, %v9311_v24  ;;  %v11287_v35 = vunpack.i.h.bf16 %v11285_v9  ;;  %v11286_v0 = vunpack.i.l.bf16 %v11285_v9  ;;  %v11312_v12 = vunpack.i.h.bf16 %v17714_v43 }
 0xc99   : > { %v9321_v7 = vsel %vm3179_vm15, %v9320_v58, %v9316_v59  ;;  %v17861_v61 = vpop.permute.xlu0 %11399 }
 0xc9a   : > { %v9796_v4 = vsel %vm20215_vm0, %v9321_v7, %v9242_v41  ;;  %v9339_v17 = vrot.slane %v11287_v35, %v19972_v34  ;;  %v9334_v52 = vrot.slane %v11286_v0, %v19970_v31  ;;  %v9384_v0 = vrot.slane %v11311_v39, %v19987_v37 }
 0xc9b   : > { %v11295_v51 = vpop.permute.xlu1 %11294  ;;  %vm20219_vm0 = vcmask 720512   ;;  %v9389_v43 = vrot.slane %v11312_v12, %v19989_v27 }
 0xc9c   : > { %v11297_v60 = vunpack.i.h.bf16 %v11295_v51  ;;  %v11296_v13 = vunpack.i.l.bf16 %v11295_v51  ;;  %v9335_v53 = vsel %vm3088_vm2, %v9334_v52, %v9330_v2 }
 0xc9d   : > { %v9340_v41 = vsel %vm3095_vm3, %v9339_v17, %v9335_v53 }
 0xc9e   : > { %v9359_v11 = vrot.slane %v11297_v60, %v19976_v40  ;;  %v9345_v38 = vsel %vm3102_vm4, %v9344_v42, %v9340_v41  ;;  %v9354_v55 = vrot.slane %v11296_v13, %v19975_v20 }
 0xc9f   : > { %v11305_v47 = vpop.permute.xlu1 %11304  ;;  %v9350_v19 = vsel %vm3109_vm5, %v9349_v33, %v9345_v38 }
 0xca0   : > { %v11307_v30 = vunpack.i.h.bf16 %v11305_v47  ;;  %v9355_v3 = vsel %vm3116_vm6, %v9354_v55, %v9350_v19  ;;  %v11306_v58 = vunpack.i.l.bf16 %v11305_v47 }
 0xca1   : > { %v9360_v9 = vsel %vm20216_vm7, %v9359_v11, %v9355_v3  ;;  %v17874_v11 = vpop.permute.xlu0 %11409  ;;  %vm20220_vm7 = vcmask 1042434  }
 0xca2   : > { %v9379_v29 = vrot.slane %v11307_v30, %v19984_v57  ;;  %v9365_v63 = vsel %vm20217_vm10, %v9364_v25, %v9360_v9  ;;  %v9374_v24 = vrot.slane %v11306_v58, %v19983_v32  ;;  %vm20222_vm10 = vmmov %vm20220_vm7  ;;  %v17885_v30 = vpop.f32.mrb[128].mxu1  ;;  %v11606_v25 = vld [vmem:[#allocation14] ss:$16 sps:$4 sm:$0xff]   ;;  %v11608_v58 = vld [vmem:[#allocation14 + $0x4] ss:$16 sps:$4 sm:$0xff]  }
 0xca3   : > { %v11315_v23 = vpop.permute.xlu1 %11314  ;;  %v9370_v59 = vsel %vm20218_vm8, %v9369_v22, %v9365_v63  ;;  %20223 = vst [vmem:[#allocation129_spill] sm:$0xff] %v17885_v30  ;;  %v11064_v3 = vpop.f32.mrb[129].mxu1  ;;  %v11609_v22 = vld [vmem:[#allocation14 + $0x8] ss:$16 sps:$4 sm:$0xff]   ;;  %v11611_v9 = vld [vmem:[#allocation14 + $0xc] ss:$16 sps:$4 sm:$0xff]   ;;  %7987 = vmatprep.subr.bf16.mxu0 %v11608_v58  ;;  %v11342_v58 = vunpack.i.h.bf16 %v17757_v56 }
 0xca4   : > { %v11317_v35 = vunpack.i.h.bf16 %v11315_v23  ;;  %v9375_v7 = vsel %vm20219_vm0, %v9374_v24, %v9370_v59  ;;  %v11316_v17 = vunpack.i.l.bf16 %v11315_v23  ;;  %v7728_v12 = vpop.f32.mrb[130].mxu1  ;;  %8028 = vmatprep.subr.bf16.mxu1 %v11611_v9  ;;  %7988 = vmatpush1.bf16.msra.mxu0 %v11606_v25  ;;  %v11612_v24 = vld [vmem:[#allocation14 + $0x20] ss:$16 sps:$4 sm:$0xff]   ;;  %v11615_v23 = vld [vmem:[#allocation14 + $0x28] ss:$16 sps:$4 sm:$0xff]   ;;  %vm20224_vm8 = vcmask 523712  }
 0xca5   : > { %v9380_v52 = vsel %vm3151_vm11, %v9379_v29, %v9375_v7  ;;  %v11065_v63 = vpop.f32.mrb[131].mxu1  ;;  %8029 = vmatpush1.bf16.msra.mxu1 %v11609_v22  ;;  %v11620_v59 = vld [vmem:[#allocation14 + $0x44] ss:$16 sps:$4 sm:$0xff]   ;;  %v11635_v3 = vld [vmem:[#allocation14 + $0x8c] ss:$16 sps:$4 sm:$0xff]   ;;  %vm20225_vm0 = vcmask 589312  }
 0xca6   : > { %v9399_v51 = vrot.slane %v11317_v35, %v19994_v14  ;;  %v9385_v2 = vsel %vm3158_vm12, %v9384_v0, %v9380_v52  ;;  %v9394_v60 = vrot.slane %v11316_v17, %v19993_v8  ;;  %v17889_v35 = vpop.permute.xlu0 %11419  ;;  %v11623_v0 = vld [vmem:[#allocation14 + $0x4c] ss:$16 sps:$4 sm:$0xff]   ;;  %v11618_v17 = vld [vmem:[#allocation14 + $0x40] ss:$16 sps:$4 sm:$0xff]   ;;  %v11626_v52 = vld [vmem:[#allocation14 + $0x64] ss:$16 sps:$4 sm:$0xff]   ;;  %v11362_v63 = vunpack.i.h.bf16 %v17794_v6 }
 0xca7   : > { %v17869_v13 = vpop.permute.xlu1 %11324  ;;  %v9390_v42 = vsel %vm3165_vm13, %v9389_v43, %v9385_v2  ;;  %v11621_v43 = vld [vmem:[#allocation14 + $0x48] ss:$16 sps:$4 sm:$0xff]   ;;  %v11321_v2 = vunpack.i.l.bf16 %v17733_v36 }
 0xca8   : > { %v9395_v62 = vsel %vm3172_vm14, %v9394_v60, %v9390_v42  ;;  %v11629_v60 = vld [vmem:[#allocation14 + $0x6c] ss:$16 sps:$4 sm:$0xff]   ;;  %v11327_v22 = vunpack.i.h.bf16 %v17869_v13 }
 0xca9   : > { %v6409_v53 = vpop.f32.mrb[12].mxu0  ;;  %v9400_v33 = vsel %vm3179_vm15, %v9399_v51, %v9395_v62  ;;  %v11322_v51 = vunpack.i.h.bf16 %v17733_v36  ;;  %v9404_v25 = vrot.slane %v11321_v2, %v19971_v26  ;;  %v11332_v36 = vunpack.i.h.bf16 %v17741_v49 }
 0xcaa   : > { %v7747_v18 = vrot.slane %v6409_v53, 6  ;;  %v10944_v41 = vpop.f32.mrb[13].mxu0  ;;  %v17877_v38 = vsel %vm20220_vm7, %v9400_v33, %v9796_v4  ;;  %v11614_v4 = vld [vmem:[#allocation14 + $0x24] ss:$16 sps:$4 sm:$0xff]   ;;  %v17897_v62 = vpop.permute.xlu0 %11429  ;;  %v11326_v53 = vunpack.i.l.bf16 %v17869_v13  ;;  %v11624_v33 = vld [vmem:[#allocation14 + $0x60] ss:$16 sps:$4 sm:$0xff]   ;;  %v9418_v2 = vrot.slane %v11327_v22, %v19972_v34 }
 0xcab   : > { %20221 = vst [vmem:[#allocation73_spill] sm:$0xff] %v17877_v38  ;;  %v17879_v55 = vpop.permute.xlu1 %11334  ;;  %v6412_v19 = vpop.f32.mrb[14].mxu0  ;;  %7989 = vmatprep.subr.bf16.mxu0 %v11614_v4  ;;  %v11632_v41 = vld [vmem:[#allocation14 + $0x84] ss:$16 sps:$4 sm:$0xff]   ;;  %v11630_v4 = vld [vmem:[#allocation14 + $0x80] ss:$16 sps:$4 sm:$0xff]   ;;  %v11381_v22 = vunpack.i.l.bf16 %v17829_v1 }
 0xcac   : > { %v17883_v47 = vsel %vm20222_vm10, %v7747_v18, %v17790_v50  ;;  %v10945_v39 = vpop.f32.mrb[15].mxu0  ;;  %v11617_v50 = vld [vmem:[#allocation14 + $0x2c] ss:$16 sps:$4 sm:$0xff]   ;;  %7990 = vmatpush1.bf16.msra.mxu0 %v11612_v24  ;;  %v11627_v18 = vld [vmem:[#allocation14 + $0x68] ss:$16 sps:$4 sm:$0xff]   ;;  %v9408_v19 = vrot.slane %v11322_v51, %v19969_v5  ;;  %v9413_v9 = vrot.slane %v11326_v53, %v19970_v31  ;;  %v11361_v24 = vunpack.i.l.bf16 %v17794_v6  ;;  %vm20227_vm10 = vmmov %vm20224_vm8 }
 0xcad   : > { %8030 = vmatprep.subr.bf16.mxu1 %v11617_v50  ;;  %7991 = vmatprep.subr.bf16.mxu0 %v11620_v59  ;;  %v11331_v39 = vunpack.i.l.bf16 %v17741_v49  ;;  %v11633_v50 = vld [vmem:[#allocation14 + $0x88] ss:$16 sps:$4 sm:$0xff]   ;;  %v11638_v49 = vld [vmem:[#allocation14 + $0xa4] ss:$16 sps:$4 sm:$0xff]   ;;  %v17913_v59 = vrot.slane %v11332_v36, %v19974_v45  ;;  %v11402_v6 = vunpack.i.h.bf16 %v17861_v61  ;;  %v11401_v51 = vunpack.i.l.bf16 %v17861_v61 }
 0xcae   : > { %8031 = vmatpush1.bf16.msra.mxu1 %v11615_v23  ;;  %v9409_v23 = vsel %vm3081_vm1, %v9408_v19, %v9404_v25  ;;  %v11352_v53 = vunpack.i.h.bf16 %v17774_v10  ;;  %v9487_v19 = vrot.slane %v11362_v63, %v19969_v5  ;;  %v9483_v25 = vrot.slane %v11361_v24, %v19971_v26 }
 0xcaf   : > { %v17887_v29 = vpop.permute.xlu1 %11344  ;;  %8032 = vmatprep.subr.bf16.mxu1 %v11623_v0  ;;  %v9423_v13 = vrot.slane %v11331_v39, %v19973_v15  ;;  %v11341_v0 = vunpack.i.l.bf16 %v17757_v56  ;;  %v9414_v56 = vsel %vm3088_vm2, %v9413_v9, %v9409_v23  ;;  %v11372_v61 = vunpack.i.h.bf16 %v17811_v21  ;;  %v11639_v39 = vld [vmem:[#allocation14 + $0xa8] ss:$16 sps:$4 sm:$0xff]  }
 0xcb0   : > { %7992 = vmatpush1.bf16.msra.mxu0 %v11618_v17  ;;  %v17917_v17 = vpop.permute.xlu0 %11439  ;;  %v11371_v36 = vunpack.i.l.bf16 %v17811_v21  ;;  %v11392_v9 = vunpack.i.h.bf16 %v17845_v44  ;;  %v9566_v63 = vrot.slane %v11402_v6, %v19969_v5  ;;  %v9562_v24 = vrot.slane %v11401_v51, %v19971_v26  ;;  %v11642_v51 = vld [vmem:[#allocation14 + $0xc0] ss:$16 sps:$4 sm:$0xff]  }
 0xcb1   : > { %7993 = vmatprep.subr.bf16.mxu0 %v11626_v52  ;;  %v17920_v52 = vrot.slane %v11342_v58, %v19981_v46  ;;  %v11382_v58 = vunpack.i.h.bf16 %v17829_v1  ;;  %v9419_v21 = vsel %vm3095_vm3, %v9418_v2, %v9414_v56  ;;  %v17948_v23 = vrot.slane %v11352_v53, %v19989_v27  ;;  %v11645_v53 = vld [vmem:[#allocation14 + $0xc8] ss:$16 sps:$4 sm:$0xff]  }
 0xcb2   : > { %8033 = vmatpush1.bf16.msra.mxu1 %v11621_v43  ;;  %v11641_v43 = vld [vmem:[#allocation14 + $0xac] ss:$16 sps:$4 sm:$0xff]   ;;  %v9488_v2 = vsel %vm3081_vm1, %v9487_v19, %v9483_v25  ;;  %v9502_v56 = vrot.slane %v11371_v36, %v19973_v15  ;;  %v17966_v28 = vrot.slane %v11381_v22, %v19982_v48  ;;  %v17971_v19 = vrot.slane %v11392_v9, %v19989_v27 }
 0xcb3   : > { %v17891_v7 = vpop.permute.xlu1 %11354  ;;  %8034 = vmatprep.subr.bf16.mxu1 %v11629_v60  ;;  %v9567_v25 = vsel %vm3081_vm1, %v9566_v63, %v9562_v24  ;;  %v11422_v9 = vunpack.i.h.bf16 %v17889_v35  ;;  %v11421_v63 = vunpack.i.l.bf16 %v17889_v35  ;;  %v11442_v24 = vunpack.i.h.bf16 %v17917_v17 }
 0xcb4   : > { %7994 = vmatpush1.bf16.msra.mxu0 %v11624_v33  ;;  %v11351_v33 = vunpack.i.l.bf16 %v17774_v10  ;;  %v17936_v10 = vrot.slane %v11341_v0, %v19982_v48  ;;  %v17953_v1 = vpop.permute.xlu0 %11449  ;;  %vm20226_vm7 = vcmask 654912  }
 0xcb5   : > { %7995 = vmatprep.subr.bf16.mxu0 %v11632_v41  ;;  %v11636_v41 = vld [vmem:[#allocation14 + $0xa0] ss:$16 sps:$4 sm:$0xff]  }
 0xcb6   : > { %8035 = vmatpush1.bf16.msra.mxu1 %v11627_v18  ;;  %v17951_v0 = vrot.slane %v11351_v33, %v19987_v37  ;;  %v17963_v33 = vrot.slane %v11382_v58, %v19981_v46 }
 0xcb7   : > { %v17895_v42 = vpop.permute.xlu1 %11364  ;;  %8036 = vmatprep.subr.bf16.mxu1 %v11635_v3  ;;  %v11644_v3 = vld [vmem:[#allocation14 + $0xc4] ss:$16 sps:$4 sm:$0xff]  }
 0xcb8   : > { %v11366_v18 = vunpack.i.l.bf16 %v17895_v42  ;;  %7996 = vmatpush1.bf16.msra.mxu0 %v11630_v4  ;;  %v11647_v4 = vld [vmem:[#allocation14 + $0xcc] ss:$16 sps:$4 sm:$0xff]  }
 0xcb9   : > { %7997 = vmatprep.subr.bf16.mxu0 %v11638_v49 }
 0xcba   : > { %8037 = vmatpush1.bf16.msra.mxu1 %v11633_v50  ;;  %v11367_v50 = vunpack.i.h.bf16 %v17895_v42  ;;  %v9492_v6 = vrot.slane %v11366_v18, %v19970_v31  ;;  %v17959_v42 = vrot.slane %v11372_v61, %v19974_v45  ;;  %v11391_v18 = vunpack.i.l.bf16 %v17845_v44 }
 0xcbb   : > { %v17906_v12 = vpop.permute.xlu1 %11374  ;;  %8038 = vmatprep.subr.bf16.mxu1 %v11641_v43  ;;  %v11336_v43 = vunpack.i.l.bf16 %v17879_v55  ;;  %v11337_v61 = vunpack.i.h.bf16 %v17879_v55  ;;  %v11412_v44 = vunpack.i.h.bf16 %v17874_v11 }
 0xcbc   : > { %7998 = vmatpush1.bf16.msra.mxu0 %v11636_v41  ;;  %v9424_v41 = vsel %vm3102_vm4, %v9423_v13, %v9419_v21  ;;  %v9497_v36 = vrot.slane %v11367_v50, %v19972_v34  ;;  %v9493_v58 = vsel %vm3088_vm2, %v9492_v6, %v9488_v2  ;;  %v11411_v13 = vunpack.i.l.bf16 %v17874_v11  ;;  %v17985_v21 = vpop.permute.xlu0 %11459 }
 0xcbd   : > { %7999 = vmatprep.subr.bf16.mxu0 %v11644_v3  ;;  %v9433_v3 = vrot.slane %v11336_v43, %v19975_v20  ;;  %v9438_v11 = vrot.slane %v11337_v61, %v19976_v40  ;;  %v18002_v61 = vrot.slane %v11391_v18, %v19987_v37 }
 0xcbe   : > { %8039 = vmatpush1.bf16.msra.mxu1 %v11639_v39  ;;  %v9498_v2 = vsel %vm3095_vm3, %v9497_v36, %v9493_v58  ;;  %v9586_v36 = vrot.slane %v11412_v44, %v19974_v45  ;;  %v9581_v58 = vrot.slane %v11411_v13, %v19973_v15  ;;  %v11377_v44 = vunpack.i.h.bf16 %v17906_v12 }
 0xcbf   : > { %v17925_v60 = vpop.permute.xlu1 %11384  ;;  %8040 = vmatprep.subr.bf16.mxu1 %v11647_v4  ;;  %v9429_v4 = vsel %vm3109_vm5, %v17913_v59, %v9424_v41 }
 0xcc0   : > { %8000 = vmatpush1.bf16.msra.mxu0 %v11642_v51  ;;  %v11441_v51 = vunpack.i.l.bf16 %v17917_v17  ;;  %v9434_v35 = vsel %vm3116_vm6, %v9433_v3, %v9429_v4  ;;  %v18008_v3 = vrot.slane %v11422_v9, %v19981_v46  ;;  %v18011_v4 = vrot.slane %v11421_v63, %v19982_v48  ;;  %v11650_v9 = vld [vmem:[#allocation14 + $0xe4] ss:$16 sps:$4 sm:$0xff]  }
 0xcc1   : > { %v9439_v18 = vsel %vm20224_vm8, %v9438_v11, %v9434_v35  ;;  %v11656_v11 = vld [vmem:[#allocation13 + $0x4] ss:$16 sps:$4 sm:$0xff]   ;;  %8001 = vmatprep.subr.bf16.mxu0 %v11650_v9  ;;  %vm20228_vm8 = vcmask 720512  }
 0xcc2   : > { %8041 = vmatpush1.bf16.msra.mxu1 %v11645_v53  ;;  %v9641_v63 = vrot.slane %v11441_v51, %v19971_v26  ;;  %v11659_v51 = vld [vmem:[#allocation13 + $0xc] ss:$16 sps:$4 sm:$0xff]   ;;  %v9444_v54 = vsel %vm20225_vm0, %v17936_v10, %v9439_v18 }
 0xcc3   : > { %v17945_v49 = vpop.permute.xlu1 %11394 }
 0xcc7   : > { %v11405_v39 = vpop.permute.xlu1 %11404 }
 0xcc8   : > { %v11407_v22 = vunpack.i.h.bf16 %v11405_v39  ;;  %v11406_v16 = vunpack.i.l.bf16 %v11405_v39  ;;  %v11376_v39 = vunpack.i.l.bf16 %v17906_v12 }
 0xcc9   : > { %v6650_v55 = vpop.f32.mrb[16].mxu0 }
 0xcca   : > { %v9571_v50 = vrot.slane %v11406_v16, %v19970_v31  ;;  %v7749_v43 = vrot.slane %v6650_v55, 5  ;;  %v10964_v6 = vpop.f32.mrb[17].mxu0  ;;  %v9576_v59 = vrot.slane %v11407_v22, %v19972_v34  ;;  %v11432_v22 = vunpack.i.h.bf16 %v17897_v62 }
 0xccb   : > { %v17992_v41 = vpop.permute.xlu1 %11414  ;;  %v6653_v53 = vpop.f32.mrb[18].mxu0  ;;  %v9645_v55 = vrot.slane %v11442_v24, %v19969_v5  ;;  %v11651_v6 = vld [vmem:[#allocation14 + $0xe8] ss:$16 sps:$4 sm:$0xff]  }
 0xccc   : > { %v9572_v30 = vsel %vm3088_vm2, %v9571_v50, %v9567_v25  ;;  %v17999_v16 = vsel %vm3738_vm9, %v7749_v43, %v17883_v47  ;;  %v10965_v17 = vpop.f32.mrb[19].mxu0  ;;  %v11431_v25 = vunpack.i.l.bf16 %v17897_v62  ;;  %v9503_v47 = vsel %vm3102_vm4, %v9502_v56, %v9498_v2  ;;  %v11648_v43 = vld [vmem:[#allocation14 + $0xe0] ss:$16 sps:$4 sm:$0xff]   ;;  %v11470_v53 = vpop.permute.xlu0 %11469  ;;  %v11653_v2 = vld [vmem:[#allocation14 + $0xec] ss:$16 sps:$4 sm:$0xff]  }
 0xccd   : > { %v9577_v13 = vsel %vm3095_vm3, %v9576_v59, %v9572_v30  ;;  %v11346_v62 = vunpack.i.l.bf16 %v17887_v29  ;;  %v9512_v56 = vrot.slane %v11376_v39, %v19975_v20  ;;  %v11416_v24 = vunpack.i.l.bf16 %v17992_v41  ;;  %8042 = vmatprep.subr.bf16.mxu1 %v11653_v2  ;;  %8002 = vmatpush1.bf16.msra.mxu0 %v11648_v43 }
 0xcce   : > { %v18026_v12 = vrot.slane %v11432_v22, %v19989_v27  ;;  %v11452_v30 = vunpack.i.h.bf16 %v17953_v1  ;;  %v11451_v59 = vunpack.i.l.bf16 %v17953_v1  ;;  %v9508_v35 = vsel %vm3109_vm5, %v17959_v42, %v9503_v47  ;;  %8043 = vmatpush1.bf16.msra.mxu1 %v11651_v6  ;;  %8229 = vmatprep.subr.bf16.mxu0 %v11656_v11 }
 0xccf   : > { %v18019_v50 = vpop.permute.xlu1 %11424  ;;  %v11462_v17 = vunpack.i.h.bf16 %v17985_v21  ;;  %v11461_v39 = vunpack.i.l.bf16 %v17985_v21  ;;  %v9582_v38 = vsel %vm3102_vm4, %v9581_v58, %v9577_v13  ;;  %v18038_v22 = vrot.slane %v11431_v25, %v19987_v37  ;;  %8270 = vmatprep.subr.bf16.mxu1 %v11659_v51 }
 0xcd0   : > { %v11347_v1 = vunpack.i.h.bf16 %v17887_v29  ;;  %v9517_v42 = vrot.slane %v11377_v44, %v19976_v40  ;;  %v11417_v47 = vunpack.i.h.bf16 %v17992_v41  ;;  %v9646_v21 = vsel %vm3081_vm1, %v9645_v55, %v9641_v63  ;;  %v11480_v63 = vpop.permute.xlu0 %11479 }
 0xcd1   : > { %v9453_v10 = vrot.slane %v11346_v62, %v19983_v32  ;;  %v9513_v58 = vsel %vm3116_vm6, %v9512_v56, %v9508_v35  ;;  %v9591_v18 = vrot.slane %v11416_v24, %v19975_v20  ;;  %v11472_v25 = vunpack.i.h.bf16 %v11470_v53 }
 0xcd2   : > { %v11471_v13 = vunpack.i.l.bf16 %v11470_v53  ;;  %v9449_v29 = vsel %vm20226_vm7, %v17920_v52, %v9444_v54  ;;  %v9587_v41 = vsel %vm3109_vm5, %v9586_v36, %v9582_v38  ;;  %v9665_v44 = vrot.slane %v11452_v30, %v19974_v45  ;;  %vm20229_vm7 = vmmov %vm20227_vm10 }
 0xcd3   : > { %v18043_v9 = vpop.permute.xlu1 %11434  ;;  %v9660_v43 = vrot.slane %v11451_v59, %v19973_v15  ;;  %v18055_v55 = vrot.slane %v11462_v17, %v19981_v46  ;;  %v18058_v6 = vrot.slane %v11461_v39, %v19982_v48  ;;  %v9458_v62 = vrot.slane %v11347_v1, %v19984_v57 }
 0xcd4   : > { %v9518_v53 = vsel %vm20227_vm10, %v9517_v42, %v9513_v58  ;;  %v11386_v56 = vunpack.i.l.bf16 %v17925_v60  ;;  %v9596_v54 = vrot.slane %v11417_v47, %v19976_v40  ;;  %v9454_v52 = vsel %vm20228_vm8, %v9453_v10, %v9449_v29  ;;  %vm20231_vm8 = vmmov %vm20225_vm0 }
 0xcd5   : > { %v9592_v36 = vsel %vm3116_vm6, %v9591_v18, %v9587_v41  ;;  %v18067_v11 = vrot.slane %v11472_v25, %v19970_v31  ;;  %v9724_v30 = vrot.slane %v11471_v13, %v19969_v5  ;;  %v11482_v59 = vunpack.i.h.bf16 %v11480_v63  ;;  %v11490_v41 = vpop.permute.xlu0 %11489 }
 0xcd6   : > { %v11481_v35 = vunpack.i.l.bf16 %v11480_v63  ;;  %v11357_v51 = vunpack.i.h.bf16 %v17891_v7  ;;  %v9523_v17 = vsel %vm20225_vm0, %v17966_v28, %v9518_v53  ;;  %v9459_v42 = vsel %vm3151_vm11, %v9458_v62, %v9454_v52 }
 0xcd7   : > { %v11445_v38 = vpop.permute.xlu1 %11444  ;;  %v11387_v47 = vunpack.i.h.bf16 %v17925_v60  ;;  %v9532_v10 = vrot.slane %v11386_v56, %v19983_v32  ;;  %v9597_v58 = vsel %vm20229_vm7, %v9596_v54, %v9592_v36  ;;  %v11426_v18 = vunpack.i.l.bf16 %v18019_v50 }
 0xcd8   : > { %v11447_v24 = vunpack.i.h.bf16 %v11445_v38  ;;  %v11446_v2 = vunpack.i.l.bf16 %v11445_v38  ;;  %v18082_v28 = vrot.slane %v11482_v59, %v19975_v20  ;;  %vm20230_vm10 = vcmask 654912  }
 0xcd9   : > { %v9528_v60 = vsel %vm20230_vm10, %v17963_v33, %v9523_v17  ;;  %v9602_v62 = vsel %vm20231_vm8, %v18011_v4, %v9597_v58  ;;  %v9464_v54 = vsel %vm3158_vm12, %v17951_v0, %v9459_v42  ;;  %v11427_v38 = vunpack.i.h.bf16 %v18019_v50  ;;  %vm20233_vm7 = vmmov %vm20230_vm10  ;;  %v18112_v42 = vpop.permute.xlu0 %11499 }
 0xcda   : > { %v9655_v39 = vrot.slane %v11447_v24, %v19972_v34  ;;  %v9650_v1 = vrot.slane %v11446_v2, %v19970_v31  ;;  %v11356_v31 = vunpack.i.l.bf16 %v17891_v7  ;;  %v9537_v7 = vrot.slane %v11387_v47, %v19984_v57 }
 0xcdb   : > { %v11455_v5 = vpop.permute.xlu1 %11454  ;;  %vm20232_vm0 = vcmask 720512   ;;  %v9611_v4 = vrot.slane %v11426_v18, %v19983_v32  ;;  %v9744_v2 = vrot.slane %v11481_v35, %v19974_v45  ;;  %v11492_v59 = vunpack.i.h.bf16 %v11490_v41 }
 0xcdc   : > { %v9651_v25 = vsel %vm3088_vm2, %v9650_v1, %v9646_v21  ;;  %v11457_v13 = vunpack.i.h.bf16 %v11455_v5  ;;  %v11456_v29 = vunpack.i.l.bf16 %v11455_v5  ;;  %v9533_v36 = vsel %vm20232_vm0, %v9532_v10, %v9528_v60  ;;  %vm20235_vm8 = vmmov %vm20232_vm0 }
 0xcdd   : > { %v9656_v63 = vsel %vm3095_vm3, %v9655_v39, %v9651_v25  ;;  %v9607_v0 = vsel %vm20233_vm7, %v18008_v3, %v9602_v62  ;;  %v9469_v50 = vsel %vm3165_vm13, %v17948_v23, %v9464_v54  ;;  %vm20234_vm10 = vcmask 523712  }
 0xcde   : > { %v9661_v53 = vsel %vm3102_vm4, %v9660_v43, %v9656_v63  ;;  %v9675_v21 = vrot.slane %v11457_v13, %v19976_v40  ;;  %v9670_v56 = vrot.slane %v11456_v29, %v19975_v20  ;;  %v9473_v20 = vrot.slane %v11356_v31, %v19993_v8 }
 0xcdf   : > { %v9666_v33 = vsel %vm3109_vm5, %v9665_v44, %v9661_v53  ;;  %v11465_v52 = vpop.permute.xlu1 %11464  ;;  %v11491_v44 = vunpack.i.l.bf16 %v11490_v41  ;;  %v18110_v1 = vrot.slane %v11357_v51, %v19994_v14  ;;  %v9538_v45 = vsel %vm3151_vm11, %v9537_v7, %v9533_v36 }
 0xce0   : > { %v9671_v43 = vsel %vm3116_vm6, %v9670_v56, %v9666_v33  ;;  %v11467_v24 = vunpack.i.h.bf16 %v11465_v52  ;;  %v9616_v35 = vrot.slane %v11427_v38, %v19984_v57  ;;  %v11466_v47 = vunpack.i.l.bf16 %v11465_v52  ;;  %v11510_v38 = vpop.permute.xlu0 %11509 }
 0xce1   : > { %v9676_v17 = vsel %vm20234_vm10, %v9675_v21, %v9671_v43  ;;  %v9612_v3 = vsel %vm20235_vm8, %v9611_v4, %v9607_v0  ;;  %v9474_v18 = vsel %vm3172_vm14, %v9473_v20, %v9469_v50  ;;  %v11396_v51 = vunpack.i.l.bf16 %v17945_v49 }
 0xce2   : > { %v9720_v39 = vrot.slane %v11467_v24, %v19971_v26  ;;  %v9695_v26 = vrot.slane %v11492_v59, %v19984_v57  ;;  %vm20236_vm0 = vcmask 589312   ;;  %v9764_v13 = vrot.slane %v11491_v44, %v19981_v46 }
 0xce3   : > { %v11475_v10 = vpop.permute.xlu1 %11474  ;;  %v9681_v25 = vsel %vm20236_vm0, %v18058_v6, %v9676_v17  ;;  %v11502_v29 = vunpack.i.h.bf16 %v18112_v42  ;;  %v9617_v60 = vsel %vm3151_vm11, %v9616_v35, %v9612_v3  ;;  %v9690_v63 = vrot.slane %v11466_v47, %v19983_v32 }
 0xce4   : > { %v9725_v23 = vsel %vm3081_vm1, %v9724_v30, %v9720_v39  ;;  %v11477_v58 = vunpack.i.h.bf16 %v11475_v10  ;;  %v11476_v5 = vunpack.i.l.bf16 %v11475_v10  ;;  %v9543_v30 = vsel %vm3158_vm12, %v18002_v61, %v9538_v45  ;;  %vm20237_vm1 = vmmov %vm20233_vm7 }
 0xce5   : > { %v9730_v62 = vsel %vm3088_vm2, %v18067_v11, %v9725_v23  ;;  %v9686_v46 = vsel %vm20237_vm1, %v18055_v55, %v9681_v25  ;;  %v9552_v56 = vrot.slane %v11396_v51, %v19993_v8  ;;  %v11436_v61 = vunpack.i.l.bf16 %v18043_v9  ;;  %vm20238_vm2 = vmmov %vm20235_vm8 }
 0xce6   : > { %v9739_v31 = vrot.slane %v11477_v58, %v19973_v15  ;;  %v9734_v41 = vrot.slane %v11476_v5, %v19972_v34  ;;  %v11397_v34 = vunpack.i.h.bf16 %v17945_v49  ;;  %v9548_v4 = vsel %vm3165_vm13, %v17971_v19, %v9543_v30  ;;  %vm20243_vm7 = vmmov %vm20238_vm2 }
 0xce7   : > { %v11485_v53 = vpop.permute.xlu1 %11484  ;;  %v9622_v49 = vsel %vm3158_vm12, %v18038_v22, %v9617_v60  ;;  %v9691_v43 = vsel %vm20238_vm2, %v9690_v63, %v9686_v46  ;;  %v11501_v19 = vunpack.i.l.bf16 %v18112_v42  ;;  %v11512_v44 = vunpack.i.h.bf16 %v11510_v38 }
 0xce8   : > { %v9735_v6 = vsel %vm3095_vm3, %v9734_v41, %v9730_v62  ;;  %v11487_v21 = vunpack.i.h.bf16 %v11485_v53  ;;  %v11486_v15 = vunpack.i.l.bf16 %v11485_v53  ;;  %vm20239_vm3 = vmmov %vm20234_vm10  ;;  %v11437_v22 = vunpack.i.h.bf16 %v18043_v9 }
 0xce9   : > { %v9740_v54 = vsel %vm3102_vm4, %v9739_v31, %v9735_v6  ;;  %v6891_v7 = vpop.f32.mrb[20].mxu0  ;;  %vm20240_vm4 = vcmask 1044484   ;;  %v9631_v39 = vrot.slane %v11436_v61, %v19993_v8  ;;  %v9553_v47 = vsel %vm3172_vm14, %v9552_v56, %v9548_v4  ;;  %v20244_v6 = vld [vmem:[#allocation73_spill] sm:$0xff] }
 0xcea   : > { %v9745_v11 = vsel %vm3109_vm5, %v9744_v2, %v9740_v54  ;;  %v9759_v33 = vrot.slane %v11487_v21, %v19982_v48  ;;  %v9754_v55 = vrot.slane %v11486_v15, %v19976_v40  ;;  %v7751_v52 = vrot.slane %v6891_v7, 4  ;;  %v10984_v36 = vpop.f32.mrb[21].mxu0  ;;  %vm20241_vm5 = vmmov %vm20236_vm0 }
 0xceb   : > { %v9750_v24 = vsel %vm3116_vm6, %v18082_v28, %v9745_v11  ;;  %v11495_v20 = vpop.permute.xlu1 %11494  ;;  %v6894_v59 = vpop.f32.mrb[22].mxu0  ;;  %vm20242_vm6 = vmmov %vm20237_vm1  ;;  %v9627_v42 = vsel %vm3165_vm13, %v18026_v12, %v9622_v49  ;;  %v9696_v10 = vsel %vm3151_vm11, %v9695_v26, %v9691_v43  ;;  %v9705_v51 = vrot.slane %v11502_v29, %v19989_v27 }
 0xcec   : > { %v9755_v2 = vsel %vm20239_vm3, %v9754_v55, %v9750_v24  ;;  %v7752_v40 = vsel %vm20240_vm4, %v7751_v52, %v17999_v16  ;;  %v11497_v48 = vunpack.i.h.bf16 %v11495_v20  ;;  %v11496_v0 = vunpack.i.l.bf16 %v11495_v20  ;;  %v10985_v50 = vpop.f32.mrb[23].mxu0  ;;  %v10126_v20 = vld [vmem:[%s20251_s19] ss:$0 sm:$0xff]  ;;  %v20252_v59 = vld [vmem:[#allocation129_spill] sm:$0xff]  ;;  %s12259_s19 = sshll.u32 %s12391_s20, 4  ;;  %s12260_s19 = int_to_ptr.vmem [resolvable:$false] %s12259_s19 }
 0xced   : > { %v9760_v17 = vsel %vm20241_vm5, %v9759_v33, %v9755_v2  ;;  %v9557_v16 = vrot.slane %v11397_v34, %v19994_v14  ;;  %v11511_v25 = vunpack.i.l.bf16 %v11510_v38  ;;  %v9479_v31 = vsel %vm3179_vm15, %v18110_v1, %v9474_v18  ;;  %v20248_v33 = vld [vmem:[#allocation74_spill] sm:$0xff]  ;;  %p12262_p9 = scmp.lt.s32.totalorder %s9840_s1, %s12260_s19 }
 0xcee   : > { %v9700_v28 = vrot.slane %v11497_v48, %v19987_v37  ;;  %v9765_v45 = vsel %vm20242_vm6, %v9764_v13, %v9760_v17  ;;  %v9769_v35 = vrot.slane %v11496_v0, %v19983_v32  ;;  %v9774_v32 = vrot.slane %v11501_v19, %v19984_v57 }
 0xcef   : > { %v11505_v9 = vpop.permute.xlu1 %11504  ;;  %v9636_v13 = vrot.slane %v11437_v22, %v19994_v14  ;;  %v9632_v12 = vsel %vm3172_vm14, %v9631_v39, %v9627_v42  ;;  %v9715_v30 = vrot.slane %v11512_v44, %v19994_v14  ;;  %v9558_v60 = vsel %vm3179_vm15, %v9557_v16, %v9553_v47 }
 0xcf0   : > { %v9701_v3 = vsel %vm3158_vm12, %v9700_v28, %v9696_v10  ;;  %v9770_v23 = vsel %vm20243_vm7, %v9769_v35, %v9765_v45  ;;  %v11507_v58 = vunpack.i.h.bf16 %v11505_v9  ;;  %v11506_v5 = vunpack.i.l.bf16 %v11505_v9 }
 0xcf1   : > { %v9706_v29 = vsel %vm3165_vm13, %v9705_v51, %v9701_v3  ;;  %v9775_v57 = vsel %vm3151_vm11, %v9774_v32, %v9770_v23  ;;  %v9784_v46 = vrot.slane %v11511_v25, %v19989_v27  ;;  %v9798_v21 = vsel %vm3738_vm9, %v9479_v31, %v20244_v6  ;;  %vm20245_vm11 = vmmov %vm20240_vm4  ;;  %v11654_v3 = vld [vmem:[#allocation13] ss:$16 sps:$4 sm:$0xff]   ;;  %v11657_v23 = vld [vmem:[#allocation13 + $0x8] ss:$16 sps:$4 sm:$0xff]  }
 0xcf2   : > { %v9710_v26 = vrot.slane %v11507_v58, %v19993_v8  ;;  %v9779_v41 = vrot.slane %v11506_v5, %v19987_v37  ;;  %v9637_v37 = vsel %vm3179_vm15, %v9636_v13, %v9632_v12  ;;  %v9799_v61 = vsel %vm20245_vm11, %v9558_v60, %v9798_v21  ;;  %v11662_v5 = vld [vmem:[#allocation13 + $0x24] ss:$16 sps:$4 sm:$0xff]   ;;  %v11665_v51 = vld [vmem:[#allocation13 + $0x2c] ss:$16 sps:$4 sm:$0xff]   ;;  %v11660_v32 = vld [vmem:[#allocation13 + $0x20] ss:$16 sps:$4 sm:$0xff]  }
 0xcf3   : > { %v11515_v63 = vpop.permute.xlu1 %11514  ;;  %vm20247_vm10 = vcmask 1046534   ;;  %vm8645_vm9 = vcmp.eq.s32.totalorder %v20248_v33, 1  ;;  %vm20249_vm8 = vcmask 1047559   ;;  %v7726_v2 = vadd.f32 %v10126_v20, %v20252_v59  ;;  %v11663_v25 = vld [vmem:[#allocation13 + $0x28] ss:$16 sps:$4 sm:$0xff]  }
 0xcf4   : > { %v9711_v62 = vsel %vm3172_vm14, %v9710_v26, %v9706_v29  ;;  %v9780_v53 = vsel %vm3158_vm12, %v9779_v41, %v9775_v57  ;;  %v11517_v1 = vunpack.i.h.bf16 %v11515_v63  ;;  %v11516_v18 = vunpack.i.l.bf16 %v11515_v63  ;;  %v11668_v13 = vld [vmem:[#allocation13 + $0x44] ss:$16 sps:$4 sm:$0xff]   ;;  %v11671_v31 = vld [vmem:[#allocation13 + $0x4c] ss:$16 sps:$4 sm:$0xff]   ;;  %v11666_v26 = vld [vmem:[#allocation13 + $0x40] ss:$16 sps:$4 sm:$0xff]  }
 0xcf5   : > { %v9716_v56 = vsel %vm3179_vm15, %v9715_v30, %v9711_v62  ;;  %v9785_v54 = vsel %vm3165_vm13, %v9784_v46, %v9780_v53  ;;  %vm20246_vm12 = vcmask 1045509   ;;  %v10135_v44 = vmul.f32 -1.442695, %v7726_v2  ;;  %v11669_v41 = vld [vmem:[#allocation13 + $0x48] ss:$16 sps:$4 sm:$0xff]  }
 0xcf6   : > { %v9794_v15 = vrot.slane %v11517_v1, %v19994_v14  ;;  %v9789_v34 = vrot.slane %v11516_v18, %v19993_v8  ;;  %v9800_v27 = vsel %vm20246_vm12, %v9637_v37, %v9799_v61  ;;  %vm20250_vm13 = vmmov %vm20246_vm12  ;;  %v20255_v12 = vmov 0   ;;  %v11674_v30 = vld [vmem:[#allocation13 + $0x64] ss:$16 sps:$4 sm:$0xff]   ;;  %v11677_v60 = vld [vmem:[#allocation13 + $0x6c] ss:$16 sps:$4 sm:$0xff]  }
 0xcf7   : > { %v9801_v11 = vsel %vm20247_vm10, %v9716_v56, %v9800_v27  ;;  %12008 = vpow2.f32 %v10135_v44  ;;  %v11672_v29 = vld [vmem:[#allocation13 + $0x60] ss:$16 sps:$4 sm:$0xff]   ;;  %v11675_v57 = vld [vmem:[#allocation13 + $0x68] ss:$16 sps:$4 sm:$0xff]   ;;  %v11680_v63 = vld [vmem:[#allocation13 + $0x84] ss:$16 sps:$4 sm:$0xff]  }
 0xcf8   : > { %v9790_v7 = vsel %vm3172_vm14, %v9789_v34, %v9785_v54  ;;  %vm20253_vm14 = vmmov %vm20247_vm10  ;;  %v11683_v62 = vld [vmem:[#allocation13 + $0x8c] ss:$16 sps:$4 sm:$0xff]   ;;  %v11678_v53 = vld [vmem:[#allocation13 + $0x80] ss:$16 sps:$4 sm:$0xff]  }
 0xcf9   : > { %v9795_v38 = vsel %vm3179_vm15, %v9794_v15, %v9790_v7  ;;  %vm20254_vm15 = vmmov %vm20249_vm8  ;;  %v11681_v1 = vld [vmem:[#allocation13 + $0x88] ss:$16 sps:$4 sm:$0xff]   ;;  %v11686_v18 = vld [vmem:[#allocation13 + $0xa4] ss:$16 sps:$4 sm:$0xff]  }
 0xcfa   : > { %v9802_v14 = vsel %vm20249_vm8, %v9795_v38, %v9801_v11  ;;  %v11689_v46 = vld [vmem:[#allocation13 + $0xac] ss:$16 sps:$4 sm:$0xff]   ;;  %v11684_v37 = vld [vmem:[#allocation13 + $0xa0] ss:$16 sps:$4 sm:$0xff]   ;;  %v11687_v6 = vld [vmem:[#allocation13 + $0xa8] ss:$16 sps:$4 sm:$0xff]  }
 0xcfb   : > { %v9804_v8 = vsel %vm8645_vm9, %v9802_v14, 0.0  ;;  %v11692_v21 = vld [vmem:[#allocation13 + $0xc4] ss:$16 sps:$4 sm:$0xff]   ;;  %v11695_v15 = vld [vmem:[#allocation13 + $0xcc] ss:$16 sps:$4 sm:$0xff]  }
 0xcfc   : > { %v9805_v55 = vpack.c.bf16 %v9804_v8, %v9804_v8  ;;  %v11690_v34 = vld [vmem:[#allocation13 + $0xc0] ss:$16 sps:$4 sm:$0xff]   ;;  %v11693_v56 = vld [vmem:[#allocation13 + $0xc8] ss:$16 sps:$4 sm:$0xff]   ;;  %v11698_v61 = vld [vmem:[#allocation13 + $0xe4] ss:$16 sps:$4 sm:$0xff]  }
 0xcfd   : > { %v11701_v54 = vld [vmem:[#allocation13 + $0xec] ss:$16 sps:$4 sm:$0xff]   ;;  %v11696_v7 = vld [vmem:[#allocation13 + $0xe0] ss:$16 sps:$4 sm:$0xff]   ;;  %v11699_v27 = vld [vmem:[#allocation13 + $0xe8] ss:$16 sps:$4 sm:$0xff]  }
 0xcfe   : > { %9806 = vst [vmem:[%s686_s16] sm:$0xf] %v9805_v55  ;;  %v11704_v38 = vld [vmem:[#allocation16 + $0x4] ss:$16 sps:$4 sm:$0xff]   ;;  %v11707_v11 = vld [vmem:[#allocation16 + $0xc] ss:$16 sps:$4 sm:$0xff]  }
 0xcff   : > { %v7762_v14 = vld [vmem:[%s20256_s5] sm:$0xf]  ;;  %v11702_v8 = vld [vmem:[#allocation16] ss:$16 sps:$4 sm:$0xff]   ;;  %v11722_v2 = vld [vmem:[#allocation16 + $0x64] ss:$16 sps:$4 sm:$0xff]  }
 0xd00   : > { %v11705_v55 = vld [vmem:[#allocation16 + $0x8] ss:$16 sps:$4 sm:$0xff]   ;;  %v11714_v20 = vld [vmem:[#allocation16 + $0x40] ss:$16 sps:$4 sm:$0xff]   ;;  %v11731_v44 = vld [vmem:[#allocation16 + $0x8c] ss:$16 sps:$4 sm:$0xff]  }
 0xd01   : > { %v12009_v39 = vpop.eup %12008  ;;  %v11717_v59 = vld [vmem:[#allocation16 + $0x48] ss:$16 sps:$4 sm:$0xff]   ;;  %s12261_s5 = scalar_lea.vmem %s12260_s19, 128 }
 0xd02   : > { %v7734_v28 = vadd.f32 1.0, %v12009_v39  ;;  %v11734_v39 = vld [vmem:[#allocation16 + $0xa4] ss:$16 sps:$4 sm:$0xff]   ;;  %p12263_p6 = scmp.lt.s32.totalorder %s12261_s5, %s12255_s21 }
 0xd04   : > { %12010 = vrcp.f32 %v7734_v28  ;;  %v11737_v28 = vld [vmem:[#allocation16 + $0xac] ss:$16 sps:$4 sm:$0xff]   ;;  %p12264_p10 = por %p12263_p6, %p12262_p9 }
 0xd06   : > { %p12265_p11 = pnand %p12264_p10, %p12258_p5 }
 0xd09   : > { %v7132_v52 = vpop.f32.mrb[24].mxu0 }
 0xd0a   : > { %v7753_v36 = vrot.slane %v7132_v52, 3  ;;  %v11004_v4 = vpop.f32.mrb[25].mxu0  ;;  %v11710_v52 = vld [vmem:[#allocation16 + $0x24] ss:$16 sps:$4 sm:$0xff]  }
 0xd0b   : > { %v7135_v49 = vpop.f32.mrb[26].mxu0  ;;  %v11708_v4 = vld [vmem:[#allocation16 + $0x20] ss:$16 sps:$4 sm:$0xff]  }
 0xd0c   : > { %v7754_v43 = vsel %vm20250_vm13, %v7753_v36, %v7752_v40  ;;  %v11005_v24 = vpop.f32.mrb[27].mxu0  ;;  %v11713_v36 = vld [vmem:[#allocation16 + $0x2c] ss:$16 sps:$4 sm:$0xff]   ;;  %v11711_v49 = vld [vmem:[#allocation16 + $0x28] ss:$16 sps:$4 sm:$0xff]  }
 0xd0d   : > { %v11719_v24 = vld [vmem:[#allocation16 + $0x4c] ss:$16 sps:$4 sm:$0xff]  }
 0xd0e   : > { %v12011_v45 = vpop.eup %12010 }
 0xd29   : > { %v7373_v48 = vpop.f32.mrb[28].mxu0 }
 0xd2a   : > { %v7755_v0 = vrot.slane %v7373_v48, 2  ;;  %v11024_v50 = vpop.f32.mrb[29].mxu0  ;;  %v11725_v48 = vld [vmem:[#allocation16 + $0x6c] ss:$16 sps:$4 sm:$0xff]  }
 0xd2b   : > { %v7376_v19 = vpop.f32.mrb[30].mxu0  ;;  %v11723_v50 = vld [vmem:[#allocation16 + $0x68] ss:$16 sps:$4 sm:$0xff]  }
 0xd2c   : > { %v7756_v22 = vsel %vm20253_vm14, %v7755_v0, %v7754_v43  ;;  %v11025_v17 = vpop.f32.mrb[31].mxu0  ;;  %v11716_v43 = vld [vmem:[#allocation16 + $0x44] ss:$16 sps:$4 sm:$0xff]   ;;  %v11720_v0 = vld [vmem:[#allocation16 + $0x60] ss:$16 sps:$4 sm:$0xff]  }
 0xd2d   : > { %v11728_v19 = vld [vmem:[#allocation16 + $0x84] ss:$16 sps:$4 sm:$0xff]   ;;  %v11729_v17 = vld [vmem:[#allocation16 + $0x88] ss:$16 sps:$4 sm:$0xff]  }
 0xd49   : > { %v7614_v40 = vpop.f32.mrb[32].mxu0 }
 0xd4a   : > { %v7757_v35 = vrot.slane %v7614_v40, 1  ;;  %v11044_v16 = vpop.f32.mrb[33].mxu0  ;;  %v11732_v40 = vld [vmem:[#allocation16 + $0xa0] ss:$16 sps:$4 sm:$0xff]  }
 0xd4b   : > { %v7617_v47 = vpop.f32.mrb[34].mxu0  ;;  %v11743_v16 = vld [vmem:[#allocation16 + $0xcc] ss:$16 sps:$4 sm:$0xff]  }
 0xd4c   : > { %v7758_v42 = vsel %vm20254_vm15, %v7757_v35, %v7756_v22  ;;  %v11045_v10 = vpop.f32.mrb[35].mxu0  ;;  %v11726_v22 = vld [vmem:[#allocation16 + $0x80] ss:$16 sps:$4 sm:$0xff]   ;;  %v11740_v35 = vld [vmem:[#allocation16 + $0xc4] ss:$16 sps:$4 sm:$0xff]  }
 0xd4d   : > { %v7760_v9 = vmul.f32 %v12011_v45, %v7758_v42  ;;  %v11735_v45 = vld [vmem:[#allocation16 + $0xa8] ss:$16 sps:$4 sm:$0xff]   ;;  %v11738_v47 = vld [vmem:[#allocation16 + $0xc0] ss:$16 sps:$4 sm:$0xff]   ;;  %v11746_v10 = vld [vmem:[#allocation16 + $0xe4] ss:$16 sps:$4 sm:$0xff]  }
 0xd4e   : > { %v11741_v42 = vld [vmem:[#allocation16 + $0xc8] ss:$16 sps:$4 sm:$0xff]  }
 0xd4f   : > { %v7761_v58 = vpack.c.bf16 %v7760_v9, %v7760_v9  ;;  %v11749_v9 = vld [vmem:[#allocation16 + $0xec] ss:$16 sps:$4 sm:$0xff]  }
 0xd51   : > { %8020 = vmatmul.mubr.bf16.vlgmr.msra.gmra.mrb[36].mxu0 %v7761_v58  ;;  %8061 = vmatmul.mubr.bf16.vlgmr.msra.gmra.mrb[132].mxu1 %v7761_v58  ;;  %v20257_v58 = vld [vmem:[#allocation28_spill] sm:$0xff] }
 0xd52   : > { %8230 = vmatpush1.bf16.msra.mxu0 %v11654_v3  ;;  %8271 = vmatpush1.bf16.msra.mxu1 %v11657_v23  ;;  %v11744_v3 = vld [vmem:[#allocation16 + $0xe0] ss:$16 sps:$4 sm:$0xff]   ;;  %v11747_v23 = vld [vmem:[#allocation16 + $0xe8] ss:$16 sps:$4 sm:$0xff]  }
 0xd53   : > { %8231 = vmatprep.subr.bf16.mxu0 %v11662_v5  ;;  %8272 = vmatprep.subr.bf16.mxu1 %v11665_v51 }
 0xd54   : > { %8261 = vmatprep.mubr.bf16.mxu0 %v20255_v12  ;;  %8302 = vmatprep.mubr.bf16.mxu1 %v20255_v12 }
 0xd56   : > { %8232 = vmatpush1.bf16.msra.mxu0 %v11660_v32  ;;  %8273 = vmatpush1.bf16.msra.mxu1 %v11663_v25 }
 0xd57   : > { %8233 = vmatprep.subr.bf16.mxu0 %v11668_v13  ;;  %8274 = vmatprep.subr.bf16.mxu1 %v11671_v31 }
 0xd5a   : > { %8234 = vmatpush1.bf16.msra.mxu0 %v11666_v26  ;;  %8275 = vmatpush1.bf16.msra.mxu1 %v11669_v41 }
 0xd5b   : > { %8235 = vmatprep.subr.bf16.mxu0 %v11674_v30  ;;  %8276 = vmatprep.subr.bf16.mxu1 %v11677_v60 }
 0xd5e   : > { %8236 = vmatpush1.bf16.msra.mxu0 %v11672_v29  ;;  %8277 = vmatpush1.bf16.msra.mxu1 %v11675_v57 }
 0xd5f   : > { %8237 = vmatprep.subr.bf16.mxu0 %v11680_v63  ;;  %8278 = vmatprep.subr.bf16.mxu1 %v11683_v62 }
 0xd62   : > { %8238 = vmatpush1.bf16.msra.mxu0 %v11678_v53  ;;  %8279 = vmatpush1.bf16.msra.mxu1 %v11681_v1 }
 0xd63   : > { %8239 = vmatprep.subr.bf16.mxu0 %v11686_v18  ;;  %8280 = vmatprep.subr.bf16.mxu1 %v11689_v46 }
 0xd66   : > { %8240 = vmatpush1.bf16.msra.mxu0 %v11684_v37  ;;  %8281 = vmatpush1.bf16.msra.mxu1 %v11687_v6 }
 0xd67   : > { %8241 = vmatprep.subr.bf16.mxu0 %v11692_v21  ;;  %8282 = vmatprep.subr.bf16.mxu1 %v11695_v15 }
 0xd6a   : > { %8242 = vmatpush1.bf16.msra.mxu0 %v11690_v34  ;;  %8283 = vmatpush1.bf16.msra.mxu1 %v11693_v56 }
 0xd6b   : > { %8243 = vmatprep.subr.bf16.mxu0 %v11698_v61  ;;  %8284 = vmatprep.subr.bf16.mxu1 %v11701_v54 }
 0xd6e   : > { %8244 = vmatpush1.bf16.msra.mxu0 %v11696_v7  ;;  %8285 = vmatpush1.bf16.msra.mxu1 %v11699_v27 }
 0xd6f   : > { %8503 = vmatprep.subr.bf16.mxu0 %v11704_v38  ;;  %8544 = vmatprep.subr.bf16.mxu1 %v11707_v11 }
 0xd71   : > { %8262 = vmatmul.mubr.bf16.vlgmr.msra.gmra.mrb[40].mxu0 %v7762_v14  ;;  %8303 = vmatmul.mubr.bf16.vlgmr.msra.gmra.mrb[136].mxu1 %v7762_v14 }
 0xd72   : > { %8504 = vmatpush1.bf16.msra.mxu0 %v11702_v8  ;;  %8545 = vmatpush1.bf16.msra.mxu1 %v11705_v55 }
 0xd73   : > { %8505 = vmatprep.subr.bf16.mxu0 %v11710_v52  ;;  %8546 = vmatprep.subr.bf16.mxu1 %v11713_v36 }
 0xd74   : > { %8535 = vmatprep.mubr.bf16.mxu0 %v20255_v12  ;;  %8576 = vmatprep.mubr.bf16.mxu1 %v20255_v12 }
 0xd76   : > { %8506 = vmatpush1.bf16.msra.mxu0 %v11708_v4  ;;  %8547 = vmatpush1.bf16.msra.mxu1 %v11711_v49 }
 0xd77   : > { %8507 = vmatprep.subr.bf16.mxu0 %v11716_v43  ;;  %8548 = vmatprep.subr.bf16.mxu1 %v11719_v24 }
 0xd7a   : > { %8508 = vmatpush1.bf16.msra.mxu0 %v11714_v20  ;;  %8549 = vmatpush1.bf16.msra.mxu1 %v11717_v59 }
 0xd7b   : > { %8509 = vmatprep.subr.bf16.mxu0 %v11722_v2  ;;  %8550 = vmatprep.subr.bf16.mxu1 %v11725_v48 }
 0xd7e   : > { %8510 = vmatpush1.bf16.msra.mxu0 %v11720_v0  ;;  %8551 = vmatpush1.bf16.msra.mxu1 %v11723_v50 }
 0xd7f   : > { %8511 = vmatprep.subr.bf16.mxu0 %v11728_v19  ;;  %8552 = vmatprep.subr.bf16.mxu1 %v11731_v44 }
 0xd82   : > { %8512 = vmatpush1.bf16.msra.mxu0 %v11726_v22  ;;  %8553 = vmatpush1.bf16.msra.mxu1 %v11729_v17 }
 0xd83   : > { %8513 = vmatprep.subr.bf16.mxu0 %v11734_v39  ;;  %8554 = vmatprep.subr.bf16.mxu1 %v11737_v28 }
 0xd86   : > { %8514 = vmatpush1.bf16.msra.mxu0 %v11732_v40  ;;  %8555 = vmatpush1.bf16.msra.mxu1 %v11735_v45 }
 0xd87   : > { %8515 = vmatprep.subr.bf16.mxu0 %v11740_v35  ;;  %8556 = vmatprep.subr.bf16.mxu1 %v11743_v16 }
 0xd8a   : > { %8516 = vmatpush1.bf16.msra.mxu0 %v11738_v47  ;;  %8557 = vmatpush1.bf16.msra.mxu1 %v11741_v42 }
 0xd8b   : > { %8517 = vmatprep.subr.bf16.mxu0 %v11746_v10  ;;  %8558 = vmatprep.subr.bf16.mxu1 %v11749_v9 }
 0xd8e   : > { %8518 = vmatpush1.bf16.msra.mxu0 %v11744_v3  ;;  %8559 = vmatpush1.bf16.msra.mxu1 %v11747_v23 }
 0xd91   : > { %8536 = vmatmul.mubr.bf16.vlgmr.msra.gmra.mrb[44].mxu0 %v20257_v58  ;;  %8577 = vmatmul.mubr.bf16.vlgmr.msra.gmra.mrb[140].mxu1 %v20257_v58 }
 0xd92   : > { %12268 = shalt.err (!%p12265_p11)
}
 0xd93   : > { %s12269_s16 = scalar_lea.hbm %s18221_s23, 64  ;;  %s12273_s20 = scalar_lea.hbm %s20258_s4, 448 }
 0xd94   : > { %p12270_p3 = scmp.ne.s32.totalorder %s18221_s23, %s12269_s16  ;;  %p12274_p13 = scmp.lt.u32.totalorder %s18221_s23, %s20258_s4 }
 0xd95   : > { %p12275_p7 = scmp.lt.u32.totalorder %s12273_s20, %s12269_s16  ;;  %p12277_p2 = scmp.lt.u32.totalorder %s12269_s16, %s18221_s23 }
 0xd96   : > { %p12271_p12 = pnand %p12270_p3, %p20259_p4 }
 0xd97   : > { %p12276_p0 = por %p12275_p7, %p12274_p13 }
 0xd98   : > { %p12272_p1 = pneg %p12271_p12 }
 0xd99   : > { %p12278_p8 = por %p12277_p2, %p12276_p0 }
 0xd9b   : > { %p12279_p5 = pnand %p12278_p8, %p12272_p1 }
 0xd9d   : > { %12282 = shalt.err (!%p12279_p5)
}
 0xd9e   : > { %11097 = dma.vmem_to_hbm [thread:$0]  (%p20259_p4), %s9840_s1, 64, %s18221_s23, %s9813_s15   ;;  %v20261_v21 = vld [vmem:[#allocation30_spill] sm:$0xff]  ;;  %v20262_v61 = vld [vmem:[#allocation113_spill] sm:$0xff]  ;;  %v20263_v59 = vld [vmem:[#allocation228_spill] sm:$0xff] }
 0xd9f   : > { %s20260_s1 = sld [smem:[#allocation246_spill]]  ;;  %v20264_v0 = vld [vmem:[#allocation127_spill] sm:$0xff]  ;;  %v701_v35 = vld [vmem:[#allocation3] sm:$0xff]  ;;  %s20265_s15 = scalar_lea.vmem [#allocation17], %s12781_s30 }
 0xda0   : > { %s9826_s21 = sshll.u32 %s20265_s15, 4  ;;  %s20266_s5 = sshll.u32 %s12504_s0, 6  ;;  %s18263_s21 = int_to_ptr.vmem [resolvable:$true] %s9826_s21 }
 0xda1   : > { %s20267_s9 = sld [smem:[#allocation247_spill]]  ;;  %s20268_s19 = smov %s20265_s15 }
 0xda2   : > { %s9808_s29 = scalar_lea.sflag [#allocation6], %s12778_s7  ;;  %s12283_s23 = scalar_lea.vmem %s18263_s21, 64 }
 0xda3   : > { %p12284_p9 = scmp.ne.s32.totalorder %s18263_s21, %s12283_s23  ;;  %s12392_s0 = smov [#allocation17]  }
 0xda5   : > { %v8589_v6 = vld [vmem:[%s20260_s1] sm:$0xf]  ;;  %p12285_p6 = pnand %p12284_p9, %p20259_p4  ;;  %s12287_s1 = sshll.u32 %s12392_s0, 4  ;;  %s12288_s1 = int_to_ptr.vmem [resolvable:$false] %s12287_s1 }
 0xda6   : > { %v8594_v15 = vrot.slane %v8589_v6, %v20261_v21  ;;  %v8598_v54 = vrot.slane %v8589_v6, %v20262_v61  ;;  %v8606_v2 = vrot.slane %v8589_v6, %v20263_v59  ;;  %v8602_v50 = vrot.slane %v8589_v6, %v20264_v0  ;;  %s12289_s15 = scalar_lea.vmem %s12288_s1, 128  ;;  %p12290_p11 = scmp.lt.s32.totalorder %s18263_s21, %s12288_s1 }
 0xda7   : > { %s18261_s20 = scalar_lea.hbm %s20267_s9, %s20266_s5  ;;  %p12286_p10 = pneg %p12285_p6 }
 0xda8   : > { %p12291_p3 = scmp.lt.s32.totalorder %s12289_s15, %s12283_s23 }
 0xdaa   : > { %p12292_p12 = por %p12291_p3, %p12290_p11 }
 0xdac   : > { %p12293_p1 = pnand %p12292_p12, %p12286_p10 }
 0xe24   : > { %v8021_v5 = vpop.f32.mrb[36].mxu0  ;;  %v8062_v51 = vpop.f32.mrb[132].mxu1 }
 0xe25   : > { %v8023_v32 = vpop.f32.mrb[37].mxu0  ;;  %v8064_v25 = vpop.f32.mrb[133].mxu1 }
 0xe26   : > { %v8025_v13 = vpop.f32.mrb[38].mxu0  ;;  %v8066_v31 = vpop.f32.mrb[134].mxu1 }
 0xe27   : > { %v8026_v12 = vpop.f32.mrb[39].mxu0  ;;  %v8067_v26 = vpop.f32.mrb[135].mxu1 }
 0xe44   : > { %v8263_v41 = vpop.f32.mrb[40].mxu0  ;;  %v8304_v30 = vpop.f32.mrb[136].mxu1 }
 0xe45   : > { %v8264_v60 = vadd.f32 %v8263_v41, %v8021_v5  ;;  %v8305_v29 = vadd.f32 %v8304_v30, %v8062_v51  ;;  %v8265_v57 = vpop.f32.mrb[41].mxu0  ;;  %v8306_v63 = vpop.f32.mrb[137].mxu1 }
 0xe46   : > { %v8266_v62 = vadd.f32 %v8265_v57, %v8023_v32  ;;  %v8307_v53 = vadd.f32 %v8306_v63, %v8064_v25  ;;  %v8267_v1 = vpop.f32.mrb[42].mxu0  ;;  %v8308_v18 = vpop.f32.mrb[138].mxu1  ;;  %v12028_v32 = vld [vmem:[#allocation2] sm:$0xff] }
 0xe47   : > { %v8268_v46 = vpop.f32.mrb[43].mxu0  ;;  %v8309_v37 = vpop.f32.mrb[139].mxu1 }
 0xe64   : > { %v8537_v34 = vpop.f32.mrb[44].mxu0  ;;  %v8578_v56 = vpop.f32.mrb[140].mxu1 }
 0xe65   : > { %v8585_v7 = vadd.f32 %v8537_v34, %v8264_v60  ;;  %v8587_v27 = vadd.f32 %v8578_v56, %v8305_v29  ;;  %v8539_v38 = vpop.f32.mrb[45].mxu0  ;;  %v8580_v11 = vpop.f32.mrb[141].mxu1 }
 0xe66   : > { %v8586_v14 = vadd.f32 %v8539_v38, %v8266_v62  ;;  %v8588_v8 = vadd.f32 %v8580_v11, %v8307_v53  ;;  %v8541_v55 = vpop.f32.mrb[46].mxu0  ;;  %v8582_v52 = vpop.f32.mrb[142].mxu1 }
 0xe67   : > { %v8611_v36 = vadd.f32 %v8594_v15, %v8585_v7  ;;  %v8542_v4 = vpop.f32.mrb[47].mxu0  ;;  %v8583_v49 = vpop.f32.mrb[143].mxu1  ;;  %v8613_v44 = vadd.f32 %v8602_v50, %v8587_v27 }
 0xe68   : > { %v8612_v43 = vadd.f32 %v8598_v54, %v8586_v14  ;;  %v8614_v48 = vadd.f32 %v8606_v2, %v8588_v8 }
 0xe69   : > { %v10232_v24 = vmul.f32 -1.442695, %v8611_v36 }
 0xe6a   : > { %v10233_v20 = vmul.f32 -1.442695, %v8612_v43  ;;  %v10234_v19 = vmul.f32 -1.442695, %v8614_v48 }
 0xe6b   : > { %12012 = vpow2.f32 %v10232_v24 }
 0xe6c   : > { %12014 = vpow2.f32 %v10233_v20 }
 0xe6d   : > { %12016 = vpow2.f32 %v10234_v19 }
 0xe6e   : > { %12018 = vtanh.f32 %v8613_v44 }
 0xe75   : > { %v12013_v22 = vpop.eup %12012 }
 0xe76   : > { %v12015_v17 = vpop.eup %12014  ;;  %v8618_v39 = vadd.f32 1.0, %v12013_v22 }
 0xe77   : > { %v8624_v28 = vadd.f32 1.0, %v12015_v17  ;;  %v12017_v40 = vpop.eup %12016 }
 0xe78   : > { %12020 = vrcp.f32 %v8618_v39  ;;  %v12019_v45 = vpop.eup %12018  ;;  %v8631_v10 = vadd.f32 1.0, %v12017_v40 }
 0xe79   : > { %12022 = vrcp.f32 %v8624_v28 }
 0xe7a   : > { %12024 = vrcp.f32 %v8631_v10 }
 0xe82   : > { %v12021_v16 = vpop.eup %12020 }
 0xe83   : > { %v12023_v47 = vpop.eup %12022  ;;  %v8635_v42 = vmul.f32 %v12021_v16, %v12019_v45 }
 0xe84   : > { %v8634_v9 = vmul.f32 %v12023_v47, %v701_v35  ;;  %v12025_v58 = vpop.eup %12024 }
 0xe86   : > { %v8636_v3 = vadd.f32 %v8635_v42, %v8634_v9 }
 0xe88   : > { %12026 = vtanh.f32 %v8636_v3  ;;  %v8648_v23 = vsel %vm8645_vm9, %v8636_v3, %v701_v35 }
 0xe89   : > { %8649 = vst [vmem:[#allocation3] sm:$0xff] %v8648_v23 }
 0xe92   : > { %v12027_v5 = vpop.eup %12026 }
 0xe93   : > { %v8638_v51 = vmul.f32 %v12027_v5, %v12025_v58 }
 0xe95   : > { %v8646_v25 = vsel %vm8645_vm9, %v8638_v51, %v12028_v32  ;;  %v8650_v13 = vpack.c.bf16 %v8638_v51, %v8638_v51 }
 0xe96   : > { %8647 = vst [vmem:[#allocation2] sm:$0xff] %v8646_v25 }
 0xe97   : > { %8651 = vst [vmem:[%s20268_s19] sm:$0xf] %v8650_v13 }
 0xe98   : > { %12296 = shalt.err (!%p12293_p1)
}
 0xe99   : > { %s12297_s7 = scalar_lea.hbm %s18261_s20, 64  ;;  %s12301_s16 = scalar_lea.hbm %s20267_s9, 448 }
 0xe9a   : > { %p12298_p13 = scmp.ne.s32.totalorder %s18261_s20, %s12297_s7  ;;  %p12302_p2 = scmp.lt.u32.totalorder %s18261_s20, %s20267_s9 }
 0xe9b   : > { %p12303_p8 = scmp.lt.u32.totalorder %s12301_s16, %s12297_s7  ;;  %p12305_p9 = scmp.lt.u32.totalorder %s12297_s7, %s18261_s20 }
 0xe9c   : > { %p12299_p7 = pnand %p12298_p13, %p20259_p4 }
 0xe9d   : > { %p12304_p5 = por %p12303_p8, %p12302_p2 }
 0xe9e   : > { %p12300_p0 = pneg %p12299_p7 }
 0xe9f   : > { %p12306_p6 = por %p12305_p9, %p12304_p5 }
 0xea1   : > { %p12307_p10 = pnand %p12306_p6, %p12300_p0 }
 0xea3   : > { %12310 = shalt.err (!%p12307_p10)
}
 0xea4   : > { %11096 = dma.vmem_to_hbm [thread:$0]  (%p20259_p4), %s18263_s21, 64, %s18261_s20, %s9808_s29  }
 0xea5 PF: > { %p11148_p11 = scmp.ge.s32.totalorder %s12373_s27, 2  ;;  %s9851_s23 = sand.u32 1, %s12361_s24  }
 0xea6   : > { %p20269_p3 = scmp.ne.s32.totalorder %s18883_s22, 0  ;;  %s9852_s0 = scalar_lea.sflag [#allocation6], %s9851_s23 }
 0xea8   : > { %p11127_p12 = pnand %p11148_p11, %p20269_p3 }
 0xeaa   : > { %12352 = dma.done.wait (!%p11127_p12), %s9852_s0, 64  }
 0xeab   : > { %12354 = vsyncadd (!%p11127_p12), %s9852_s0, 4294967232  ;;  %s9861_s1 = scalar_lea.sflag [#allocation19], %s9851_s23 }
 0xeac   : > { %12356 = dma.done.wait (!%p11127_p12), %s9861_s1, 64  }
 0xead   : > { %12358 = vsyncadd (!%p11127_p12), %s9861_s1, 4294967232  ;;  %p35_p4 = scmp.ge.s32.totalorder %s12698_s18, 9   ;;  %s20270_s24 = smov %s12365_s25 }
 0xeae   : > { %s20271_s25 = smov %s12369_s26  ;;  %s20272_s26 = smov %s12710_s8 }
 0xeaf   : > { %s20273_s27 = smov %s12698_s18  ;;  %37 = sbr.rel (!%p35_p4) target bundleno = 22 (0x16), region = 180 }
 0xeb6   :  { %9866 = vsyncpa [#allocation5], 1 }
 0xeb7   :  { %9868 = vsyncpa [#allocation5 + $0x1], 1 }
 0xeb8   :  { %9869 = vsyncpa [#allocation8], 1 }
 0xeb9   :  { %9870 = vsyncpa [#allocation12], 1 }
 0xeba   :  { %9871 = vsyncpa [#allocation15], 1 }
 0xebb   :  { %9872 = vsyncpa [#allocation6], 1 }
 0xebc   :  { %9874 = vsyncpa [#allocation6 + $0x1], 1 }
 0xebd   :  { %9875 = vsyncpa [#allocation19], 1 }
 0xebe   :  { %9877 = vsyncpa [#allocation19 + $0x1], 1 }

</bundles_post_ra>
